<compile_context>
chip_gen: v6e
topology: v6e:2x2x1
jax: 0.10.0
libtpu: 0.0.40
codegen_flags: <defaults>
</compile_context>

<pallas_src>
import jax
import jax.numpy as jnp
from jax.experimental import pallas as pl
from jax.experimental.pallas import tpu as pltpu


def fused_kernel(x63_ref, w1_ref, b1_ref, x61_ref, w2_ref, gamma_ref, beta_ref,
                 out_ref):
    # ---- SE gate branch (tiny; recomputed each grid step -> megacore-safe)
    g = jnp.maximum(x63_ref[...], 0.0)                                  # ReLU [1, Cin]
    pre = jnp.dot(g.astype(jnp.bfloat16), w1_ref[...],
                  preferred_element_type=jnp.float32) + b1_ref[...]     # [1, Cmid]
    gate = jax.nn.sigmoid(pre)                                          # exact sigmoid

    # ---- fold per-channel gate into this step's weight block:
    #      conv1x1(W2, gate * x) == conv1x1(W2 * gate_row, x)
    w2g = (w2_ref[...] * gate).astype(jnp.bfloat16)                     # [bc, Cmid]

    # ---- main 1x1 conv as channel-major matmul: [bc, Cmid] @ [Cmid, HW]
    y = jnp.dot(w2g, x61_ref[...].astype(jnp.bfloat16),
                preferred_element_type=jnp.float32)                     # [bc, HW] f32

    # ---- BatchNorm2d, training mode: two-pass per-channel batch stats,
    #      biased variance, affine folded into scale/shift.
    inv_hw = 1.0 / y.shape[1]
    mean = jnp.sum(y, axis=1, keepdims=True) * inv_hw                   # [bc, 1]
    centered = y - mean
    var = jnp.sum(centered * centered, axis=1, keepdims=True) * inv_hw  # biased
    scale = jax.lax.rsqrt(var + 1e-5) * gamma_ref[...]                  # [bc, 1]
    out_ref[...] = centered * scale + beta_ref[...]
    # TODO(synk): training-mode BN also updates running_mean/running_var module
    # buffers; those state updates are not produced here (outputs unaffected).


def run_module(x63, x61, w1, b1, w2, gamma, beta, *, block_c=224):
    """x63: [1,Cin,1,1], x61: [1,Cout,H,W] (NCHW) -> [1,Cout,H,W] (NCHW).

    block_c=224 -> grid=(2,) parallel (uses both v7x TensorCores).
    block_c=448 -> grid=(1,) (best on single-TC v5e/v6e).
    """
    N, C_in, _, _ = x63.shape
    _, C_out, H, W = x61.shape
    HW = H * W
    assert C_out % block_c == 0 and block_c % 8 == 0

    # Free (metadata-only) reshapes -- no HBM transposes.
    x63_m = x63.reshape(N, C_in)            # [1, Cin]
    x61_m = x61.reshape(C_out, HW)          # [C, HW] channel-major
    c_in2 = w2.shape[1]                     # conv2d22 input channels (== C_out)

    out = pl.pallas_call(
        fused_kernel,
        out_shape=jax.ShapeDtypeStruct((C_out, HW), jnp.float32),
        grid=(C_out // block_c,),
        in_specs=[
            pl.BlockSpec((N, C_in), lambda i: (0, 0)),          # x63   (resident)
            pl.BlockSpec((C_in, C_out), lambda i: (0, 0)),      # w1    (resident, bf16)
            pl.BlockSpec((1, C_out), lambda i: (0, 0)),         # b1    (resident)
            pl.BlockSpec((C_out, HW), lambda i: (0, 0)),        # x61   (resident)
            pl.BlockSpec((block_c, c_in2), lambda i: (i, 0)),   # w2    (per-block, bf16)
            pl.BlockSpec((block_c, 1), lambda i: (i, 0)),       # gamma (per-block)
            pl.BlockSpec((block_c, 1), lambda i: (i, 0)),       # beta  (per-block)
        ],
        out_specs=pl.BlockSpec((block_c, HW), lambda i: (i, 0)),
        compiler_params=pltpu.CompilerParams(
            dimension_semantics=("parallel",)),
    )(x63_m, w1, b1, x61_m, w2, gamma, beta)

    # Channel-major result reshapes straight back to NCHW (free).
    return out.reshape(1, C_out, H, W)


if __name__ == "__main__":
    key = jax.random.PRNGKey(0)
    k1, k2, k3, k4, k5 = jax.random.split(key, 5)

    # Channel sizes are fixed by the module (112 -> 448 -> 448); spatial 28x28.
    C_in, C_out, H, W = 112, 448, 28, 28

    # Inputs (shapes implied by the module's forward).
    x63 = jax.random.normal(k1, (1, C_in, 1, 1), dtype=jnp.float32)
    x61 = jax.random.normal(k2, (1, C_out, H, W), dtype=jnp.float32)

    # Deterministic synthetic parameters (not a checkpoint).
    # conv2d21: PyTorch weight [448,112,1,1] + bias, stored as [Cin, Cout] bf16.
    w1 = ((jax.random.normal(k3, (C_in, C_out), dtype=jnp.float32)
           * (1.0 / jnp.sqrt(C_in))).astype(jnp.bfloat16))
    b1 = (jax.random.normal(k4, (1, C_out), dtype=jnp.float32)
          * (1.0 / jnp.sqrt(C_in)))
    # conv2d22: PyTorch weight [448,448,1,1] (no bias) -> [Cout, Cin], stored bf16.
    w2 = ((jax.random.normal(k5, (C_out, C_out), dtype=jnp.float32)
           * (1.0 / jnp.sqrt(C_out))).astype(jnp.bfloat16))
    # BatchNorm2d affine params as [C,1] columns (PyTorch init: gamma=1, beta=0).
    gamma = jnp.ones((C_out, 1), dtype=jnp.float32)
    beta = jnp.zeros((C_out, 1), dtype=jnp.float32)

    y = run_module(x63, x61, w1, b1, w2, gamma, beta)
    jax.block_until_ready(y)
    assert y.shape == (1, C_out, H, W)
    print("KERNEL_OK")
</pallas_src>

<mosaic_0001>
module attributes {stable_mosaic.version = 11 : i64} {
  func.func @fused_kernel(%arg0: i32, %arg1: memref<1x112xf32, #tpu.memory_space<vmem>>, %arg2: memref<112x448xbf16, #tpu.memory_space<vmem>>, %arg3: memref<1x448xf32, #tpu.memory_space<vmem>>, %arg4: memref<448x784xf32, #tpu.memory_space<vmem>>, %arg5: memref<224x448xbf16, #tpu.memory_space<vmem>>, %arg6: memref<224x1xf32, #tpu.memory_space<vmem>>, %arg7: memref<224x1xf32, #tpu.memory_space<vmem>>, %arg8: memref<224x784xf32, #tpu.memory_space<vmem>>) attributes {dimension_semantics = [#tpu.dimension_semantics<parallel>], iteration_bounds = array<i64: 2>, scalar_prefetch = 0 : i64, scratch_operands = 0 : i64, tpu.core_type = #tpu.core_type<tc>, window_params = [{pipeline_mode = #tpu.pipeline_mode<synchronous>, transform_indices = @transform_0, window_bounds = array<i64: 1, 112>}, {pipeline_mode = #tpu.pipeline_mode<synchronous>, transform_indices = @transform_1, window_bounds = array<i64: 112, 448>}, {pipeline_mode = #tpu.pipeline_mode<synchronous>, transform_indices = @transform_2, window_bounds = array<i64: 1, 448>}, {pipeline_mode = #tpu.pipeline_mode<synchronous>, transform_indices = @transform_3, window_bounds = array<i64: 448, 784>}, {transform_indices = @transform_4, window_bounds = array<i64: 224, 448>}, {transform_indices = @transform_5, window_bounds = array<i64: 224, 1>}, {transform_indices = @transform_6, window_bounds = array<i64: 224, 1>}, {transform_indices = @transform_7, window_bounds = array<i64: 224, 784>}]} {
    %c0 = arith.constant 0 : index
    %c0_0 = arith.constant 0 : index
    %0 = vector.load %arg1[%c0, %c0_0] : memref<1x112xf32, #tpu.memory_space<vmem>>, vector<1x112xf32>
    %cst = arith.constant 0.000000e+00 : f32
    %1 = vector.broadcast %cst : f32 to vector<1x112xf32>
    %2 = arith.maximumf %0, %1 : vector<1x112xf32>
    %3 = arith.truncf %2 : vector<1x112xf32> to vector<1x112xbf16>
    %c0_1 = arith.constant 0 : index
    %c0_2 = arith.constant 0 : index
    %4 = vector.load %arg2[%c0_1, %c0_2] : memref<112x448xbf16, #tpu.memory_space<vmem>>, vector<112x448xbf16>
    %cst_3 = arith.constant dense<0.000000e+00> : vector<1x448xf32>
    %5 = tpu.matmul %3, %4, %cst_3 {dimension_numbers = #tpu.dot_dimension_numbers<[1], [0], [0], [1], [0, 0, 1, 1], [], []>} : vector<1x112xbf16>, vector<112x448xbf16>, vector<1x448xf32> -> vector<1x448xf32>
    %c0_4 = arith.constant 0 : index
    %c0_5 = arith.constant 0 : index
    %6 = vector.load %arg3[%c0_4, %c0_5] : memref<1x448xf32, #tpu.memory_space<vmem>>, vector<1x448xf32>
    %7 = arith.addf %5, %6 : vector<1x448xf32>
    %8 = arith.negf %7 : vector<1x448xf32>
    %9 = math.exp %8 : vector<1x448xf32>
    %cst_6 = arith.constant 1.000000e+00 : f32
    %10 = vector.broadcast %cst_6 : f32 to vector<1x448xf32>
    %11 = arith.addf %10, %9 : vector<1x448xf32>
    %12 = arith.divf %10, %11 : vector<1x448xf32>
    %c0_7 = arith.constant 0 : index
    %c0_8 = arith.constant 0 : index
    %13 = vector.load %arg5[%c0_7, %c0_8] : memref<224x448xbf16, #tpu.memory_space<vmem>>, vector<224x448xbf16>
    %14 = arith.extf %13 : vector<224x448xbf16> to vector<224x448xf32>
    %15 = vector.broadcast %12 : vector<1x448xf32> to vector<224x448xf32>
    %16 = arith.mulf %14, %15 : vector<224x448xf32>
    %17 = arith.truncf %16 : vector<224x448xf32> to vector<224x448xbf16>
    %c0_9 = arith.constant 0 : index
    %c0_10 = arith.constant 0 : index
    %18 = vector.load %arg4[%c0_9, %c0_10] : memref<448x784xf32, #tpu.memory_space<vmem>>, vector<448x784xf32>
    %19 = arith.truncf %18 : vector<448x784xf32> to vector<448x784xbf16>
    %cst_11 = arith.constant dense<0.000000e+00> : vector<224x784xf32>
    %20 = tpu.matmul %17, %19, %cst_11 {dimension_numbers = #tpu.dot_dimension_numbers<[1], [0], [0], [1], [0, 0, 1, 1], [], []>} : vector<224x448xbf16>, vector<448x784xbf16>, vector<224x784xf32> -> vector<224x784xf32>
    %cst_12 = arith.constant dense<0.000000e+00> : vector<224xf32>
    %21 = vector.multi_reduction <add>, %20, %cst_12 [1] : vector<224x784xf32> to vector<224xf32>
    %22 = vector.shape_cast %21 : vector<224xf32> to vector<224x1xf32>
    %cst_13 = arith.constant 0.00127551018 : f32
    %23 = vector.broadcast %cst_13 : f32 to vector<224x1xf32>
    %24 = arith.mulf %22, %23 : vector<224x1xf32>
    %25 = vector.broadcast %24 : vector<224x1xf32> to vector<224x784xf32>
    %26 = arith.subf %20, %25 : vector<224x784xf32>
    %27 = arith.mulf %26, %26 : vector<224x784xf32>
    %cst_14 = arith.constant dense<0.000000e+00> : vector<224xf32>
    %28 = vector.multi_reduction <add>, %27, %cst_14 [1] : vector<224x784xf32> to vector<224xf32>
    %29 = vector.shape_cast %28 : vector<224xf32> to vector<224x1xf32>
    %cst_15 = arith.constant 0.00127551018 : f32
    %30 = vector.broadcast %cst_15 : f32 to vector<224x1xf32>
    %31 = arith.mulf %29, %30 : vector<224x1xf32>
    %cst_16 = arith.constant 9.99999974E-6 : f32
    %32 = vector.broadcast %cst_16 : f32 to vector<224x1xf32>
    %33 = arith.addf %31, %32 : vector<224x1xf32>
    %34 = math.rsqrt %33 : vector<224x1xf32>
    %c0_17 = arith.constant 0 : index
    %c0_18 = arith.constant 0 : index
    %35 = vector.load %arg6[%c0_17, %c0_18] : memref<224x1xf32, #tpu.memory_space<vmem>>, vector<224x1xf32>
    %36 = arith.mulf %34, %35 : vector<224x1xf32>
    %37 = vector.broadcast %36 : vector<224x1xf32> to vector<224x784xf32>
    %38 = arith.mulf %26, %37 : vector<224x784xf32>
    %c0_19 = arith.constant 0 : index
    %c0_20 = arith.constant 0 : index
    %39 = vector.load %arg7[%c0_19, %c0_20] : memref<224x1xf32, #tpu.memory_space<vmem>>, vector<224x1xf32>
    %40 = vector.broadcast %39 : vector<224x1xf32> to vector<224x784xf32>
    %41 = arith.addf %38, %40 : vector<224x784xf32>
    %c0_21 = arith.constant 0 : index
    %c0_22 = arith.constant 0 : index
    %42 = vector.load %arg8[%c0_21, %c0_22] : memref<224x784xf32, #tpu.memory_space<vmem>>, vector<224x784xf32>
    tpu.vector_store %arg8[%c0_21, %c0_22], %41 {strides = array<i32>} : memref<224x784xf32, #tpu.memory_space<vmem>>, vector<224x784xf32>,
    return
  }
  func.func @transform_0(%arg0: i32) -> (i32, i32) {
    %c0_i32 = arith.constant 0 : i32
    %c0_i32_0 = arith.constant 0 : i32
    %c0_i32_1 = arith.constant 0 : i32
    return %c0_i32, %c0_i32_0 : i32, i32
  }
  func.func @transform_1(%arg0: i32) -> (i32, i32) {
    %c0_i32 = arith.constant 0 : i32
    %c0_i32_0 = arith.constant 0 : i32
    %c0_i32_1 = arith.constant 0 : i32
    return %c0_i32, %c0_i32_0 : i32, i32
  }
  func.func @transform_2(%arg0: i32) -> (i32, i32) {
    %c0_i32 = arith.constant 0 : i32
    %c0_i32_0 = arith.constant 0 : i32
    %c0_i32_1 = arith.constant 0 : i32
    return %c0_i32, %c0_i32_0 : i32, i32
  }
  func.func @transform_3(%arg0: i32) -> (i32, i32) {
    %c0_i32 = arith.constant 0 : i32
    %c0_i32_0 = arith.constant 0 : i32
    %c0_i32_1 = arith.constant 0 : i32
    return %c0_i32, %c0_i32_0 : i32, i32
  }
  func.func @transform_4(%arg0: i32) -> (i32, i32) {
    %c0_i32 = arith.constant 0 : i32
    %c0_i32_0 = arith.constant 0 : i32
    return %arg0, %c0_i32 : i32, i32
  }
  func.func @transform_5(%arg0: i32) -> (i32, i32) {
    %c0_i32 = arith.constant 0 : i32
    %c0_i32_0 = arith.constant 0 : i32
    return %arg0, %c0_i32 : i32, i32
  }
  func.func @transform_6(%arg0: i32) -> (i32, i32) {
    %c0_i32 = arith.constant 0 : i32
    %c0_i32_0 = arith.constant 0 : i32
    return %arg0, %c0_i32 : i32, i32
  }
  func.func @transform_7(%arg0: i32) -> (i32, i32) {
    %c0_i32 = arith.constant 0 : i32
    %c0_i32_0 = arith.constant 0 : i32
    return %arg0, %c0_i32 : i32, i32
  }
}

</mosaic_0001>

<bundles_post_ra>
// kernel: tpu_custom_call.1
= control target key start
LH: loop header
LB: loop body
LE: loop exit
PB: predicated region body
PF: predicated region fallthrough
CT: control target
= control target key end

     0   :  { %s9506_s0 = inlined_call_operand.hbm [shape: f32[1,112], index: 0, kind: input, shape index: {}]   ;;  %s9507_s1 = inlined_call_operand.hbm [shape: bf16[112,448], index: 1, kind: input, shape index: {}]   ;;  %s9508_s2 = inlined_call_operand.hbm [shape: f32[1,448], index: 2, kind: input, shape index: {}]   ;;  %s9509_s3 = inlined_call_operand.hbm [shape: f32[448,784], index: 3, kind: input, shape index: {}]   ;;  %s9510_s4 = inlined_call_operand.hbm [shape: bf16[448,448], index: 4, kind: input, shape index: {}]   ;;  %s9511_s5 = inlined_call_operand.vmem [shape: f32[448,1], index: 5, kind: input, shape index: {}]   ;;  %s9512_s6 = inlined_call_operand.vmem [shape: f32[448,1], index: 6, kind: input, shape index: {}]   ;;  %s9513_s7 = inlined_call_operand.hbm [shape: f32[448,784], index: 7, kind: output, shape index: {}]  }
   0x1   :  { %9917 = sst [smem:[#allocation196_spill]] %s9506_s0 }
   0x2   :  { %12 = vsyncpa [#allocation3], 0 }
   0x3   :  { %13 = vsyncpa [#allocation6], 0 }
   0x4   :  { %14 = vsyncpa [#allocation9], 0 }
   0x5   :  { %15 = vsyncpa [#allocation4], 0 }
   0x6   :  { %17 = vsyncpa [#allocation4 + $0x1], 0  ;;  %s5836_s24 = smov 0   ;;  %s5838_s25 = smov 0  }
   0x7   :  { %s5840_s26 = smov 0   ;;  %s5842_s27 = smov 0  }
   0x8 LB: > { %s5857_s28 = sadd.s32 4294967295, %s5781_s27   ;;  %s5122_s29 = sadd.s32 4294967294, %s5781_s27   ;;  %s5781_s27 = sphi %s5842_s27, %s10817_s27   ;;  %s5777_s26 = sphi %s5840_s26, %s10816_s26   ;;  %s5773_s25 = sphi %s5838_s25, %s10815_s25   ;;  %s5769_s24 = sphi %s5836_s24, %s10814_s24  }
   0x9   : > { %p127_p0 = scmp.ne.s32.totalorder %s5773_s25, %s5769_s24  ;;  %p9514_p1 = scmp.eq.s32.totalorder %s5857_s28, 0 }
   0xa   : > { %p209_p3 = scmp.eq.s32.totalorder %s5122_s29, 1  ;;  %p5123_p5 = scmp.ge.s32.totalorder %s5781_s27, 1 }
   0xb   : > { %p5866_p4 = por %p9514_p1, %p127_p0  ;;  %p216_p7 = scmp.lt.s32.totalorder %s5781_s27, 3 }
   0xc   : > { %p5871_p6 = por %p209_p3, %p127_p0  ;;  %s5783_s10 = smov [#allocation2]  }
   0xd   : > { %s9918_s30 = scalar_select %p5866_p4, 1, 0 }
   0xe   : > { %s9919_s8 = scalar_select %p5871_p6, 1, 0 }
   0xf   : > { %p5876_p8 = pnand %p5123_p5, %p216_p7  ;;  %s229_s11 = sshll.u32 %s5783_s10, 4  ;;  %s230_s11 = int_to_ptr.vmem [resolvable:$true] %s229_s11 }
  0x10   : > { %s5784_s12 = smov [#allocation5]   ;;  %s5785_s15 = smov [#allocation7]  }
  0x11   : > { %s9920_s9 = scalar_select %p5876_p8, 1, 0 }
  0x12   : > { %p5382_p10 = pneg %p5876_p8  ;;  %s239_s13 = sshll.u32 %s5784_s12, 4  ;;  %s5889_s13 = int_to_ptr.vmem [resolvable:$true] %s239_s13 }
  0x13   : > { %s253_s16 = sshll.u32 %s5785_s15, 4  ;;  %s5584_s17 = scalar_lea.vmem %s230_s11, 16  ;;  %s254_s16 = int_to_ptr.vmem [resolvable:$true] %s253_s16 }
  0x14   : > { %p5885_p11 = pnand %p5382_p10, %p9514_p1  ;;  %p5585_p13 = scmp.ne.s32.totalorder %s230_s11, %s5584_s17 }
  0x15   : > { %s5591_s18 = scalar_lea.vmem %s230_s11, 32  ;;  %p5592_p5 = scmp.lt.s32.totalorder %s230_s11, %s230_s11 }
  0x16   : > { %p5575_p12 = pneg %p5885_p11  ;;  %p5593_p7 = scmp.lt.s32.totalorder %s5591_s18, %s5584_s17 }
  0x18   : > { %p5587_p0 = pnand %p5585_p13, %p5575_p12  ;;  %p5594_p10 = por %p5593_p7, %p5592_p5 }
  0x1a   : > { %p5588_p3 = pneg %p5587_p0 }
  0x1c   : > { %p5595_p9 = pnand %p5594_p10, %p5588_p3 }
  0x1e   : > { %5598 = shalt.err (!%p5595_p9)
}
  0x1f   : > { %s9922_s0 = sld [smem:[#allocation196_spill]]  ;;  %s5610_s21 = scalar_lea.vmem %s5889_s13, 3584 }
  0x20   : > { %p5611_p1 = scmp.ne.s32.totalorder %s5889_s13, %s5610_s21  ;;  %p5618_p5 = scmp.lt.s32.totalorder %s5889_s13, %s5889_s13 }
  0x21   : > { %p5619_p3 = scmp.lt.s32.totalorder %s5610_s21, %s5610_s21 }
  0x22   : > { %p5613_p13 = pnand %p5611_p1, %p5575_p12 }
  0x23   : > { %p5620_p9 = por %p5619_p3, %p5618_p5 }
  0x24   : > { %p5614_p0 = pneg %p5613_p13 }
  0x25   : > { %5385 = dma.hbm_to_vmem [thread:$0]  (!%p5885_p11), %s9922_s0, 16, %s230_s11, [#allocation3]  }
  0x26   : > { %p5621_p7 = pnand %p5620_p9, %p5614_p0 }
  0x28   : > { %5624 = shalt.err (!%p5621_p7)
}
  0x29   : > { %s9515_s22 = smov 256   ;;  %s9516_s23 = smov 16  }
  0x2a   : > { %5388 = dma.hbm_to_vmem [thread:$0]  (!%p5885_p11), %s9507_s1, 3584, %s5889_s13, [#allocation6], %s9515_s22, %s9515_s22, %s9516_s23  }
  0x2b   : > { %s5636_s11 = scalar_lea.vmem %s254_s16, 64  ;;  %p5644_p0 = scmp.lt.s32.totalorder %s254_s16, %s254_s16 }
  0x2c   : > { %p5637_p1 = scmp.ne.s32.totalorder %s254_s16, %s5636_s11  ;;  %p5645_p5 = scmp.lt.s32.totalorder %s5636_s11, %s5636_s11 }
  0x2e   : > { %p5639_p10 = pnand %p5637_p1, %p5575_p12  ;;  %p5646_p3 = por %p5645_p5, %p5644_p0 }
  0x30   : > { %p5640_p13 = pneg %p5639_p10 }
  0x32   : > { %p5647_p9 = pnand %p5646_p3, %p5640_p13 }
  0x34   : > { %5650 = shalt.err (!%p5647_p9)
}
  0x35   : > { %5391 = dma.hbm_to_vmem [thread:$0]  (!%p5885_p11), %s9508_s2, 64, %s254_s16, [#allocation6]  }
  0x36   : > { %s5788_s13 = smov [#allocation8]  }
  0x37   : > { %s263_s17 = sshll.u32 %s5788_s13, 4  ;;  %s264_s17 = int_to_ptr.vmem [resolvable:$true] %s263_s17 }
  0x38   : > { %s5662_s18 = scalar_lea.vmem %s264_s17, 50176  ;;  %p5670_p2 = scmp.lt.s32.totalorder %s264_s17, %s264_s17 }
  0x39   : > { %p5663_p7 = scmp.ne.s32.totalorder %s264_s17, %s5662_s18  ;;  %p5671_p0 = scmp.lt.s32.totalorder %s5662_s18, %s5662_s18 }
  0x3b   : > { %p5665_p1 = pnand %p5663_p7, %p5575_p12  ;;  %p5672_p13 = por %p5671_p0, %p5670_p2 }
  0x3d   : > { %p5666_p10 = pneg %p5665_p1 }
  0x3f   : > { %p5673_p5 = pnand %p5672_p13, %p5666_p10 }
  0x41   : > { %5676 = shalt.err (!%p5673_p5)
}
  0x42   : > { %s5789_s19 = smov 896   ;;  %s5790_s16 = smov 56  }
  0x43   : > { %5394 = dma.hbm_to_vmem [thread:$0]  (!%p5885_p11), %s9509_s3, 50176, %s264_s17, [#allocation9], %s5789_s19, %s5789_s19, %s5790_s16  }
  0x44   : > { %s5934_s29 = sadd.s32 1, %s5781_s27   ;;  %s114_s11 = sadd.s32 1, %s5777_s26 }
  0x45   : > { %s111_s10 = ssub.s32 %s5781_s27, %s5934_s29  ;;  %p121_p12 = scmp.ne.s32.totalorder %s5777_s26, %s5773_s25 }
  0x46   : > { %p112_p2 = scmp.eq.s32.totalorder %s111_s10, 0  ;;  %p122_p3 = scmp.eq.s32.totalorder %s5781_s27, 0 }
  0x47   : > { %p9923_p7 = scmp.eq.s32.totalorder %s5857_s28, 1  ;;  %p5407_p10 = scmp.lt.s32.totalorder %s5781_s27, 2 }
  0x48   : > { %s5943_s12 = scalar_select %p112_p2, %s5777_s26, %s114_s11  }
  0x49   : > { %p123_p9 = por %p122_p3, %p121_p12  ;;  %p5947_p1 = por %p9923_p7, %p121_p12 }
  0x4a   : > { %s277_s14 = sand.u32 1, %s5781_s27   ;;  %s279_s13 = sand.u32 1, %s5777_s26  }
  0x4b   : > { %s9924_s15 = scalar_select %p5947_p1, 1, 0 }
  0x4c   : > { %s5358_s17 = smul.u32 448, %s279_s13  ;;  %p5954_p11 = pnand %p5407_p10, %p123_p9 }
  0x4d   : > { %s5233_s19 = smul.u32 7168, %s5781_s27  ;;  %s5966_s22 = scalar_lea.sflag [#allocation3], %s277_s14 }
  0x4e   : > { %s281_s10 = scalar_lea.vmem [#allocation10], %s5358_s17  ;;  %p5679_p13 = pneg %p5954_p11 }
  0x4f   : > { %s5962_s21 = scalar_lea.hbm %s9510_s4, %s5233_s19  ;;  %s289_s11 = sshll.u32 %s281_s10, 4  ;;  %s5964_s11 = int_to_ptr.vmem [resolvable:$true] %s289_s11 }
  0x50   : > { %s5677_s13 = scalar_lea.hbm %s5962_s21, 7168  ;;  %s5682_s19 = scalar_lea.hbm %s9510_s4, 14336 }
  0x51   : > { %p5678_p0 = scmp.ne.s32.totalorder %s5962_s21, %s5677_s13  ;;  %p5683_p12 = scmp.lt.s32.totalorder %s5962_s21, %s9510_s4 }
  0x52   : > { %p5684_p3 = scmp.lt.s32.totalorder %s5682_s19, %s5677_s13 }
  0x53   : > { %p5680_p5 = pnand %p5679_p13, %p5678_p0 }
  0x54   : > { %p5685_p9 = por %p5684_p3, %p5683_p12 }
  0x55   : > { %p5681_p2 = pneg %p5680_p5 }
  0x57   : > { %p5686_p7 = pnand %p5685_p9, %p5681_p2 }
  0x59   : > { %5689 = shalt.err (!%p5686_p7)
}
  0x5a   : > { %s5690_s14 = scalar_lea.vmem %s5964_s11, 7168  ;;  %s5791_s17 = smov [#allocation10]  }
  0x5b   : > { %p5691_p10 = scmp.ne.s32.totalorder %s5964_s11, %s5690_s14  ;;  %s5695_s10 = sshll.u32 %s5791_s17, 4  ;;  %s5696_s10 = int_to_ptr.vmem [resolvable:$false] %s5695_s10 }
  0x5c   : > { %s5697_s0 = scalar_lea.vmem %s5696_s10, 14336  ;;  %p5698_p5 = scmp.lt.s32.totalorder %s5964_s11, %s5696_s10 }
  0x5d   : > { %p5693_p6 = pnand %p5691_p10, %p5679_p13  ;;  %p5699_p1 = scmp.lt.s32.totalorder %s5697_s0, %s5690_s14 }
  0x5f   : > { %p5694_p0 = pneg %p5693_p6  ;;  %p5700_p4 = por %p5699_p1, %p5698_p5 }
  0x61   : > { %p5701_p8 = pnand %p5700_p4, %p5694_p0 }
  0x63   : > { %5704 = shalt.err (!%p5701_p8)
}
  0x64   : > { %s9926_s23 = smov 16   ;;  %s9927_s13 = smov 256  }
  0x65   : > { %5398 = dma.hbm_to_vmem [thread:$0]  (!%p5954_p11), %s5962_s21, 7168, %s5964_s11, %s5966_s22, %s9927_s13, %s9927_s13, %s9926_s23  }
  0x66   : > { %p9928_p6 = scmp.ne.s32.totalorder %s9920_s9, 0 }
  0x68   : > { %319 = sbr.rel (%p9928_p6) target bundleno = 1601 (0x641), region = 48 }
  0x6d   : > { %p9929_p13 = scmp.eq.s32.totalorder %s5857_s28, 0 }
  0x6f   : > { %5748 = dma.done.wait (%p9929_p13), [#allocation3], 16   ;;  %p9930_p2 = pmov %p9929_p13 }
  0x71   : > { %5750 = vsyncadd (%p9930_p2), [#allocation3], 4294967280  ;;  %p9931_p4 = pmov %p9930_p2 }
  0x72   : > { %p9932_p8 = pmov %p9930_p2 }
  0x73   : > { %5752 = dma.done.wait (%p9931_p4), [#allocation6], 3648  }
  0x74   : > { %5754 = vsyncadd (%p9932_p8), [#allocation6], 4294963648  ;;  %p9933_p1 = pmov %p9930_p2 }
  0x76   : > { %5756 = dma.done.wait (%p9933_p1), [#allocation9], 50176   ;;  %p9934_p11 = pmov %p9933_p1 }
  0x77   : > { %s337_s9 = sand.u32 1, %s5857_s28   ;;  %s6006_s22 = sand.u32 1, %s5773_s25  }
  0x78   : > { %5758 = vsyncadd (%p9934_p11), [#allocation9], 4294917120  ;;  %s5359_s18 = smul.u32 448, %s6006_s22  ;;  %s338_s21 = scalar_lea.sflag [#allocation3], %s337_s9 }
  0x79   : > { %p9935_p12 = scmp.ne.s32.totalorder %s9918_s30, 0 }
  0x7a   : > { %s6009_s11 = scalar_lea.vmem [#allocation10], %s5359_s18 }
  0x7b   : > { %5760 = dma.done.wait (%p9935_p12), %s338_s21, 7168  }
  0x7c   : > { %5762 = vsyncadd (%p9935_p12), %s338_s21, 4294960128  ;;  %v9520_v0 = vmov 0   ;;  %v5459_v1 = vld [vmem:[#allocation5 + $0xc4] ss:$16 sps:$4 sm:$0xff]   ;;  %v5461_v2 = vld [vmem:[#allocation5 + $0xcc] ss:$16 sps:$4 sm:$0xff]  }
  0x7d   : > { %626 = vmatprep.mubr.bf16.mxu0 %v9520_v0  ;;  %667 = vmatprep.mubr.bf16.mxu1 %v9520_v0  ;;  %v5463_v3 = vld [vmem:[#allocation5 + $0xc0] ss:$16 sps:$4 sm:$0xff]   ;;  %v5464_v4 = vld [vmem:[#allocation5 + $0xc8] ss:$16 sps:$4 sm:$0xff]   ;;  %v5465_v5 = vld [vmem:[#allocation5 + $0xa4] ss:$16 sps:$4 sm:$0xff]  }
  0x7e   : > { %5457 = vset.pattern.permute.xlu1 %v9520_v0  ;;  %5458 = vset.pattern.permute.xlu0 %v9520_v0  ;;  %v5467_v6 = vld [vmem:[#allocation5 + $0xac] ss:$16 sps:$4 sm:$0xff]   ;;  %v5469_v7 = vld [vmem:[#allocation5 + $0xa0] ss:$16 sps:$4 sm:$0xff]   ;;  %v5470_v8 = vld [vmem:[#allocation5 + $0xa8] ss:$16 sps:$4 sm:$0xff]  }
  0x7f   : > { %596 = vmatprep.subr.bf16.mxu0 %v5459_v1  ;;  %637 = vmatprep.subr.bf16.mxu1 %v5461_v2  ;;  %v5471_v9 = vld [vmem:[#allocation5 + $0x84] ss:$16 sps:$4 sm:$0xff]   ;;  %v5473_v10 = vld [vmem:[#allocation5 + $0x8c] ss:$16 sps:$4 sm:$0xff]   ;;  %v5475_v11 = vld [vmem:[#allocation5 + $0x80] ss:$16 sps:$4 sm:$0xff]  }
  0x80   : > { %597 = vmatpush1.bf16.msra.mxu0 %v5463_v3  ;;  %638 = vmatpush1.bf16.msra.mxu1 %v5464_v4  ;;  %v5476_v12 = vld [vmem:[#allocation5 + $0x88] ss:$16 sps:$4 sm:$0xff]   ;;  %v5477_v13 = vld [vmem:[#allocation5 + $0x64] ss:$16 sps:$4 sm:$0xff]   ;;  %v5479_v14 = vld [vmem:[#allocation5 + $0x6c] ss:$16 sps:$4 sm:$0xff]  }
  0x81   : > { %598 = vmatprep.subr.bf16.mxu0 %v5465_v5  ;;  %639 = vmatprep.subr.bf16.mxu1 %v5467_v6  ;;  %v5481_v15 = vld [vmem:[#allocation5 + $0x60] ss:$16 sps:$4 sm:$0xff]   ;;  %v5482_v16 = vld [vmem:[#allocation5 + $0x68] ss:$16 sps:$4 sm:$0xff]   ;;  %v5483_v17 = vld [vmem:[#allocation5 + $0x44] ss:$16 sps:$4 sm:$0xff]  }
  0x82   : > { %v5485_v18 = vld [vmem:[#allocation5 + $0x4c] ss:$16 sps:$4 sm:$0xff]   ;;  %v5487_v19 = vld [vmem:[#allocation5 + $0x40] ss:$16 sps:$4 sm:$0xff]   ;;  %v5488_v20 = vld [vmem:[#allocation5 + $0x48] ss:$16 sps:$4 sm:$0xff]  }
  0x83   : > { %v5489_v21 = vld [vmem:[#allocation5 + $0x24] ss:$16 sps:$4 sm:$0xff]   ;;  %v5491_v22 = vld [vmem:[#allocation5 + $0x2c] ss:$16 sps:$4 sm:$0xff]   ;;  %v5493_v23 = vld [vmem:[#allocation5 + $0x20] ss:$16 sps:$4 sm:$0xff]  }
  0x84   : > { %599 = vmatpush1.bf16.msra.mxu0 %v5469_v7  ;;  %640 = vmatpush1.bf16.msra.mxu1 %v5470_v8  ;;  %v5494_v24 = vld [vmem:[#allocation5 + $0x28] ss:$16 sps:$4 sm:$0xff]   ;;  %v397_v25 = vld [vmem:[#allocation2] sm:$0x1]  ;;  %v5495_v26 = vld [vmem:[#allocation5 + $0x4] ss:$16 sps:$4 sm:$0xff]  }
  0x85   : > { %600 = vmatprep.subr.bf16.mxu0 %v5471_v9  ;;  %641 = vmatprep.subr.bf16.mxu1 %v5473_v10  ;;  %v5497_v27 = vld [vmem:[#allocation5 + $0xc] ss:$16 sps:$4 sm:$0xff]   ;;  %v1158_v29 = vld [vmem:[#allocation8 + $0x350] sm:$0xff]  ;;  %v5499_v30 = vld [vmem:[#allocation5] ss:$16 sps:$4 sm:$0xff]   ;;  %v398_v31 = vmax.f32 %v397_v25, 0.0 }
  0x86   : > { %v1151_v28 = vld [vmem:[#allocation8 + $0x318] sm:$0xff]  ;;  %v5500_v32 = vld [vmem:[#allocation5 + $0x8] ss:$16 sps:$4 sm:$0xff]   ;;  %v1157_v37 = vld [vmem:[#allocation8 + $0x348] sm:$0xff]  ;;  %vm590_vm0 = vcmask 916480   ;;  %vm1640_vm1 = vcmask 523264  }
  0x87   : > { %v1375_v33 = vld [vmem:[#allocation8 + $0xa18] sm:$0xff]  ;;  %v1382_v34 = vld [vmem:[#allocation8 + $0xa50] sm:$0xff]  ;;  %v1494_v35 = vpack.c.bf16 %v1158_v29, %v1151_v28  ;;  %v1137_v40 = vld [vmem:[#allocation8 + $0x2a8] sm:$0xff]  ;;  %v399_v43 = vpack.c.bf16 %v398_v31, %v398_v31  ;;  %s383_s30 = smul.u32 28, %s5857_s28  ;;  %vm3016_vm2 = vcmask 130048   ;;  %p10811_p7 = scmp.ne.s32.totalorder %s9924_s15, 0 }
  0x88   : > { %601 = vmatpush1.bf16.msra.mxu0 %v5475_v11  ;;  %642 = vmatpush1.bf16.msra.mxu1 %v5476_v12  ;;  %v1150_v36 = vld [vmem:[#allocation8 + $0x310] sm:$0xff]  ;;  %v1606_v38 = vpack.c.bf16 %v1382_v34, %v1375_v33  ;;  %v1144_v41 = vld [vmem:[#allocation8 + $0x2e0] sm:$0xff]  ;;  %v1381_v42 = vld [vmem:[#allocation8 + $0xa48] sm:$0xff]  ;;  %s5360_s23 = smul.u32 1568, %s6006_s22  ;;  %s5793_s16 = smov [#allocation11]  }
  0x89   : > { %602 = vmatprep.subr.bf16.mxu0 %v5477_v13  ;;  %643 = vmatprep.subr.bf16.mxu1 %v5479_v14  ;;  %v1374_v39 = vld [vmem:[#allocation8 + $0xa10] sm:$0xff]  ;;  %v1361_v44 = vld [vmem:[#allocation8 + $0x9a8] sm:$0xff]  ;;  %v1368_v45 = vld [vmem:[#allocation8 + $0x9e0] sm:$0xff]  ;;  %v1493_v46 = vpack.c.bf16 %v1157_v37, %v1150_v36  ;;  %v1487_v48 = vpack.c.bf16 %v1144_v41, %v1137_v40  ;;  %p384_p3 = scmp.lt.s32.totalorder %s383_s30, 55  ;;  %s5412_s9 = smul.u32 25088, %s5857_s28 }
  0x8a   : > { %v1605_v47 = vpack.c.bf16 %v1381_v42, %v1374_v39  ;;  %v1136_v49 = vld [vmem:[#allocation8 + $0x2a0] sm:$0xff]  ;;  %v1143_v50 = vld [vmem:[#allocation8 + $0x2d8] sm:$0xff]  ;;  %v1599_v51 = vpack.c.bf16 %v1368_v45, %v1361_v44  ;;  %v1130_v53 = vld [vmem:[#allocation8 + $0x270] sm:$0xff]  ;;  %s8829_s13 = scalar_lea.vmem [#allocation11], %s5360_s23  ;;  %s5709_s20 = sshll.u32 %s5793_s16, 4  ;;  %s5710_s20 = int_to_ptr.vmem [resolvable:$false] %s5709_s20 }
  0x8b   : > { %v1123_v52 = vld [vmem:[#allocation8 + $0x238] sm:$0xff]  ;;  %v1486_v54 = vpack.c.bf16 %v1143_v50, %v1136_v49  ;;  %v1122_v56 = vld [vmem:[#allocation8 + $0x230] sm:$0xff]  ;;  %v1129_v57 = vld [vmem:[#allocation8 + $0x268] sm:$0xff]  ;;  %s10819_s30 = smov (!%p384_p3, %s383_s30), 55  ;;  %s4987_s18 = sshll.u32 %s8829_s13, 4  ;;  %s9455_s18 = int_to_ptr.vmem [resolvable:$true] %s4987_s18 }
  0x8c   : > { %603 = vmatpush1.bf16.msra.mxu0 %v5481_v15  ;;  %644 = vmatpush1.bf16.msra.mxu1 %v5482_v16  ;;  %v1480_v55 = vpack.c.bf16 %v1130_v53, %v1123_v52  ;;  %v1109_v58 = vld [vmem:[#allocation8 + $0x1c8] sm:$0xff]  ;;  %v1116_v59 = vld [vmem:[#allocation8 + $0x200] sm:$0xff]  ;;  %v1479_v60 = vpack.c.bf16 %v1129_v57, %v1122_v56  ;;  %v1115_v63 = vld [vmem:[#allocation8 + $0x1f8] sm:$0xff]  ;;  %s5136_s19 = sshll.u32 %s10819_s30, 3  ;;  %s4973_s30 = scalar_lea.sflag [#allocation4], %s6006_s22 }
  0x8d   : > { %604 = vmatprep.subr.bf16.mxu0 %v5483_v17  ;;  %645 = vmatprep.subr.bf16.mxu1 %v5485_v18  ;;  %v1473_v61 = vpack.c.bf16 %v1116_v59, %v1109_v58  ;;  %v1108_v62 = vld [vmem:[#allocation8 + $0x1c0] sm:$0xff]  ;;  %v1095_v1 = vld [vmem:[#allocation8 + $0x158] sm:$0xff]  ;;  %v1102_v2 = vld [vmem:[#allocation8 + $0x190] sm:$0xff]  ;;  %s7026_s14 = scalar_lea.vmem %s9512_s6, %s5136_s19  ;;  %s8743_s0 = scalar_lea.vmem %s9511_s5, %s5136_s19 }
  0x8e   : > { %v1472_v3 = vpack.c.bf16 %v1115_v63, %v1108_v62  ;;  %v1466_v4 = vpack.c.bf16 %v1102_v2, %v1095_v1  ;;  %v1094_v5 = vld [vmem:[#allocation8 + $0x150] sm:$0xff]  ;;  %v1101_v6 = vld [vmem:[#allocation8 + $0x188] sm:$0xff]  ;;  %v1088_v9 = vld [vmem:[#allocation8 + $0x120] sm:$0xff]  ;;  %s5705_s19 = scalar_lea.vmem %s9455_s18, 25088  ;;  %p5712_p5 = scmp.lt.s32.totalorder %s9455_s18, %s5710_s20 }
  0x8f   : > { %v1465_v7 = vpack.c.bf16 %v1101_v6, %v1094_v5  ;;  %v1081_v8 = vld [vmem:[#allocation8 + $0xe8] sm:$0xff]  ;;  %v1360_v11 = vld [vmem:[#allocation8 + $0x9a0] sm:$0xff]  ;;  %v1367_v12 = vld [vmem:[#allocation8 + $0x9d8] sm:$0xff]  ;;  %p5706_p9 = scmp.ne.s32.totalorder %s9455_s18, %s5705_s19 }
  0x90   : > { %605 = vmatpush1.bf16.msra.mxu0 %v5487_v19  ;;  %646 = vmatpush1.bf16.msra.mxu1 %v5488_v20  ;;  %v1459_v10 = vpack.c.bf16 %v1088_v9, %v1081_v8  ;;  %v1080_v13 = vld [vmem:[#allocation8 + $0xe0] sm:$0xff]  ;;  %v1598_v14 = vpack.c.bf16 %v1367_v12, %v1360_v11  ;;  %v1087_v15 = vld [vmem:[#allocation8 + $0x118] sm:$0xff]  ;;  %v1354_v18 = vld [vmem:[#allocation8 + $0x970] sm:$0xff] }
  0x91   : > { %606 = vmatprep.subr.bf16.mxu0 %v5489_v21  ;;  %647 = vmatprep.subr.bf16.mxu1 %v5491_v22  ;;  %v1458_v16 = vpack.c.bf16 %v1087_v15, %v1080_v13  ;;  %v1347_v17 = vld [vmem:[#allocation8 + $0x938] sm:$0xff]  ;;  %v1074_v21 = vld [vmem:[#allocation8 + $0xb0] sm:$0xff]  ;;  %v1333_v29 = vld [vmem:[#allocation8 + $0x8c8] sm:$0xff]  ;;  %p5707_p10 = pnand %p5706_p9, %p10811_p7 }
  0x92   : > { %v1067_v19 = vld [vmem:[#allocation8 + $0x78] sm:$0xff]  ;;  %v1592_v20 = vpack.c.bf16 %v1354_v18, %v1347_v17  ;;  %v1346_v22 = vld [vmem:[#allocation8 + $0x930] sm:$0xff]  ;;  %v1053_v31 = vld [vmem:[#allocation8 + $0x8] sm:$0xff] }
  0x93   : > { %v1060_v33 = vld [vmem:[#allocation8 + $0x40] sm:$0xff]  ;;  %v1059_v39 = vld [vmem:[#allocation8 + $0x38] sm:$0xff]  ;;  %v1326_v42 = vld [vmem:[#allocation8 + $0x890] sm:$0xff]  ;;  %p5708_p0 = pneg %p5707_p10 }
  0x94   : > { %607 = vmatpush1.bf16.msra.mxu0 %v5493_v23  ;;  %648 = vmatpush1.bf16.msra.mxu1 %v5494_v24  ;;  %v1353_v23 = vld [vmem:[#allocation8 + $0x968] sm:$0xff]  ;;  %v1452_v24 = vpack.c.bf16 %v1074_v21, %v1067_v19  ;;  %v1332_v34 = vld [vmem:[#allocation8 + $0x8c0] sm:$0xff]  ;;  %v1445_v36 = vpack.c.bf16 %v1060_v33, %v1053_v31  ;;  %v1319_v41 = vld [vmem:[#allocation8 + $0x858] sm:$0xff] }
  0x95   : > { %608 = vmatprep.subr.bf16.mxu0 %v5495_v26  ;;  %649 = vmatprep.subr.bf16.mxu1 %v5497_v27  ;;  %v1591_v25 = vpack.c.bf16 %v1353_v23, %v1346_v22  ;;  %v1066_v26 = vld [vmem:[#allocation8 + $0x70] sm:$0xff]  ;;  %v1073_v27 = vld [vmem:[#allocation8 + $0xa8] sm:$0xff]  ;;  %v1578_v44 = vpack.c.bf16 %v1326_v42, %v1319_v41  ;;  %v1256_v57 = vld [vmem:[#allocation8 + $0x660] sm:$0xff] }
  0x96   : > { %v1451_v28 = vpack.c.bf16 %v1073_v27, %v1066_v26  ;;  %v1270_v45 = vld [vmem:[#allocation8 + $0x6d0] sm:$0xff]  ;;  %v1305_v53 = vld [vmem:[#allocation8 + $0x7e8] sm:$0xff]  ;;  %v1304_v58 = vld [vmem:[#allocation8 + $0x7e0] sm:$0xff] }
  0x97   : > { %v1262_v50 = vld [vmem:[#allocation8 + $0x690] sm:$0xff]  ;;  %v1311_v59 = vld [vmem:[#allocation8 + $0x818] sm:$0xff]  ;;  %v1248_v62 = vld [vmem:[#allocation8 + $0x620] sm:$0xff] }
  0x98   : > { %609 = vmatpush1.bf16.msra.mxu0 %v5499_v30  ;;  %650 = vmatpush1.bf16.msra.mxu1 %v5500_v32  ;;  %v1340_v30 = vld [vmem:[#allocation8 + $0x900] sm:$0xff]  ;;  %v1255_v63 = vld [vmem:[#allocation8 + $0x658] sm:$0xff]  ;;  %v1242_v6 = vld [vmem:[#allocation8 + $0x5f0] sm:$0xff] }
  0x99   : > { %1683 = vmatprep.subr.bf16.mxu0 %v1494_v35  ;;  %1856 = vmatprep.subr.bf16.mxu1 %v1606_v38  ;;  %v1585_v32 = vpack.c.bf16 %v1340_v30, %v1333_v29  ;;  %v1339_v35 = vld [vmem:[#allocation8 + $0x8f8] sm:$0xff]  ;;  %v1052_v38 = vld [vmem:[#allocation8] sm:$0xff]  ;;  %v1542_v1 = vpack.c.bf16 %v1255_v63, %v1248_v62  ;;  %v1297_v8 = vld [vmem:[#allocation8 + $0x7a8] sm:$0xff] }
  0x9a   : > { %v1584_v37 = vpack.c.bf16 %v1339_v35, %v1332_v34  ;;  %v1444_v40 = vpack.c.bf16 %v1059_v39, %v1052_v38  ;;  %v1291_v2 = vld [vmem:[#allocation8 + $0x778] sm:$0xff]  ;;  %v1234_v11 = vld [vmem:[#allocation8 + $0x5b0] sm:$0xff]  ;;  %v1241_v12 = vld [vmem:[#allocation8 + $0x5e8] sm:$0xff] }
  0x9b   : > { %5166 = vmatmul.mubr.msk.bf16.vlgmr.msra.gmra.mxu0 %vm590_vm0, %v399_v43  ;;  %5167 = vmatmul.mubr.msk.bf16.vlgmr.msra.gmra.mxu1 %vm590_vm0, %v399_v43  ;;  %v1263_v43 = vld [vmem:[#allocation8 + $0x698] sm:$0xff]  ;;  %v1535_v13 = vpack.c.bf16 %v1241_v12, %v1234_v11  ;;  %v1284_v15 = vld [vmem:[#allocation8 + $0x740] sm:$0xff]  ;;  %v1438_v27 = vld [vmem:[#allocation8 + $0xc10] sm:$0xff] }
  0x9c   : > { %1684 = vmatpush1.bf16.msra.mxu0 %v1493_v46  ;;  %1857 = vmatpush1.bf16.msra.mxu1 %v1605_v47  ;;  %v1318_v46 = vld [vmem:[#allocation8 + $0x850] sm:$0xff]  ;;  %v1325_v47 = vld [vmem:[#allocation8 + $0x888] sm:$0xff]  ;;  %v1228_v18 = vld [vmem:[#allocation8 + $0x580] sm:$0xff] }
  0x9d   : > { %1685 = vmatprep.subr.bf16.mxu0 %v1487_v48  ;;  %1858 = vmatprep.subr.bf16.mxu1 %v1599_v51  ;;  %v1550_v48 = vpack.c.bf16 %v1270_v45, %v1263_v43  ;;  %v1577_v49 = vpack.c.bf16 %v1325_v47, %v1318_v46  ;;  %v1269_v51 = vld [vmem:[#allocation8 + $0x6c8] sm:$0xff]  ;;  %v1276_v19 = vld [vmem:[#allocation8 + $0x700] sm:$0xff]  ;;  %v1431_v26 = vld [vmem:[#allocation8 + $0xbd8] sm:$0xff] }
  0x9e   : > { %v1549_v52 = vpack.c.bf16 %v1269_v51, %v1262_v50  ;;  %v1220_v23 = vld [vmem:[#allocation8 + $0x540] sm:$0xff]  ;;  %v1634_v29 = vpack.c.bf16 %v1438_v27, %v1431_v26  ;;  %v1214_v30 = vld [vmem:[#allocation8 + $0x510] sm:$0xff]  ;;  %v1417_v38 = vld [vmem:[#allocation8 + $0xb68] sm:$0xff] }
  0x9f   : > { %v1430_v31 = vld [vmem:[#allocation8 + $0xbd0] sm:$0xff]  ;;  %v1424_v39 = vld [vmem:[#allocation8 + $0xba0] sm:$0xff]  ;;  %v1403_v50 = vld [vmem:[#allocation8 + $0xaf8] sm:$0xff] }
  0xa0   : > { %1686 = vmatpush1.bf16.msra.mxu0 %v1486_v54  ;;  %1859 = vmatpush1.bf16.msra.mxu1 %v1598_v14  ;;  %v1312_v54 = vld [vmem:[#allocation8 + $0x820] sm:$0xff]  ;;  %v1277_v14 = vld [vmem:[#allocation8 + $0x708] sm:$0xff]  ;;  %v1206_v35 = vld [vmem:[#allocation8 + $0x4d0] sm:$0xff]  ;;  %v1627_v41 = vpack.c.bf16 %v1424_v39, %v1417_v38 }
  0xa1   : > { %1687 = vmatprep.subr.bf16.mxu0 %v1480_v55  ;;  %1860 = vmatprep.subr.bf16.mxu1 %v1592_v20  ;;  %v1249_v55 = vld [vmem:[#allocation8 + $0x628] sm:$0xff]  ;;  %v1571_v56 = vpack.c.bf16 %v1312_v54, %v1305_v53  ;;  %v1557_v17 = vpack.c.bf16 %v1284_v15, %v1277_v14  ;;  %v1283_v20 = vld [vmem:[#allocation8 + $0x738] sm:$0xff]  ;;  %v1200_v42 = vld [vmem:[#allocation8 + $0x4a0] sm:$0xff] }
  0xa2   : > { %v1556_v22 = vpack.c.bf16 %v1283_v20, %v1276_v19  ;;  %v1416_v43 = vld [vmem:[#allocation8 + $0xb60] sm:$0xff]  ;;  %v1410_v51 = vld [vmem:[#allocation8 + $0xb30] sm:$0xff]  ;;  %v1389_v62 = vld [vmem:[#allocation8 + $0xa88] sm:$0xff] }
  0xa3   : > { %v1192_v47 = vld [vmem:[#allocation8 + $0x460] sm:$0xff]  ;;  %v1620_v53 = vpack.c.bf16 %v1410_v51, %v1403_v50  ;;  %v1186_v54 = vld [vmem:[#allocation8 + $0x430] sm:$0xff]  ;;  %v1153_v11 = vld [vmem:[#allocation8 + $0x328] sm:$0xff] }
  0xa4   : > { %1688 = vmatpush1.bf16.msra.mxu0 %v1479_v60  ;;  %1861 = vmatpush1.bf16.msra.mxu1 %v1591_v25  ;;  %v1543_v60 = vpack.c.bf16 %v1256_v57, %v1249_v55  ;;  %v1402_v55 = vld [vmem:[#allocation8 + $0xaf0] sm:$0xff]  ;;  %v1396_v63 = vld [vmem:[#allocation8 + $0xac0] sm:$0xff]  ;;  %v1377_v14 = vld [vmem:[#allocation8 + $0xa28] sm:$0xff] }
  0xa5   : > { %1689 = vmatprep.subr.bf16.mxu0 %v1473_v61  ;;  %1862 = vmatprep.subr.bf16.mxu1 %v1585_v32  ;;  %v1570_v61 = vpack.c.bf16 %v1311_v59, %v1304_v58  ;;  %v1437_v32 = vld [vmem:[#allocation8 + $0xc08] sm:$0xff]  ;;  %v1178_v59 = vld [vmem:[#allocation8 + $0x3f0] sm:$0xff]  ;;  %v1160_v12 = vld [vmem:[#allocation8 + $0x360] sm:$0xff] }
  0xa6   : > { %v1633_v34 = vpack.c.bf16 %v1437_v32, %v1430_v31  ;;  %v1384_v15 = vld [vmem:[#allocation8 + $0xa60] sm:$0xff]  ;;  %v1390_v0 = vld [vmem:[#allocation8 + $0xa90] sm:$0xff] }
  0xa8   : > { %1690 = vmatpush1.bf16.msra.mxu0 %v1472_v3  ;;  %1863 = vmatpush1.bf16.msra.mxu1 %v1584_v37  ;;  %v1298_v3 = vld [vmem:[#allocation8 + $0x7b0] sm:$0xff] }
  0xa9   : > { %1691 = vmatprep.subr.bf16.mxu0 %v1466_v4  ;;  %1864 = vmatprep.subr.bf16.mxu1 %v1578_v44  ;;  %v1235_v4 = vld [vmem:[#allocation8 + $0x5b8] sm:$0xff]  ;;  %v1564_v5 = vpack.c.bf16 %v1298_v3, %v1291_v2  ;;  %v1613_v2 = vpack.c.bf16 %v1396_v63, %v1389_v62  ;;  %v1172_v3 = vld [vmem:[#allocation8 + $0x3c0] sm:$0xff] }
  0xaa   : > { %v1536_v9 = vpack.c.bf16 %v1242_v6, %v1235_v4  ;;  %v1423_v44 = vld [vmem:[#allocation8 + $0xb98] sm:$0xff]  ;;  %v1388_v4 = vld [vmem:[#allocation8 + $0xa80] sm:$0xff] }
  0xab   : > { %v1626_v46 = vpack.c.bf16 %v1423_v44, %v1416_v43 }
  0xac   : > { %1692 = vmatpush1.bf16.msra.mxu0 %v1465_v7  ;;  %1865 = vmatpush1.bf16.msra.mxu1 %v1577_v49  ;;  %v1290_v7 = vld [vmem:[#allocation8 + $0x770] sm:$0xff] }
  0xad   : > { %1693 = vmatprep.subr.bf16.mxu0 %v1459_v10  ;;  %1866 = vmatprep.subr.bf16.mxu1 %v1571_v56  ;;  %v1563_v10 = vpack.c.bf16 %v1297_v8, %v1290_v7  ;;  %v1409_v56 = vld [vmem:[#allocation8 + $0xb28] sm:$0xff]  ;;  %v1164_v8 = vld [vmem:[#allocation8 + $0x380] sm:$0xff] }
  0xae   : > { %v1619_v58 = vpack.c.bf16 %v1409_v56, %v1402_v55  ;;  %v703_v55 = vld [vmem:[%s6009_s11 + $0x18] sm:$0xff]  ;;  %v6027_v56 = vld [vmem:[%s6009_s11 + $0x20] sm:$0xff] }
  0xb0   : > { %1694 = vmatpush1.bf16.msra.mxu0 %v1458_v16  ;;  %1867 = vmatpush1.bf16.msra.mxu1 %v1570_v61  ;;  %v1221_v16 = vld [vmem:[#allocation8 + $0x548] sm:$0xff] }
  0xb1   : > { %1695 = vmatprep.subr.bf16.mxu0 %v1452_v24  ;;  %1868 = vmatprep.subr.bf16.mxu1 %v1564_v5  ;;  %v1529_v21 = vpack.c.bf16 %v1228_v18, %v1221_v16  ;;  %v1227_v24 = vld [vmem:[#allocation8 + $0x578] sm:$0xff]  ;;  %v1608_v16 = vpack.c.bf16 %v1384_v15, %v1377_v14 }
  0xb2   : > { %v1528_v25 = vpack.c.bf16 %v1227_v24, %v1220_v23  ;;  %v1395_v5 = vld [vmem:[#allocation8 + $0xab8] sm:$0xff] }
  0xb3   : > { %v1612_v7 = vpack.c.bf16 %v1395_v5, %v1388_v4  ;;  %v762_v5 = vunpack.c.l.bf16 %v703_v55 }
  0xb4   : > { %1696 = vmatpush1.bf16.msra.mxu0 %v1451_v28  ;;  %1869 = vmatpush1.bf16.msra.mxu1 %v1563_v10  ;;  %v1207_v28 = vld [vmem:[#allocation8 + $0x4d8] sm:$0xff] }
  0xb5   : > { %1697 = vmatprep.subr.bf16.mxu0 %v1445_v36  ;;  %1870 = vmatprep.subr.bf16.mxu1 %v1557_v17  ;;  %v1522_v33 = vpack.c.bf16 %v1214_v30, %v1207_v28  ;;  %v1213_v36 = vld [vmem:[#allocation8 + $0x508] sm:$0xff]  ;;  %v570_v17 = vlaneseq }
  0xb6   : > { %v1521_v37 = vpack.c.bf16 %v1213_v36, %v1206_v35 }
  0xb7   : > { %v571_v18 = vshrl.u32 %v570_v17, 7 }
  0xb8   : > { %1698 = vmatpush1.bf16.msra.mxu0 %v1444_v40  ;;  %1871 = vmatpush1.bf16.msra.mxu1 %v1556_v22  ;;  %v1193_v40 = vld [vmem:[#allocation8 + $0x468] sm:$0xff] }
  0xb9   : > { %1699 = vmatprep.subr.bf16.mxu0 %v1550_v48  ;;  %1880 = vmatprep.subr.bf16.mxu1 %v1634_v29  ;;  %v1515_v45 = vpack.c.bf16 %v1200_v42, %v1193_v40  ;;  %v1199_v48 = vld [vmem:[#allocation8 + $0x498] sm:$0xff]  ;;  %v6019_v19 = vsub.s32 0, %v571_v18  ;;  %v580_v20 = vsub.s32 2, %v571_v18  ;;  %v576_v22 = vsub.s32 1, %v571_v18 }
  0xba   : > { %v1514_v49 = vpack.c.bf16 %v1199_v48, %v1192_v47  ;;  %v584_v23 = vsub.s32 3, %v571_v18 }
  0xbc   : > { %1700 = vmatpush2.bf16.msra.mxu0 %v1549_v52  ;;  %1881 = vmatpush2.bf16.msra.mxu1 %v1633_v34  ;;  %v1179_v52 = vld [vmem:[#allocation8 + $0x3f8] sm:$0xff] }
  0xbd   : > { %1701 = vmatprep.subr.bf16.mxu0 %v1543_v60  ;;  %1882 = vmatprep.subr.bf16.mxu1 %v1627_v41  ;;  %v1508_v57 = vpack.c.bf16 %v1186_v54, %v1179_v52  ;;  %v1185_v60 = vld [vmem:[#allocation8 + $0x428] sm:$0xff]  ;;  %v700_v52 = vld [vmem:[%s6009_s11] sm:$0xff] }
  0xbe   : > { %v1507_v61 = vpack.c.bf16 %v1185_v60, %v1178_v59  ;;  %v701_v54 = vld [vmem:[%s6009_s11 + $0x8] sm:$0xff]  ;;  %v6030_v60 = vld [vmem:[%s6009_s11 + $0x30] sm:$0xff]  ;;  %v757_v62 = vunpack.c.h.bf16 %v700_v52 }
  0xbf   : > { %v758_v59 = vunpack.c.l.bf16 %v701_v54 }
  0xc0   : > { %1702 = vmatpush2.bf16.msra.mxu0 %v1542_v1  ;;  %1883 = vmatpush2.bf16.msra.mxu1 %v1626_v46  ;;  %v1165_v1 = vld [vmem:[#allocation8 + $0x388] sm:$0xff] }
  0xc1   : > { %1703 = vmatprep.subr.bf16.mxu0 %v1536_v9  ;;  %1884 = vmatprep.subr.bf16.mxu1 %v1620_v53  ;;  %v1501_v6 = vpack.c.bf16 %v1172_v3, %v1165_v1  ;;  %v1171_v9 = vld [vmem:[#allocation8 + $0x3b8] sm:$0xff]  ;;  %v702_v53 = vld [vmem:[%s6009_s11 + $0x10] sm:$0xff]  ;;  %v759_v1 = vunpack.c.h.bf16 %v701_v54  ;;  %v6095_v54 = vld [vmem:[#allocation8 + $0x9e8] sm:$0xff] }
  0xc2   : > { %v1500_v10 = vpack.c.bf16 %v1171_v9, %v1164_v8  ;;  %v761_v63 = vunpack.c.h.bf16 %v702_v53  ;;  %v6040_v8 = vld [vmem:[%s6009_s11 + $0x38] sm:$0xff]  ;;  %v764_v9 = vunpack.c.l.bf16 %v6027_v56 }
  0xc3   : > { %v771_v14 = vunpack.c.h.bf16 %v6040_v8 }
  0xc4   : > { %1704 = vmatpush2.bf16.msra.mxu0 %v1535_v13  ;;  %1885 = vmatpush2.bf16.msra.mxu1 %v1619_v58  ;;  %v1496_v13 = vpack.c.bf16 %v1160_v12, %v1153_v11  ;;  %v760_v58 = vunpack.c.l.bf16 %v702_v53  ;;  %v769_v12 = vunpack.c.h.bf16 %v6030_v60  ;;  %v6093_v53 = vld [vmem:[#allocation8 + $0x9b0] sm:$0xff] }
  0xc5   : > { %1705 = vmatprep.subr.bf16.mxu0 %v1529_v21  ;;  %1886 = vmatprep.subr.bf16.mxu1 %v1613_v2  ;;  %v428_v21 = vld [vmem:[#allocation7] sm:$0xf]  ;;  %v763_v2 = vunpack.c.h.bf16 %v703_v55 }
  0xc6   : > { %v573_v24 = vrot.slane %v428_v21, %v6019_v19  ;;  %v577_v26 = vrot.slane %v428_v21, %v576_v22  ;;  %v585_v27 = vrot.slane %v428_v21, %v584_v23 }
  0xc8   : > { %1706 = vmatpush2.bf16.msra.mxu0 %v1528_v25  ;;  %1887 = vmatpush2.bf16.msra.mxu1 %v1612_v7  ;;  %v581_v25 = vrot.slane %v428_v21, %v580_v20  ;;  %v6037_v7 = vld [vmem:[%s6009_s11 + $0x28] sm:$0xff]  ;;  %v768_v20 = vunpack.c.l.bf16 %v6030_v60  ;;  %v6056_v21 = vld [vmem:[%s6009_s11 + $0x40] sm:$0xff] }
  0xc9   : > { %1707 = vmatprep.subr.bf16.mxu0 %v1522_v33  ;;  %2029 = vmatprep.subr.bf16.mxu1 %v1496_v13  ;;  %v767_v13 = vunpack.c.h.bf16 %v6037_v7  ;;  %v6102_v60 = vld [vmem:[%s6009_s11 + $0x48] sm:$0xff] }
  0xcc   : > { %1708 = vmatpush2.bf16.msra.mxu0 %v1521_v37 }
  0xcd   : > { %1709 = vmatprep.subr.bf16.mxu0 %v1515_v45 }
  0xd0   : > { %1710 = vmatpush2.bf16.msra.mxu0 %v1514_v49 }
  0xd1   : > { %1711 = vmatprep.subr.bf16.mxu0 %v1508_v57  ;;  %v756_v57 = vunpack.c.l.bf16 %v700_v52  ;;  %v6091_v52 = vld [vmem:[#allocation8 + $0x280] sm:$0xff] }
  0xd4   : > { %1712 = vmatpush2.bf16.msra.mxu0 %v1507_v61 }
  0xd5   : > { %1713 = vmatprep.subr.bf16.mxu0 %v1501_v6  ;;  %v765_v6 = vunpack.c.h.bf16 %v6027_v56  ;;  %v1131_v56 = vld [vmem:[#allocation8 + $0x278] sm:$0xff] }
  0xd8   : > { %1714 = vmatpush2.bf16.msra.mxu0 %v1500_v10 }
  0xd9   : > { %2202 = vmatprep.subr.bf16.mxu0 %v1608_v16 }
 0x15b   : > { %v628_v28 = vpop.f32.mrf.mxu0  ;;  %v669_v29 = vpop.f32.mrf.mxu1 }
 0x15c   : > { %v629_v30 = vadd.f32 %v628_v28, %v573_v24  ;;  %v670_v31 = vadd.f32 %v669_v29, %v581_v25  ;;  %v1152_v24 = vld [vmem:[#allocation8 + $0x320] sm:$0xff]  ;;  %v1159_v25 = vld [vmem:[#allocation8 + $0x358] sm:$0xff] }
 0x15d   : > { %v630_v32 = vpop.f32.mrf.mxu0  ;;  %v671_v33 = vpop.f32.mrf.mxu1 }
 0x15e   : > { %v5168_v34 = vmul.f32 -1.442695, %v629_v30  ;;  %v5170_v35 = vmul.f32 -1.442695, %v670_v31  ;;  %v631_v36 = vadd.f32 %v630_v32, %v577_v26  ;;  %v672_v37 = vadd.f32 %v671_v33, %v585_v27  ;;  %v6064_v27 = vld [vmem:[%s6009_s11 + $0x50] sm:$0xff]  ;;  %v1376_v32 = vld [vmem:[#allocation8 + $0xa20] sm:$0xff] }
 0x15f   : > { %v632_v38 = vpop.f32.mrf.mxu0  ;;  %v673_v39 = vpop.f32.mrf.mxu1  ;;  %v766_v26 = vunpack.c.l.bf16 %v6037_v7  ;;  %v1139_v33 = vld [vmem:[#allocation8 + $0x2b8] sm:$0xff]  ;;  %v1349_v7 = vld [vmem:[#allocation8 + $0x948] sm:$0xff] }
 0x160   : > { %5501 = vpow2.f32 %v5168_v34  ;;  %v5169_v40 = vmul.f32 -1.442695, %v631_v36  ;;  %v5171_v41 = vmul.f32 -1.442695, %v672_v37  ;;  %v1146_v38 = vld [vmem:[#allocation8 + $0x2f0] sm:$0xff] }
 0x161   : > { %5503 = vpow2.f32 %v5170_v35  ;;  %v633_v42 = vpop.f32.mrf.mxu0  ;;  %v674_v43 = vpop.f32.mrf.mxu1  ;;  %v6075_v39 = vld [vmem:[#allocation8 + $0x2b0] sm:$0xff] }
 0x162   : > { %5505 = vpow2.f32 %v5169_v40  ;;  %v6077_v40 = vld [vmem:[#allocation8 + $0x2e8] sm:$0xff] }
 0x163   : > { %5507 = vpow2.f32 %v5171_v41 }
 0x16d   : > { %v5502_v44 = vpop.eup %5501 }
 0x16e   : > { %v5504_v45 = vpop.eup %5503  ;;  %v688_v46 = vadd.f32 1.0, %v5502_v44  ;;  %v770_v44 = vunpack.c.l.bf16 %v6040_v8  ;;  %v1356_v8 = vld [vmem:[#allocation8 + $0x980] sm:$0xff] }
 0x16f   : > { %v5506_v47 = vpop.eup %5505  ;;  %v690_v48 = vadd.f32 1.0, %v5504_v45  ;;  %v6084_v45 = vld [vmem:[#allocation8 + $0x248] sm:$0xff] }
 0x170   : > { %v5508_v49 = vpop.eup %5507  ;;  %5509 = vrcp.f32 %v688_v46  ;;  %v689_v50 = vadd.f32 1.0, %v5506_v47  ;;  %v1363_v46 = vld [vmem:[#allocation8 + $0x9b8] sm:$0xff]  ;;  %v1370_v47 = vld [vmem:[#allocation8 + $0x9f0] sm:$0xff] }
 0x171   : > { %5511 = vrcp.f32 %v690_v48  ;;  %v691_v51 = vadd.f32 1.0, %v5508_v49  ;;  %v1495_v49 = vpack.c.bf16 %v1159_v25, %v1152_v24  ;;  %v1111_v25 = vld [vmem:[#allocation8 + $0x1d8] sm:$0xff] }
 0x172   : > { %5513 = vrcp.f32 %v689_v50 }
 0x173   : > { %5515 = vrcp.f32 %v691_v51  ;;  %v773_v51 = vunpack.c.h.bf16 %v6056_v21 }
 0x17d   : > { %v5510_v61 = vpop.eup %5509 }
 0x17e   : > { %v5512_v3 = vpop.eup %5511  ;;  %v6033_v4 = vrot.slane %v5510_v61, %v6019_v19  ;;  %v6105_v61 = vld [vmem:[%s6009_s11 + $0x58] sm:$0xff] }
 0x17f   : > { %v5514_v10 = vpop.eup %5513  ;;  %v6044_v11 = vrot.slane %v5512_v3, %v6019_v19  ;;  %v1488_v3 = vpack.c.bf16 %v6077_v40, %v6075_v39  ;;  %v1342_v39 = vld [vmem:[#allocation8 + $0x910] sm:$0xff] }
 0x180   : > { %v5516_v15 = vpop.eup %5515  ;;  %v6050_v16 = vrot.slane %v5514_v10, %v6019_v19  ;;  %v884_v17 = vmul.f32 %v6033_v4, %v756_v57  ;;  %v888_v18 = vmul.f32 %v6033_v4, %v760_v58  ;;  %v1489_v58 = vpack.c.bf16 %v1146_v38, %v1139_v33  ;;  %v1335_v38 = vld [vmem:[#allocation8 + $0x8d8] sm:$0xff] }
 0x181   : > { %v6059_v22 = vrot.slane %v5516_v15, %v6019_v19  ;;  %v886_v23 = vmul.f32 %v6044_v11, %v758_v59  ;;  %v890_v30 = vmul.f32 %v6044_v11, %v762_v5  ;;  %v1383_v19 = vld [vmem:[#allocation8 + $0xa58] sm:$0xff]  ;;  %v777_v59 = vunpack.c.h.bf16 %v6064_v27  ;;  %v6130_v15 = vld [vmem:[%s6009_s11 + $0x60] sm:$0xff] }
 0x182   : > { %v885_v28 = vmul.f32 %v6050_v16, %v757_v62  ;;  %v889_v29 = vmul.f32 %v6050_v16, %v761_v63  ;;  %v893_v31 = vmul.f32 %v6050_v16, %v765_v6  ;;  %v6072_v36 = vpack.c.bf16 %v888_v18, %v884_v17  ;;  %v6133_v17 = vld [vmem:[%s6009_s11 + $0x70] sm:$0xff] }
 0x183   : > { %v887_v34 = vmul.f32 %v6059_v22, %v759_v1  ;;  %v891_v35 = vmul.f32 %v6059_v22, %v763_v2  ;;  %v897_v37 = vmul.f32 %v6050_v16, %v769_v12  ;;  %v895_v42 = vmul.f32 %v6059_v22, %v767_v13 }
 0x184   : > { %9936 = vst [vmem:[#allocation17_spill] sm:$0xff] %v6072_v36  ;;  %v6079_v41 = vpack.c.bf16 %v889_v29, %v885_v28  ;;  %v899_v43 = vmul.f32 %v6059_v22, %v771_v14  ;;  %v6098_v55 = vpack.c.bf16 %v890_v30, %v886_v23  ;;  %v1607_v57 = vpack.c.bf16 %v1383_v19, %v1376_v32  ;;  %v1124_v14 = vld [vmem:[#allocation8 + $0x240] sm:$0xff]  ;;  %v6140_v28 = vld [vmem:[#allocation8 + $0x1d0] sm:$0xff]  ;;  %v6142_v29 = vld [vmem:[#allocation8 + $0x208] sm:$0xff] }
 0x185   : > { %v6086_v48 = vpack.c.bf16 %v891_v35, %v887_v34  ;;  %v6088_v50 = vpack.c.bf16 %v897_v37, %v893_v31  ;;  %v775_v63 = vunpack.c.h.bf16 %v6102_v60  ;;  %v779_v1 = vunpack.c.h.bf16 %v6105_v61  ;;  %v1348_v31 = vld [vmem:[#allocation8 + $0x940] sm:$0xff]  ;;  %v1355_v32 = vld [vmem:[#allocation8 + $0x978] sm:$0xff]  ;;  %v6148_v37 = vld [vmem:[#allocation8 + $0x168] sm:$0xff] }
 0x186   : > { %9937 = vst [vmem:[#allocation18_spill] sm:$0xff] %v6079_v41  ;;  %1715 = vmatprep.mubr.bf16.mxu0 %v6079_v41  ;;  %9939 = vst [vmem:[#allocation20_spill] sm:$0xff] %v6098_v55  ;;  %v6110_v62 = vpack.c.bf16 %v899_v43, %v895_v42  ;;  %v1601_v2 = vpack.c.bf16 %v1370_v47, %v1363_v46  ;;  %v1482_v5 = vpack.c.bf16 %v6091_v52, %v6084_v45  ;;  %v6157_v45 = vld [vmem:[#allocation8 + $0x908] sm:$0xff]  ;;  %v6168_v52 = vld [vmem:[%s6009_s11 + $0x78] sm:$0xff] }
 0x187   : > { %9938 = vst [vmem:[#allocation19_spill] sm:$0xff] %v6086_v48  ;;  %5172 = vmatprep.mubr.msk.bf16.mxu1 %vm1640_vm1, %v6086_v48  ;;  %1716 = vmatmul.mubr.bf16.vlgmr.msra.gmra.mxu0 %v6072_v36  ;;  %v1600_v6 = vpack.c.bf16 %v6095_v54, %v6093_v53  ;;  %v892_v10 = vmul.f32 %v6033_v4, %v764_v9  ;;  %v1118_v9 = vld [vmem:[#allocation8 + $0x210] sm:$0xff]  ;;  %v772_v19 = vunpack.c.l.bf16 %v6056_v21  ;;  %v776_v33 = vunpack.c.l.bf16 %v6064_v27  ;;  %v6153_v21 = vld [vmem:[#allocation8 + $0x1a0] sm:$0xff] }
 0x188   : > { %9940 = vst [vmem:[#allocation21_spill] sm:$0xff] %v6110_v62  ;;  %1889 = vmatmul.mubr.bf16.vlgmr.msra.gmra.mxu1 %v6098_v55  ;;  %1725 = vmatprep.mubr.bf16.mxu0 %v6088_v50  ;;  %v896_v12 = vmul.f32 %v6033_v4, %v768_v20  ;;  %v894_v13 = vmul.f32 %v6044_v11, %v766_v26  ;;  %v774_v34 = vunpack.c.l.bf16 %v6102_v60  ;;  %v778_v35 = vunpack.c.l.bf16 %v6105_v61  ;;  %v6155_v27 = vld [vmem:[#allocation8 + $0x8d0] sm:$0xff] }
 0x189   : > { %2030 = vmatpush1.bf16.msra.mxu1 %v1495_v49  ;;  %5173 = vmatprep.mubr.msk.bf16.mxu1 %vm1640_vm1, %v6110_v62  ;;  %v898_v18 = vmul.f32 %v6044_v11, %v770_v44  ;;  %v901_v23 = vmul.f32 %v6050_v16, %v773_v51  ;;  %v905_v24 = vmul.f32 %v6050_v16, %v777_v59  ;;  %v781_v43 = vunpack.c.h.bf16 %v6130_v15  ;;  %v6165_v51 = vld [vmem:[%s6009_s11 + $0x68] sm:$0xff] }
 0x18a   : > { %2203 = vmatpush1.bf16.msra.mxu0 %v1607_v57  ;;  %2031 = vmatprep.subr.bf16.mxu1 %v1489_v58  ;;  %v903_v20 = vmul.f32 %v6059_v22, %v775_v63  ;;  %v907_v26 = vmul.f32 %v6059_v22, %v779_v1  ;;  %v1594_v30 = vpack.c.bf16 %v1356_v8, %v1349_v7  ;;  %v785_v49 = vunpack.c.h.bf16 %v6133_v17  ;;  %v1321_v1 = vld [vmem:[#allocation8 + $0x868] sm:$0xff]  ;;  %v6189_v7 = vld [vmem:[%s6009_s11 + $0x80] sm:$0xff]  ;;  %v6192_v8 = vld [vmem:[%s6009_s11 + $0x90] sm:$0xff] }
 0x18b   : > { %2204 = vmatprep.subr.bf16.mxu0 %v1601_v2  ;;  %v6150_v40 = vpack.c.bf16 %v896_v12, %v892_v10  ;;  %v1481_v42 = vpack.c.bf16 %v1131_v56, %v1124_v14  ;;  %v1475_v44 = vpack.c.bf16 %v1118_v9, %v1111_v25  ;;  %v6159_v46 = vpack.c.bf16 %v898_v18, %v894_v13  ;;  %v1328_v2 = vld [vmem:[#allocation8 + $0x8a0] sm:$0xff]  ;;  %v1103_v18 = vld [vmem:[#allocation8 + $0x198] sm:$0xff]  ;;  %v6199_v9 = vld [vmem:[#allocation8 + $0xf0] sm:$0xff] }
 0x18c   : > { %v6161_v47 = vpack.c.bf16 %v905_v24, %v901_v23  ;;  %v1593_v53 = vpack.c.bf16 %v1355_v32, %v1348_v31  ;;  %v6171_v54 = vpack.c.bf16 %v907_v26, %v903_v20  ;;  %v783_v57 = vunpack.c.h.bf16 %v6165_v51  ;;  %v1096_v10 = vld [vmem:[#allocation8 + $0x160] sm:$0xff]  ;;  %v1083_v23 = vld [vmem:[#allocation8 + $0xf8] sm:$0xff]  ;;  %v1090_v24 = vld [vmem:[#allocation8 + $0x130] sm:$0xff] }
 0x18d   : > { %2032 = vmatpush1.bf16.msra.mxu1 %v1488_v3  ;;  %v787_v58 = vunpack.c.h.bf16 %v6168_v52  ;;  %v1587_v59 = vpack.c.bf16 %v1342_v39, %v1335_v38  ;;  %v1474_v60 = vpack.c.bf16 %v6142_v29, %v6140_v28  ;;  %v1468_v61 = vpack.c.bf16 %v6153_v21, %v6148_v37  ;;  %v6201_v20 = vld [vmem:[#allocation8 + $0x128] sm:$0xff]  ;;  %v1320_v28 = vld [vmem:[#allocation8 + $0x860] sm:$0xff]  ;;  %v1327_v29 = vld [vmem:[#allocation8 + $0x898] sm:$0xff] }
 0x18e   : > { %2033 = vmatprep.subr.bf16.mxu1 %v1482_v5  ;;  %2205 = vmatpush1.bf16.msra.mxu0 %v1600_v6  ;;  %9941 = vst [vmem:[#allocation22_spill] sm:$0xff] %v6171_v54  ;;  %v1586_v63 = vpack.c.bf16 %v6157_v45, %v6155_v27  ;;  %v900_v3 = vmul.f32 %v6033_v4, %v772_v19  ;;  %v784_v31 = vunpack.c.l.bf16 %v6133_v17  ;;  %v782_v32 = vunpack.c.l.bf16 %v6165_v51  ;;  %v6214_v17 = vld [vmem:[#allocation8 + $0x7f0] sm:$0xff]  ;;  %v6224_v45 = vld [vmem:[%s6009_s11 + $0x88] sm:$0xff] }
 0x18f   : > { %1726 = vmatmul.mubr.bf16.gmra.mxu0 %v6150_v40  ;;  %2206 = vmatprep.subr.bf16.mxu0 %v1594_v30  ;;  %v904_v5 = vmul.f32 %v6033_v4, %v776_v33  ;;  %v902_v6 = vmul.f32 %v6044_v11, %v774_v34  ;;  %v906_v12 = vmul.f32 %v6044_v11, %v778_v35  ;;  %v780_v30 = vunpack.c.l.bf16 %v6130_v15  ;;  %v6207_v33 = vld [vmem:[#allocation8 + $0x88] sm:$0xff]  ;;  %v1307_v34 = vld [vmem:[#allocation8 + $0x7f8] sm:$0xff]  ;;  %v1314_v35 = vld [vmem:[#allocation8 + $0x830] sm:$0xff] }
 0x190   : > { %1899 = vmatmul.mubr.bf16.gmra.mxu1 %v6159_v46  ;;  %1735 = vmatprep.mubr.bf16.mxu0 %v6161_v47  ;;  %v909_v13 = vmul.f32 %v6050_v16, %v781_v43  ;;  %v913_v14 = vmul.f32 %v6050_v16, %v785_v49  ;;  %v911_v56 = vmul.f32 %v6059_v22, %v783_v57  ;;  %v786_v19 = vunpack.c.l.bf16 %v6168_v52  ;;  %v6212_v15 = vld [vmem:[#allocation8 + $0xc0] sm:$0xff]  ;;  %v6216_v43 = vld [vmem:[#allocation8 + $0x828] sm:$0xff]  ;;  %v6227_v49 = vld [vmem:[%s6009_s11 + $0x98] sm:$0xff] }
 0x191   : > { %5174 = vmatprep.mubr.msk.bf16.mxu1 %vm1640_vm1, %v6171_v54  ;;  %2034 = vmatpush1.bf16.msra.mxu1 %v1481_v42  ;;  %v915_v25 = vmul.f32 %v6059_v22, %v787_v58  ;;  %v1580_v26 = vpack.c.bf16 %v1328_v2, %v1321_v1  ;;  %v6209_v37 = vpack.c.bf16 %v904_v5, %v900_v3  ;;  %v789_v38 = vunpack.c.h.bf16 %v6189_v7  ;;  %v1300_v1 = vld [vmem:[#allocation8 + $0x7c0] sm:$0xff] }
 0x192   : > { %2035 = vmatprep.subr.bf16.mxu1 %v1475_v44  ;;  %2207 = vmatpush1.bf16.msra.mxu0 %v1593_v53  ;;  %v1467_v39 = vpack.c.bf16 %v1103_v18, %v1096_v10  ;;  %v1461_v42 = vpack.c.bf16 %v1090_v24, %v1083_v23  ;;  %v6218_v44 = vpack.c.bf16 %v906_v12, %v902_v6  ;;  %v793_v27 = vunpack.c.h.bf16 %v6192_v8  ;;  %v6248_v6 = vld [vmem:[%s6009_s11 + $0xa0] sm:$0xff]  ;;  %v6251_v10 = vld [vmem:[%s6009_s11 + $0xb0] sm:$0xff]  ;;  %v1075_v23 = vld [vmem:[#allocation8 + $0xb8] sm:$0xff] }
 0x193   : > { %2208 = vmatprep.subr.bf16.mxu0 %v1587_v59  ;;  %9942 = vst [vmem:[#allocation23_spill] sm:$0xff] %v6209_v37  ;;  %v6220_v21 = vpack.c.bf16 %v913_v14, %v909_v13  ;;  %v1579_v51 = vpack.c.bf16 %v1327_v29, %v1320_v28  ;;  %v6230_v52 = vpack.c.bf16 %v915_v25, %v911_v56  ;;  %v791_v53 = vunpack.c.h.bf16 %v6224_v45  ;;  %v1068_v12 = vld [vmem:[#allocation8 + $0x80] sm:$0xff]  ;;  %v1055_v24 = vld [vmem:[#allocation8 + $0x18] sm:$0xff]  ;;  %v1062_v56 = vld [vmem:[#allocation8 + $0x50] sm:$0xff] }
 0x194   : > { %v795_v57 = vunpack.c.h.bf16 %v6227_v49  ;;  %v1573_v58 = vpack.c.bf16 %v1314_v35, %v1307_v34  ;;  %v1460_v59 = vpack.c.bf16 %v6201_v20, %v6199_v9  ;;  %v908_v2 = vmul.f32 %v6033_v4, %v780_v30  ;;  %v6258_v20 = vld [vmem:[#allocation8 + $0x10] sm:$0xff]  ;;  %v1292_v29 = vld [vmem:[#allocation8 + $0x780] sm:$0xff]  ;;  %v1299_v30 = vld [vmem:[#allocation8 + $0x7b8] sm:$0xff] }
 0x195   : > { %2036 = vmatpush1.bf16.msra.mxu1 %v1474_v60  ;;  %9943 = vst [vmem:[#allocation24_spill] sm:$0xff] %v6220_v21  ;;  %9944 = vst [vmem:[#allocation25_spill] sm:$0xff] %v6230_v52  ;;  %v1454_v60 = vpack.c.bf16 %v6212_v15, %v6207_v33  ;;  %v912_v3 = vmul.f32 %v6033_v4, %v784_v31  ;;  %v910_v5 = vmul.f32 %v6044_v11, %v782_v32  ;;  %v6266_v34 = vld [vmem:[#allocation8 + $0x6a8] sm:$0xff]  ;;  %v1279_v35 = vld [vmem:[#allocation8 + $0x718] sm:$0xff] }
 0x196   : > { %2037 = vmatprep.subr.bf16.mxu1 %v1468_v61  ;;  %2209 = vmatpush1.bf16.msra.mxu0 %v1586_v63  ;;  %v1572_v61 = vpack.c.bf16 %v6216_v43, %v6214_v17  ;;  %v1293_v63 = vld [vmem:[#allocation8 + $0x788] sm:$0xff]  ;;  %v914_v13 = vmul.f32 %v6044_v11, %v786_v19  ;;  %v917_v14 = vmul.f32 %v6050_v16, %v789_v38  ;;  %v788_v31 = vunpack.c.l.bf16 %v6189_v7  ;;  %v1286_v38 = vld [vmem:[#allocation8 + $0x750] sm:$0xff]  ;;  %v6271_v7 = vld [vmem:[#allocation8 + $0x6e0] sm:$0xff] }
 0x197   : > { %1736 = vmatmul.mubr.bf16.gmra.mxu0 %v6209_v37  ;;  %2210 = vmatprep.subr.bf16.mxu0 %v1580_v26  ;;  %v921_v18 = vmul.f32 %v6050_v16, %v793_v27  ;;  %v919_v25 = vmul.f32 %v6059_v22, %v791_v53  ;;  %v923_v9 = vmul.f32 %v6059_v22, %v795_v57  ;;  %v6260_v26 = vld [vmem:[#allocation8 + $0x48] sm:$0xff]  ;;  %v792_v32 = vunpack.c.l.bf16 %v6192_v8  ;;  %v6273_v8 = vld [vmem:[#allocation8 + $0x710] sm:$0xff]  ;;  %v6286_v53 = vld [vmem:[%s6009_s11 + $0xb8] sm:$0xff] }
 0x198   : > { %1909 = vmatmul.mubr.bf16.gmra.mxu1 %v6218_v44  ;;  %1745 = vmatprep.mubr.bf16.mxu0 %v6220_v21  ;;  %v1566_v28 = vpack.c.bf16 %v1300_v1, %v1293_v63  ;;  %v790_v19 = vunpack.c.l.bf16 %v6224_v45  ;;  %v794_v33 = vunpack.c.l.bf16 %v6227_v49  ;;  %v1453_v15 = vpack.c.bf16 %v1075_v23, %v1068_v12  ;;  %v6275_v43 = vld [vmem:[#allocation8 + $0x748] sm:$0xff]  ;;  %v6310_v23 = vld [vmem:[%s6009_s11 + $0xd0] sm:$0xff] }
 0x199   : > { %5175 = vmatprep.mubr.msk.bf16.mxu1 %vm1640_vm1, %v6230_v52  ;;  %2038 = vmatpush1.bf16.msra.mxu1 %v1467_v39  ;;  %v6268_v39 = vpack.c.bf16 %v912_v3, %v908_v2  ;;  %v1447_v17 = vpack.c.bf16 %v1062_v56, %v1055_v24  ;;  %v6277_v27 = vpack.c.bf16 %v914_v13, %v910_v5  ;;  %v801_v49 = vunpack.c.h.bf16 %v6251_v10  ;;  %v1433_v3 = vld [vmem:[#allocation8 + $0xbe8] sm:$0xff]  ;;  %v1440_v5 = vld [vmem:[#allocation8 + $0xc20] sm:$0xff] }
 0x19a   : > { %2039 = vmatprep.subr.bf16.mxu1 %v1461_v42  ;;  %2211 = vmatpush1.bf16.msra.mxu0 %v1579_v51  ;;  %v797_v42 = vunpack.c.h.bf16 %v6248_v6  ;;  %v6279_v45 = vpack.c.bf16 %v921_v18, %v917_v14  ;;  %v6283_v51 = vld [vmem:[%s6009_s11 + $0xa8] sm:$0xff]  ;;  %v1565_v57 = vpack.c.bf16 %v1299_v30, %v1292_v29  ;;  %v803_v63 = vunpack.c.h.bf16 %v6286_v53  ;;  %v6307_v18 = vld [vmem:[%s6009_s11 + $0xc0] sm:$0xff] }
 0x19b   : > { %2212 = vmatprep.subr.bf16.mxu0 %v1573_v58  ;;  %v6289_v58 = vpack.c.bf16 %v923_v9, %v919_v25  ;;  %v1559_v1 = vpack.c.bf16 %v1286_v38, %v1279_v35  ;;  %v1558_v2 = vpack.c.bf16 %v6275_v43, %v6273_v8  ;;  %v916_v12 = vmul.f32 %v6033_v4, %v788_v31  ;;  %v1264_v24 = vld [vmem:[#allocation8 + $0x6a0] sm:$0xff]  ;;  %v6317_v31 = vld [vmem:[#allocation8 + $0x630] sm:$0xff] }
 0x19c   : > { %v920_v13 = vmul.f32 %v6033_v4, %v792_v32  ;;  %v918_v14 = vmul.f32 %v6044_v11, %v790_v19  ;;  %v922_v56 = vmul.f32 %v6044_v11, %v794_v33  ;;  %v925_v25 = vmul.f32 %v6050_v16, %v797_v42  ;;  %v6319_v32 = vld [vmem:[#allocation8 + $0x668] sm:$0xff]  ;;  %v1432_v33 = vld [vmem:[#allocation8 + $0xbe0] sm:$0xff]  ;;  %v1426_v8 = vld [vmem:[#allocation8 + $0xbb0] sm:$0xff] }
 0x19d   : > { %2040 = vmatpush1.bf16.msra.mxu1 %v1460_v59  ;;  %v799_v59 = vunpack.c.h.bf16 %v6283_v51  ;;  %v929_v9 = vmul.f32 %v6050_v16, %v801_v49  ;;  %v931_v30 = vmul.f32 %v6059_v22, %v803_v63  ;;  %v1636_v19 = vpack.c.bf16 %v1440_v5, %v1433_v3  ;;  %v6342_v3 = vld [vmem:[%s6009_s11 + $0xc8] sm:$0xff]  ;;  %v6345_v5 = vld [vmem:[%s6009_s11 + $0xd8] sm:$0xff] }
 0x19e   : > { %2041 = vmatprep.subr.bf16.mxu1 %v1454_v60  ;;  %2213 = vmatpush1.bf16.msra.mxu0 %v1572_v61  ;;  %v1446_v60 = vpack.c.bf16 %v6260_v26, %v6258_v20  ;;  %v1552_v61 = vpack.c.bf16 %v6271_v7, %v6266_v34  ;;  %v1271_v20 = vld [vmem:[#allocation8 + $0x6d8] sm:$0xff]  ;;  %v796_v35 = vunpack.c.l.bf16 %v6248_v6  ;;  %v800_v38 = vunpack.c.l.bf16 %v6251_v10  ;;  %v6330_v6 = vld [vmem:[#allocation8 + $0x600] sm:$0xff]  ;;  %v6332_v10 = vld [vmem:[#allocation8 + $0xb70] sm:$0xff] }
 0x19f   : > { %1746 = vmatmul.mubr.bf16.gmra.mxu0 %v6268_v39  ;;  %2214 = vmatprep.subr.bf16.mxu0 %v1566_v28  ;;  %v1251_v26 = vld [vmem:[#allocation8 + $0x638] sm:$0xff]  ;;  %v1258_v28 = vld [vmem:[#allocation8 + $0x670] sm:$0xff]  ;;  %v927_v29 = vmul.f32 %v6059_v22, %v799_v59  ;;  %v798_v42 = vunpack.c.l.bf16 %v6283_v51  ;;  %v6327_v43 = vpack.c.bf16 %v920_v13, %v916_v12  ;;  %v805_v49 = vunpack.c.h.bf16 %v6307_v18  ;;  %v6334_v51 = vld [vmem:[#allocation8 + $0xba8] sm:$0xff] }
 0x1a0   : > { %1919 = vmatmul.mubr.bf16.gmra.mxu1 %v6277_v27  ;;  %1755 = vmatprep.mubr.bf16.mxu0 %v6279_v45  ;;  %v1439_v34 = vld [vmem:[#allocation8 + $0xc18] sm:$0xff]  ;;  %v1545_v59 = vpack.c.bf16 %v1258_v28, %v1251_v26  ;;  %v6336_v63 = vpack.c.bf16 %v922_v56, %v918_v14  ;;  %v807_v13 = vunpack.c.h.bf16 %v6342_v3  ;;  %v811_v14 = vunpack.c.h.bf16 %v6345_v5 }
 0x1a1   : > { %5176 = vmatprep.mubr.msk.bf16.mxu1 %vm1640_vm1, %v6289_v58  ;;  %2042 = vmatpush1.bf16.msra.mxu1 %v1453_v15  ;;  %v802_v15 = vunpack.c.l.bf16 %v6286_v53  ;;  %v1419_v7 = vld [vmem:[#allocation8 + $0xb78] sm:$0xff]  ;;  %9945 = vst [vmem:[#allocation26_spill] sm:$0xff] %v6327_v43  ;;  %v6338_v53 = vpack.c.bf16 %v929_v9, %v925_v25  ;;  %v6348_v12 = vpack.c.bf16 %v931_v30, %v927_v29  ;;  %v1405_v25 = vld [vmem:[#allocation8 + $0xb08] sm:$0xff]  ;;  %v1412_v9 = vld [vmem:[#allocation8 + $0xb40] sm:$0xff] }
 0x1a2   : > { %2043 = vmatprep.subr.bf16.mxu1 %v1447_v17  ;;  %2215 = vmatpush1.bf16.msra.mxu0 %v1565_v57  ;;  %v6325_v17 = vld [vmem:[#allocation8 + $0x5c8] sm:$0xff]  ;;  %v1551_v57 = vpack.c.bf16 %v1271_v20, %v1264_v24  ;;  %v1629_v24 = vpack.c.bf16 %v1426_v8, %v1419_v7  ;;  %v1628_v56 = vpack.c.bf16 %v6334_v51, %v6332_v10  ;;  %v6366_v29 = vld [vmem:[%s6009_s11 + $0xe0] sm:$0xff]  ;;  %v6369_v30 = vld [vmem:[%s6009_s11 + $0xf0] sm:$0xff]  ;;  %v806_v10 = vunpack.c.l.bf16 %v6342_v3 }
 0x1a3   : > { %2216 = vmatprep.subr.bf16.mxu0 %v1559_v1  ;;  %9946 = vst [vmem:[#allocation27_spill] sm:$0xff] %v6338_v53  ;;  %v809_v1 = vunpack.c.h.bf16 %v6310_v23  ;;  %9947 = vst [vmem:[#allocation28_spill] sm:$0xff] %v6348_v12  ;;  %v924_v20 = vmul.f32 %v6033_v4, %v796_v35  ;;  %v928_v26 = vmul.f32 %v6033_v4, %v800_v38  ;;  %v1230_v35 = vld [vmem:[#allocation8 + $0x590] sm:$0xff]  ;;  %v6378_v8 = vld [vmem:[#allocation8 + $0x588] sm:$0xff]  ;;  %v810_v51 = vunpack.c.l.bf16 %v6345_v5 }
 0x1a4   : > { %v926_v28 = vmul.f32 %v6044_v11, %v798_v42  ;;  %v935_v38 = vmul.f32 %v6059_v22, %v807_v13  ;;  %v939_v42 = vmul.f32 %v6059_v22, %v811_v14  ;;  %v6376_v7 = vld [vmem:[#allocation8 + $0x550] sm:$0xff]  ;;  %v817_v5 = vunpack.c.h.bf16 %v6369_v30 }
 0x1a5   : > { %2044 = vmatpush1.bf16.msra.mxu1 %v1446_v60  ;;  %v1635_v60 = vpack.c.bf16 %v1439_v34, %v1432_v33  ;;  %v937_v33 = vmul.f32 %v6050_v16, %v809_v1  ;;  %v1243_v34 = vld [vmem:[#allocation8 + $0x5f8] sm:$0xff]  ;;  %v6384_v1 = vld [vmem:[#allocation8 + $0x4e8] sm:$0xff]  ;;  %v1398_v13 = vld [vmem:[#allocation8 + $0xad0] sm:$0xff]  ;;  %v6386_v14 = vpack.c.bf16 %v928_v26, %v924_v20 }
 0x1a6   : > { %2045 = vmatprep.subr.bf16.mxu1 %v1552_v61  ;;  %2217 = vmatpush1.bf16.msra.mxu0 %v1558_v2  ;;  %v1544_v61 = vpack.c.bf16 %v6319_v32, %v6317_v31  ;;  %v1538_v2 = vpack.c.bf16 %v6330_v6, %v6325_v17  ;;  %v1236_v31 = vld [vmem:[#allocation8 + $0x5c0] sm:$0xff]  ;;  %v930_v32 = vmul.f32 %v6044_v11, %v802_v15  ;;  %v1223_v17 = vld [vmem:[#allocation8 + $0x558] sm:$0xff] }
 0x1a7   : > { %1756 = vmatmul.mubr.bf16.gmra.mxu0 %v6327_v43  ;;  %2226 = vmatprep.subr.bf16.mxu0 %v1636_v19  ;;  %v933_v19 = vmul.f32 %v6050_v16, %v805_v49  ;;  %v1404_v15 = vld [vmem:[#allocation8 + $0xb00] sm:$0xff]  ;;  %v1411_v6 = vld [vmem:[#allocation8 + $0xb38] sm:$0xff]  ;;  %v804_v49 = vunpack.c.l.bf16 %v6307_v18 }
 0x1a8   : > { %1929 = vmatmul.mubr.bf16.gmra.mxu1 %v6336_v63  ;;  %1765 = vmatprep.mubr.bf16.mxu0 %v6338_v53  ;;  %v1216_v18 = vld [vmem:[#allocation8 + $0x520] sm:$0xff]  ;;  %v6389_v53 = vpack.c.bf16 %v930_v32, %v926_v28  ;;  %v6398_v43 = vld [vmem:[%s6009_s11 + $0xf8] sm:$0xff]  ;;  %v1621_v20 = vpack.c.bf16 %v1411_v6, %v1404_v15 }
 0x1a9   : > { %5177 = vmatprep.mubr.msk.bf16.mxu1 %vm1640_vm1, %v6348_v12  ;;  %2046 = vmatpush2.bf16.msra.mxu1 %v1551_v57  ;;  %v1622_v57 = vpack.c.bf16 %v1412_v9, %v1405_v25  ;;  %v1537_v25 = vpack.c.bf16 %v1243_v34, %v1236_v31  ;;  %v1531_v9 = vpack.c.bf16 %v1230_v35, %v1223_v17  ;;  %v6395_v12 = vld [vmem:[%s6009_s11 + $0xe8] sm:$0xff]  ;;  %v819_v28 = vunpack.c.h.bf16 %v6398_v43 }
 0x1aa   : > { %2047 = vmatprep.subr.bf16.mxu1 %v1545_v59  ;;  %2227 = vmatpush2.bf16.msra.mxu0 %v1635_v60  ;;  %v808_v59 = vunpack.c.l.bf16 %v6310_v23  ;;  %v1391_v60 = vld [vmem:[#allocation8 + $0xa98] sm:$0xff]  ;;  %v1397_v23 = vld [vmem:[#allocation8 + $0xac8] sm:$0xff]  ;;  %v6391_v3 = vpack.c.bf16 %v937_v33, %v933_v19  ;;  %v815_v26 = vunpack.c.h.bf16 %v6395_v12  ;;  %v1386_v33 = vld [vmem:[#allocation8 + $0xa70] sm:$0xff]  ;;  %v932_v34 = vmul.f32 %v6033_v4, %v804_v49 }
 0x1ab   : > { %2228 = vmatprep.subr.bf16.mxu0 %v1629_v24  ;;  %v813_v24 = vunpack.c.h.bf16 %v6366_v29  ;;  %v1615_v31 = vpack.c.bf16 %v1398_v13, %v1391_v60  ;;  %v1614_v32 = vpack.c.bf16 %v1397_v23, %v1390_v0  ;;  %v1379_v19 = vld [vmem:[#allocation8 + $0xa38] sm:$0xff]  ;;  %v934_v35 = vmul.f32 %v6044_v11, %v806_v10  ;;  %v6419_v0 = vld [vmem:[%s6009_s11 + $0x100] sm:$0xff]  ;;  %v6424_v49 = vld [vmem:[%s6009_s11 + $0x110] sm:$0xff] }
 0x1ac   : > { %v936_v17 = vmul.f32 %v6033_v4, %v808_v59  ;;  %v943_v15 = vmul.f32 %v6059_v22, %v815_v26  ;;  %v947_v6 = vmul.f32 %v6059_v22, %v819_v28  ;;  %v1195_v59 = vld [vmem:[#allocation8 + $0x478] sm:$0xff]  ;;  %v1202_v10 = vld [vmem:[#allocation8 + $0x4b0] sm:$0xff]  ;;  %v814_v60 = vunpack.c.l.bf16 %v6395_v12 }
 0x1ad   : > { %2048 = vmatpush2.bf16.msra.mxu1 %v1544_v61  ;;  %v6401_v61 = vpack.c.bf16 %v939_v42, %v935_v38  ;;  %v938_v38 = vmul.f32 %v6044_v11, %v810_v51  ;;  %v941_v42 = vmul.f32 %v6050_v16, %v813_v24  ;;  %v1610_v51 = vpack.c.bf16 %v1386_v33, %v1379_v19 }
 0x1ae   : > { %2049 = vmatprep.subr.bf16.mxu1 %v1538_v2  ;;  %2229 = vmatpush2.bf16.msra.mxu0 %v1628_v56  ;;  %v1530_v2 = vpack.c.bf16 %v6378_v8, %v6376_v7  ;;  %v1524_v56 = vpack.c.bf16 %v1216_v18, %v6384_v1  ;;  %v945_v7 = vmul.f32 %v6050_v16, %v817_v5  ;;  %v1208_v8 = vld [vmem:[#allocation8 + $0x4e0] sm:$0xff]  ;;  %v812_v1 = vunpack.c.l.bf16 %v6366_v29  ;;  %v6434_v18 = vld [vmem:[%s6009_s11 + $0x108] sm:$0xff]  ;;  %v1194_v5 = vld [vmem:[#allocation8 + $0x470] sm:$0xff] }
 0x1af   : > { %1766 = vmatmul.mubr.bf16.gmra.mxu0 %v6386_v14  ;;  %9948 = vst [vmem:[#allocation29_spill] sm:$0xff] %v6401_v61  ;;  %2230 = vmatprep.subr.bf16.mxu0 %v1622_v57  ;;  %v1215_v57 = vld [vmem:[#allocation8 + $0x518] sm:$0xff]  ;;  %v818_v13 = vunpack.c.l.bf16 %v6398_v43  ;;  %v6429_v24 = vpack.c.bf16 %v936_v17, %v932_v34  ;;  %v6436_v26 = vpack.c.bf16 %v938_v38, %v934_v35  ;;  %v825_v12 = vunpack.c.h.bf16 %v6424_v49 }
 0x1b0   : > { %1939 = vmatmul.mubr.bf16.gmra.mxu1 %v6389_v53  ;;  %1775 = vmatprep.mubr.bf16.mxu0 %v6391_v3  ;;  %v1523_v23 = vpack.c.bf16 %v1215_v57, %v1208_v8  ;;  %v6438_v28 = vpack.c.bf16 %v945_v7, %v941_v42  ;;  %v6442_v29 = vld [vmem:[%s6009_s11 + $0x118] sm:$0xff]  ;;  %v1517_v43 = vpack.c.bf16 %v1202_v10, %v1195_v59  ;;  %v6460_v8 = vld [vmem:[%s6009_s11 + $0x120] sm:$0xff]  ;;  %v6465_v10 = vld [vmem:[%s6009_s11 + $0x130] sm:$0xff] }
 0x1b1   : > { %5178 = vmatprep.mubr.msk.bf16.mxu1 %vm1640_vm1, %v6401_v61  ;;  %2050 = vmatpush2.bf16.msra.mxu1 %v1537_v25  ;;  %v816_v25 = vunpack.c.l.bf16 %v6369_v30  ;;  %v1188_v30 = vld [vmem:[#allocation8 + $0x440] sm:$0xff]  ;;  %v6445_v19 = vpack.c.bf16 %v947_v6, %v943_v15  ;;  %v827_v33 = vunpack.c.h.bf16 %v6442_v29  ;;  %v942_v35 = vmul.f32 %v6044_v11, %v814_v60  ;;  %v1187_v15 = vld [vmem:[#allocation8 + $0x438] sm:$0xff] }
 0x1b2   : > { %2051 = vmatprep.subr.bf16.mxu1 %v1531_v9  ;;  %2231 = vmatpush2.bf16.msra.mxu0 %v1621_v20  ;;  %v821_v9 = vunpack.c.h.bf16 %v6419_v0  ;;  %v1201_v20 = vld [vmem:[#allocation8 + $0x4a8] sm:$0xff]  ;;  %v946_v38 = vmul.f32 %v6044_v11, %v818_v13  ;;  %v953_v7 = vmul.f32 %v6050_v16, %v825_v12  ;;  %v1180_v57 = vld [vmem:[#allocation8 + $0x400] sm:$0xff]  ;;  %v820_v60 = vunpack.c.l.bf16 %v6419_v0 }
 0x1b3   : > { %2232 = vmatprep.subr.bf16.mxu0 %v1615_v31  ;;  %v1181_v31 = vld [vmem:[#allocation8 + $0x408] sm:$0xff]  ;;  %9949 = vst [vmem:[#allocation30_spill] sm:$0xff] %v6445_v19  ;;  %v1516_v34 = vpack.c.bf16 %v1201_v20, %v1194_v5  ;;  %v955_v59 = vmul.f32 %v6059_v22, %v827_v33  ;;  %v822_v13 = vunpack.c.l.bf16 %v6434_v18  ;;  %v829_v5 = vunpack.c.h.bf16 %v6460_v8  ;;  %v1155_v33 = vld [vmem:[#allocation8 + $0x338] sm:$0xff] }
 0x1b4   : > { %v1510_v17 = vpack.c.bf16 %v1188_v30, %v1181_v31  ;;  %v949_v42 = vmul.f32 %v6050_v16, %v821_v9  ;;  %v737_v20 = vld [vmem:[%s6009_s11 + $0x128] sm:$0xff]  ;;  %v1509_v12 = vpack.c.bf16 %v1187_v15, %v1180_v57  ;;  %v6475_v30 = vpack.c.bf16 %v946_v38, %v942_v35 }
 0x1b5   : > { %2052 = vmatpush2.bf16.msra.mxu1 %v1530_v2  ;;  %v823_v2 = vunpack.c.h.bf16 %v6434_v18  ;;  %v1173_v31 = vld [vmem:[#allocation8 + $0x3c8] sm:$0xff]  ;;  %v833_v0 = vunpack.c.h.bf16 %v6465_v10  ;;  %v739_v18 = vld [vmem:[%s6009_s11 + $0x138] sm:$0xff]  ;;  %v957_v15 = vmul.f32 %v6050_v16, %v829_v5 }
 0x1b6   : > { %2053 = vmatprep.subr.bf16.mxu1 %v1524_v56  ;;  %2233 = vmatpush2.bf16.msra.mxu0 %v1614_v32  ;;  %v940_v56 = vmul.f32 %v6033_v4, %v812_v1  ;;  %v944_v32 = vmul.f32 %v6033_v4, %v816_v25  ;;  %v1174_v1 = vld [vmem:[#allocation8 + $0x3d0] sm:$0xff]  ;;  %v826_v25 = vunpack.c.l.bf16 %v6442_v29 }
 0x1b7   : > { %1776 = vmatmul.mubr.bf16.gmra.mxu0 %v6429_v24  ;;  %2548 = vmatprep.subr.bf16.mxu0 %v1610_v51  ;;  %v951_v6 = vmul.f32 %v6059_v22, %v823_v2  ;;  %v1167_v51 = vld [vmem:[#allocation8 + $0x398] sm:$0xff]  ;;  %v6477_v2 = vpack.c.bf16 %v953_v7, %v949_v42  ;;  %v950_v7 = vmul.f32 %v6044_v11, %v822_v13  ;;  %v828_v13 = vunpack.c.l.bf16 %v6460_v8 }
 0x1b8   : > { %1949 = vmatmul.mubr.bf16.gmra.mxu1 %v6436_v26  ;;  %1785 = vmatprep.mubr.bf16.mxu0 %v6438_v28  ;;  %v6470_v9 = vpack.c.bf16 %v944_v32, %v940_v56  ;;  %v1503_v29 = vpack.c.bf16 %v1174_v1, %v1167_v51  ;;  %v1162_v56 = vld [vmem:[#allocation8 + $0x370] sm:$0xff]  ;;  %v831_v32 = vunpack.c.h.bf16 %v737_v20  ;;  %v954_v57 = vmul.f32 %v6044_v11, %v826_v25  ;;  %v740_v1 = vld [vmem:[%s6009_s11 + $0x140] sm:$0xff] }
 0x1b9   : > { %5179 = vmatprep.mubr.msk.bf16.mxu1 %vm1640_vm1, %v6445_v19  ;;  %2054 = vmatpush2.bf16.msra.mxu1 %v1523_v23  ;;  %v824_v23 = vunpack.c.l.bf16 %v6424_v49  ;;  %v6482_v49 = vpack.c.bf16 %v955_v59, %v951_v6  ;;  %v1498_v42 = vpack.c.bf16 %v1162_v56, %v1155_v33  ;;  %v961_v6 = vmul.f32 %v6050_v16, %v833_v0  ;;  %v741_v33 = vld [vmem:[%s6009_s11 + $0x148] sm:$0xff]  ;;  %v743_v56 = vld [vmem:[%s6009_s11 + $0x158] sm:$0xff] }
 0x1ba   : > { %2055 = vmatprep.subr.bf16.mxu1 %v1517_v43  ;;  %v1166_v43 = vld [vmem:[#allocation8 + $0x390] sm:$0xff]  ;;  %v959_v59 = vmul.f32 %v6059_v22, %v831_v32  ;;  %v832_v25 = vunpack.c.l.bf16 %v6465_v10  ;;  %v6502_v5 = vpack.c.bf16 %v954_v57, %v950_v7  ;;  %v837_v0 = vunpack.c.h.bf16 %v740_v1  ;;  %v744_v57 = vld [vmem:[%s6009_s11 + $0x160] sm:$0xff] }
 0x1bb   : > { %v1502_v35 = vpack.c.bf16 %v1173_v31, %v1166_v43  ;;  %v952_v38 = vmul.f32 %v6033_v4, %v824_v23  ;;  %v830_v23 = vunpack.c.l.bf16 %v737_v20  ;;  %v834_v43 = vunpack.c.l.bf16 %v739_v18 }
 0x1bc   : > { %v6504_v31 = vpack.c.bf16 %v961_v6, %v957_v15  ;;  %v839_v8 = vunpack.c.h.bf16 %v741_v33  ;;  %v843_v32 = vunpack.c.h.bf16 %v743_v56  ;;  %v956_v10 = vmul.f32 %v6033_v4, %v828_v13  ;;  %v746_v15 = vld [vmem:[%s6009_s11 + $0x170] sm:$0xff] }
 0x1bd   : > { %2056 = vmatpush2.bf16.msra.mxu1 %v1516_v34  ;;  %v835_v34 = vunpack.c.h.bf16 %v739_v18  ;;  %v960_v18 = vmul.f32 %v6033_v4, %v832_v25  ;;  %v838_v6 = vunpack.c.l.bf16 %v741_v33 }
 0x1be   : > { %2057 = vmatprep.subr.bf16.mxu1 %v1510_v17  ;;  %v948_v17 = vmul.f32 %v6033_v4, %v820_v60  ;;  %v742_v60 = vld [vmem:[%s6009_s11 + $0x150] sm:$0xff]  ;;  %9951 = vst [vmem:[#allocation32_spill] sm:$0xff] %v6504_v31  ;;  %v971_v7 = vmul.f32 %v6059_v22, %v843_v32 }
 0x1bf   : > { %1786 = vmatmul.mubr.bf16.gmra.mxu0 %v6470_v9  ;;  %v963_v51 = vmul.f32 %v6059_v22, %v835_v34  ;;  %v958_v34 = vmul.f32 %v6044_v11, %v830_v23  ;;  %v840_v13 = vunpack.c.l.bf16 %v742_v60  ;;  %v842_v23 = vunpack.c.l.bf16 %v743_v56 }
 0x1c0   : > { %1959 = vmatmul.mubr.bf16.gmra.mxu1 %v6475_v30  ;;  %1795 = vmatprep.mubr.bf16.mxu0 %v6477_v2  ;;  %v966_v56 = vmul.f32 %v6044_v11, %v838_v6 }
 0x1c1   : > { %5180 = vmatprep.mubr.msk.bf16.mxu1 %vm1640_vm1, %v6482_v49  ;;  %2058 = vmatpush2.bf16.msra.mxu1 %v1509_v12  ;;  %v6498_v12 = vpack.c.bf16 %v952_v38, %v948_v17  ;;  %v6509_v20 = vpack.c.bf16 %v963_v51, %v959_v59  ;;  %v965_v17 = vmul.f32 %v6050_v16, %v837_v0  ;;  %v836_v51 = vunpack.c.l.bf16 %v740_v1 }
 0x1c2   : > { %2059 = vmatprep.subr.bf16.mxu1 %v1503_v29  ;;  %v841_v29 = vunpack.c.h.bf16 %v742_v60  ;;  %v6525_v59 = vpack.c.bf16 %v960_v18, %v956_v10  ;;  %v845_v0 = vunpack.c.h.bf16 %v744_v57  ;;  %v968_v60 = vmul.f32 %v6033_v4, %v840_v13 }
 0x1c3   : > { %9950 = vst [vmem:[#allocation31_spill] sm:$0xff] %v6498_v12  ;;  %9952 = vst [vmem:[#allocation33_spill] sm:$0xff] %v6509_v20  ;;  %v964_v1 = vmul.f32 %v6033_v4, %v836_v51  ;;  %v970_v10 = vmul.f32 %v6044_v11, %v842_v23  ;;  %v844_v13 = vunpack.c.l.bf16 %v744_v57 }
 0x1c4   : > { %v969_v38 = vmul.f32 %v6050_v16, %v841_v29  ;;  %9953 = vst [vmem:[#allocation34_spill] sm:$0xff] %v6525_v59  ;;  %v747_v29 = vld [vmem:[%s6009_s11 + $0x178] sm:$0xff]  ;;  %v973_v18 = vmul.f32 %v6050_v16, %v845_v0 }
 0x1c5   : > { %2060 = vmatpush2.bf16.msra.mxu1 %v1502_v35  ;;  %v962_v35 = vmul.f32 %v6044_v11, %v834_v43  ;;  %v851_v32 = vunpack.c.h.bf16 %v747_v29  ;;  %v6550_v51 = vpack.c.bf16 %v968_v60, %v964_v1  ;;  %v850_v6 = vunpack.c.l.bf16 %v747_v29 }
 0x1c6   : > { %2375 = vmatprep.subr.bf16.mxu1 %v1498_v42  ;;  %v967_v42 = vmul.f32 %v6059_v22, %v839_v8  ;;  %v6529_v43 = vpack.c.bf16 %v969_v38, %v965_v17  ;;  %v748_v38 = vld [vmem:[%s6009_s11 + $0x180] sm:$0xff]  ;;  %v972_v57 = vmul.f32 %v6033_v4, %v844_v13 }
 0x1c7   : > { %1796 = vmatmul.mubr.bf16.gmra.mxu0 %v6498_v12  ;;  %v6527_v25 = vpack.c.bf16 %v962_v35, %v958_v34  ;;  %v979_v17 = vmul.f32 %v6059_v22, %v851_v32  ;;  %9957 = vst [vmem:[#allocation38_spill] sm:$0xff] %v6550_v51  ;;  %v853_v0 = vunpack.c.h.bf16 %v748_v38  ;;  %v978_v1 = vmul.f32 %v6044_v11, %v850_v6 }
 0x1c8   : > { %1969 = vmatmul.mubr.bf16.gmra.mxu1 %v6502_v5  ;;  %1805 = vmatprep.mubr.bf16.mxu0 %v6504_v31  ;;  %9955 = vst [vmem:[#allocation36_spill] sm:$0xff] %v6529_v43  ;;  %v849_v31 = vunpack.c.h.bf16 %v746_v15  ;;  %v6534_v8 = vpack.c.bf16 %v971_v7, %v967_v42  ;;  %v750_v42 = vld [vmem:[%s6009_s11 + $0x190] sm:$0xff] }
 0x1c9   : > { %5181 = vmatprep.mubr.msk.bf16.mxu1 %vm1640_vm1, %v6509_v20  ;;  %9954 = vst [vmem:[#allocation35_spill] sm:$0xff] %v6527_v25  ;;  %v745_v20 = vld [vmem:[%s6009_s11 + $0x168] sm:$0xff]  ;;  %v981_v60 = vmul.f32 %v6050_v16, %v853_v0 }
 0x1ca   : > { %9956 = vst [vmem:[#allocation37_spill] sm:$0xff] %v6534_v8  ;;  %v847_v33 = vunpack.c.h.bf16 %v745_v20  ;;  %v977_v34 = vmul.f32 %v6050_v16, %v849_v31  ;;  %v846_v7 = vunpack.c.l.bf16 %v745_v20  ;;  %v751_v31 = vld [vmem:[%s6009_s11 + $0x198] sm:$0xff] }
 0x1cb   : > { %v859_v32 = vunpack.c.h.bf16 %v751_v31 }
 0x1cc   : > { %v975_v35 = vmul.f32 %v6059_v22, %v847_v33  ;;  %v6554_v23 = vpack.c.bf16 %v977_v34, %v973_v18  ;;  %v974_v29 = vmul.f32 %v6044_v11, %v846_v7  ;;  %v752_v34 = vld [vmem:[%s6009_s11 + $0x1a0] sm:$0xff]  ;;  %v858_v7 = vunpack.c.l.bf16 %v751_v31 }
 0x1cd   : > { %v987_v18 = vmul.f32 %v6059_v22, %v859_v32  ;;  %v861_v0 = vunpack.c.h.bf16 %v752_v34 }
 0x1ce   : > { %9959 = vst [vmem:[#allocation40_spill] sm:$0xff] %v6554_v23  ;;  %v6559_v33 = vpack.c.bf16 %v979_v17, %v975_v35  ;;  %v754_v35 = vld [vmem:[%s6009_s11 + $0x1b0] sm:$0xff]  ;;  %v986_v31 = vmul.f32 %v6044_v11, %v858_v7 }
 0x1cf   : > { %1806 = vmatmul.mubr.bf16.gmra.mxu0 %v6525_v59  ;;  %v857_v59 = vunpack.c.h.bf16 %v750_v42 }
 0x1d0   : > { %1979 = vmatmul.mubr.bf16.gmra.mxu1 %v6527_v25  ;;  %1815 = vmatprep.mubr.bf16.mxu0 %v6529_v43  ;;  %v848_v43 = vunpack.c.l.bf16 %v746_v15  ;;  %v749_v25 = vld [vmem:[%s6009_s11 + $0x188] sm:$0xff]  ;;  %9960 = vst [vmem:[#allocation41_spill] sm:$0xff] %v6559_v33 }
 0x1d1   : > { %5182 = vmatprep.mubr.msk.bf16.mxu1 %vm1640_vm1, %v6534_v8  ;;  %v6552_v8 = vpack.c.bf16 %v970_v10, %v966_v56  ;;  %v855_v20 = vunpack.c.h.bf16 %v749_v25  ;;  %v985_v56 = vmul.f32 %v6050_v16, %v857_v59  ;;  %v854_v17 = vunpack.c.l.bf16 %v749_v25  ;;  %v755_v59 = vld [vmem:[%s6009_s11 + $0x1b8] sm:$0xff] }
 0x1d2   : > { %v976_v15 = vmul.f32 %v6033_v4, %v848_v43  ;;  %v852_v43 = vunpack.c.l.bf16 %v748_v38  ;;  %v867_v12 = vunpack.c.h.bf16 %v755_v59 }
 0x1d3   : > { %9958 = vst [vmem:[#allocation39_spill] sm:$0xff] %v6552_v8  ;;  %v983_v10 = vmul.f32 %v6059_v22, %v855_v20  ;;  %v6579_v6 = vpack.c.bf16 %v985_v56, %v981_v60  ;;  %v860_v56 = vunpack.c.l.bf16 %v752_v34 }
 0x1d4   : > { %v6575_v13 = vpack.c.bf16 %v976_v15, %v972_v57  ;;  %v980_v25 = vmul.f32 %v6033_v4, %v852_v43  ;;  %v989_v57 = vmul.f32 %v6050_v16, %v861_v0  ;;  %v1161_v0 = vld [vmem:[#allocation8 + $0x368] sm:$0xff] }
 0x1d5   : > { %9963 = vst [vmem:[#allocation44_spill] sm:$0xff] %v6579_v6  ;;  %v6584_v20 = vpack.c.bf16 %v987_v18, %v983_v10  ;;  %v864_v10 = vunpack.c.l.bf16 %v754_v35 }
 0x1d6   : > { %9961 = vst [vmem:[#allocation42_spill] sm:$0xff] %v6575_v13 }
 0x1d7   : > { %1816 = vmatmul.mubr.bf16.gmra.mxu0 %v6550_v51  ;;  %v865_v51 = vunpack.c.h.bf16 %v754_v35  ;;  %9964 = vst [vmem:[#allocation45_spill] sm:$0xff] %v6584_v20  ;;  %v1154_v35 = vld [vmem:[#allocation8 + $0x330] sm:$0xff] }
 0x1d8   : > { %1989 = vmatmul.mubr.bf16.gmra.mxu1 %v6552_v8  ;;  %1825 = vmatprep.mubr.bf16.mxu0 %v6554_v23  ;;  %v856_v23 = vunpack.c.l.bf16 %v750_v42  ;;  %v753_v8 = vld [vmem:[%s6009_s11 + $0x1a8] sm:$0xff]  ;;  %v982_v42 = vmul.f32 %v6044_v11, %v854_v17  ;;  %v866_v17 = vunpack.c.l.bf16 %v755_v59  ;;  %s9453_s11 = scalar_lea.hbm %s9513_s7, %s5412_s9 }
 0x1d9   : > { %5183 = vmatprep.mubr.msk.bf16.mxu1 %vm1640_vm1, %v6559_v33  ;;  %v6577_v33 = vpack.c.bf16 %v978_v1, %v974_v29  ;;  %v863_v32 = vunpack.c.h.bf16 %v753_v8  ;;  %v993_v15 = vmul.f32 %v6050_v16, %v865_v51  ;;  %v995_v1 = vmul.f32 %v6059_v22, %v867_v12  ;;  %v1385_v59 = vld [vmem:[#allocation8 + $0xa68] sm:$0xff] }
 0x1da   : > { %v984_v38 = vmul.f32 %v6033_v4, %v856_v23  ;;  %v6600_v18 = vpack.c.bf16 %v986_v31, %v982_v42  ;;  %v862_v23 = vunpack.c.l.bf16 %v753_v8  ;;  %v988_v16 = vmul.f32 %v6033_v4, %v860_v56  ;;  %v1134_v56 = vld [vmem:[#allocation8 + $0x290] sm:$0xff] }
 0x1db   : > { %9962 = vst [vmem:[#allocation43_spill] sm:$0xff] %v6577_v33  ;;  %v991_v29 = vmul.f32 %v6059_v22, %v863_v32  ;;  %v6602_v43 = vpack.c.bf16 %v993_v15, %v989_v57  ;;  %v992_v22 = vmul.f32 %v6033_v4, %v864_v10  ;;  %v994_v8 = vmul.f32 %v6044_v11, %v866_v17  ;;  %v1378_v4 = vld [vmem:[#allocation8 + $0xa30] sm:$0xff]  ;;  %v1141_v32 = vld [vmem:[#allocation8 + $0x2c8] sm:$0xff]  ;;  %v1140_v15 = vld [vmem:[#allocation8 + $0x2c0] sm:$0xff] }
 0x1dc   : > { %v6598_v60 = vpack.c.bf16 %v984_v38, %v980_v25  ;;  %9966 = vst [vmem:[#allocation47_spill] sm:$0xff] %v6600_v18  ;;  %v990_v12 = vmul.f32 %v6044_v11, %v862_v23  ;;  %v1148_v25 = vld [vmem:[#allocation8 + $0x300] sm:$0xff]  ;;  %v1365_v11 = vld [vmem:[#allocation8 + $0x9c8] sm:$0xff]  ;;  %v1497_v42 = vpack.c.bf16 %v1161_v0, %v1154_v35  ;;  %v1609_v31 = vpack.c.bf16 %v1385_v59, %v1378_v4  ;;  %v1371_v17 = vld [vmem:[#allocation8 + $0x9f8] sm:$0xff] }
 0x1dd   : > { %9967 = vst [vmem:[#allocation48_spill] sm:$0xff] %v6602_v43  ;;  %v6605_v7 = vpack.c.bf16 %v995_v1, %v991_v29  ;;  %v6615_v51 = vpack.c.bf16 %v992_v22, %v988_v16  ;;  %v1372_v38 = vld [vmem:[#allocation8 + $0xa00] sm:$0xff]  ;;  %v1491_v57 = vpack.c.bf16 %v1148_v25, %v1141_v32  ;;  %v1147_v29 = vld [vmem:[#allocation8 + $0x2f8] sm:$0xff]  ;;  %v1358_v22 = vld [vmem:[#allocation8 + $0x990] sm:$0xff] }
 0x1de   : > { %9965 = vst [vmem:[#allocation46_spill] sm:$0xff] %v6598_v60  ;;  %v6617_v34 = vpack.c.bf16 %v994_v8, %v990_v12  ;;  %v1127_v1 = vld [vmem:[#allocation8 + $0x258] sm:$0xff]  ;;  %v1603_v10 = vpack.c.bf16 %v1372_v38, %v1365_v11  ;;  %v1364_v23 = vld [vmem:[#allocation8 + $0x9c0] sm:$0xff]  ;;  %v1490_v12 = vpack.c.bf16 %v1147_v29, %v1140_v15  ;;  %v1126_v35 = vld [vmem:[#allocation8 + $0x250] sm:$0xff] }
 0x1df   : > { %1826 = vmatmul.mubr.bf16.gmra.mxu0 %v6575_v13  ;;  %9968 = vst [vmem:[#allocation49_spill] sm:$0xff] %v6605_v7  ;;  %9969 = vst [vmem:[#allocation50_spill] sm:$0xff] %v6615_v51  ;;  %v1351_v16 = vld [vmem:[#allocation8 + $0x958] sm:$0xff]  ;;  %v1484_v8 = vpack.c.bf16 %v1134_v56, %v1127_v1  ;;  %v1133_v0 = vld [vmem:[#allocation8 + $0x288] sm:$0xff]  ;;  %v1602_v4 = vpack.c.bf16 %v1371_v17, %v1364_v23 }
 0x1e0   : > { %1999 = vmatmul.mubr.bf16.gmra.mxu1 %v6577_v33  ;;  %1835 = vmatprep.mubr.bf16.mxu0 %v6579_v6  ;;  %9970 = vst [vmem:[#allocation51_spill] sm:$0xff] %v6617_v34  ;;  %v1113_v59 = vld [vmem:[#allocation8 + $0x1e8] sm:$0xff]  ;;  %v1120_v32 = vld [vmem:[#allocation8 + $0x220] sm:$0xff]  ;;  %v1596_v25 = vpack.c.bf16 %v1358_v22, %v1351_v16  ;;  %v1350_v11 = vld [vmem:[#allocation8 + $0x950] sm:$0xff] }
 0x1e1   : > { %5184 = vmatprep.mubr.msk.bf16.mxu1 %vm1640_vm1, %v6584_v20  ;;  %v1357_v38 = vld [vmem:[#allocation8 + $0x988] sm:$0xff]  ;;  %v1112_v15 = vld [vmem:[#allocation8 + $0x1e0] sm:$0xff]  ;;  %v1099_v29 = vld [vmem:[#allocation8 + $0x178] sm:$0xff] }
 0x1e2   : > { %v1106_v1 = vld [vmem:[#allocation8 + $0x1b0] sm:$0xff]  ;;  %v1343_v23 = vld [vmem:[#allocation8 + $0x918] sm:$0xff] }
 0x1e3   : > { %v1323_v17 = vld [vmem:[#allocation8 + $0x878] sm:$0xff]  ;;  %v1330_v16 = vld [vmem:[#allocation8 + $0x8b0] sm:$0xff] }
 0x1e7   : > { %1836 = vmatmul.mubr.bf16.gmra.mxu0 %v6598_v60 }
 0x1e8   : > { %2009 = vmatmul.mubr.bf16.gmra.mxu1 %v6600_v18  ;;  %1845 = vmatprep.mubr.bf16.mxu0 %v6602_v43 }
 0x1e9   : > { %5185 = vmatprep.mubr.msk.bf16.mxu1 %vm1640_vm1, %v6605_v7 }
 0x1ef   : > { %1846 = vmatmul.mubr.bf16.gmra.mxu0 %v6615_v51 }
 0x1f0   : > { %2019 = vmatmul.mubr.bf16.gmra.mxu1 %v6617_v34  ;;  %5186 = vmatprep.mubr.msk.bf16.mxu0 %vm1640_vm1, %v6086_v48 }
 0x1f1   : > { %2061 = vmatprep.mubr.bf16.mxu1 %v6079_v41 }
 0x1f7   : > { %2235 = vmatmul.mubr.bf16.vlgmr.msra.gmra.mxu0 %v6098_v55  ;;  %v1483_v55 = vpack.c.bf16 %v1133_v0, %v1126_v35  ;;  %v1105_v35 = vld [vmem:[#allocation8 + $0x1a8] sm:$0xff] }
 0x1f8   : > { %2062 = vmatmul.mubr.bf16.vlgmr.msra.gmra.mxu1 %v6072_v36  ;;  %5187 = vmatprep.mubr.msk.bf16.mxu0 %vm1640_vm1, %v6110_v62  ;;  %v1337_v36 = vld [vmem:[#allocation8 + $0x8e8] sm:$0xff]  ;;  %v1344_v62 = vld [vmem:[#allocation8 + $0x920] sm:$0xff] }
 0x1f9   : > { %2376 = vmatpush1.bf16.msra.mxu1 %v1497_v42  ;;  %2071 = vmatprep.mubr.bf16.mxu1 %v6088_v50  ;;  %v1477_v42 = vpack.c.bf16 %v1120_v32, %v1113_v59  ;;  %v1589_v56 = vpack.c.bf16 %v1344_v62, %v1337_v36  ;;  %v1085_v36 = vld [vmem:[#allocation8 + $0x108] sm:$0xff]  ;;  %v1092_v62 = vld [vmem:[#allocation8 + $0x140] sm:$0xff]  ;;  %v1322_v59 = vld [vmem:[#allocation8 + $0x870] sm:$0xff] }
 0x1fa   : > { %2549 = vmatpush1.bf16.msra.mxu0 %v1609_v31  ;;  %2377 = vmatprep.subr.bf16.mxu1 %v1491_v57  ;;  %v1119_v31 = vld [vmem:[#allocation8 + $0x218] sm:$0xff]  ;;  %v1595_v57 = vpack.c.bf16 %v1357_v38, %v1350_v11  ;;  %v1329_v32 = vld [vmem:[#allocation8 + $0x8a8] sm:$0xff]  ;;  %v1316_v11 = vld [vmem:[#allocation8 + $0x840] sm:$0xff] }
 0x1fb   : > { %2550 = vmatprep.subr.bf16.mxu0 %v1603_v10  ;;  %v1336_v10 = vld [vmem:[#allocation8 + $0x8e0] sm:$0xff]  ;;  %v1476_v22 = vpack.c.bf16 %v1119_v31, %v1112_v15  ;;  %v1071_v31 = vld [vmem:[#allocation8 + $0x98] sm:$0xff] }
 0x1fc   : > { %v1588_v0 = vpack.c.bf16 %v1343_v23, %v1336_v10  ;;  %v1084_v15 = vld [vmem:[#allocation8 + $0x100] sm:$0xff]  ;;  %v1315_v10 = vld [vmem:[#allocation8 + $0x838] sm:$0xff] }
 0x1fd   : > { %2378 = vmatpush1.bf16.msra.mxu1 %v1490_v12  ;;  %v1470_v12 = vpack.c.bf16 %v1106_v1, %v1099_v29  ;;  %v1078_v29 = vld [vmem:[#allocation8 + $0xd0] sm:$0xff]  ;;  %v1295_v23 = vld [vmem:[#allocation8 + $0x798] sm:$0xff] }
 0x1fe   : > { %2379 = vmatprep.subr.bf16.mxu1 %v1484_v8  ;;  %2551 = vmatpush1.bf16.msra.mxu0 %v1602_v4  ;;  %v1098_v8 = vld [vmem:[#allocation8 + $0x170] sm:$0xff]  ;;  %v1582_v4 = vpack.c.bf16 %v1330_v16, %v1323_v17 }
 0x1ff   : > { %2245 = vmatmul.mubr.bf16.gmra.mxu0 %v6159_v46  ;;  %2552 = vmatprep.subr.bf16.mxu0 %v1596_v25  ;;  %v1309_v25 = vld [vmem:[#allocation8 + $0x808] sm:$0xff]  ;;  %v1469_v38 = vpack.c.bf16 %v1105_v35, %v1098_v8  ;;  %v1302_v17 = vld [vmem:[#allocation8 + $0x7d0] sm:$0xff] }
 0x200   : > { %2072 = vmatmul.mubr.bf16.gmra.mxu1 %v6150_v40  ;;  %5188 = vmatprep.mubr.msk.bf16.mxu0 %vm1640_vm1, %v6171_v54  ;;  %v1575_v1 = vpack.c.bf16 %v1316_v11, %v1309_v25  ;;  %v1077_v8 = vld [vmem:[#allocation8 + $0xc8] sm:$0xff]  ;;  %v1288_v25 = vld [vmem:[#allocation8 + $0x760] sm:$0xff] }
 0x201   : > { %2081 = vmatprep.mubr.bf16.mxu1 %v6161_v47  ;;  %2380 = vmatpush1.bf16.msra.mxu1 %v1483_v55  ;;  %v1463_v55 = vpack.c.bf16 %v1092_v62, %v1085_v36  ;;  %v1057_v35 = vld [vmem:[#allocation8 + $0x28] sm:$0xff]  ;;  %v1064_v36 = vld [vmem:[#allocation8 + $0x60] sm:$0xff]  ;;  %v1568_v62 = vpack.c.bf16 %v1302_v17, %v1295_v23 }
 0x202   : > { %2381 = vmatprep.subr.bf16.mxu1 %v1477_v42  ;;  %2553 = vmatpush1.bf16.msra.mxu0 %v1595_v57  ;;  %v1091_v42 = vld [vmem:[#allocation8 + $0x138] sm:$0xff]  ;;  %v1581_v57 = vpack.c.bf16 %v1329_v32, %v1322_v59  ;;  %v1301_v59 = vld [vmem:[#allocation8 + $0x7c8] sm:$0xff] }
 0x203   : > { %2554 = vmatprep.subr.bf16.mxu0 %v1589_v56  ;;  %v1308_v56 = vld [vmem:[#allocation8 + $0x800] sm:$0xff]  ;;  %v1462_v16 = vpack.c.bf16 %v1091_v42, %v1084_v15  ;;  %v1281_v32 = vld [vmem:[#allocation8 + $0x728] sm:$0xff]  ;;  %v1063_v15 = vld [vmem:[#allocation8 + $0x58] sm:$0xff] }
 0x205   : > { %2382 = vmatpush1.bf16.msra.mxu1 %v1476_v22  ;;  %v1456_v22 = vpack.c.bf16 %v1078_v29, %v1071_v31  ;;  %v1274_v31 = vld [vmem:[#allocation8 + $0x6f0] sm:$0xff]  ;;  %v1280_v29 = vld [vmem:[#allocation8 + $0x720] sm:$0xff] }
 0x206   : > { %2383 = vmatprep.subr.bf16.mxu1 %v1470_v12  ;;  %2555 = vmatpush1.bf16.msra.mxu0 %v1588_v0  ;;  %v1070_v12 = vld [vmem:[#allocation8 + $0x90] sm:$0xff]  ;;  %v1574_v0 = vpack.c.bf16 %v1315_v10, %v1308_v56  ;;  %v1435_v56 = vld [vmem:[#allocation8 + $0xbf8] sm:$0xff] }
 0x207   : > { %2255 = vmatmul.mubr.bf16.gmra.mxu0 %v6218_v44  ;;  %2556 = vmatprep.subr.bf16.mxu0 %v1582_v4  ;;  %v1294_v4 = vld [vmem:[#allocation8 + $0x790] sm:$0xff]  ;;  %v1455_v11 = vpack.c.bf16 %v1077_v8, %v1070_v12  ;;  %v1253_v12 = vld [vmem:[#allocation8 + $0x648] sm:$0xff] }
 0x208   : > { %2082 = vmatmul.mubr.bf16.gmra.mxu1 %v6209_v37  ;;  %5189 = vmatprep.mubr.msk.bf16.mxu0 %vm1640_vm1, %v6230_v52  ;;  %v1567_v42 = vpack.c.bf16 %v1301_v59, %v1294_v4  ;;  %v1442_v10 = vld [vmem:[#allocation8 + $0xc30] sm:$0xff]  ;;  %v1421_v4 = vld [vmem:[#allocation8 + $0xb88] sm:$0xff]  ;;  %v1428_v59 = vld [vmem:[#allocation8 + $0xbc0] sm:$0xff] }
 0x209   : > { %2091 = vmatprep.mubr.bf16.mxu1 %v6220_v21  ;;  %2384 = vmatpush1.bf16.msra.mxu1 %v1469_v38  ;;  %v1449_v21 = vpack.c.bf16 %v1064_v36, %v1057_v35  ;;  %v1056_v38 = vld [vmem:[#allocation8 + $0x20] sm:$0xff]  ;;  %v1434_v36 = vld [vmem:[#allocation8 + $0xbf0] sm:$0xff] }
 0x20a   : > { %2385 = vmatprep.subr.bf16.mxu1 %v1463_v55  ;;  %2557 = vmatpush1.bf16.msra.mxu0 %v1581_v57  ;;  %v1267_v55 = vld [vmem:[#allocation8 + $0x6b8] sm:$0xff]  ;;  %v1561_v57 = vpack.c.bf16 %v1288_v25, %v1281_v32  ;;  %v1448_v23 = vpack.c.bf16 %v1063_v15, %v1056_v38  ;;  %v1260_v35 = vld [vmem:[#allocation8 + $0x680] sm:$0xff] }
 0x20b   : > { %2558 = vmatprep.subr.bf16.mxu0 %v1575_v1  ;;  %v1287_v1 = vld [vmem:[#allocation8 + $0x758] sm:$0xff]  ;;  %v1554_v17 = vpack.c.bf16 %v1274_v31, %v1267_v55  ;;  %v1547_v25 = vpack.c.bf16 %v1260_v35, %v1253_v12  ;;  %v1246_v55 = vld [vmem:[#allocation8 + $0x610] sm:$0xff]  ;;  %v1420_v31 = vld [vmem:[#allocation8 + $0xb80] sm:$0xff] }
 0x20c   : > { %v1560_v8 = vpack.c.bf16 %v1287_v1, %v1280_v29  ;;  %v1259_v38 = vld [vmem:[#allocation8 + $0x678] sm:$0xff]  ;;  %v9971_v29 = vld [vmem:[#allocation26_spill] sm:$0xff] }
 0x20d   : > { %2386 = vmatpush1.bf16.msra.mxu1 %v1462_v16  ;;  %v1266_v16 = vld [vmem:[#allocation8 + $0x6b0] sm:$0xff]  ;;  %v9972_v1 = vld [vmem:[#allocation28_spill] sm:$0xff]  ;;  %v1245_v12 = vld [vmem:[#allocation8 + $0x608] sm:$0xff] }
 0x20e   : > { %2387 = vmatprep.subr.bf16.mxu1 %v1456_v22  ;;  %2559 = vmatpush1.bf16.msra.mxu0 %v1574_v0  ;;  %v1273_v22 = vld [vmem:[#allocation8 + $0x6e8] sm:$0xff]  ;;  %v1638_v0 = vpack.c.bf16 %v1442_v10, %v1435_v56  ;;  %v1407_v56 = vld [vmem:[#allocation8 + $0xb18] sm:$0xff]  ;;  %v1414_v10 = vld [vmem:[#allocation8 + $0xb50] sm:$0xff] }
 0x20f   : > { %2265 = vmatmul.mubr.bf16.gmra.mxu0 %v6277_v27  ;;  %2560 = vmatprep.subr.bf16.mxu0 %v1568_v62  ;;  %v1441_v62 = vld [vmem:[#allocation8 + $0xc28] sm:$0xff]  ;;  %v1553_v32 = vpack.c.bf16 %v1273_v22, %v1266_v16  ;;  %v1238_v22 = vld [vmem:[#allocation8 + $0x5d0] sm:$0xff] }
 0x210   : > { %2092 = vmatmul.mubr.bf16.gmra.mxu1 %v6268_v39  ;;  %5190 = vmatprep.mubr.msk.bf16.mxu0 %vm1640_vm1, %v6289_v58  ;;  %v1637_v15 = vpack.c.bf16 %v1441_v62, %v1434_v36  ;;  %v1624_v36 = vpack.c.bf16 %v1414_v10, %v1407_v56  ;;  %v1406_v62 = vld [vmem:[#allocation8 + $0xb10] sm:$0xff]  ;;  %v1217_v10 = vld [vmem:[#allocation8 + $0x528] sm:$0xff] }
 0x211   : > { %2101 = vmatprep.mubr.bf16.mxu1 %v6279_v45  ;;  %2388 = vmatpush1.bf16.msra.mxu1 %v1455_v11  ;;  %v1252_v11 = vld [vmem:[#allocation8 + $0x640] sm:$0xff]  ;;  %v1210_v56 = vld [vmem:[#allocation8 + $0x4f0] sm:$0xff] }
 0x212   : > { %2389 = vmatprep.subr.bf16.mxu1 %v1449_v21  ;;  %2561 = vmatpush1.bf16.msra.mxu0 %v1567_v42  ;;  %v1239_v21 = vld [vmem:[#allocation8 + $0x5d8] sm:$0xff]  ;;  %v1631_v42 = vpack.c.bf16 %v1428_v59, %v1421_v4  ;;  %v1413_v4 = vld [vmem:[#allocation8 + $0xb48] sm:$0xff] }
 0x213   : > { %2562 = vmatprep.subr.bf16.mxu0 %v1561_v57  ;;  %v1427_v57 = vld [vmem:[#allocation8 + $0xbb8] sm:$0xff]  ;;  %v1540_v16 = vpack.c.bf16 %v1246_v55, %v1239_v21  ;;  %v1393_v59 = vld [vmem:[#allocation8 + $0xaa8] sm:$0xff]  ;;  %v1218_v21 = vld [vmem:[#allocation8 + $0x530] sm:$0xff] }
 0x214   : > { %v1630_v35 = vpack.c.bf16 %v1427_v57, %v1420_v31  ;;  %v1392_v55 = vld [vmem:[#allocation8 + $0xaa0] sm:$0xff] }
 0x215   : > { %2390 = vmatpush1.bf16.msra.mxu1 %v1448_v23  ;;  %v9973_v23 = vld [vmem:[#allocation27_spill] sm:$0xff] }
 0x216   : > { %2391 = vmatprep.subr.bf16.mxu1 %v1554_v17  ;;  %2563 = vmatpush1.bf16.msra.mxu0 %v1560_v8  ;;  %v1546_v17 = vpack.c.bf16 %v1259_v38, %v1252_v11  ;;  %v1225_v8 = vld [vmem:[#allocation8 + $0x568] sm:$0xff]  ;;  %v1231_v11 = vld [vmem:[#allocation8 + $0x598] sm:$0xff]  ;;  %v1623_v38 = vpack.c.bf16 %v1413_v4, %v1406_v62  ;;  %v1182_v4 = vld [vmem:[#allocation8 + $0x410] sm:$0xff] }
 0x217   : > { %2275 = vmatmul.mubr.bf16.gmra.mxu0 %v6336_v63  ;;  %2572 = vmatprep.subr.bf16.mxu0 %v1638_v0  ;;  %v1232_v0 = vld [vmem:[#allocation8 + $0x5a0] sm:$0xff] }
 0x218   : > { %2102 = vmatmul.mubr.bf16.gmra.mxu1 %v9971_v29  ;;  %5191 = vmatprep.mubr.msk.bf16.mxu0 %vm1640_vm1, %v9972_v1  ;;  %v1400_v1 = vld [vmem:[#allocation8 + $0xae0] sm:$0xff]  ;;  %v1539_v29 = vpack.c.bf16 %v1245_v12, %v1238_v22 }
 0x219   : > { %2111 = vmatprep.mubr.bf16.mxu1 %v9973_v23  ;;  %2392 = vmatpush2.bf16.msra.mxu1 %v1553_v32  ;;  %v1533_v23 = vpack.c.bf16 %v1232_v0, %v1225_v8  ;;  %v1224_v32 = vld [vmem:[#allocation8 + $0x560] sm:$0xff]  ;;  %v1190_v0 = vld [vmem:[#allocation8 + $0x450] sm:$0xff] }
 0x21a   : > { %2393 = vmatprep.subr.bf16.mxu1 %v1547_v25  ;;  %2573 = vmatpush2.bf16.msra.mxu0 %v1637_v15  ;;  %v1211_v25 = vld [vmem:[#allocation8 + $0x4f8] sm:$0xff]  ;;  %v1617_v15 = vpack.c.bf16 %v1400_v1, %v1393_v59  ;;  %v1532_v31 = vpack.c.bf16 %v1231_v11, %v1224_v32  ;;  %v1204_v22 = vld [vmem:[#allocation8 + $0x4c0] sm:$0xff]  ;;  %v1525_v1 = vpack.c.bf16 %v1217_v10, %v1210_v56  ;;  %v1189_v59 = vld [vmem:[#allocation8 + $0x448] sm:$0xff] }
 0x21b   : > { %2574 = vmatprep.subr.bf16.mxu0 %v1631_v42  ;;  %v1399_v42 = vld [vmem:[#allocation8 + $0xad8] sm:$0xff]  ;;  %v1526_v57 = vpack.c.bf16 %v1218_v21, %v1211_v25  ;;  %v1196_v8 = vld [vmem:[#allocation8 + $0x480] sm:$0xff]  ;;  %v1169_v32 = vld [vmem:[#allocation8 + $0x3a8] sm:$0xff]  ;;  %v1511_v25 = vpack.c.bf16 %v1189_v59, %v1182_v4 }
 0x21c   : > { %v1176_v11 = vld [vmem:[#allocation8 + $0x3e0] sm:$0xff]  ;;  %v9975_v56 = vld [vmem:[#allocation31_spill] sm:$0xff]  ;;  %v9986_v4 = vld [vmem:[#allocation40_spill] sm:$0xff] }
 0x21d   : > { %2394 = vmatpush2.bf16.msra.mxu1 %v1546_v17  ;;  %v1616_v17 = vpack.c.bf16 %v1399_v42, %v1392_v55  ;;  %v1168_v21 = vld [vmem:[#allocation8 + $0x3a0] sm:$0xff]  ;;  %v1275_v42 = vld [vmem:[#allocation8 + $0x6f8] sm:$0xff] }
 0x21e   : > { %2395 = vmatprep.subr.bf16.mxu1 %v1540_v16  ;;  %2575 = vmatpush2.bf16.msra.mxu0 %v1630_v35  ;;  %v1197_v16 = vld [vmem:[#allocation8 + $0x488] sm:$0xff]  ;;  %v1203_v35 = vld [vmem:[#allocation8 + $0x4b8] sm:$0xff]  ;;  %v1268_v55 = vld [vmem:[#allocation8 + $0x6c0] sm:$0xff] }
 0x21f   : > { %2285 = vmatmul.mubr.bf16.gmra.mxu0 %v6389_v53  ;;  %2576 = vmatprep.subr.bf16.mxu0 %v1624_v36  ;;  %v1519_v12 = vpack.c.bf16 %v1204_v22, %v1197_v16  ;;  %v1518_v36 = vpack.c.bf16 %v1203_v35, %v1196_v8  ;;  %v9976_v10 = vld [vmem:[#allocation33_spill] sm:$0xff]  ;;  %v9978_v16 = vld [vmem:[#allocation35_spill] sm:$0xff]  ;;  %v9979_v22 = vld [vmem:[#allocation34_spill] sm:$0xff] }
 0x220   : > { %2112 = vmatmul.mubr.bf16.gmra.mxu1 %v6386_v14  ;;  %5192 = vmatprep.mubr.msk.bf16.mxu0 %vm1640_vm1, %v6401_v61  ;;  %v9982_v35 = vld [vmem:[#allocation39_spill] sm:$0xff] }
 0x221   : > { %2121 = vmatprep.mubr.bf16.mxu1 %v6391_v3  ;;  %2396 = vmatpush2.bf16.msra.mxu1 %v1539_v29  ;;  %v1183_v29 = vld [vmem:[#allocation8 + $0x418] sm:$0xff] }
 0x222   : > { %2397 = vmatprep.subr.bf16.mxu1 %v1533_v23  ;;  %2577 = vmatpush2.bf16.msra.mxu0 %v1623_v38  ;;  %v9974_v23 = vmov 0   ;;  %v1512_v62 = vpack.c.bf16 %v1190_v0, %v1183_v29  ;;  %v1505_v38 = vpack.c.bf16 %v1176_v11, %v1169_v32  ;;  %v9983_v0 = vld [vmem:[#allocation38_spill] sm:$0xff] }
 0x223   : > { %2578 = vmatprep.subr.bf16.mxu0 %v1617_v15  ;;  %v1175_v15 = vld [vmem:[#allocation8 + $0x3d8] sm:$0xff] }
 0x225   : > { %2398 = vmatpush2.bf16.msra.mxu1 %v1532_v31  ;;  %v1504_v31 = vpack.c.bf16 %v1175_v15, %v1168_v21 }
 0x226   : > { %2399 = vmatprep.subr.bf16.mxu1 %v1526_v57  ;;  %2579 = vmatpush2.bf16.msra.mxu0 %v1616_v17  ;;  %v1555_v57 = vpack.c.bf16 %v1275_v42, %v1268_v55  ;;  %v9977_v17 = vld [vmem:[#allocation32_spill] sm:$0xff] }
 0x227   : > { %2295 = vmatmul.mubr.bf16.gmra.mxu0 %v6436_v26  ;;  %2866 = vmatprep.subr.bf16.mxu0 %v9974_v23 }
 0x228   : > { %2122 = vmatmul.mubr.bf16.gmra.mxu1 %v6429_v24  ;;  %5193 = vmatprep.mubr.msk.bf16.mxu0 %vm1640_vm1, %v6445_v19 }
 0x229   : > { %2131 = vmatprep.mubr.bf16.mxu1 %v6438_v28  ;;  %2400 = vmatpush2.bf16.msra.mxu1 %v1525_v1  ;;  %v9980_v1 = vld [vmem:[#allocation37_spill] sm:$0xff] }
 0x22a   : > { %2401 = vmatprep.subr.bf16.mxu1 %v1519_v12  ;;  %v9981_v12 = vld [vmem:[#allocation36_spill] sm:$0xff] }
 0x22d   : > { %2402 = vmatpush2.bf16.msra.mxu1 %v1518_v36  ;;  %v9984_v36 = vld [vmem:[#allocation41_spill] sm:$0xff] }
 0x22e   : > { %2403 = vmatprep.subr.bf16.mxu1 %v1512_v62 }
 0x22f   : > { %2305 = vmatmul.mubr.bf16.gmra.mxu0 %v6475_v30 }
 0x230   : > { %2132 = vmatmul.mubr.bf16.gmra.mxu1 %v6470_v9  ;;  %5194 = vmatprep.mubr.msk.bf16.mxu0 %vm1640_vm1, %v6482_v49 }
 0x231   : > { %2141 = vmatprep.mubr.bf16.mxu1 %v6477_v2  ;;  %2404 = vmatpush2.bf16.msra.mxu1 %v1511_v25 }
 0x232   : > { %2405 = vmatprep.subr.bf16.mxu1 %v1505_v38 }
 0x235   : > { %2406 = vmatpush2.bf16.msra.mxu1 %v1504_v31 }
 0x236   : > { %5234 = vmatprep.subr.bf16.mxu1 %v1555_v57 }
 0x237   : > { %2315 = vmatmul.mubr.bf16.gmra.mxu0 %v6502_v5 }
 0x238   : > { %2142 = vmatmul.mubr.bf16.gmra.mxu1 %v9975_v56  ;;  %5195 = vmatprep.mubr.msk.bf16.mxu0 %vm1640_vm1, %v9976_v10 }
 0x239   : > { %2151 = vmatprep.mubr.bf16.mxu1 %v9977_v17 }
 0x23f   : > { %2325 = vmatmul.mubr.bf16.gmra.mxu0 %v9978_v16 }
 0x240   : > { %2152 = vmatmul.mubr.bf16.gmra.mxu1 %v9979_v22  ;;  %5196 = vmatprep.mubr.msk.bf16.mxu0 %vm1640_vm1, %v9980_v1 }
 0x241   : > { %2161 = vmatprep.mubr.bf16.mxu1 %v9981_v12 }
 0x247   : > { %v1717_v8 = vpop.f32.mrf.mxu0  ;;  %2335 = vmatmul.mubr.bf16.gmra.mxu0 %v9982_v35 }
 0x248   : > { %v1890_v29 = vpop.f32.mrf.mxu1  ;;  %2162 = vmatmul.mubr.bf16.gmra.mxu1 %v9983_v0  ;;  %5197 = vmatprep.mubr.msk.bf16.mxu0 %vm1640_vm1, %v9984_v36 }
 0x249   : > { %v6679_v62 = vadd.f32 %v1890_v29, %v1717_v8  ;;  %2171 = vmatprep.mubr.bf16.mxu1 %v9986_v4  ;;  %v1719_v59 = vpop.f32.mrf.mxu0 }
 0x24a   : > { %v1892_v32 = vpop.f32.mrf.mxu1 }
 0x24b   : > { %9985 = vst [vmem:[#allocation31_spill] sm:$0xff] %v6679_v62  ;;  %v6682_v11 = vadd.f32 %v1892_v32, %v1719_v59  ;;  %v1721_v25 = vpop.f32.mrf.mxu0 }
 0x24c   : > { %v1894_v38 = vpop.f32.mrf.mxu1 }
 0x24d   : > { %9987 = vst [vmem:[#allocation33_spill] sm:$0xff] %v6682_v11  ;;  %v6684_v21 = vadd.f32 %v1894_v38, %v1721_v25  ;;  %v1723_v15 = vpop.f32.mrf.mxu0 }
 0x24e   : > { %v1896_v55 = vpop.f32.mrf.mxu1 }
 0x24f   : > { %9988 = vst [vmem:[#allocation32_spill] sm:$0xff] %v6684_v21  ;;  %v6686_v42 = vadd.f32 %v1896_v55, %v1723_v15  ;;  %v1727_v31 = vpop.f32.mrf.mxu0  ;;  %2345 = vmatmul.mubr.bf16.gmra.mxu0 %v6577_v33 }
 0x250   : > { %v1900_v57 = vpop.f32.mrf.mxu1  ;;  %2172 = vmatmul.mubr.bf16.gmra.mxu1 %v6575_v13  ;;  %5198 = vmatprep.mubr.msk.bf16.mxu0 %vm1640_vm1, %v6584_v20 }
 0x251   : > { %9989 = vst [vmem:[#allocation35_spill] sm:$0xff] %v6686_v42  ;;  %v6692_v8 = vadd.f32 %v1900_v57, %v1727_v31  ;;  %2181 = vmatprep.mubr.bf16.mxu1 %v6579_v6  ;;  %v1729_v29 = vpop.f32.mrf.mxu0  ;;  %v1247_v6 = vld [vmem:[#allocation8 + $0x618] sm:$0xff] }
 0x252   : > { %v1902_v59 = vpop.f32.mrf.mxu1 }
 0x253   : > { %9990 = vst [vmem:[#allocation34_spill] sm:$0xff] %v6692_v8  ;;  %v6695_v32 = vadd.f32 %v1902_v59, %v1729_v29  ;;  %v1731_v25 = vpop.f32.mrf.mxu0 }
 0x254   : > { %v1904_v38 = vpop.f32.mrf.mxu1 }
 0x255   : > { %9991 = vst [vmem:[#allocation37_spill] sm:$0xff] %v6695_v32  ;;  %v6697_v15 = vadd.f32 %v1904_v38, %v1731_v25  ;;  %v1733_v55 = vpop.f32.mrf.mxu0 }
 0x256   : > { %v1906_v42 = vpop.f32.mrf.mxu1 }
 0x257   : > { %9992 = vst [vmem:[#allocation36_spill] sm:$0xff] %v6697_v15  ;;  %v6699_v21 = vadd.f32 %v1906_v42, %v1733_v55  ;;  %v1737_v11 = vpop.f32.mrf.mxu0  ;;  %2355 = vmatmul.mubr.bf16.gmra.mxu0 %v6600_v18  ;;  %v1240_v18 = vld [vmem:[#allocation8 + $0x5e0] sm:$0xff] }
 0x258   : > { %v1910_v62 = vpop.f32.mrf.mxu1  ;;  %2182 = vmatmul.mubr.bf16.gmra.mxu1 %v6598_v60  ;;  %5199 = vmatprep.mubr.msk.bf16.mxu0 %vm1640_vm1, %v6605_v7  ;;  %v1366_v7 = vld [vmem:[#allocation8 + $0x9d0] sm:$0xff] }
 0x259   : > { %9993 = vst [vmem:[#allocation39_spill] sm:$0xff] %v6699_v21  ;;  %v6705_v31 = vadd.f32 %v1910_v62, %v1737_v11  ;;  %2191 = vmatprep.mubr.bf16.mxu1 %v6602_v43  ;;  %v1739_v57 = vpop.f32.mrf.mxu0  ;;  %v1149_v43 = vld [vmem:[#allocation8 + $0x308] sm:$0xff] }
 0x25a   : > { %v1912_v29 = vpop.f32.mrf.mxu1 }
 0x25b   : > { %9994 = vst [vmem:[#allocation38_spill] sm:$0xff] %v6705_v31  ;;  %v6708_v59 = vadd.f32 %v1912_v29, %v1739_v57  ;;  %v1741_v25 = vpop.f32.mrf.mxu0  ;;  %v1156_v29 = vld [vmem:[#allocation8 + $0x340] sm:$0xff] }
 0x25c   : > { %v1914_v42 = vpop.f32.mrf.mxu1 }
 0x25d   : > { %9995 = vst [vmem:[#allocation41_spill] sm:$0xff] %v6708_v59  ;;  %v6710_v38 = vadd.f32 %v1914_v42, %v1741_v25  ;;  %v1743_v55 = vpop.f32.mrf.mxu0  ;;  %v1163_v25 = vld [vmem:[#allocation8 + $0x378] sm:$0xff]  ;;  %v1380_v42 = vld [vmem:[#allocation8 + $0xa40] sm:$0xff]  ;;  %v1261_v59 = vld [vmem:[#allocation8 + $0x688] sm:$0xff] }
 0x25e   : > { %v1916_v21 = vpop.f32.mrf.mxu1 }
 0x25f   : > { %9996 = vst [vmem:[#allocation40_spill] sm:$0xff] %v6710_v38  ;;  %v6712_v15 = vadd.f32 %v1916_v21, %v1743_v55  ;;  %v1747_v32 = vpop.f32.mrf.mxu0  ;;  %2365 = vmatmul.mubr.bf16.gmra.mxu0 %v6617_v34  ;;  %v1254_v38 = vld [vmem:[#allocation8 + $0x650] sm:$0xff] }
 0x260   : > { %v1920_v8 = vpop.f32.mrf.mxu1  ;;  %2192 = vmatmul.mubr.bf16.gmra.mxu1 %v6615_v51  ;;  %5200 = vmatprep.mubr.msk.bf16.mxu0 %vm1640_vm1, %v6086_v48  ;;  %v1499_v48 = vpack.c.bf16 %v1163_v25, %v1156_v29  ;;  %v1352_v25 = vld [vmem:[#allocation8 + $0x960] sm:$0xff] }
 0x261   : > { %9997 = vst [vmem:[#allocation52_spill] sm:$0xff] %v6712_v15  ;;  %v6718_v62 = vadd.f32 %v1920_v8, %v1747_v32  ;;  %2407 = vmatprep.mubr.bf16.mxu1 %v6079_v41  ;;  %v1749_v11 = vpop.f32.mrf.mxu0  ;;  %v1387_v15 = vld [vmem:[#allocation8 + $0xa78] sm:$0xff]  ;;  %v1142_v41 = vld [vmem:[#allocation8 + $0x2d0] sm:$0xff] }
 0x262   : > { %v1922_v57 = vpop.f32.mrf.mxu1  ;;  %v6725_v32 = vpack.c.bf16 %v1387_v15, %v1380_v42  ;;  %v1541_v42 = vpack.c.bf16 %v1247_v6, %v1240_v18  ;;  %v1338_v18 = vld [vmem:[#allocation8 + $0x8f0] sm:$0xff] }
 0x263   : > { %9998 = vst [vmem:[#allocation53_spill] sm:$0xff] %v6718_v62  ;;  %v6721_v21 = vadd.f32 %v1922_v57, %v1749_v11  ;;  %v1751_v55 = vpop.f32.mrf.mxu0  ;;  %v1548_v62 = vpack.c.bf16 %v1261_v59, %v1254_v38  ;;  %v10003_v57 = vld [vmem:[#allocation20_spill] sm:$0xff] }
 0x264   : > { %v1924_v31 = vpop.f32.mrf.mxu1  ;;  %10001 = vst [vmem:[#allocation56_spill] sm:$0xff] %v6725_v32 }
 0x265   : > { %9999 = vst [vmem:[#allocation54_spill] sm:$0xff] %v6721_v21  ;;  %v6723_v51 = vadd.f32 %v1924_v31, %v1751_v55  ;;  %v1753_v34 = vpop.f32.mrf.mxu0  ;;  %v1373_v21 = vld [vmem:[#allocation8 + $0xa08] sm:$0xff]  ;;  %v10004_v31 = vld [vmem:[#allocation17_spill] sm:$0xff] }
 0x266   : > { %v1926_v8 = vpop.f32.mrf.mxu1  ;;  %v10005_v55 = vld [vmem:[#allocation21_spill] sm:$0xff]  ;;  %v6737_v29 = vpack.c.bf16 %v1373_v21, %v1366_v7 }
 0x267   : > { %10000 = vst [vmem:[#allocation55_spill] sm:$0xff] %v6723_v51  ;;  %v6727_v60 = vadd.f32 %v1926_v8, %v1753_v34  ;;  %v1757_v11 = vpop.f32.mrf.mxu0  ;;  %2581 = vmatmul.mubr.bf16.vlgmr.msra.gmra.mxu0 %v10003_v57  ;;  %v1492_v34 = vpack.c.bf16 %v1149_v43, %v1142_v41  ;;  %v1128_v8 = vld [vmem:[#allocation8 + $0x260] sm:$0xff] }
 0x268   : > { %v1930_v20 = vpop.f32.mrf.mxu1  ;;  %2408 = vmatmul.mubr.bf16.vlgmr.msra.gmra.mxu1 %v10004_v31  ;;  %5201 = vmatprep.mubr.msk.bf16.mxu0 %vm1640_vm1, %v10005_v55 }
 0x269   : > { %10002 = vst [vmem:[#allocation57_spill] sm:$0xff] %v6727_v60  ;;  %v6733_v15 = vadd.f32 %v1930_v20, %v1757_v11  ;;  %5235 = vmatpush3.bf16.msra.mxu1 %v1499_v48  ;;  %2417 = vmatprep.mubr.bf16.mxu1 %v6088_v50  ;;  %v1759_v59 = vpop.f32.mrf.mxu0  ;;  %v1135_v60 = vld [vmem:[#allocation8 + $0x298] sm:$0xff]  ;;  %v1226_v20 = vld [vmem:[#allocation8 + $0x570] sm:$0xff]  ;;  %v1233_v11 = vld [vmem:[#allocation8 + $0x5a8] sm:$0xff] }
 0x26a   : > { %v1932_v38 = vpop.f32.mrf.mxu1  ;;  %2867 = vmatpush1.bf16.msra.mxu0 %v6725_v32  ;;  %5236 = vmatprep.subr.bf16.mxu1 %v1548_v62  ;;  %v1359_v48 = vld [vmem:[#allocation8 + $0x998] sm:$0xff]  ;;  %v1485_v62 = vpack.c.bf16 %v1135_v60, %v1128_v8  ;;  %v1534_v21 = vpack.c.bf16 %v1233_v11, %v1226_v20  ;;  %v1324_v11 = vld [vmem:[#allocation8 + $0x880] sm:$0xff] }
 0x26b   : > { %10006 = vst [vmem:[#allocation20_spill] sm:$0xff] %v6733_v15  ;;  %v6739_v51 = vadd.f32 %v1932_v38, %v1759_v59  ;;  %v1761_v55 = vpop.f32.mrf.mxu0  ;;  %2868 = vmatprep.subr.bf16.mxu0 %v9974_v23  ;;  %v6745_v6 = vpack.c.bf16 %v1359_v48, %v1352_v25  ;;  %v1114_v59 = vld [vmem:[#allocation8 + $0x1f0] sm:$0xff]  ;;  %v1121_v38 = vld [vmem:[#allocation8 + $0x228] sm:$0xff]  ;;  %v1219_v60 = vld [vmem:[#allocation8 + $0x538] sm:$0xff] }
 0x26c   : > { %v1934_v15 = vpop.f32.mrf.mxu1  ;;  %v1478_v8 = vpack.c.bf16 %v1121_v38, %v1114_v59 }
 0x26d   : > { %10007 = vst [vmem:[#allocation17_spill] sm:$0xff] %v6739_v51  ;;  %v6742_v41 = vadd.f32 %v1934_v15, %v1761_v55  ;;  %v1763_v43 = vpop.f32.mrf.mxu0  ;;  %5237 = vmatpush3.bf16.msra.mxu1 %v1492_v34  ;;  %10009 = vst [vmem:[#allocation59_spill] sm:$0xff] %v6745_v6  ;;  %v1345_v55 = vld [vmem:[#allocation8 + $0x928] sm:$0xff]  ;;  %v1212_v15 = vld [vmem:[#allocation8 + $0x500] sm:$0xff] }
 0x26e   : > { %v1936_v7 = vpop.f32.mrf.mxu1  ;;  %2869 = vmatpush1.bf16.msra.mxu0 %v6737_v29  ;;  %5238 = vmatprep.subr.bf16.mxu1 %v1541_v42  ;;  %v6758_v20 = vpack.c.bf16 %v1345_v55, %v1338_v18 }
 0x26f   : > { %10008 = vst [vmem:[#allocation58_spill] sm:$0xff] %v6742_v41  ;;  %v6747_v51 = vadd.f32 %v1936_v7, %v1763_v43  ;;  %v1767_v32 = vpop.f32.mrf.mxu0  ;;  %2591 = vmatmul.mubr.bf16.gmra.mxu0 %v6159_v46  ;;  %2870 = vmatprep.subr.bf16.mxu0 %v9974_v23  ;;  %v1527_v43 = vpack.c.bf16 %v1219_v60, %v1212_v15  ;;  %v1100_v7 = vld [vmem:[#allocation8 + $0x180] sm:$0xff]  ;;  %v1310_v15 = vld [vmem:[#allocation8 + $0x810] sm:$0xff] }
 0x270   : > { %v1940_v34 = vpop.f32.mrf.mxu1  ;;  %2418 = vmatmul.mubr.bf16.gmra.mxu1 %v6150_v40  ;;  %5202 = vmatprep.mubr.msk.bf16.mxu0 %vm1640_vm1, %v6171_v54 }
 0x271   : > { %10010 = vst [vmem:[#allocation60_spill] sm:$0xff] %v6747_v51  ;;  %v6754_v25 = vadd.f32 %v1940_v34, %v1767_v32  ;;  %2427 = vmatprep.mubr.bf16.mxu1 %v6161_v47  ;;  %v1769_v42 = vpop.f32.mrf.mxu0  ;;  %5239 = vmatpush3.bf16.msra.mxu1 %v1485_v62  ;;  %v1107_v51 = vld [vmem:[#allocation8 + $0x1b8] sm:$0xff]  ;;  %v1198_v34 = vld [vmem:[#allocation8 + $0x490] sm:$0xff] }
 0x272   : > { %v1942_v48 = vpop.f32.mrf.mxu1  ;;  %2871 = vmatpush1.bf16.msra.mxu0 %v6745_v6  ;;  %5240 = vmatprep.subr.bf16.mxu1 %v1534_v21  ;;  %v1331_v32 = vld [vmem:[#allocation8 + $0x8b8] sm:$0xff]  ;;  %v1471_v18 = vpack.c.bf16 %v1107_v51, %v1100_v7 }
 0x273   : > { %10011 = vst [vmem:[#allocation61_spill] sm:$0xff] %v6754_v25  ;;  %v6760_v41 = vadd.f32 %v1942_v48, %v1769_v42  ;;  %v1771_v54 = vpop.f32.mrf.mxu0  ;;  %2872 = vmatprep.subr.bf16.mxu0 %v9974_v23  ;;  %v1205_v25 = vld [vmem:[#allocation8 + $0x4c8] sm:$0xff]  ;;  %v6766_v21 = vpack.c.bf16 %v1331_v32, %v1324_v11  ;;  %v1086_v42 = vld [vmem:[#allocation8 + $0x110] sm:$0xff]  ;;  %v1191_v51 = vld [vmem:[#allocation8 + $0x458] sm:$0xff] }
 0x274   : > { %v1944_v62 = vpop.f32.mrf.mxu1  ;;  %v1520_v60 = vpack.c.bf16 %v1205_v25, %v1198_v34  ;;  %v1093_v48 = vld [vmem:[#allocation8 + $0x148] sm:$0xff]  ;;  %v10016_v25 = vld [vmem:[#allocation24_spill] sm:$0xff] }
 0x275   : > { %10012 = vst [vmem:[#allocation62_spill] sm:$0xff] %v6760_v41  ;;  %v6763_v59 = vadd.f32 %v1944_v62, %v1771_v54  ;;  %v1773_v38 = vpop.f32.mrf.mxu0  ;;  %5241 = vmatpush3.bf16.msra.mxu1 %v1478_v8  ;;  %v1317_v54 = vld [vmem:[#allocation8 + $0x848] sm:$0xff]  ;;  %v1184_v8 = vld [vmem:[#allocation8 + $0x420] sm:$0xff]  ;;  %v1464_v32 = vpack.c.bf16 %v1093_v48, %v1086_v42 }
 0x276   : > { %v1946_v55 = vpop.f32.mrf.mxu1  ;;  %2873 = vmatpush1.bf16.msra.mxu0 %v6758_v20  ;;  %5242 = vmatprep.subr.bf16.mxu1 %v1527_v43  ;;  %v6779_v62 = vpack.c.bf16 %v1317_v54, %v1310_v15 }
 0x277   : > { %10013 = vst [vmem:[#allocation63_spill] sm:$0xff] %v6763_v59  ;;  %v6768_v41 = vadd.f32 %v1946_v55, %v1773_v38  ;;  %v1777_v6 = vpop.f32.mrf.mxu0  ;;  %2601 = vmatmul.mubr.bf16.gmra.mxu0 %v6218_v44  ;;  %2874 = vmatprep.subr.bf16.mxu0 %v9974_v23  ;;  %v1296_v38 = vld [vmem:[#allocation8 + $0x7a0] sm:$0xff]  ;;  %v1513_v55 = vpack.c.bf16 %v1191_v51, %v1184_v8  ;;  %v1079_v59 = vld [vmem:[#allocation8 + $0xd8] sm:$0xff]  ;;  %v1058_v51 = vld [vmem:[#allocation8 + $0x30] sm:$0xff] }
 0x278   : > { %v1950_v7 = vpop.f32.mrf.mxu1  ;;  %2428 = vmatmul.mubr.bf16.gmra.mxu1 %v6209_v37  ;;  %5203 = vmatprep.mubr.msk.bf16.mxu0 %vm1640_vm1, %v6230_v52 }
 0x279   : > { %10014 = vst [vmem:[#allocation64_spill] sm:$0xff] %v6768_v41  ;;  %v6775_v11 = vadd.f32 %v1950_v7, %v1777_v6  ;;  %2437 = vmatprep.mubr.bf16.mxu1 %v10016_v25  ;;  %v1779_v43 = vpop.f32.mrf.mxu0  ;;  %5243 = vmatpush3.bf16.msra.mxu1 %v1471_v18  ;;  %v1072_v41 = vld [vmem:[#allocation8 + $0xa0] sm:$0xff]  ;;  %v1303_v6 = vld [vmem:[#allocation8 + $0x7d8] sm:$0xff]  ;;  %v1170_v7 = vld [vmem:[#allocation8 + $0x3b0] sm:$0xff] }
 0x27a   : > { %v1952_v34 = vpop.f32.mrf.mxu1  ;;  %2875 = vmatpush1.bf16.msra.mxu0 %v6766_v21  ;;  %5244 = vmatprep.subr.bf16.mxu1 %v1520_v60  ;;  %v1457_v15 = vpack.c.bf16 %v1079_v59, %v1072_v41  ;;  %v6787_v60 = vpack.c.bf16 %v1303_v6, %v1296_v38 }
 0x27b   : > { %10015 = vst [vmem:[#allocation65_spill] sm:$0xff] %v6775_v11  ;;  %v6781_v37 = vadd.f32 %v1952_v34, %v1779_v43  ;;  %v1781_v52 = vpop.f32.mrf.mxu0  ;;  %2876 = vmatprep.subr.bf16.mxu0 %v9974_v23  ;;  %v1177_v11 = vld [vmem:[#allocation8 + $0x3e8] sm:$0xff] }
 0x27c   : > { %v1954_v18 = vpop.f32.mrf.mxu1  ;;  %v1506_v8 = vpack.c.bf16 %v1177_v11, %v1170_v7  ;;  %v1065_v43 = vld [vmem:[#allocation8 + $0x68] sm:$0xff] }
 0x27d   : > { %10017 = vst [vmem:[#allocation24_spill] sm:$0xff] %v6781_v37  ;;  %v6784_v42 = vadd.f32 %v1954_v18, %v1781_v52  ;;  %v1783_v48 = vpop.f32.mrf.mxu0  ;;  %5245 = vmatpush3.bf16.msra.mxu1 %v1464_v32  ;;  %v1282_v52 = vld [vmem:[#allocation8 + $0x730] sm:$0xff]  ;;  %v1289_v18 = vld [vmem:[#allocation8 + $0x768] sm:$0xff]  ;;  %v1450_v11 = vpack.c.bf16 %v1065_v43, %v1058_v51 }
 0x27e   : > { %v1956_v54 = vpop.f32.mrf.mxu1  ;;  %2877 = vmatpush1.bf16.msra.mxu0 %v6779_v62  ;;  %5246 = vmatprep.subr.bf16.mxu1 %v1513_v55  ;;  %v6800_v55 = vpack.c.bf16 %v1289_v18, %v1282_v52  ;;  %v1422_v52 = vld [vmem:[#allocation8 + $0xb90] sm:$0xff]  ;;  %v1429_v18 = vld [vmem:[#allocation8 + $0xbc8] sm:$0xff] }
 0x27f   : > { %10018 = vst [vmem:[#allocation66_spill] sm:$0xff] %v6784_v42  ;;  %v6789_v34 = vadd.f32 %v1956_v54, %v1783_v48  ;;  %v1787_v37 = vpop.f32.mrf.mxu0  ;;  %2611 = vmatmul.mubr.bf16.gmra.mxu0 %v6277_v27  ;;  %2878 = vmatprep.subr.bf16.mxu0 %v9974_v23  ;;  %v1436_v48 = vld [vmem:[#allocation8 + $0xc00] sm:$0xff]  ;;  %v1443_v54 = vld [vmem:[#allocation8 + $0xc38] sm:$0xff] }
 0x280   : > { %v1960_v32 = vpop.f32.mrf.mxu1  ;;  %2438 = vmatmul.mubr.bf16.gmra.mxu1 %v6268_v39  ;;  %5204 = vmatprep.mubr.msk.bf16.mxu0 %vm1640_vm1, %v6289_v58  ;;  %v6808_v51 = vpack.c.bf16 %v1443_v54, %v1436_v48  ;;  %v10027_v48 = vld [vmem:[#allocation27_spill] sm:$0xff] }
 0x281   : > { %10019 = vst [vmem:[#allocation67_spill] sm:$0xff] %v6789_v34  ;;  %v6796_v41 = vadd.f32 %v1960_v32, %v1787_v37  ;;  %2447 = vmatprep.mubr.bf16.mxu1 %v6279_v45  ;;  %v1789_v59 = vpop.f32.mrf.mxu0  ;;  %5247 = vmatpush3.bf16.msra.mxu1 %v1457_v15 }
 0x282   : > { %v1962_v38 = vpop.f32.mrf.mxu1  ;;  %2879 = vmatpush1.bf16.msra.mxu0 %v6787_v60  ;;  %5248 = vmatprep.subr.bf16.mxu1 %v1506_v8 }
 0x283   : > { %10020 = vst [vmem:[#allocation68_spill] sm:$0xff] %v6796_v41  ;;  %v6802_v6 = vadd.f32 %v1962_v38, %v1789_v59  ;;  %v1791_v7 = vpop.f32.mrf.mxu0  ;;  %2880 = vmatprep.subr.bf16.mxu0 %v9974_v23  ;;  %v10024_v38 = vld [vmem:[#allocation26_spill] sm:$0xff] }
 0x284   : > { %v1964_v37 = vpop.f32.mrf.mxu1 }
 0x285   : > { %10021 = vst [vmem:[#allocation69_spill] sm:$0xff] %v6802_v6  ;;  %v6805_v32 = vadd.f32 %v1964_v37, %v1791_v7  ;;  %v1793_v41 = vpop.f32.mrf.mxu0  ;;  %5249 = vmatpush3.bf16.msra.mxu1 %v1450_v11  ;;  %v10025_v11 = vld [vmem:[#allocation28_spill] sm:$0xff]  ;;  %v6822_v37 = vpack.c.bf16 %v1429_v18, %v1422_v52  ;;  %v1394_v18 = vld [vmem:[#allocation8 + $0xab0] sm:$0xff] }
 0x286   : > { %v1966_v15 = vpop.f32.mrf.mxu1  ;;  %2881 = vmatpush1.bf16.msra.mxu0 %v6800_v55  ;;  %5334 = vmatprep.subr.bf16.mxu1 %v9974_v23  ;;  %v1415_v6 = vld [vmem:[#allocation8 + $0xb58] sm:$0xff] }
 0x287   : > { %10022 = vst [vmem:[#allocation70_spill] sm:$0xff] %v6805_v32  ;;  %v6811_v8 = vadd.f32 %v1966_v15, %v1793_v41  ;;  %v1797_v43 = vpop.f32.mrf.mxu0  ;;  %2621 = vmatmul.mubr.bf16.gmra.mxu0 %v6336_v63  ;;  %2890 = vmatprep.subr.bf16.mxu0 %v9974_v23  ;;  %v1408_v32 = vld [vmem:[#allocation8 + $0xb20] sm:$0xff] }
 0x288   : > { %v1970_v59 = vpop.f32.mrf.mxu1  ;;  %2448 = vmatmul.mubr.bf16.gmra.mxu1 %v10024_v38  ;;  %5205 = vmatprep.mubr.msk.bf16.mxu0 %vm1640_vm1, %v10025_v11 }
 0x289   : > { %10023 = vst [vmem:[#allocation71_spill] sm:$0xff] %v6811_v8  ;;  %v6818_v7 = vadd.f32 %v1970_v59, %v1797_v43  ;;  %2457 = vmatprep.mubr.bf16.mxu1 %v10027_v48  ;;  %v1799_v54 = vpop.f32.mrf.mxu0 }
 0x28a   : > { %v1972_v41 = vpop.f32.mrf.mxu1  ;;  %2891 = vmatpush2.bf16.msra.mxu0 %v6808_v51 }
 0x28b   : > { %10026 = vst [vmem:[#allocation26_spill] sm:$0xff] %v6818_v7  ;;  %v6824_v15 = vadd.f32 %v1972_v41, %v1799_v54  ;;  %v1801_v8 = vpop.f32.mrf.mxu0  ;;  %2892 = vmatprep.subr.bf16.mxu0 %v9974_v23  ;;  %v6830_v7 = vpack.c.bf16 %v1415_v6, %v1408_v32  ;;  %v1401_v54 = vld [vmem:[#allocation8 + $0xae8] sm:$0xff] }
 0x28c   : > { %v1974_v34 = vpop.f32.mrf.mxu1 }
 0x28d   : > { %10028 = vst [vmem:[#allocation28_spill] sm:$0xff] %v6824_v15  ;;  %v6827_v42 = vadd.f32 %v1974_v34, %v1801_v8  ;;  %v1803_v43 = vpop.f32.mrf.mxu0  ;;  %v6843_v8 = vpack.c.bf16 %v1401_v54, %v1394_v18 }
 0x28e   : > { %v1976_v59 = vpop.f32.mrf.mxu1  ;;  %2893 = vmatpush2.bf16.msra.mxu0 %v6822_v37 }
 0x28f   : > { %10029 = vst [vmem:[#allocation72_spill] sm:$0xff] %v6827_v42  ;;  %v6832_v48 = vadd.f32 %v1976_v59, %v1803_v43  ;;  %v1807_v52 = vpop.f32.mrf.mxu0  ;;  %2631 = vmatmul.mubr.bf16.gmra.mxu0 %v6389_v53  ;;  %2894 = vmatprep.subr.bf16.mxu0 %v9974_v23 }
 0x290   : > { %v1980_v41 = vpop.f32.mrf.mxu1  ;;  %2458 = vmatmul.mubr.bf16.gmra.mxu1 %v6386_v14  ;;  %5206 = vmatprep.mubr.msk.bf16.mxu0 %vm1640_vm1, %v6401_v61 }
 0x291   : > { %10030 = vst [vmem:[#allocation73_spill] sm:$0xff] %v6832_v48  ;;  %v6839_v34 = vadd.f32 %v1980_v41, %v1807_v52  ;;  %2467 = vmatprep.mubr.bf16.mxu1 %v6391_v3  ;;  %v1809_v6 = vpop.f32.mrf.mxu0 }
 0x292   : > { %v1982_v32 = vpop.f32.mrf.mxu1  ;;  %2895 = vmatpush2.bf16.msra.mxu0 %v6830_v7 }
 0x293   : > { %10031 = vst [vmem:[#allocation74_spill] sm:$0xff] %v6839_v34  ;;  %v6845_v43 = vadd.f32 %v1982_v32, %v1809_v6  ;;  %v1811_v59 = vpop.f32.mrf.mxu0  ;;  %2896 = vmatprep.subr.bf16.mxu0 %v9974_v23 }
 0x294   : > { %v1984_v48 = vpop.f32.mrf.mxu1 }
 0x295   : > { %10032 = vst [vmem:[#allocation75_spill] sm:$0xff] %v6845_v43  ;;  %v6848_v42 = vadd.f32 %v1984_v48, %v1811_v59  ;;  %v1813_v15 = vpop.f32.mrf.mxu0 }
 0x296   : > { %v1986_v61 = vpop.f32.mrf.mxu1  ;;  %2897 = vmatpush2.bf16.msra.mxu0 %v6843_v8 }
 0x297   : > { %10033 = vst [vmem:[#allocation76_spill] sm:$0xff] %v6848_v42  ;;  %v6851_v52 = vadd.f32 %v1986_v61, %v1813_v15  ;;  %v1817_v41 = vpop.f32.mrf.mxu0  ;;  %2641 = vmatmul.mubr.bf16.gmra.mxu0 %v6436_v26 }
 0x298   : > { %v1990_v34 = vpop.f32.mrf.mxu1  ;;  %2468 = vmatmul.mubr.bf16.gmra.mxu1 %v6429_v24  ;;  %5207 = vmatprep.mubr.msk.bf16.mxu0 %vm1640_vm1, %v6445_v19 }
 0x299   : > { %10034 = vst [vmem:[#allocation77_spill] sm:$0xff] %v6851_v52  ;;  %v6857_v18 = vadd.f32 %v1990_v34, %v1817_v41  ;;  %2477 = vmatprep.mubr.bf16.mxu1 %v6438_v28  ;;  %v1819_v48 = vpop.f32.mrf.mxu0 }
 0x29a   : > { %v1992_v54 = vpop.f32.mrf.mxu1 }
 0x29b   : > { %10035 = vst [vmem:[#allocation78_spill] sm:$0xff] %v6857_v18  ;;  %v6860_v6 = vadd.f32 %v1992_v54, %v1819_v48  ;;  %v1821_v32 = vpop.f32.mrf.mxu0 }
 0x29c   : > { %v1994_v61 = vpop.f32.mrf.mxu1 }
 0x29d   : > { %10036 = vst [vmem:[#allocation79_spill] sm:$0xff] %v6860_v6  ;;  %v6862_v15 = vadd.f32 %v1994_v61, %v1821_v32  ;;  %v1823_v59 = vpop.f32.mrf.mxu0 }
 0x29e   : > { %v1996_v52 = vpop.f32.mrf.mxu1 }
 0x29f   : > { %10037 = vst [vmem:[#allocation80_spill] sm:$0xff] %v6862_v15  ;;  %v6864_v42 = vadd.f32 %v1996_v52, %v1823_v59  ;;  %v1827_v43 = vpop.f32.mrf.mxu0  ;;  %2651 = vmatmul.mubr.bf16.gmra.mxu0 %v6475_v30 }
 0x2a0   : > { %v2000_v19 = vpop.f32.mrf.mxu1  ;;  %2478 = vmatmul.mubr.bf16.gmra.mxu1 %v6470_v9  ;;  %5208 = vmatprep.mubr.msk.bf16.mxu0 %vm1640_vm1, %v6482_v49 }
 0x2a1   : > { %10038 = vst [vmem:[#allocation81_spill] sm:$0xff] %v6864_v42  ;;  %v6870_v34 = vadd.f32 %v2000_v19, %v1827_v43  ;;  %2487 = vmatprep.mubr.bf16.mxu1 %v6477_v2  ;;  %v1829_v41 = vpop.f32.mrf.mxu0 }
 0x2a2   : > { %v2002_v48 = vpop.f32.mrf.mxu1 }
 0x2a3   : > { %10039 = vst [vmem:[#allocation82_spill] sm:$0xff] %v6870_v34  ;;  %v6873_v54 = vadd.f32 %v2002_v48, %v1829_v41  ;;  %v1831_v32 = vpop.f32.mrf.mxu0 }
 0x2a4   : > { %v2004_v52 = vpop.f32.mrf.mxu1 }
 0x2a5   : > { %10040 = vst [vmem:[#allocation83_spill] sm:$0xff] %v6873_v54  ;;  %v6875_v61 = vadd.f32 %v2004_v52, %v1831_v32  ;;  %v1833_v59 = vpop.f32.mrf.mxu0 }
 0x2a6   : > { %v2006_v42 = vpop.f32.mrf.mxu1 }
 0x2a7   : > { %10041 = vst [vmem:[#allocation84_spill] sm:$0xff] %v6875_v61  ;;  %v6877_v15 = vadd.f32 %v2006_v42, %v1833_v59  ;;  %v1837_v6 = vpop.f32.mrf.mxu0  ;;  %2661 = vmatmul.mubr.bf16.gmra.mxu0 %v6502_v5 }
 0x2a8   : > { %v2010_v18 = vpop.f32.mrf.mxu1  ;;  %2488 = vmatmul.mubr.bf16.gmra.mxu1 %v9975_v56  ;;  %5209 = vmatprep.mubr.msk.bf16.mxu0 %vm1640_vm1, %v9976_v10 }
 0x2a9   : > { %10042 = vst [vmem:[#allocation85_spill] sm:$0xff] %v6877_v15  ;;  %v6883_v19 = vadd.f32 %v2010_v18, %v1837_v6  ;;  %2497 = vmatprep.mubr.bf16.mxu1 %v9977_v17  ;;  %v1839_v43 = vpop.f32.mrf.mxu0 }
 0x2aa   : > { %v2012_v41 = vpop.f32.mrf.mxu1 }
 0x2ab   : > { %10043 = vst [vmem:[#allocation86_spill] sm:$0xff] %v6883_v19  ;;  %v6886_v48 = vadd.f32 %v2012_v41, %v1839_v43  ;;  %v1841_v32 = vpop.f32.mrf.mxu0 }
 0x2ac   : > { %v2014_v42 = vpop.f32.mrf.mxu1 }
 0x2ad   : > { %10044 = vst [vmem:[#allocation87_spill] sm:$0xff] %v6886_v48  ;;  %v6888_v52 = vadd.f32 %v2014_v42, %v1841_v32  ;;  %v1843_v59 = vpop.f32.mrf.mxu0 }
 0x2ae   : > { %v2016_v15 = vpop.f32.mrf.mxu1 }
 0x2af   : > { %10045 = vst [vmem:[#allocation88_spill] sm:$0xff] %v6888_v52  ;;  %v6890_v61 = vadd.f32 %v2016_v15, %v1843_v59  ;;  %v1847_v54 = vpop.f32.mrf.mxu0  ;;  %2671 = vmatmul.mubr.bf16.gmra.mxu0 %v9978_v16 }
 0x2b0   : > { %v2020_v34 = vpop.f32.mrf.mxu1  ;;  %2498 = vmatmul.mubr.bf16.gmra.mxu1 %v9979_v22  ;;  %5210 = vmatprep.mubr.msk.bf16.mxu0 %vm1640_vm1, %v9980_v1 }
 0x2b1   : > { %10046 = vst [vmem:[#allocation89_spill] sm:$0xff] %v6890_v61  ;;  %v6896_v18 = vadd.f32 %v2020_v34, %v1847_v54  ;;  %2507 = vmatprep.mubr.bf16.mxu1 %v9981_v12  ;;  %v1849_v6 = vpop.f32.mrf.mxu0 }
 0x2b2   : > { %v2022_v43 = vpop.f32.mrf.mxu1 }
 0x2b3   : > { %10047 = vst [vmem:[#allocation90_spill] sm:$0xff] %v6896_v18  ;;  %v6899_v41 = vadd.f32 %v2022_v43, %v1849_v6  ;;  %v1851_v32 = vpop.f32.mrf.mxu0 }
 0x2b4   : > { %v2024_v15 = vpop.f32.mrf.mxu1 }
 0x2b5   : > { %10048 = vst [vmem:[#allocation91_spill] sm:$0xff] %v6899_v41  ;;  %v6901_v42 = vadd.f32 %v2024_v15, %v1851_v32  ;;  %v1853_v59 = vpop.f32.mrf.mxu0 }
 0x2b6   : > { %v2026_v61 = vpop.f32.mrf.mxu1 }
 0x2b7   : > { %10049 = vst [vmem:[#allocation92_spill] sm:$0xff] %v6901_v42  ;;  %v6903_v52 = vadd.f32 %v2026_v61, %v1853_v59  ;;  %v2236_v48 = vpop.f32.mrf.mxu0  ;;  %2681 = vmatmul.mubr.bf16.gmra.mxu0 %v9982_v35 }
 0x2b8   : > { %v2063_v19 = vpop.f32.mrf.mxu1  ;;  %2508 = vmatmul.mubr.bf16.gmra.mxu1 %v9983_v0  ;;  %5211 = vmatprep.mubr.msk.bf16.mxu0 %vm1640_vm1, %v9984_v36 }
 0x2b9   : > { %10050 = vst [vmem:[#allocation93_spill] sm:$0xff] %v6903_v52  ;;  %v6909_v34 = vadd.f32 %v2236_v48, %v2063_v19  ;;  %2517 = vmatprep.mubr.bf16.mxu1 %v9986_v4  ;;  %v2238_v54 = vpop.f32.mrf.mxu0  ;;  %v10055_v19 = vld [vmem:[#allocation45_spill] sm:$0xff] }
 0x2ba   : > { %v2065_v6 = vpop.f32.mrf.mxu1 }
 0x2bb   : > { %10051 = vst [vmem:[#allocation94_spill] sm:$0xff] %v6909_v34  ;;  %v6912_v43 = vadd.f32 %v2238_v54, %v2065_v6  ;;  %v2240_v32 = vpop.f32.mrf.mxu0  ;;  %v10057_v54 = vld [vmem:[#allocation44_spill] sm:$0xff] }
 0x2bc   : > { %v2067_v61 = vpop.f32.mrf.mxu1 }
 0x2bd   : > { %10052 = vst [vmem:[#allocation95_spill] sm:$0xff] %v6912_v43  ;;  %v6914_v15 = vadd.f32 %v2240_v32, %v2067_v61  ;;  %v2242_v59 = vpop.f32.mrf.mxu0 }
 0x2be   : > { %v2069_v52 = vpop.f32.mrf.mxu1 }
 0x2bf   : > { %10053 = vst [vmem:[#allocation96_spill] sm:$0xff] %v6914_v15  ;;  %v6916_v42 = vadd.f32 %v2242_v59, %v2069_v52  ;;  %v2246_v41 = vpop.f32.mrf.mxu0  ;;  %2691 = vmatmul.mubr.bf16.gmra.mxu0 %v6577_v33  ;;  %v10061_v33 = vld [vmem:[#allocation47_spill] sm:$0xff] }
 0x2c0   : > { %v2073_v18 = vpop.f32.mrf.mxu1  ;;  %2518 = vmatmul.mubr.bf16.gmra.mxu1 %v6575_v13  ;;  %5212 = vmatprep.mubr.msk.bf16.mxu0 %vm1640_vm1, %v10055_v19 }
 0x2c1   : > { %10054 = vst [vmem:[#allocation97_spill] sm:$0xff] %v6916_v42  ;;  %v6922_v48 = vadd.f32 %v2246_v41, %v2073_v18  ;;  %2527 = vmatprep.mubr.bf16.mxu1 %v10057_v54  ;;  %v2248_v6 = vpop.f32.mrf.mxu0  ;;  %v10062_v18 = vld [vmem:[#allocation46_spill] sm:$0xff]  ;;  %v10063_v41 = vld [vmem:[#allocation49_spill] sm:$0xff]  ;;  %v10069_v54 = vld [vmem:[#allocation51_spill] sm:$0xff] }
 0x2c2   : > { %v2075_v32 = vpop.f32.mrf.mxu1 }
 0x2c3   : > { %10056 = vst [vmem:[#allocation98_spill] sm:$0xff] %v6922_v48  ;;  %v6925_v61 = vadd.f32 %v2248_v6, %v2075_v32  ;;  %v2250_v15 = vpop.f32.mrf.mxu0  ;;  %v10065_v6 = vld [vmem:[#allocation48_spill] sm:$0xff] }
 0x2c4   : > { %v2077_v52 = vpop.f32.mrf.mxu1 }
 0x2c5   : > { %10058 = vst [vmem:[#allocation99_spill] sm:$0xff] %v6925_v61  ;;  %v6927_v59 = vadd.f32 %v2250_v15, %v2077_v52  ;;  %v2252_v42 = vpop.f32.mrf.mxu0 }
 0x2c6   : > { %v2079_v43 = vpop.f32.mrf.mxu1 }
 0x2c7   : > { %10059 = vst [vmem:[#allocation100_spill] sm:$0xff] %v6927_v59  ;;  %v6929_v34 = vadd.f32 %v2252_v42, %v2079_v43  ;;  %v2256_v13 = vpop.f32.mrf.mxu0  ;;  %2701 = vmatmul.mubr.bf16.gmra.mxu0 %v10061_v33 }
 0x2c8   : > { %v2083_v19 = vpop.f32.mrf.mxu1  ;;  %2528 = vmatmul.mubr.bf16.gmra.mxu1 %v10062_v18  ;;  %5213 = vmatprep.mubr.msk.bf16.mxu0 %vm1640_vm1, %v10063_v41 }
 0x2c9   : > { %10060 = vst [vmem:[#allocation101_spill] sm:$0xff] %v6929_v34  ;;  %v6935_v48 = vadd.f32 %v2256_v13, %v2083_v19  ;;  %2537 = vmatprep.mubr.bf16.mxu1 %v10065_v6  ;;  %v2258_v32 = vpop.f32.mrf.mxu0  ;;  %v10070_v13 = vld [vmem:[#allocation50_spill] sm:$0xff]  ;;  %v10071_v19 = vld [vmem:[#allocation19_spill] sm:$0xff] }
 0x2ca   : > { %v2085_v15 = vpop.f32.mrf.mxu1 }
 0x2cb   : > { %10064 = vst [vmem:[#allocation102_spill] sm:$0xff] %v6935_v48  ;;  %v6938_v52 = vadd.f32 %v2258_v32, %v2085_v15  ;;  %v2260_v59 = vpop.f32.mrf.mxu0  ;;  %v10073_v32 = vld [vmem:[#allocation18_spill] sm:$0xff] }
 0x2cc   : > { %v2087_v42 = vpop.f32.mrf.mxu1 }
 0x2cd   : > { %10066 = vst [vmem:[#allocation48_spill] sm:$0xff] %v6938_v52  ;;  %v6940_v43 = vadd.f32 %v2260_v59, %v2087_v42  ;;  %v2262_v34 = vpop.f32.mrf.mxu0 }
 0x2ce   : > { %v2089_v61 = vpop.f32.mrf.mxu1 }
 0x2cf   : > { %10067 = vst [vmem:[#allocation103_spill] sm:$0xff] %v6940_v43  ;;  %v6942_v33 = vadd.f32 %v2262_v34, %v2089_v61  ;;  %v2266_v18 = vpop.f32.mrf.mxu0  ;;  %2711 = vmatmul.mubr.bf16.gmra.mxu0 %v10069_v54 }
 0x2d0   : > { %v2093_v41 = vpop.f32.mrf.mxu1  ;;  %2538 = vmatmul.mubr.bf16.gmra.mxu1 %v10070_v13  ;;  %5214 = vmatprep.mubr.msk.bf16.mxu0 %vm1640_vm1, %v10071_v19 }
 0x2d1   : > { %10068 = vst [vmem:[#allocation104_spill] sm:$0xff] %v6942_v33  ;;  %v6948_v48 = vadd.f32 %v2266_v18, %v2093_v41  ;;  %2753 = vmatprep.mubr.bf16.mxu1 %v10073_v32  ;;  %v2268_v15 = vpop.f32.mrf.mxu0  ;;  %v10075_v18 = vld [vmem:[#allocation21_spill] sm:$0xff] }
 0x2d2   : > { %v2095_v59 = vpop.f32.mrf.mxu1 }
 0x2d3   : > { %10072 = vst [vmem:[#allocation19_spill] sm:$0xff] %v6948_v48  ;;  %v6951_v42 = vadd.f32 %v2268_v15, %v2095_v59  ;;  %v2270_v43 = vpop.f32.mrf.mxu0 }
 0x2d4   : > { %v2097_v34 = vpop.f32.mrf.mxu1 }
 0x2d5   : > { %v6953_v61 = vadd.f32 %v2270_v43, %v2097_v34  ;;  %v2272_v33 = vpop.f32.mrf.mxu0  ;;  %v10077_v43 = vld [vmem:[#allocation56_spill] sm:$0xff] }
 0x2d6   : > { %v2099_v52 = vpop.f32.mrf.mxu1 }
 0x2d7   : > { %10074 = vst [vmem:[#allocation18_spill] sm:$0xff] %v6953_v61  ;;  %v6955_v54 = vadd.f32 %v2272_v33, %v2099_v52  ;;  %v2276_v13 = vpop.f32.mrf.mxu0  ;;  %2899 = vmatmul.mubr.bf16.vlgmr.msra.gmra.mxu0 %v10003_v57 }
 0x2d8   : > { %v2103_v19 = vpop.f32.mrf.mxu1  ;;  %2754 = vmatmul.mubr.bf16.vlgmr.msra.gmra.mxu1 %v10004_v31  ;;  %5215 = vmatprep.mubr.msk.bf16.mxu0 %vm1640_vm1, %v10075_v18  ;;  %v10079_v18 = vld [vmem:[#allocation22_spill] sm:$0xff] }
 0x2d9   : > { %v6961_v41 = vadd.f32 %v2276_v13, %v2103_v19  ;;  %2761 = vmatprep.mubr.bf16.mxu1 %v6088_v50  ;;  %v2278_v32 = vpop.f32.mrf.mxu0  ;;  %5346 = vmatpush1.bf16.msra.mxu1 %v10077_v43 }
 0x2da   : > { %v2105_v15 = vpop.f32.mrf.mxu1  ;;  %5335 = vmatprep.subr.bf16.mxu1 %v9974_v23 }
 0x2db   : > { %10076 = vst [vmem:[#allocation21_spill] sm:$0xff] %v6961_v41  ;;  %v6966_v33 = vadd.f32 %v2278_v32, %v2105_v15  ;;  %v2280_v52 = vpop.f32.mrf.mxu0 }
 0x2dc   : > { %v2107_v57 = vpop.f32.mrf.mxu1 }
 0x2dd   : > { %v6968_v59 = vadd.f32 %v2280_v52, %v2107_v57  ;;  %v2282_v31 = vpop.f32.mrf.mxu0  ;;  %5347 = vmatpush1.bf16.msra.mxu1 %v6737_v29  ;;  %v10081_v29 = vld [vmem:[#allocation59_spill] sm:$0xff] }
 0x2de   : > { %v2109_v34 = vpop.f32.mrf.mxu1  ;;  %5336 = vmatprep.subr.bf16.mxu1 %v9974_v23 }
 0x2df   : > { %10078 = vst [vmem:[#allocation56_spill] sm:$0xff] %v6968_v59  ;;  %v6972_v13 = vadd.f32 %v2282_v31, %v2109_v34  ;;  %v2286_v50 = vpop.f32.mrf.mxu0  ;;  %2907 = vmatmul.mubr.bf16.gmra.mxu0 %v6159_v46 }
 0x2e0   : > { %v2113_v19 = vpop.f32.mrf.mxu1  ;;  %2762 = vmatmul.mubr.bf16.gmra.mxu1 %v6150_v40  ;;  %5216 = vmatprep.mubr.msk.bf16.mxu0 %vm1640_vm1, %v10079_v18  ;;  %v10083_v18 = vld [vmem:[#allocation23_spill] sm:$0xff] }
 0x2e1   : > { %v6978_v32 = vadd.f32 %v2286_v50, %v2113_v19  ;;  %2769 = vmatprep.mubr.bf16.mxu1 %v6161_v47  ;;  %v2288_v43 = vpop.f32.mrf.mxu0  ;;  %5348 = vmatpush1.bf16.msra.mxu1 %v10081_v29 }
 0x2e2   : > { %v2115_v15 = vpop.f32.mrf.mxu1  ;;  %5337 = vmatprep.subr.bf16.mxu1 %v9974_v23 }
 0x2e3   : > { %10080 = vst [vmem:[#allocation22_spill] sm:$0xff] %v6978_v32  ;;  %v6983_v52 = vadd.f32 %v2288_v43, %v2115_v15  ;;  %v2290_v57 = vpop.f32.mrf.mxu0  ;;  %v10084_v43 = vld [vmem:[#allocation25_spill] sm:$0xff] }
 0x2e4   : > { %v2117_v46 = vpop.f32.mrf.mxu1 }
 0x2e5   : > { %v6985_v31 = vadd.f32 %v2290_v57, %v2117_v46  ;;  %v2292_v40 = vpop.f32.mrf.mxu0  ;;  %5349 = vmatpush1.bf16.msra.mxu1 %v6758_v20 }
 0x2e6   : > { %v2119_v34 = vpop.f32.mrf.mxu1  ;;  %5338 = vmatprep.subr.bf16.mxu1 %v9974_v23 }
 0x2e7   : > { %10082 = vst [vmem:[#allocation59_spill] sm:$0xff] %v6985_v31  ;;  %v6989_v47 = vadd.f32 %v2292_v40, %v2119_v34  ;;  %v2296_v50 = vpop.f32.mrf.mxu0  ;;  %2915 = vmatmul.mubr.bf16.gmra.mxu0 %v6218_v44 }
 0x2e8   : > { %v2123_v19 = vpop.f32.mrf.mxu1  ;;  %2770 = vmatmul.mubr.bf16.gmra.mxu1 %v10083_v18  ;;  %5217 = vmatprep.mubr.msk.bf16.mxu0 %vm1640_vm1, %v10084_v43 }
 0x2e9   : > { %v6995_v29 = vadd.f32 %v2296_v50, %v2123_v19  ;;  %2777 = vmatprep.mubr.bf16.mxu1 %v10016_v25  ;;  %v2298_v20 = vpop.f32.mrf.mxu0  ;;  %5350 = vmatpush1.bf16.msra.mxu1 %v6766_v21 }
 0x2ea   : > { %v2125_v15 = vpop.f32.mrf.mxu1  ;;  %5339 = vmatprep.subr.bf16.mxu1 %v9974_v23 }
 0x2eb   : > { %10085 = vst [vmem:[#allocation23_spill] sm:$0xff] %v6995_v29  ;;  %v7000_v57 = vadd.f32 %v2298_v20, %v2125_v15  ;;  %v2300_v46 = vpop.f32.mrf.mxu0 }
 0x2ec   : > { %v2127_v44 = vpop.f32.mrf.mxu1 }
 0x2ed   : > { %10086 = vst [vmem:[#allocation25_spill] sm:$0xff] %v7000_v57  ;;  %v7003_v40 = vadd.f32 %v2300_v46, %v2127_v44  ;;  %v2302_v34 = vpop.f32.mrf.mxu0  ;;  %5351 = vmatpush1.bf16.msra.mxu1 %v6779_v62 }
 0x2ee   : > { %v2129_v50 = vpop.f32.mrf.mxu1  ;;  %5340 = vmatprep.subr.bf16.mxu1 %v9974_v23 }
 0x2ef   : > { %10087 = vst [vmem:[#allocation105_spill] sm:$0xff] %v7003_v40  ;;  %v7007_v25 = vadd.f32 %v2302_v34, %v2129_v50  ;;  %v2306_v21 = vpop.f32.mrf.mxu0  ;;  %2923 = vmatmul.mubr.bf16.gmra.mxu0 %v6277_v27  ;;  %v4414_v50 = vld [vmem:[%s7026_s14 + $0x10] sm:$0xff] }
 0x2f0   : > { %v2133_v19 = vpop.f32.mrf.mxu1  ;;  %2778 = vmatmul.mubr.bf16.gmra.mxu1 %v6268_v39  ;;  %5218 = vmatprep.mubr.msk.bf16.mxu0 %vm1640_vm1, %v6289_v58  ;;  %v4413_v58 = vld [vmem:[%s7026_s14 + $0x8] sm:$0xff] }
 0x2f1   : > { %10088 = vst [vmem:[#allocation106_spill] sm:$0xff] %v7007_v25  ;;  %v7015_v62 = vadd.f32 %v2306_v21, %v2133_v19  ;;  %2785 = vmatprep.mubr.bf16.mxu1 %v6279_v45  ;;  %v2308_v18 = vpop.f32.mrf.mxu0  ;;  %5352 = vmatpush1.bf16.msra.mxu1 %v6787_v60  ;;  %v4412_v45 = vld [vmem:[%s7026_s14] sm:$0xff]  ;;  %v4415_v19 = vld [vmem:[%s7026_s14 + $0x18] sm:$0xff] }
 0x2f2   : > { %v2135_v43 = vpop.f32.mrf.mxu1  ;;  %5341 = vmatprep.subr.bf16.mxu1 %v9974_v23  ;;  %4442 = vperm.xlu1 %5457, %v4412_v45  }
 0x2f3   : > { %10089 = vst [vmem:[#allocation107_spill] sm:$0xff] %v7015_v62  ;;  %v7028_v39 = vadd.f32 %v2308_v18, %v2135_v43  ;;  %v2310_v27 = vpop.f32.mrf.mxu0  ;;  %4447 = vperm.xlu0 %5458, %v4413_v58  }
 0x2f4   : > { %v2137_v60 = vpop.f32.mrf.mxu1 }
 0x2f5   : > { %10090 = vst [vmem:[#allocation108_spill] sm:$0xff] %v7028_v39  ;;  %v7032_v20 = vadd.f32 %v2310_v27, %v2137_v60  ;;  %v2312_v15 = vpop.f32.mrf.mxu0  ;;  %5353 = vmatpush1.bf16.msra.mxu1 %v6800_v55  ;;  %v10094_v55 = vld [vmem:[#allocation27_spill] sm:$0xff] }
 0x2f6   : > { %v2139_v46 = vpop.f32.mrf.mxu1  ;;  %5342 = vmatprep.subr.bf16.mxu1 %v9974_v23  ;;  %4452 = vperm.xlu1 %5457, %v4414_v50   ;;  %v4418_v50 = vld [vmem:[%s7026_s14 + $0x30] sm:$0xff] }
 0x2f7   : > { %10091 = vst [vmem:[#allocation109_spill] sm:$0xff] %v7032_v20  ;;  %v7036_v44 = vadd.f32 %v2312_v15, %v2139_v46  ;;  %v2316_v34 = vpop.f32.mrf.mxu0  ;;  %2931 = vmatmul.mubr.bf16.gmra.mxu0 %v6336_v63  ;;  %4457 = vperm.xlu0 %5458, %v4415_v19   ;;  %v10098_v19 = vld [vmem:[#allocation29_spill] sm:$0xff] }
 0x2f8   : > { %v2143_v21 = vpop.f32.mrf.mxu1  ;;  %2786 = vmatmul.mubr.bf16.gmra.mxu1 %v10024_v38  ;;  %5219 = vmatprep.mubr.msk.bf16.mxu0 %vm1640_vm1, %v10025_v11  ;;  %v4416_v38 = vld [vmem:[%s7026_s14 + $0x20] sm:$0xff]  ;;  %v4417_v11 = vld [vmem:[%s7026_s14 + $0x28] sm:$0xff] }
 0x2f9   : > { %10092 = vst [vmem:[#allocation110_spill] sm:$0xff] %v7036_v44  ;;  %v7044_v18 = vadd.f32 %v2316_v34, %v2143_v21  ;;  %2793 = vmatprep.mubr.bf16.mxu1 %v10094_v55  ;;  %v2318_v43 = vpop.f32.mrf.mxu0  ;;  %5354 = vmatpush2.bf16.msra.mxu1 %v6808_v51 }
 0x2fa   : > { %v2145_v27 = vpop.f32.mrf.mxu1  ;;  %5343 = vmatprep.subr.bf16.mxu1 %v9974_v23  ;;  %4462 = vperm.xlu1 %5457, %v4416_v38  }
 0x2fb   : > { %10093 = vst [vmem:[#allocation111_spill] sm:$0xff] %v7044_v18  ;;  %v7049_v63 = vadd.f32 %v2318_v43, %v2145_v27  ;;  %v2320_v45 = vpop.f32.mrf.mxu0  ;;  %4467 = vperm.xlu0 %5458, %v4417_v11  }
 0x2fc   : > { %v2147_v58 = vpop.f32.mrf.mxu1 }
 0x2fd   : > { %10095 = vst [vmem:[#allocation27_spill] sm:$0xff] %v7049_v63  ;;  %v7053_v60 = vadd.f32 %v2320_v45, %v2147_v58  ;;  %v2322_v15 = vpop.f32.mrf.mxu0  ;;  %5355 = vmatpush2.bf16.msra.mxu1 %v6822_v37  ;;  %v4419_v37 = vld [vmem:[%s7026_s14 + $0x38] sm:$0xff]  ;;  %v4421_v58 = vld [vmem:[%s7026_s14 + $0x48] sm:$0xff] }
 0x2fe   : > { %v2149_v46 = vpop.f32.mrf.mxu1  ;;  %5344 = vmatprep.subr.bf16.mxu1 %v9974_v23  ;;  %4472 = vperm.xlu1 %5457, %v4418_v50   ;;  %v10103_v50 = vld [vmem:[#allocation30_spill] sm:$0xff] }
 0x2ff   : > { %10096 = vst [vmem:[#allocation112_spill] sm:$0xff] %v7053_v60  ;;  %v7057_v51 = vadd.f32 %v2322_v15, %v2149_v46  ;;  %v2326_v34 = vpop.f32.mrf.mxu0  ;;  %2939 = vmatmul.mubr.bf16.gmra.mxu0 %v6389_v53  ;;  %4477 = vperm.xlu0 %5458, %v4419_v37   ;;  %v4422_v46 = vld [vmem:[%s7026_s14 + $0x50] sm:$0xff] }
 0x300   : > { %v2153_v21 = vpop.f32.mrf.mxu1  ;;  %2794 = vmatmul.mubr.bf16.gmra.mxu1 %v6386_v14  ;;  %5220 = vmatprep.mubr.msk.bf16.mxu0 %vm1640_vm1, %v10098_v19  ;;  %v4420_v14 = vld [vmem:[%s7026_s14 + $0x40] sm:$0xff] }
 0x301   : > { %10097 = vst [vmem:[#allocation113_spill] sm:$0xff] %v7057_v51  ;;  %v7065_v55 = vadd.f32 %v2326_v34, %v2153_v21  ;;  %2801 = vmatprep.mubr.bf16.mxu1 %v6391_v3  ;;  %v2328_v43 = vpop.f32.mrf.mxu0  ;;  %5356 = vmatpush2.bf16.msra.mxu1 %v6830_v7  ;;  %v4423_v21 = vld [vmem:[%s7026_s14 + $0x58] sm:$0xff] }
 0x302   : > { %v2155_v27 = vpop.f32.mrf.mxu1  ;;  %5345 = vmatprep.subr.bf16.mxu1 %v9974_v23  ;;  %4482 = vperm.xlu1 %5457, %v4420_v14   ;;  %v4425_v14 = vld [vmem:[%s7026_s14 + $0x68] sm:$0xff] }
 0x303   : > { %10099 = vst [vmem:[#allocation29_spill] sm:$0xff] %v7065_v55  ;;  %v7070_v53 = vadd.f32 %v2328_v43, %v2155_v27  ;;  %v2330_v45 = vpop.f32.mrf.mxu0  ;;  %4487 = vperm.xlu0 %5458, %v4421_v58   ;;  %v4424_v27 = vld [vmem:[%s7026_s14 + $0x60] sm:$0xff] }
 0x304   : > { %v2157_v38 = vpop.f32.mrf.mxu1 }
 0x305   : > { %10100 = vst [vmem:[#allocation114_spill] sm:$0xff] %v7070_v53  ;;  %v7074_v11 = vadd.f32 %v2330_v45, %v2157_v38  ;;  %v2332_v15 = vpop.f32.mrf.mxu0  ;;  %5357 = vmatpush2.bf16.msra.mxu1 %v6843_v8 }
 0x306   : > { %v2159_v3 = vpop.f32.mrf.mxu1  ;;  %4492 = vperm.xlu1 %5457, %v4422_v46  }
 0x307   : > { %10101 = vst [vmem:[#allocation115_spill] sm:$0xff] %v7074_v11  ;;  %v7077_v7 = vadd.f32 %v2332_v15, %v2159_v3  ;;  %v2336_v23 = vpop.f32.mrf.mxu0  ;;  %2947 = vmatmul.mubr.bf16.gmra.mxu0 %v6436_v26  ;;  %4497 = vperm.xlu0 %5458, %v4423_v21  }
 0x308   : > { %v2163_v34 = vpop.f32.mrf.mxu1  ;;  %2802 = vmatmul.mubr.bf16.gmra.mxu1 %v6429_v24  ;;  %5221 = vmatprep.mubr.msk.bf16.mxu0 %vm1640_vm1, %v10103_v50 }
 0x309   : > { %10102 = vst [vmem:[#allocation116_spill] sm:$0xff] %v7077_v7  ;;  %v7085_v19 = vadd.f32 %v2336_v23, %v2163_v34  ;;  %2809 = vmatprep.mubr.bf16.mxu1 %v6438_v28  ;;  %v2338_v8 = vpop.f32.mrf.mxu0  ;;  %v4426_v28 = vld [vmem:[%s7026_s14 + $0x70] sm:$0xff] }
 0x30a   : > { %v2165_v37 = vpop.f32.mrf.mxu1  ;;  %4502 = vperm.xlu1 %5457, %v4424_v27  }
 0x30b   : > { %10104 = vst [vmem:[#allocation30_spill] sm:$0xff] %v7085_v19  ;;  %v7088_v43 = vadd.f32 %v2338_v8, %v2165_v37  ;;  %v2340_v26 = vpop.f32.mrf.mxu0  ;;  %4507 = vperm.xlu0 %5458, %v4425_v14  }
 0x30c   : > { %v2167_v45 = vpop.f32.mrf.mxu1 }
 0x30d   : > { %10105 = vst [vmem:[#allocation117_spill] sm:$0xff] %v7088_v43  ;;  %v7092_v24 = vadd.f32 %v2340_v26, %v2167_v45  ;;  %v2342_v38 = vpop.f32.mrf.mxu0 }
 0x30e   : > { %v2169_v58 = vpop.f32.mrf.mxu1  ;;  %4512 = vperm.xlu1 %5457, %v4426_v28  }
 0x30f   : > { %10106 = vst [vmem:[#allocation118_spill] sm:$0xff] %v7092_v24  ;;  %v7094_v15 = vadd.f32 %v2342_v38, %v2169_v58  ;;  %v2346_v3 = vpop.f32.mrf.mxu0  ;;  %2955 = vmatmul.mubr.bf16.gmra.mxu0 %v6475_v30 }
 0x310   : > { %v2173_v23 = vpop.f32.mrf.mxu1  ;;  %2810 = vmatmul.mubr.bf16.gmra.mxu1 %v6470_v9  ;;  %5222 = vmatprep.mubr.msk.bf16.mxu0 %vm1640_vm1, %v6482_v49 }
 0x311   : > { %10107 = vst [vmem:[#allocation119_spill] sm:$0xff] %v7094_v15  ;;  %v7101_v46 = vadd.f32 %v2346_v3, %v2173_v23  ;;  %2817 = vmatprep.mubr.bf16.mxu1 %v6477_v2  ;;  %v2348_v34 = vpop.f32.mrf.mxu0 }
 0x312   : > { %v2175_v50 = vpop.f32.mrf.mxu1 }
 0x313   : > { %10108 = vst [vmem:[#allocation120_spill] sm:$0xff] %v7101_v46  ;;  %v7104_v21 = vadd.f32 %v2348_v34, %v2175_v50  ;;  %v2350_v8 = vpop.f32.mrf.mxu0 }
 0x314   : > { %v2177_v37 = vpop.f32.mrf.mxu1 }
 0x315   : > { %10109 = vst [vmem:[#allocation121_spill] sm:$0xff] %v7104_v21  ;;  %v7106_v30 = vadd.f32 %v2350_v8, %v2177_v37  ;;  %v2352_v26 = vpop.f32.mrf.mxu0 }
 0x316   : > { %v2179_v27 = vpop.f32.mrf.mxu1 }
 0x317   : > { %10110 = vst [vmem:[#allocation122_spill] sm:$0xff] %v7106_v30  ;;  %v7108_v45 = vadd.f32 %v2352_v26, %v2179_v27  ;;  %v2356_v9 = vpop.f32.mrf.mxu0  ;;  %2963 = vmatmul.mubr.bf16.gmra.mxu0 %v6502_v5 }
 0x318   : > { %v2183_v49 = vpop.f32.mrf.mxu1  ;;  %2818 = vmatmul.mubr.bf16.gmra.mxu1 %v9975_v56  ;;  %5223 = vmatprep.mubr.msk.bf16.mxu0 %vm1640_vm1, %v9976_v10 }
 0x319   : > { %10111 = vst [vmem:[#allocation123_spill] sm:$0xff] %v7108_v45  ;;  %v7114_v2 = vadd.f32 %v2356_v9, %v2183_v49  ;;  %2825 = vmatprep.mubr.bf16.mxu1 %v9977_v17  ;;  %v2358_v14 = vpop.f32.mrf.mxu0 }
 0x31a   : > { %v2185_v38 = vpop.f32.mrf.mxu1 }
 0x31b   : > { %10112 = vst [vmem:[#allocation124_spill] sm:$0xff] %v7114_v2  ;;  %v7117_v58 = vadd.f32 %v2358_v14, %v2185_v38  ;;  %v2360_v3 = vpop.f32.mrf.mxu0 }
 0x31c   : > { %v2187_v28 = vpop.f32.mrf.mxu1 }
 0x31d   : > { %10113 = vst [vmem:[#allocation125_spill] sm:$0xff] %v7117_v58  ;;  %v7119_v23 = vadd.f32 %v2360_v3, %v2187_v28  ;;  %v2362_v34 = vpop.f32.mrf.mxu0 }
 0x31e   : > { %v2189_v5 = vpop.f32.mrf.mxu1 }
 0x31f   : > { %10114 = vst [vmem:[#allocation126_spill] sm:$0xff] %v7119_v23  ;;  %v7121_v50 = vadd.f32 %v2362_v34, %v2189_v5  ;;  %v2366_v56 = vpop.f32.mrf.mxu0  ;;  %2971 = vmatmul.mubr.bf16.gmra.mxu0 %v9978_v16 }
 0x320   : > { %v2193_v10 = vpop.f32.mrf.mxu1  ;;  %2826 = vmatmul.mubr.bf16.gmra.mxu1 %v9979_v22  ;;  %5224 = vmatprep.mubr.msk.bf16.mxu0 %vm1640_vm1, %v9980_v1 }
 0x321   : > { %10115 = vst [vmem:[#allocation127_spill] sm:$0xff] %v7121_v50  ;;  %v7127_v17 = vadd.f32 %v2366_v56, %v2193_v10  ;;  %2833 = vmatprep.mubr.bf16.mxu1 %v9981_v12  ;;  %v2368_v8 = vpop.f32.mrf.mxu0  ;;  %v10131_v50 = vld [vmem:[#allocation50_spill] sm:$0xff] }
 0x322   : > { %v2195_v37 = vpop.f32.mrf.mxu1 }
 0x323   : > { %10116 = vst [vmem:[#allocation128_spill] sm:$0xff] %v7127_v17  ;;  %v7130_v26 = vadd.f32 %v2368_v8, %v2195_v37  ;;  %v2370_v27 = vpop.f32.mrf.mxu0 }
 0x324   : > { %v2197_v9 = vpop.f32.mrf.mxu1 }
 0x325   : > { %10117 = vst [vmem:[#allocation129_spill] sm:$0xff] %v7130_v26  ;;  %v7132_v49 = vadd.f32 %v2370_v27, %v2197_v9  ;;  %v2372_v14 = vpop.f32.mrf.mxu0  ;;  %v10122_v27 = vld [vmem:[#allocation43_spill] sm:$0xff]  ;;  %v10123_v9 = vld [vmem:[#allocation42_spill] sm:$0xff] }
 0x326   : > { %v2199_v16 = vpop.f32.mrf.mxu1 }
 0x327   : > { %10118 = vst [vmem:[#allocation130_spill] sm:$0xff] %v7132_v49  ;;  %v7134_v38 = vadd.f32 %v2372_v14, %v2199_v16  ;;  %v2582_v22 = vpop.f32.mrf.mxu0  ;;  %2979 = vmatmul.mubr.bf16.gmra.mxu0 %v9982_v35  ;;  %v10124_v14 = vld [vmem:[#allocation45_spill] sm:$0xff]  ;;  %v10126_v16 = vld [vmem:[#allocation44_spill] sm:$0xff] }
 0x328   : > { %v2409_v1 = vpop.f32.mrf.mxu1  ;;  %2834 = vmatmul.mubr.bf16.gmra.mxu1 %v9983_v0  ;;  %5225 = vmatprep.mubr.msk.bf16.mxu0 %vm1640_vm1, %v9984_v36 }
 0x329   : > { %10119 = vst [vmem:[#allocation131_spill] sm:$0xff] %v7134_v38  ;;  %v7140_v12 = vadd.f32 %v2582_v22, %v2409_v1  ;;  %2841 = vmatprep.mubr.bf16.mxu1 %v9986_v4  ;;  %v2584_v3 = vpop.f32.mrf.mxu0  ;;  %v10128_v38 = vld [vmem:[#allocation47_spill] sm:$0xff] }
 0x32a   : > { %v2411_v28 = vpop.f32.mrf.mxu1 }
 0x32b   : > { %10120 = vst [vmem:[#allocation132_spill] sm:$0xff] %v7140_v12  ;;  %v7143_v34 = vadd.f32 %v2584_v3, %v2411_v28  ;;  %v2586_v5 = vpop.f32.mrf.mxu0 }
 0x32c   : > { %v2413_v56 = vpop.f32.mrf.mxu1 }
 0x32d   : > { %v7145_v10 = vadd.f32 %v2586_v5, %v2413_v56  ;;  %v2588_v8 = vpop.f32.mrf.mxu0 }
 0x32e   : > { %v2415_v35 = vpop.f32.mrf.mxu1 }
 0x32f   : > { %10121 = vst [vmem:[#allocation133_spill] sm:$0xff] %v7145_v10  ;;  %v7147_v37 = vadd.f32 %v2588_v8, %v2415_v35  ;;  %v2592_v0 = vpop.f32.mrf.mxu0  ;;  %2987 = vmatmul.mubr.bf16.gmra.mxu0 %v10122_v27 }
 0x330   : > { %v2419_v36 = vpop.f32.mrf.mxu1  ;;  %2842 = vmatmul.mubr.bf16.gmra.mxu1 %v10123_v9  ;;  %5226 = vmatprep.mubr.msk.bf16.mxu0 %vm1640_vm1, %v10124_v14 }
 0x331   : > { %v7153_v4 = vadd.f32 %v2592_v0, %v2419_v36  ;;  %2849 = vmatprep.mubr.bf16.mxu1 %v10126_v16  ;;  %v2594_v22 = vpop.f32.mrf.mxu0  ;;  %v10129_v0 = vld [vmem:[#allocation46_spill] sm:$0xff] }
 0x332   : > { %v2421_v1 = vpop.f32.mrf.mxu1 }
 0x333   : > { %10125 = vst [vmem:[#allocation43_spill] sm:$0xff] %v7153_v4  ;;  %v7156_v3 = vadd.f32 %v2594_v22, %v2421_v1  ;;  %v2596_v28 = vpop.f32.mrf.mxu0 }
 0x334   : > { %v2423_v5 = vpop.f32.mrf.mxu1 }
 0x335   : > { %v7158_v56 = vadd.f32 %v2596_v28, %v2423_v5  ;;  %v2598_v8 = vpop.f32.mrf.mxu0 }
 0x336   : > { %v2425_v35 = vpop.f32.mrf.mxu1 }
 0x337   : > { %10127 = vst [vmem:[#allocation42_spill] sm:$0xff] %v7158_v56  ;;  %v7160_v27 = vadd.f32 %v2598_v8, %v2425_v35  ;;  %v2602_v9 = vpop.f32.mrf.mxu0  ;;  %2995 = vmatmul.mubr.bf16.gmra.mxu0 %v10128_v38 }
 0x338   : > { %v2429_v14 = vpop.f32.mrf.mxu1  ;;  %2850 = vmatmul.mubr.bf16.gmra.mxu1 %v10129_v0 }
 0x339   : > { %v7164_v36 = vadd.f32 %v2602_v9, %v2429_v14  ;;  %2857 = vmatprep.mubr.bf16.mxu1 %v10065_v6  ;;  %v2604_v16 = vpop.f32.mrf.mxu0  ;;  %v10132_v14 = vld [vmem:[#allocation49_spill] sm:$0xff] }
 0x33a   : > { %v2431_v22 = vpop.f32.mrf.mxu1 }
 0x33b   : > { %10130 = vst [vmem:[#allocation45_spill] sm:$0xff] %v7164_v36  ;;  %v7167_v1 = vadd.f32 %v2604_v16, %v2431_v22  ;;  %v2606_v28 = vpop.f32.mrf.mxu0 }
 0x33c   : > { %v2433_v5 = vpop.f32.mrf.mxu1 }
 0x33d   : > { %v7169_v49 = vadd.f32 %v2606_v28, %v2433_v5  ;;  %v2608_v8 = vpop.f32.mrf.mxu0 }
 0x33e   : > { %v2435_v35 = vpop.f32.mrf.mxu1 }
 0x33f   : > { %v7171_v26 = vadd.f32 %v2608_v8, %v2435_v35  ;;  %v2612_v38 = vpop.f32.mrf.mxu0 }
 0x340   : > { %v2439_v17 = vpop.f32.mrf.mxu1  ;;  %2858 = vmatmul.mubr.bf16.gmra.mxu1 %v10131_v50  ;;  %v10133_v50 = vld [vmem:[#allocation51_spill] sm:$0xff] }
 0x341   : > { %v7174_v9 = vadd.f32 %v2612_v38, %v2439_v17  ;;  %5227 = vmatprep.mubr.msk.bf16.mxu1 %vm1640_vm1, %v10132_v14  ;;  %v2614_v6 = vpop.f32.mrf.mxu0 }
 0x342   : > { %v2441_v0 = vpop.f32.mrf.mxu1 }
 0x343   : > { %v7178_v16 = vadd.f32 %v2614_v6, %v2441_v0  ;;  %v2616_v22 = vpop.f32.mrf.mxu0 }
 0x344   : > { %v2443_v28 = vpop.f32.mrf.mxu1 }
 0x345   : > { %v7180_v5 = vadd.f32 %v2616_v22, %v2443_v28  ;;  %v2618_v23 = vpop.f32.mrf.mxu0 }
 0x346   : > { %v2445_v8 = vpop.f32.mrf.mxu1 }
 0x347   : > { %v7182_v35 = vadd.f32 %v2618_v23, %v2445_v8  ;;  %v2622_v58 = vpop.f32.mrf.mxu0 }
 0x348   : > { %v2449_v2 = vpop.f32.mrf.mxu1  ;;  %3003 = vmatmul.mubr.bf16.vlgmr.msra.gmra.mxu1 %v10133_v50 }
 0x349   : > { %v7185_v17 = vadd.f32 %v2622_v58, %v2449_v2  ;;  %v2624_v38 = vpop.f32.mrf.mxu0 }
 0x34a   : > { %v2451_v14 = vpop.f32.mrf.mxu1 }
 0x34b   : > { %v7187_v45 = vadd.f32 %v2624_v38, %v2451_v14  ;;  %v2626_v6 = vpop.f32.mrf.mxu0 }
 0x34c   : > { %v2453_v0 = vpop.f32.mrf.mxu1 }
 0x34d   : > { %v7189_v30 = vadd.f32 %v2626_v6, %v2453_v0  ;;  %v2628_v22 = vpop.f32.mrf.mxu0 }
 0x34e   : > { %v2455_v28 = vpop.f32.mrf.mxu1 }
 0x34f   : > { %v7191_v21 = vadd.f32 %v2628_v22, %v2455_v28  ;;  %v2632_v23 = vpop.f32.mrf.mxu0 }
 0x350   : > { %v2459_v8 = vpop.f32.mrf.mxu1 }
 0x351   : > { %v7193_v46 = vadd.f32 %v2632_v23, %v2459_v8  ;;  %v2634_v15 = vpop.f32.mrf.mxu0 }
 0x352   : > { %v2461_v50 = vpop.f32.mrf.mxu1 }
 0x353   : > { %v7195_v2 = vadd.f32 %v2634_v15, %v2461_v50  ;;  %v2636_v58 = vpop.f32.mrf.mxu0 }
 0x354   : > { %v2463_v24 = vpop.f32.mrf.mxu1 }
 0x355   : > { %v7197_v38 = vadd.f32 %v2636_v58, %v2463_v24  ;;  %v2638_v14 = vpop.f32.mrf.mxu0 }
 0x356   : > { %v2465_v43 = vpop.f32.mrf.mxu1 }
 0x357   : > { %v7199_v6 = vadd.f32 %v2638_v14, %v2465_v43  ;;  %v2642_v0 = vpop.f32.mrf.mxu0 }
 0x358   : > { %v2469_v19 = vpop.f32.mrf.mxu1 }
 0x359   : > { %v7201_v22 = vadd.f32 %v2642_v0, %v2469_v19  ;;  %v2644_v28 = vpop.f32.mrf.mxu0 }
 0x35a   : > { %v2471_v7 = vpop.f32.mrf.mxu1 }
 0x35b   : > { %10134 = vst [vmem:[#allocation44_spill] sm:$0xff] %v7201_v22  ;;  %v7203_v23 = vadd.f32 %v2644_v28, %v2471_v7  ;;  %v2646_v8 = vpop.f32.mrf.mxu0 }
 0x35c   : > { %v2473_v11 = vpop.f32.mrf.mxu1 }
 0x35d   : > { %10135 = vst [vmem:[#allocation47_spill] sm:$0xff] %v7203_v23  ;;  %v7205_v15 = vadd.f32 %v2646_v8, %v2473_v11  ;;  %v2648_v50 = vpop.f32.mrf.mxu0  ;;  %v10175_v23 = vld [vmem:[#allocation97_spill] sm:$0xff] }
 0x35e   : > { %v2475_v53 = vpop.f32.mrf.mxu1 }
 0x35f   : > { %10136 = vst [vmem:[#allocation46_spill] sm:$0xff] %v7205_v15  ;;  %v7207_v24 = vadd.f32 %v2648_v50, %v2475_v53  ;;  %v2652_v58 = vpop.f32.mrf.mxu0  ;;  %v10174_v15 = vld [vmem:[#allocation37_spill] sm:$0xff] }
 0x360   : > { %v2479_v55 = vpop.f32.mrf.mxu1 }
 0x361   : > { %10137 = vst [vmem:[#allocation50_spill] sm:$0xff] %v7207_v24  ;;  %v7209_v43 = vadd.f32 %v2652_v58, %v2479_v55  ;;  %v2654_v14 = vpop.f32.mrf.mxu0 }
 0x362   : > { %v2481_v51 = vpop.f32.mrf.mxu1 }
 0x363   : > { %10138 = vst [vmem:[#allocation49_spill] sm:$0xff] %v7209_v43  ;;  %v7211_v19 = vadd.f32 %v2654_v14, %v2481_v51  ;;  %v2656_v0 = vpop.f32.mrf.mxu0 }
 0x364   : > { %v2483_v60 = vpop.f32.mrf.mxu1 }
 0x365   : > { %10139 = vst [vmem:[#allocation51_spill] sm:$0xff] %v7211_v19  ;;  %v7213_v7 = vadd.f32 %v2656_v0, %v2483_v60  ;;  %v2658_v28 = vpop.f32.mrf.mxu0 }
 0x366   : > { %v2485_v63 = vpop.f32.mrf.mxu1 }
 0x367   : > { %10140 = vst [vmem:[#allocation134_spill] sm:$0xff] %v7213_v7  ;;  %v7215_v11 = vadd.f32 %v2658_v28, %v2485_v63  ;;  %v2662_v8 = vpop.f32.mrf.mxu0 }
 0x368   : > { %v2489_v18 = vpop.f32.mrf.mxu1 }
 0x369   : > { %10141 = vst [vmem:[#allocation135_spill] sm:$0xff] %v7215_v11  ;;  %v7217_v53 = vadd.f32 %v2662_v8, %v2489_v18  ;;  %v2664_v50 = vpop.f32.mrf.mxu0 }
 0x36a   : > { %v2491_v44 = vpop.f32.mrf.mxu1 }
 0x36b   : > { %10142 = vst [vmem:[#allocation136_spill] sm:$0xff] %v7217_v53  ;;  %v7219_v55 = vadd.f32 %v2664_v50, %v2491_v44  ;;  %v2666_v58 = vpop.f32.mrf.mxu0 }
 0x36c   : > { %v2493_v43 = vpop.f32.mrf.mxu1 }
 0x36d   : > { %10143 = vst [vmem:[#allocation137_spill] sm:$0xff] %v7219_v55  ;;  %v7221_v51 = vadd.f32 %v2666_v58, %v2493_v43  ;;  %v2668_v14 = vpop.f32.mrf.mxu0 }
 0x36e   : > { %v2495_v19 = vpop.f32.mrf.mxu1 }
 0x36f   : > { %10144 = vst [vmem:[#allocation138_spill] sm:$0xff] %v7221_v51  ;;  %v7223_v60 = vadd.f32 %v2668_v14, %v2495_v19  ;;  %v2672_v0 = vpop.f32.mrf.mxu0 }
 0x370   : > { %v2499_v7 = vpop.f32.mrf.mxu1 }
 0x371   : > { %10145 = vst [vmem:[#allocation139_spill] sm:$0xff] %v7223_v60  ;;  %v7225_v63 = vadd.f32 %v2672_v0, %v2499_v7  ;;  %v2674_v28 = vpop.f32.mrf.mxu0 }
 0x372   : > { %v2501_v11 = vpop.f32.mrf.mxu1 }
 0x373   : > { %10146 = vst [vmem:[#allocation140_spill] sm:$0xff] %v7225_v63  ;;  %v7227_v18 = vadd.f32 %v2674_v28, %v2501_v11  ;;  %v2676_v8 = vpop.f32.mrf.mxu0 }
 0x374   : > { %v2503_v53 = vpop.f32.mrf.mxu1 }
 0x375   : > { %10147 = vst [vmem:[#allocation141_spill] sm:$0xff] %v7227_v18  ;;  %v7229_v44 = vadd.f32 %v2676_v8, %v2503_v53  ;;  %v2678_v50 = vpop.f32.mrf.mxu0 }
 0x376   : > { %v2505_v55 = vpop.f32.mrf.mxu1 }
 0x377   : > { %10148 = vst [vmem:[#allocation142_spill] sm:$0xff] %v7229_v44  ;;  %v7231_v43 = vadd.f32 %v2678_v50, %v2505_v55  ;;  %v2682_v58 = vpop.f32.mrf.mxu0 }
 0x378   : > { %v2509_v51 = vpop.f32.mrf.mxu1 }
 0x379   : > { %10149 = vst [vmem:[#allocation143_spill] sm:$0xff] %v7231_v43  ;;  %v7233_v19 = vadd.f32 %v2682_v58, %v2509_v51  ;;  %v2684_v14 = vpop.f32.mrf.mxu0 }
 0x37a   : > { %v2511_v60 = vpop.f32.mrf.mxu1 }
 0x37b   : > { %10150 = vst [vmem:[#allocation144_spill] sm:$0xff] %v7233_v19  ;;  %v7235_v7 = vadd.f32 %v2684_v14, %v2511_v60  ;;  %v2686_v0 = vpop.f32.mrf.mxu0 }
 0x37c   : > { %v2513_v63 = vpop.f32.mrf.mxu1 }
 0x37d   : > { %10151 = vst [vmem:[#allocation145_spill] sm:$0xff] %v7235_v7  ;;  %v7237_v11 = vadd.f32 %v2686_v0, %v2513_v63  ;;  %v2688_v28 = vpop.f32.mrf.mxu0 }
 0x37e   : > { %v2515_v18 = vpop.f32.mrf.mxu1 }
 0x37f   : > { %10152 = vst [vmem:[#allocation146_spill] sm:$0xff] %v7237_v11  ;;  %v7239_v53 = vadd.f32 %v2688_v28, %v2515_v18  ;;  %v2692_v8 = vpop.f32.mrf.mxu0 }
 0x380   : > { %v2519_v44 = vpop.f32.mrf.mxu1 }
 0x381   : > { %10153 = vst [vmem:[#allocation147_spill] sm:$0xff] %v7239_v53  ;;  %v7241_v55 = vadd.f32 %v2692_v8, %v2519_v44  ;;  %v2694_v50 = vpop.f32.mrf.mxu0 }
 0x382   : > { %v2521_v43 = vpop.f32.mrf.mxu1 }
 0x383   : > { %10154 = vst [vmem:[#allocation148_spill] sm:$0xff] %v7241_v55  ;;  %v7243_v51 = vadd.f32 %v2694_v50, %v2521_v43  ;;  %v2696_v58 = vpop.f32.mrf.mxu0 }
 0x384   : > { %v2523_v19 = vpop.f32.mrf.mxu1 }
 0x385   : > { %10155 = vst [vmem:[#allocation149_spill] sm:$0xff] %v7243_v51  ;;  %v7245_v60 = vadd.f32 %v2696_v58, %v2523_v19  ;;  %v2698_v14 = vpop.f32.mrf.mxu0 }
 0x386   : > { %v2525_v7 = vpop.f32.mrf.mxu1 }
 0x387   : > { %10156 = vst [vmem:[#allocation150_spill] sm:$0xff] %v7245_v60  ;;  %v7247_v63 = vadd.f32 %v2698_v14, %v2525_v7  ;;  %v2702_v0 = vpop.f32.mrf.mxu0 }
 0x388   : > { %v2529_v11 = vpop.f32.mrf.mxu1 }
 0x389   : > { %10157 = vst [vmem:[#allocation151_spill] sm:$0xff] %v7247_v63  ;;  %v7249_v18 = vadd.f32 %v2702_v0, %v2529_v11  ;;  %v2704_v28 = vpop.f32.mrf.mxu0  ;;  %v10163_v63 = vld [vmem:[#allocation31_spill] sm:$0xff]  ;;  %v10164_v11 = vld [vmem:[#allocation33_spill] sm:$0xff] }
 0x38a   : > { %v2531_v53 = vpop.f32.mrf.mxu1  ;;  %v3011_v0 = vadd.f32 %v10164_v11, %v10163_v63  ;;  %v10172_v11 = vld [vmem:[#allocation96_spill] sm:$0xff] }
 0x38b   : > { %10158 = vst [vmem:[#allocation152_spill] sm:$0xff] %v7249_v18  ;;  %v7251_v44 = vadd.f32 %v2704_v28, %v2531_v53  ;;  %v2706_v8 = vpop.f32.mrf.mxu0  ;;  %v10166_v28 = vld [vmem:[#allocation94_spill] sm:$0xff] }
 0x38c   : > { %v2533_v55 = vpop.f32.mrf.mxu1 }
 0x38d   : > { %10159 = vst [vmem:[#allocation153_spill] sm:$0xff] %v7251_v44  ;;  %v7253_v43 = vadd.f32 %v2706_v8, %v2533_v55  ;;  %v2708_v50 = vpop.f32.mrf.mxu0  ;;  %v3012_v44 = vadd.f32 %v3011_v0, %v10166_v28 }
 0x38e   : > { %v2535_v51 = vpop.f32.mrf.mxu1 }
 0x38f   : > { %10160 = vst [vmem:[#allocation154_spill] sm:$0xff] %v7253_v43  ;;  %v7255_v19 = vadd.f32 %v2708_v50, %v2535_v51  ;;  %v2712_v58 = vpop.f32.mrf.mxu0  ;;  %v10168_v51 = vld [vmem:[#allocation32_spill] sm:$0xff]  ;;  %v10169_v50 = vld [vmem:[#allocation35_spill] sm:$0xff] }
 0x390   : > { %v2539_v60 = vpop.f32.mrf.mxu1 }
 0x391   : > { %10161 = vst [vmem:[#allocation155_spill] sm:$0xff] %v7255_v19  ;;  %v7257_v7 = vadd.f32 %v2712_v58, %v2539_v60  ;;  %v2714_v14 = vpop.f32.mrf.mxu0  ;;  %v3021_v19 = vadd.f32 %v10169_v50, %v10168_v51  ;;  %v10176_v51 = vld [vmem:[#allocation98_spill] sm:$0xff] }
 0x392   : > { %v2541_v18 = vpop.f32.mrf.mxu1 }
 0x393   : > { %10162 = vst [vmem:[#allocation156_spill] sm:$0xff] %v7257_v7  ;;  %v7261_v24 = vadd.f32 %v2714_v14, %v2541_v18  ;;  %v2716_v53 = vpop.f32.mrf.mxu0  ;;  %v10171_v7 = vld [vmem:[#allocation95_spill] sm:$0xff]  ;;  %v3022_v63 = vadd.f32 %v3021_v19, %v10172_v11  ;;  %v10178_v19 = vld [vmem:[#allocation36_spill] sm:$0xff] }
 0x394   : > { %v2543_v55 = vpop.f32.mrf.mxu1  ;;  %v3013_v39 = vadd.f32 %v3012_v44, %v10171_v7  ;;  %v10179_v11 = vld [vmem:[#allocation39_spill] sm:$0xff] }
 0x395   : > { %10165 = vst [vmem:[#allocation157_spill] sm:$0xff] %v7261_v24  ;;  %v7264_v8 = vadd.f32 %v2716_v53, %v2543_v55  ;;  %v2718_v43 = vpop.f32.mrf.mxu0  ;;  %v10173_v24 = vld [vmem:[#allocation34_spill] sm:$0xff]  ;;  %v3023_v50 = vadd.f32 %v3022_v63, %v10175_v23 }
 0x396   : > { %v2545_v20 = vpop.f32.mrf.mxu1  ;;  %v3030_v0 = vadd.f32 %v10174_v15, %v10173_v24  ;;  %v3014_v53 = vadd.f32 %v3013_v39, %v7140_v12 }
 0x397   : > { %10167 = vst [vmem:[#allocation158_spill] sm:$0xff] %v7264_v8  ;;  %v7268_v60 = vadd.f32 %v2718_v43, %v2545_v20  ;;  %v2900_v58 = vpop.f32.mrf.mxu0  ;;  %v3024_v15 = vadd.f32 %v3023_v50, %v7145_v10 }
 0x398   : > { %v5250_v18 = vpop.f32.mrf.mxu1  ;;  %v3031_v20 = vadd.f32 %v3030_v0, %v10176_v51  ;;  %v3015_v7 = vadd.f32 %v3014_v53, %v7143_v34  ;;  %v10181_v51 = vld [vmem:[#allocation100_spill] sm:$0xff] }
 0x399   : > { %10170 = vst [vmem:[#allocation159_spill] sm:$0xff] %v7268_v60  ;;  %v2902_v14 = vpop.f32.mrf.mxu0  ;;  %v3025_v50 = vadd.f32 %v3024_v15, %v7147_v37  ;;  %v10187_v15 = vld [vmem:[#allocation52_spill] sm:$0xff] }
 0x39a   : > { %v5251_v55 = vpop.f32.mrf.mxu1  ;;  %v3039_v14 = vadd.f32 %v10179_v11, %v10178_v19  ;;  %v10182_v11 = vld [vmem:[#allocation38_spill] sm:$0xff]  ;;  %v10183_v19 = vld [vmem:[#allocation41_spill] sm:$0xff] }
 0x39b   : > { %v5252_v28 = vadd.f32 %v5251_v55, %v5250_v18  ;;  %v2903_v8 = vpop.f32.mrf.mxu0  ;;  %v10180_v55 = vld [vmem:[#allocation99_spill] sm:$0xff]  ;;  %v3048_v53 = vadd.f32 %v10183_v19, %v10182_v11  ;;  %v10186_v11 = vld [vmem:[#allocation40_spill] sm:$0xff] }
 0x39c   : > { %v5253_v43 = vpop.f32.mrf.mxu1  ;;  %v3032_v0 = vadd.f32 %v3031_v20, %v10180_v55  ;;  %v3040_v23 = vadd.f32 %v3039_v14, %v10181_v51  ;;  %v10184_v14 = vld [vmem:[#allocation101_spill] sm:$0xff]  ;;  %v3057_v55 = vadd.f32 %v10187_v15, %v10186_v11 }
 0x39d   : > { %v7277_v60 = vadd.f32 %v5252_v28, %v2900_v58  ;;  %v2905_v44 = vpop.f32.mrf.mxu0  ;;  %v10190_v11 = vld [vmem:[#allocation53_spill] sm:$0xff] }
 0x39e   : > { %v5254_v39 = vpop.f32.mrf.mxu1  ;;  %v3041_v51 = vadd.f32 %v3040_v23, %v10184_v14 }
 0x39f   : > { %10177 = vst [vmem:[#allocation160_spill] sm:$0xff] %v7277_v60  ;;  %v5255_v24 = vadd.f32 %v5254_v39, %v5253_v43  ;;  %v2908_v18 = vpop.f32.mrf.mxu0  ;;  %v3017_v63 = vsel %vm3016_vm2, %v7277_v60, 0.0  ;;  %v3033_v43 = vadd.f32 %v3032_v0, %v7153_v4 }
 0x3a0   : > { %v5256_v28 = vpop.f32.mrf.mxu1  ;;  %v3018_v58 = vadd.f32 %v3017_v63, %v3015_v7  ;;  %v10185_v7 = vld [vmem:[#allocation102_spill] sm:$0xff] }
 0x3a1   : > { %v7287_v44 = vadd.f32 %v5255_v24, %v2903_v8  ;;  %v2910_v12 = vpop.f32.mrf.mxu0  ;;  %v3049_v24 = vadd.f32 %v3048_v53, %v10185_v7  ;;  %v3034_v0 = vadd.f32 %v3033_v43, %v7156_v3  ;;  %v10188_v53 = vld [vmem:[#allocation48_spill] sm:$0xff]  ;;  %v10191_v43 = vld [vmem:[#allocation54_spill] sm:$0xff] }
 0x3a2   : > { %v5257_v39 = vpop.f32.mrf.mxu1  ;;  %3019 = vadd.xlane.f32.xlu0 %v3018_v58  ;;  %v3066_v14 = vadd.f32 %v10191_v43, %v10190_v11  ;;  %v10193_v43 = vld [vmem:[#allocation55_spill] sm:$0xff] }
 0x3a3   : > { %v5258_v10 = vadd.f32 %v5257_v39, %v5256_v28  ;;  %v2911_v60 = vpop.f32.mrf.mxu0  ;;  %v3026_v20 = vsel %vm3016_vm2, %v7287_v44, 0.0  ;;  %v3042_v28 = vadd.f32 %v3041_v51, %v7158_v56  ;;  %v3050_v7 = vadd.f32 %v3049_v24, %v10188_v53 }
 0x3a4   : > { %v5259_v8 = vpop.f32.mrf.mxu1  ;;  %v3027_v12 = vadd.f32 %v3026_v20, %v3025_v50  ;;  %v10189_v50 = vld [vmem:[#allocation103_spill] sm:$0xff] }
 0x3a5   : > { %v7297_v63 = vadd.f32 %v5258_v10, %v2908_v18  ;;  %v2913_v19 = vpop.f32.mrf.mxu0  ;;  %v3058_v10 = vadd.f32 %v3057_v55, %v10189_v50  ;;  %v3043_v51 = vadd.f32 %v3042_v28, %v7160_v27  ;;  %v10192_v55 = vld [vmem:[#allocation104_spill] sm:$0xff]  ;;  %v10194_v28 = vld [vmem:[#allocation57_spill] sm:$0xff] }
 0x3a6   : > { %v5260_v58 = vpop.f32.mrf.mxu1  ;;  %3028 = vadd.xlane.f32.xlu0 %v3027_v12  ;;  %v3075_v11 = vadd.f32 %v10194_v28, %v10193_v43  ;;  %v10195_v28 = vld [vmem:[#allocation20_spill] sm:$0xff] }
 0x3a7   : > { %v5261_v39 = vadd.f32 %v5260_v58, %v5259_v8  ;;  %v2916_v4 = vpop.f32.mrf.mxu0  ;;  %v3035_v23 = vsel %vm3016_vm2, %v7297_v63, 0.0  ;;  %v3051_v8 = vadd.f32 %v3050_v7, %v7164_v36  ;;  %v3059_v50 = vadd.f32 %v3058_v10, %v10192_v55 }
 0x3a8   : > { %v5262_v18 = vpop.f32.mrf.mxu1  ;;  %v3036_v19 = vadd.f32 %v3035_v23, %v3034_v0 }
 0x3a9   : > { %v7307_v20 = vadd.f32 %v5261_v39, %v2911_v60  ;;  %v2918_v15 = vpop.f32.mrf.mxu0  ;;  %v3067_v60 = vadd.f32 %v3066_v14, %v6948_v48  ;;  %v3052_v7 = vadd.f32 %v3051_v8, %v7167_v1  ;;  %v10196_v8 = vld [vmem:[#allocation17_spill] sm:$0xff] }
 0x3aa   : > { %v5263_v12 = vpop.f32.mrf.mxu1  ;;  %3037 = vadd.xlane.f32.xlu1 %v3036_v19  ;;  %v3084_v43 = vadd.f32 %v10196_v8, %v10195_v28  ;;  %v10197_v8 = vld [vmem:[#allocation58_spill] sm:$0xff] }
 0x3ab   : > { %v5264_v58 = vadd.f32 %v5263_v12, %v5262_v18  ;;  %v2919_v56 = vpop.f32.mrf.mxu0  ;;  %v3044_v24 = vsel %vm3016_vm2, %v7307_v20, 0.0  ;;  %v3060_v18 = vadd.f32 %v3059_v50, %v7169_v49  ;;  %v3068_v14 = vadd.f32 %v3067_v60, %v6951_v42 }
 0x3ac   : > { %v5265_v0 = vpop.f32.mrf.mxu1  ;;  %v3045_v15 = vadd.f32 %v3044_v24, %v3043_v51 }
 0x3ad   : > { %v7317_v39 = vadd.f32 %v5264_v58, %v2916_v4  ;;  %v2921_v23 = vpop.f32.mrf.mxu0  ;;  %v3076_v4 = vadd.f32 %v3075_v11, %v6953_v61  ;;  %v3061_v50 = vadd.f32 %v3060_v18, %v7171_v26  ;;  %v10198_v18 = vld [vmem:[#allocation60_spill] sm:$0xff] }
 0x3ae   : > { %v5266_v19 = vpop.f32.mrf.mxu1  ;;  %3046 = vadd.xlane.f32.xlu1 %v3045_v15  ;;  %v3093_v28 = vadd.f32 %v10198_v18, %v10197_v8  ;;  %v10199_v18 = vld [vmem:[#allocation61_spill] sm:$0xff] }
 0x3af   : > { %v5267_v12 = vadd.f32 %v5266_v19, %v5265_v0  ;;  %v2924_v36 = vpop.f32.mrf.mxu0  ;;  %v3053_v10 = vsel %vm3016_vm2, %v7317_v39, 0.0  ;;  %v3069_v0 = vadd.f32 %v3068_v14, %v7174_v9  ;;  %v3077_v11 = vadd.f32 %v3076_v4, %v6955_v54 }
 0x3b0   : > { %v5268_v51 = vpop.f32.mrf.mxu1  ;;  %v3054_v58 = vadd.f32 %v3053_v10, %v3052_v7 }
 0x3b1   : > { %v7327_v24 = vadd.f32 %v5267_v12, %v2919_v56  ;;  %v2926_v23 = vpop.f32.mrf.mxu0  ;;  %v3085_v56 = vadd.f32 %v3084_v43, %v6961_v41  ;;  %v3070_v14 = vadd.f32 %v3069_v0, %v7178_v16  ;;  %v10200_v0 = vld [vmem:[#allocation62_spill] sm:$0xff] }
 0x3b2   : > { %v5269_v15 = vpop.f32.mrf.mxu1  ;;  %3055 = vadd.xlane.f32.xlu0 %v3054_v58  ;;  %v3102_v8 = vadd.f32 %v10200_v0, %v10199_v18  ;;  %v10201_v0 = vld [vmem:[#allocation63_spill] sm:$0xff] }
 0x3b3   : > { %v5270_v19 = vadd.f32 %v5269_v15, %v5268_v51  ;;  %v2927_v48 = vpop.f32.mrf.mxu0  ;;  %v3062_v60 = vsel %vm3016_vm2, %v7327_v24, 0.0  ;;  %v3078_v51 = vadd.f32 %v3077_v11, %v7180_v5  ;;  %v3086_v43 = vadd.f32 %v3085_v56, %v6966_v33 }
 0x3b4   : > { %v5271_v7 = vpop.f32.mrf.mxu1  ;;  %v3063_v12 = vadd.f32 %v3062_v60, %v3061_v50 }
 0x3b5   : > { %v7337_v10 = vadd.f32 %v5270_v19, %v2924_v36  ;;  %v2929_v23 = vpop.f32.mrf.mxu0  ;;  %v3094_v36 = vadd.f32 %v3093_v28, %v6968_v59  ;;  %v3079_v11 = vadd.f32 %v3078_v51, %v7182_v35  ;;  %v10202_v51 = vld [vmem:[#allocation64_spill] sm:$0xff] }
 0x3b6   : > { %v5272_v58 = vpop.f32.mrf.mxu1  ;;  %3064 = vadd.xlane.f32.xlu1 %v3063_v12  ;;  %v3111_v18 = vadd.f32 %v10202_v51, %v10201_v0  ;;  %v10203_v51 = vld [vmem:[#allocation65_spill] sm:$0xff] }
 0x3b7   : > { %v5273_v15 = vadd.f32 %v5272_v58, %v5271_v7  ;;  %v2932_v61 = vpop.f32.mrf.mxu0  ;;  %v3071_v4 = vsel %vm3016_vm2, %v7337_v10, 0.0  ;;  %v3087_v7 = vadd.f32 %v3086_v43, %v7185_v17  ;;  %v3095_v28 = vadd.f32 %v3094_v36, %v6972_v13 }
 0x3b8   : > { %v5274_v50 = vpop.f32.mrf.mxu1  ;;  %v3072_v19 = vadd.f32 %v3071_v4, %v3070_v14 }
 0x3b9   : > { %v7347_v60 = vadd.f32 %v5273_v15, %v2927_v48  ;;  %v2934_v23 = vpop.f32.mrf.mxu0  ;;  %v3103_v48 = vadd.f32 %v3102_v8, %v6978_v32  ;;  %v3088_v43 = vadd.f32 %v3087_v7, %v7187_v45  ;;  %v10204_v7 = vld [vmem:[#allocation24_spill] sm:$0xff] }
 0x3ba   : > { %v5275_v12 = vpop.f32.mrf.mxu1  ;;  %3073 = vadd.xlane.f32.xlu0 %v3072_v19  ;;  %v3120_v0 = vadd.f32 %v10204_v7, %v10203_v51  ;;  %v10205_v7 = vld [vmem:[#allocation66_spill] sm:$0xff] }
 0x3bb   : > { %v5276_v58 = vadd.f32 %v5275_v12, %v5274_v50  ;;  %v2935_v41 = vpop.f32.mrf.mxu0  ;;  %v3080_v56 = vsel %vm3016_vm2, %v7347_v60, 0.0  ;;  %v3096_v50 = vadd.f32 %v3095_v28, %v7189_v30  ;;  %v3104_v8 = vadd.f32 %v3103_v48, %v6983_v52 }
 0x3bc   : > { %v5277_v14 = vpop.f32.mrf.mxu1  ;;  %v3081_v15 = vadd.f32 %v3080_v56, %v3079_v11 }
 0x3bd   : > { %v7357_v4 = vadd.f32 %v5276_v58, %v2932_v61  ;;  %v2937_v23 = vpop.f32.mrf.mxu0  ;;  %v3112_v61 = vadd.f32 %v3111_v18, %v6985_v31  ;;  %v3097_v28 = vadd.f32 %v3096_v50, %v7191_v21  ;;  %v10206_v50 = vld [vmem:[#allocation67_spill] sm:$0xff] }
 0x3be   : > { %v5278_v19 = vpop.f32.mrf.mxu1  ;;  %3082 = vadd.xlane.f32.xlu1 %v3081_v15  ;;  %v3129_v51 = vadd.f32 %v10206_v50, %v10205_v7  ;;  %v10207_v50 = vld [vmem:[#allocation68_spill] sm:$0xff] }
 0x3bf   : > { %v5279_v12 = vadd.f32 %v5278_v19, %v5277_v14  ;;  %v2940_v59 = vpop.f32.mrf.mxu0  ;;  %v3089_v36 = vsel %vm3016_vm2, %v7357_v4, 0.0  ;;  %v3105_v14 = vadd.f32 %v3104_v8, %v7193_v46  ;;  %v3113_v18 = vadd.f32 %v3112_v61, %v6989_v47 }
 0x3c0   : > { %v5280_v11 = vpop.f32.mrf.mxu1  ;;  %v3090_v58 = vadd.f32 %v3089_v36, %v3088_v43 }
 0x3c1   : > { %v7367_v56 = vadd.f32 %v5279_v12, %v2935_v41  ;;  %v2942_v23 = vpop.f32.mrf.mxu0  ;;  %v3121_v41 = vadd.f32 %v3120_v0, %v6995_v29  ;;  %v3106_v8 = vadd.f32 %v3105_v14, %v7195_v2  ;;  %v10208_v14 = vld [vmem:[#allocation69_spill] sm:$0xff] }
 0x3c2   : > { %v5281_v15 = vpop.f32.mrf.mxu1  ;;  %3091 = vadd.xlane.f32.xlu0 %v3090_v58  ;;  %v3138_v7 = vadd.f32 %v10208_v14, %v10207_v50  ;;  %v10210_v14 = vld [vmem:[#allocation70_spill] sm:$0xff] }
 0x3c3   : > { %v5282_v19 = vadd.f32 %v5281_v15, %v5280_v11  ;;  %v2943_v32 = vpop.f32.mrf.mxu0  ;;  %v3098_v48 = vsel %vm3016_vm2, %v7367_v56, 0.0  ;;  %v3114_v11 = vadd.f32 %v3113_v18, %v7197_v38  ;;  %v3122_v0 = vadd.f32 %v3121_v41, %v7000_v57 }
 0x3c4   : > { %v5283_v43 = vpop.f32.mrf.mxu1  ;;  %v3099_v12 = vadd.f32 %v3098_v48, %v3097_v28 }
 0x3c5   : > { %v7377_v36 = vadd.f32 %v5282_v19, %v2940_v59  ;;  %v2945_v23 = vpop.f32.mrf.mxu0  ;;  %v3130_v59 = vadd.f32 %v3129_v51, %v7003_v40  ;;  %v3115_v18 = vadd.f32 %v3114_v11, %v7199_v6  ;;  %v10211_v11 = vld [vmem:[#allocation71_spill] sm:$0xff] }
 0x3c6   : > { %v5284_v58 = vpop.f32.mrf.mxu1  ;;  %3100 = vadd.xlane.f32.xlu1 %v3099_v12  ;;  %v3147_v50 = vadd.f32 %v10211_v11, %v10210_v14  ;;  %v10217_v14 = vld [vmem:[#allocation26_spill] sm:$0xff] }
 0x3c7   : > { %v5285_v15 = vadd.f32 %v5284_v58, %v5283_v43  ;;  %v2948_v31 = vpop.f32.mrf.mxu0  ;;  %v3107_v61 = vsel %vm3016_vm2, %v7377_v36, 0.0  ;;  %v3123_v43 = vadd.f32 %v3122_v0, %v7201_v22  ;;  %v3131_v51 = vadd.f32 %v3130_v59, %v7007_v25  ;;  %v10212_v0 = vld [vmem:[#allocation47_spill] sm:$0xff] }
 0x3c8   : > { %v5286_v28 = vpop.f32.mrf.mxu1  ;;  %v3108_v19 = vadd.f32 %v3107_v61, %v3106_v8 }
 0x3c9   : > { %v7387_v48 = vadd.f32 %v5285_v15, %v2943_v32  ;;  %v2950_v23 = vpop.f32.mrf.mxu0  ;;  %v3139_v32 = vadd.f32 %v3138_v7, %v7015_v62  ;;  %v3124_v40 = vadd.f32 %v3123_v43, %v10212_v0  ;;  %v10214_v7 = vld [vmem:[#allocation108_spill] sm:$0xff] }
 0x3ca   : > { %v5287_v12 = vpop.f32.mrf.mxu1  ;;  %3109 = vadd.xlane.f32.xlu0 %v3108_v19  ;;  %v10213_v19 = vld [vmem:[#allocation46_spill] sm:$0xff]  ;;  %v10218_v43 = vld [vmem:[#allocation28_spill] sm:$0xff] }
 0x3cb   : > { %v5288_v58 = vadd.f32 %v5287_v12, %v5286_v28  ;;  %v2951_v29 = vpop.f32.mrf.mxu0  ;;  %v3116_v41 = vsel %vm3016_vm2, %v7387_v48, 0.0  ;;  %v3132_v28 = vadd.f32 %v3131_v51, %v10213_v19  ;;  %v3140_v62 = vadd.f32 %v3139_v32, %v10214_v7  ;;  %v10219_v51 = vld [vmem:[#allocation50_spill] sm:$0xff] }
 0x3cc   : > { %v5289_v8 = vpop.f32.mrf.mxu1  ;;  %v3117_v15 = vadd.f32 %v3116_v41, %v3115_v18  ;;  %v10215_v18 = vld [vmem:[#allocation109_spill] sm:$0xff]  ;;  %v3156_v25 = vadd.f32 %v10218_v43, %v10217_v14  ;;  %v10224_v14 = vld [vmem:[#allocation72_spill] sm:$0xff] }
 0x3cd   : > { %v7397_v61 = vadd.f32 %v5288_v58, %v2948_v31  ;;  %v2953_v23 = vpop.f32.mrf.mxu0  ;;  %v3148_v31 = vadd.f32 %v3147_v50, %v10215_v18  ;;  %v3133_v19 = vadd.f32 %v3132_v28, %v10219_v51  ;;  %v10221_v50 = vld [vmem:[#allocation110_spill] sm:$0xff]  ;;  %v10225_v28 = vld [vmem:[#allocation73_spill] sm:$0xff] }
 0x3ce   : > { %v5290_v12 = vpop.f32.mrf.mxu1  ;;  %3118 = vadd.xlane.f32.xlu1 %v3117_v15  ;;  %v10220_v15 = vld [vmem:[#allocation49_spill] sm:$0xff]  ;;  %v3165_v7 = vadd.f32 %v10225_v28, %v10224_v14  ;;  %v10231_v14 = vld [vmem:[#allocation74_spill] sm:$0xff] }
 0x3cf   : > { %10209 = vst [vmem:[#allocation48_spill] sm:$0xff] %v7397_v61  ;;  %v5291_v22 = vadd.f32 %v5290_v12, %v5289_v8  ;;  %v2956_v57 = vpop.f32.mrf.mxu0  ;;  %v3125_v59 = vsel %vm3016_vm2, %v7397_v61, 0.0  ;;  %v3141_v8 = vadd.f32 %v3140_v62, %v10220_v15  ;;  %v3149_v18 = vadd.f32 %v3148_v31, %v10221_v50  ;;  %v10226_v62 = vld [vmem:[#allocation51_spill] sm:$0xff] }
 0x3d0   : > { %v5292_v58 = vpop.f32.mrf.mxu1  ;;  %v3126_v41 = vadd.f32 %v3125_v59, %v3124_v40  ;;  %v10222_v40 = vld [vmem:[#allocation111_spill] sm:$0xff] }
 0x3d1   : > { %v7407_v23 = vadd.f32 %v5291_v22, %v2951_v29  ;;  %v2958_v11 = vpop.f32.mrf.mxu0  ;;  %v3157_v29 = vadd.f32 %v3156_v25, %v10222_v40  ;;  %v3142_v15 = vadd.f32 %v3141_v8, %v10226_v62  ;;  %v10228_v25 = vld [vmem:[#allocation27_spill] sm:$0xff] }
 0x3d2   : > { %v5293_v12 = vpop.f32.mrf.mxu1  ;;  %3127 = vadd.xlane.f32.xlu0 %v3126_v41  ;;  %v10227_v41 = vld [vmem:[#allocation134_spill] sm:$0xff]  ;;  %v10232_v8 = vld [vmem:[#allocation75_spill] sm:$0xff] }
 0x3d3   : > { %10216 = vst [vmem:[#allocation104_spill] sm:$0xff] %v7407_v23  ;;  %v5294_v0 = vadd.f32 %v5293_v12, %v5292_v58  ;;  %v2959_v61 = vpop.f32.mrf.mxu0  ;;  %v3134_v32 = vsel %vm3016_vm2, %v7407_v23, 0.0  ;;  %v3150_v58 = vadd.f32 %v3149_v18, %v10227_v41  ;;  %v3158_v40 = vadd.f32 %v3157_v29, %v10228_v25  ;;  %v10233_v18 = vld [vmem:[#allocation135_spill] sm:$0xff] }
 0x3d4   : > { %v5295_v22 = vpop.f32.mrf.mxu1  ;;  %v3135_v11 = vadd.f32 %v3134_v32, %v3133_v19  ;;  %v10229_v19 = vld [vmem:[#allocation112_spill] sm:$0xff]  ;;  %v3174_v50 = vadd.f32 %v10232_v8, %v10231_v14 }
 0x3d5   : > { %v7417_v59 = vadd.f32 %v5294_v0, %v2956_v57  ;;  %v2961_v43 = vpop.f32.mrf.mxu0  ;;  %v3166_v57 = vadd.f32 %v3165_v7, %v10229_v19  ;;  %v3151_v41 = vadd.f32 %v3150_v58, %v10233_v18  ;;  %v10235_v7 = vld [vmem:[#allocation113_spill] sm:$0xff]  ;;  %v10238_v14 = vld [vmem:[#allocation76_spill] sm:$0xff] }
 0x3d6   : > { %v5296_v12 = vpop.f32.mrf.mxu1  ;;  %3136 = vadd.xlane.f32.xlu1 %v3135_v11  ;;  %v10234_v11 = vld [vmem:[#allocation136_spill] sm:$0xff]  ;;  %v10239_v58 = vld [vmem:[#allocation77_spill] sm:$0xff] }
 0x3d7   : > { %10223 = vst [vmem:[#allocation161_spill] sm:$0xff] %v7417_v59  ;;  %v5297_v51 = vadd.f32 %v5296_v12, %v5295_v22  ;;  %v2964_v23 = vpop.f32.mrf.mxu0  ;;  %v3143_v31 = vsel %vm3016_vm2, %v7417_v59, 0.0  ;;  %v3159_v22 = vadd.f32 %v3158_v40, %v10234_v11  ;;  %v3167_v19 = vadd.f32 %v3166_v57, %v10235_v7  ;;  %v10240_v40 = vld [vmem:[#allocation137_spill] sm:$0xff] }
 0x3d8   : > { %v5298_v0 = vpop.f32.mrf.mxu1  ;;  %v3144_v43 = vadd.f32 %v3143_v31, %v3142_v15  ;;  %v10236_v15 = vld [vmem:[#allocation29_spill] sm:$0xff]  ;;  %v3183_v25 = vadd.f32 %v10239_v58, %v10238_v14  ;;  %v10245_v14 = vld [vmem:[#allocation78_spill] sm:$0xff] }
 0x3d9   : > { %v7427_v32 = vadd.f32 %v5297_v51, %v2959_v61  ;;  %v2966_v28 = vpop.f32.mrf.mxu0  ;;  %v3175_v61 = vadd.f32 %v3174_v50, %v10236_v15  ;;  %v3160_v11 = vadd.f32 %v3159_v22, %v10240_v40  ;;  %v10242_v50 = vld [vmem:[#allocation114_spill] sm:$0xff]  ;;  %v10246_v22 = vld [vmem:[#allocation79_spill] sm:$0xff] }
 0x3da   : > { %v5299_v12 = vpop.f32.mrf.mxu1  ;;  %3145 = vadd.xlane.f32.xlu0 %v3144_v43  ;;  %v10241_v43 = vld [vmem:[#allocation138_spill] sm:$0xff]  ;;  %v3192_v7 = vadd.f32 %v10246_v22, %v10245_v14  ;;  %v10252_v14 = vld [vmem:[#allocation80_spill] sm:$0xff] }
 0x3db   : > { %10230 = vst [vmem:[#allocation162_spill] sm:$0xff] %v7427_v32  ;;  %v5300_v62 = vadd.f32 %v5299_v12, %v5298_v0  ;;  %v2967_v59 = vpop.f32.mrf.mxu0  ;;  %v3152_v29 = vsel %vm3016_vm2, %v7427_v32, 0.0  ;;  %v3168_v0 = vadd.f32 %v3167_v19, %v10241_v43  ;;  %v3176_v15 = vadd.f32 %v3175_v61, %v10242_v50  ;;  %v10247_v19 = vld [vmem:[#allocation139_spill] sm:$0xff] }
 0x3dc   : > { %v5301_v51 = vpop.f32.mrf.mxu1  ;;  %v3153_v28 = vadd.f32 %v3152_v29, %v3151_v41  ;;  %v10243_v41 = vld [vmem:[#allocation115_spill] sm:$0xff] }
 0x3dd   : > { %v7437_v31 = vadd.f32 %v5300_v62, %v2964_v23  ;;  %v2969_v8 = vpop.f32.mrf.mxu0  ;;  %v3184_v23 = vadd.f32 %v3183_v25, %v10243_v41  ;;  %v3169_v43 = vadd.f32 %v3168_v0, %v10247_v19  ;;  %v10249_v25 = vld [vmem:[#allocation116_spill] sm:$0xff]  ;;  %v10253_v0 = vld [vmem:[#allocation81_spill] sm:$0xff] }
 0x3de   : > { %v5302_v12 = vpop.f32.mrf.mxu1  ;;  %3154 = vadd.xlane.f32.xlu1 %v3153_v28  ;;  %v10248_v28 = vld [vmem:[#allocation140_spill] sm:$0xff]  ;;  %v3201_v50 = vadd.f32 %v10253_v0, %v10252_v14  ;;  %v10259_v14 = vld [vmem:[#allocation82_spill] sm:$0xff] }
 0x3df   : > { %10237 = vst [vmem:[#allocation163_spill] sm:$0xff] %v7437_v31  ;;  %v5303_v18 = vadd.f32 %v5302_v12, %v5301_v51  ;;  %v2972_v32 = vpop.f32.mrf.mxu0  ;;  %v3161_v57 = vsel %vm3016_vm2, %v7437_v31, 0.0  ;;  %v3177_v51 = vadd.f32 %v3176_v15, %v10248_v28  ;;  %v3185_v41 = vadd.f32 %v3184_v23, %v10249_v25  ;;  %v10254_v15 = vld [vmem:[#allocation141_spill] sm:$0xff] }
 0x3e0   : > { %v5304_v62 = vpop.f32.mrf.mxu1  ;;  %v3162_v8 = vadd.f32 %v3161_v57, %v3160_v11  ;;  %v10250_v11 = vld [vmem:[#allocation30_spill] sm:$0xff] }
 0x3e1   : > { %v7447_v29 = vadd.f32 %v5303_v18, %v2967_v59  ;;  %v2974_v58 = vpop.f32.mrf.mxu0  ;;  %v3193_v59 = vadd.f32 %v3192_v7, %v10250_v11  ;;  %v3178_v28 = vadd.f32 %v3177_v51, %v10254_v15  ;;  %v10256_v7 = vld [vmem:[#allocation117_spill] sm:$0xff]  ;;  %v10260_v51 = vld [vmem:[#allocation83_spill] sm:$0xff] }
 0x3e2   : > { %v5305_v12 = vpop.f32.mrf.mxu1  ;;  %3163 = vadd.xlane.f32.xlu0 %v3162_v8  ;;  %v10255_v8 = vld [vmem:[#allocation142_spill] sm:$0xff]  ;;  %v3210_v25 = vadd.f32 %v10260_v51, %v10259_v14  ;;  %v10266_v14 = vld [vmem:[#allocation84_spill] sm:$0xff] }
 0x3e3   : > { %10244 = vst [vmem:[#allocation164_spill] sm:$0xff] %v7447_v29  ;;  %v5306_v40 = vadd.f32 %v5305_v12, %v5304_v62  ;;  %v2975_v31 = vpop.f32.mrf.mxu0  ;;  %v3170_v61 = vsel %vm3016_vm2, %v7447_v29, 0.0  ;;  %v3186_v62 = vadd.f32 %v3185_v41, %v10255_v8  ;;  %v3194_v11 = vadd.f32 %v3193_v59, %v10256_v7  ;;  %v10261_v41 = vld [vmem:[#allocation143_spill] sm:$0xff] }
 0x3e4   : > { %v5307_v18 = vpop.f32.mrf.mxu1  ;;  %v3171_v58 = vadd.f32 %v3170_v61, %v3169_v43  ;;  %v10257_v43 = vld [vmem:[#allocation118_spill] sm:$0xff] }
 0x3e5   : > { %v7457_v57 = vadd.f32 %v5306_v40, %v2972_v32  ;;  %v2977_v22 = vpop.f32.mrf.mxu0  ;;  %v3202_v32 = vadd.f32 %v3201_v50, %v10257_v43  ;;  %v3187_v8 = vadd.f32 %v3186_v62, %v10261_v41  ;;  %v10263_v50 = vld [vmem:[#allocation119_spill] sm:$0xff]  ;;  %v10267_v62 = vld [vmem:[#allocation85_spill] sm:$0xff] }
 0x3e6   : > { %v5308_v12 = vpop.f32.mrf.mxu1  ;;  %3172 = vadd.xlane.f32.xlu1 %v3171_v58  ;;  %v10262_v58 = vld [vmem:[#allocation144_spill] sm:$0xff]  ;;  %v3219_v7 = vadd.f32 %v10267_v62, %v10266_v14  ;;  %v10273_v14 = vld [vmem:[#allocation86_spill] sm:$0xff] }
 0x3e7   : > { %10251 = vst [vmem:[#allocation165_spill] sm:$0xff] %v7457_v57  ;;  %v5309_v19 = vadd.f32 %v5308_v12, %v5307_v18  ;;  %v2980_v29 = vpop.f32.mrf.mxu0  ;;  %v3179_v23 = vsel %vm3016_vm2, %v7457_v57, 0.0  ;;  %v3195_v18 = vadd.f32 %v3194_v11, %v10262_v58  ;;  %v3203_v43 = vadd.f32 %v3202_v32, %v10263_v50  ;;  %v10268_v11 = vld [vmem:[#allocation145_spill] sm:$0xff] }
 0x3e8   : > { %v5310_v40 = vpop.f32.mrf.mxu1  ;;  %v3180_v22 = vadd.f32 %v3179_v23, %v3178_v28  ;;  %v10264_v28 = vld [vmem:[#allocation120_spill] sm:$0xff] }
 0x3e9   : > { %v7467_v61 = vadd.f32 %v5309_v19, %v2975_v31  ;;  %v2982_v0 = vpop.f32.mrf.mxu0  ;;  %v3211_v31 = vadd.f32 %v3210_v25, %v10264_v28  ;;  %v3196_v58 = vadd.f32 %v3195_v18, %v10268_v11  ;;  %v10270_v25 = vld [vmem:[#allocation121_spill] sm:$0xff]  ;;  %v10274_v18 = vld [vmem:[#allocation87_spill] sm:$0xff] }
 0x3ea   : > { %v5311_v12 = vpop.f32.mrf.mxu1  ;;  %3181 = vadd.xlane.f32.xlu0 %v3180_v22  ;;  %v10269_v22 = vld [vmem:[#allocation146_spill] sm:$0xff]  ;;  %v3228_v50 = vadd.f32 %v10274_v18, %v10273_v14  ;;  %v10279_v14 = vld [vmem:[#allocation88_spill] sm:$0xff] }
 0x3eb   : > { %10258 = vst [vmem:[#allocation166_spill] sm:$0xff] %v7467_v61  ;;  %v5312_v15 = vadd.f32 %v5311_v12, %v5310_v40  ;;  %v2983_v57 = vpop.f32.mrf.mxu0  ;;  %v3188_v59 = vsel %vm3016_vm2, %v7467_v61, 0.0  ;;  %v3204_v40 = vadd.f32 %v3203_v43, %v10269_v22  ;;  %v3212_v28 = vadd.f32 %v3211_v31, %v10270_v25  ;;  %v10275_v43 = vld [vmem:[#allocation147_spill] sm:$0xff] }
 0x3ec   : > { %v5313_v19 = vpop.f32.mrf.mxu1  ;;  %v3189_v0 = vadd.f32 %v3188_v59, %v3187_v8  ;;  %v10271_v8 = vld [vmem:[#allocation122_spill] sm:$0xff] }
 0x3ed   : > { %v7477_v23 = vadd.f32 %v5312_v15, %v2980_v29  ;;  %v2985_v51 = vpop.f32.mrf.mxu0  ;;  %v3220_v29 = vadd.f32 %v3219_v7, %v10271_v8  ;;  %v3205_v22 = vadd.f32 %v3204_v40, %v10275_v43  ;;  %v10277_v7 = vld [vmem:[#allocation123_spill] sm:$0xff]  ;;  %v10280_v40 = vld [vmem:[#allocation89_spill] sm:$0xff] }
 0x3ee   : > { %v5314_v12 = vpop.f32.mrf.mxu1  ;;  %3190 = vadd.xlane.f32.xlu1 %v3189_v0  ;;  %v10276_v0 = vld [vmem:[#allocation148_spill] sm:$0xff]  ;;  %v3237_v25 = vadd.f32 %v10280_v40, %v10279_v14  ;;  %v10286_v14 = vld [vmem:[#allocation151_spill] sm:$0xff] }
 0x3ef   : > { %10265 = vst [vmem:[#allocation167_spill] sm:$0xff] %v7477_v23  ;;  %v5315_v41 = vadd.f32 %v5314_v12, %v5313_v19  ;;  %v2988_v61 = vpop.f32.mrf.mxu0  ;;  %v3197_v32 = vsel %vm3016_vm2, %v7477_v23, 0.0  ;;  %v3213_v19 = vadd.f32 %v3212_v28, %v10276_v0  ;;  %v3221_v8 = vadd.f32 %v3220_v29, %v10277_v7  ;;  %v10281_v28 = vld [vmem:[#allocation149_spill] sm:$0xff]  ;;  %v10287_v7 = vld [vmem:[#allocation152_spill] sm:$0xff] }
 0x3f0   : > { %v5316_v15 = vpop.f32.mrf.mxu1  ;;  %v3198_v51 = vadd.f32 %v3197_v32, %v3196_v58  ;;  %v10278_v58 = vld [vmem:[#allocation124_spill] sm:$0xff] }
 0x3f1   : > { %v7487_v59 = vadd.f32 %v5315_v41, %v2983_v57  ;;  %v2990_v62 = vpop.f32.mrf.mxu0  ;;  %v3229_v57 = vadd.f32 %v3228_v50, %v10278_v58  ;;  %v3214_v0 = vadd.f32 %v3213_v19, %v10281_v28  ;;  %v10283_v50 = vld [vmem:[#allocation125_spill] sm:$0xff]  ;;  %v10288_v28 = vld [vmem:[#allocation127_spill] sm:$0xff] }
 0x3f2   : > { %v5317_v12 = vpop.f32.mrf.mxu1  ;;  %3199 = vadd.xlane.f32.xlu0 %v3198_v51  ;;  %v10282_v51 = vld [vmem:[#allocation150_spill] sm:$0xff] }
 0x3f3   : > { %10272 = vst [vmem:[#allocation168_spill] sm:$0xff] %v7487_v59  ;;  %v5318_v11 = vadd.f32 %v5317_v12, %v5316_v15  ;;  %v2991_v23 = vpop.f32.mrf.mxu0  ;;  %v3206_v31 = vsel %vm3016_vm2, %v7487_v59, 0.0  ;;  %v3222_v15 = vadd.f32 %v3221_v8, %v10282_v51  ;;  %v3230_v58 = vadd.f32 %v3229_v57, %v10283_v50 }
 0x3f4   : > { %v5319_v41 = vpop.f32.mrf.mxu1  ;;  %v3207_v62 = vadd.f32 %v3206_v31, %v3205_v22  ;;  %v10284_v22 = vld [vmem:[#allocation126_spill] sm:$0xff] }
 0x3f5   : > { %v7497_v32 = vadd.f32 %v5318_v11, %v2988_v61  ;;  %v2993_v18 = vpop.f32.mrf.mxu0  ;;  %v3238_v61 = vadd.f32 %v3237_v25, %v10284_v22  ;;  %v3223_v19 = vadd.f32 %v3222_v15, %v10286_v14  ;;  %v3231_v8 = vadd.f32 %v3230_v58, %v10287_v7  ;;  %v10292_v15 = vld [vmem:[#allocation153_spill] sm:$0xff]  ;;  %v10293_v58 = vld [vmem:[#allocation154_spill] sm:$0xff]  ;;  %v10294_v14 = vld [vmem:[#allocation128_spill] sm:$0xff] }
 0x3f6   : > { %v5320_v12 = vpop.f32.mrf.mxu1  ;;  %3208 = vadd.xlane.f32.xlu1 %v3207_v62 }
 0x3f7   : > { %v5321_v43 = vadd.f32 %v5320_v12, %v5319_v41  ;;  %v2996_v59 = vpop.f32.mrf.mxu0  ;;  %v3215_v29 = vsel %vm3016_vm2, %v7497_v32, 0.0  ;;  %v3239_v57 = vadd.f32 %v3238_v61, %v10288_v28 }
 0x3f8   : > { %v5322_v11 = vpop.f32.mrf.mxu1  ;;  %v3216_v18 = vadd.f32 %v3215_v29, %v3214_v0  ;;  %v10291_v0 = vld [vmem:[#allocation91_spill] sm:$0xff]  ;;  %v3232_v29 = vadd.f32 %v3231_v8, %v10292_v15  ;;  %v10352_v15 = vld [vmem:[#allocation98_spill] sm:$0xff] }
 0x3f9   : > { %v7507_v31 = vadd.f32 %v5321_v43, %v2991_v23  ;;  %v2998_v40 = vpop.f32.mrf.mxu0  ;;  %v10290_v43 = vld [vmem:[#allocation90_spill] sm:$0xff]  ;;  %v3240_v7 = vadd.f32 %v3239_v57, %v10293_v58  ;;  %v10298_v57 = vld [vmem:[#allocation129_spill] sm:$0xff] }
 0x3fa   : > { %v5323_v51 = vpop.f32.mrf.mxu1  ;;  %3217 = vadd.xlane.f32.xlu0 %v3216_v18  ;;  %v3246_v40 = vadd.f32 %v10291_v0, %v10290_v43  ;;  %v7526_v0 = vpop.permute.xlu0 %4447 }
 0x3fb   : > { %10285 = vst [vmem:[#allocation169_spill] sm:$0xff] %v7507_v31  ;;  %v5324_v41 = vadd.f32 %v5323_v51, %v5322_v11  ;;  %v2999_v62 = vpop.f32.mrf.mxu0  ;;  %v3224_v12 = vsel %vm3016_vm2, %v7507_v31, 0.0  ;;  %10297 = vst [vmem:[#allocation172_spill] sm:$0xff] %v7526_v0  ;;  %v7531_v43 = vpop.permute.xlu1 %4442 }
 0x3fc   : > { %v5325_v50 = vpop.f32.mrf.mxu1  ;;  %v3225_v25 = vadd.f32 %v3224_v12, %v3223_v19  ;;  %v3247_v61 = vadd.f32 %v3246_v40, %v10294_v14  ;;  %10299 = vst [vmem:[#allocation173_spill] sm:$0xff] %v7531_v43  ;;  %v10300_v40 = vld [vmem:[#allocation156_spill] sm:$0xff] }
 0x3fd   : > { %v7514_v22 = vadd.f32 %v5324_v41, %v2996_v59  ;;  %v3001_v23 = vpop.f32.mrf.mxu0  ;;  %v10296_v41 = vld [vmem:[#allocation155_spill] sm:$0xff] }
 0x3fe   : > { %v5326_v18 = vpop.f32.mrf.mxu1  ;;  %3226 = vadd.xlane.f32.xlu1 %v3225_v25  ;;  %v3241_v12 = vadd.f32 %v3240_v7, %v10296_v41 }
 0x3ff   : > { %10289 = vst [vmem:[#allocation170_spill] sm:$0xff] %v7514_v22  ;;  %v5327_v51 = vadd.f32 %v5326_v18, %v5325_v50  ;;  %v3233_v11 = vsel %vm3016_vm2, %v7514_v22, 0.0  ;;  %v3248_v50 = vadd.f32 %v3247_v61, %v10298_v57  ;;  %v7539_v61 = vpop.permute.xlu1 %4452 }
 0x400   : > { %v5328_v28 = vpop.f32.mrf.mxu1  ;;  %v3234_v19 = vadd.f32 %v3233_v11, %v3232_v29  ;;  %10304 = vst [vmem:[#allocation176_spill] sm:$0xff] %v7539_v61  ;;  %v4427_v61 = vld [vmem:[%s7026_s14 + $0x78] sm:$0xff] }
 0x401   : > { %v7523_v59 = vadd.f32 %v5327_v51, %v2999_v62  ;;  %v3249_v14 = vadd.f32 %v3248_v50, %v10300_v40  ;;  %v7534_v51 = vpop.permute.xlu0 %4457 }
 0x402   : > { %v5329_v23 = vpop.f32.mrf.mxu1  ;;  %3235 = vadd.xlane.f32.xlu0 %v3234_v19  ;;  %10301 = vst [vmem:[#allocation174_spill] sm:$0xff] %v7534_v51  ;;  %v10303_v19 = vld [vmem:[#allocation157_spill] sm:$0xff] }
 0x403   : > { %10295 = vst [vmem:[#allocation171_spill] sm:$0xff] %v7523_v59  ;;  %v3242_v8 = vsel %vm3016_vm2, %v7523_v59, 0.0  ;;  %v5330_v62 = vadd.f32 %v5329_v23, %v5328_v28  ;;  %v3250_v0 = vadd.f32 %v3249_v14, %v10303_v19  ;;  %v7545_v28 = vpop.permute.xlu1 %4462  ;;  %v4428_v23 = vld [vmem:[%s7026_s14 + $0x80] sm:$0xff] }
 0x404   : > { %v5331_v25 = vpop.f32.mrf.mxu1  ;;  %v3243_v18 = vadd.f32 %v3242_v8, %v3241_v12  ;;  %10306 = vst [vmem:[#allocation178_spill] sm:$0xff] %v7545_v28 }
 0x406   : > { %v5332_v29 = vpop.f32.mrf.mxu1  ;;  %3244 = vadd.xlane.f32.xlu1 %v3243_v18  ;;  %v7543_v18 = vpop.permute.xlu0 %4467 }
 0x407   : > { %10305 = vst [vmem:[#allocation177_spill] sm:$0xff] %v7543_v18  ;;  %v10315_v18 = vld [vmem:[#allocation130_spill] sm:$0xff] }
 0x408   : > { %v3004_v7 = vpop.f32.mrf.mxu1 }
 0x409   : > { %v7536_v11 = vadd.f32 %v5330_v62, %v3004_v7  ;;  %v7550_v7 = vpop.permute.xlu1 %4472 }
 0x40a   : > { %v3006_v59 = vpop.f32.mrf.mxu1  ;;  %v7548_v62 = vpop.permute.xlu0 %4477  ;;  %10308 = vst [vmem:[#allocation180_spill] sm:$0xff] %v7550_v7  ;;  %v10317_v7 = vld [vmem:[#allocation131_spill] sm:$0xff] }
 0x40b   : > { %10302 = vst [vmem:[#allocation175_spill] sm:$0xff] %v7536_v11  ;;  %v3251_v12 = vsel %vm3016_vm2, %v7536_v11, 0.0  ;;  %10307 = vst [vmem:[#allocation179_spill] sm:$0xff] %v7548_v62  ;;  %v5333_v62 = vadd.f32 %v5332_v29, %v5331_v25  ;;  %v10325_v25 = vld [vmem:[#allocation159_spill] sm:$0xff] }
 0x40c   : > { %v3007_v8 = vpop.f32.mrf.mxu1  ;;  %v3252_v50 = vadd.f32 %v3251_v12, %v3250_v0  ;;  %v10312_v0 = vld [vmem:[#allocation92_spill] sm:$0xff] }
 0x40d   : > { %v7554_v59 = vpop.permute.xlu1 %4482 }
 0x40e   : > { %v3009_v43 = vpop.f32.mrf.mxu1  ;;  %3253 = vadd.xlane.f32.xlu0 %v3252_v50  ;;  %v7552_v14 = vpop.permute.xlu0 %4487  ;;  %10310 = vst [vmem:[#allocation182_spill] sm:$0xff] %v7554_v59  ;;  %v10320_v59 = vld [vmem:[#allocation158_spill] sm:$0xff] }
 0x40f   : > { %10309 = vst [vmem:[#allocation181_spill] sm:$0xff] %v7552_v14  ;;  %v10313_v43 = vld [vmem:[#allocation93_spill] sm:$0xff]  ;;  %v7569_v14 = vadd.f32 %v5333_v62, %v3007_v8  ;;  %v10327_v8 = vld [vmem:[#allocation94_spill] sm:$0xff] }
 0x410   : > { %v3255_v12 = vadd.f32 %v10313_v43, %v10312_v0 }
 0x411   : > { %v7561_v50 = vpop.permute.xlu1 %4492  ;;  %10319 = vst [vmem:[#allocation187_spill] sm:$0xff] %v7569_v14  ;;  %v3260_v43 = vsel %vm3016_vm2, %v7569_v14, 0.0 }
 0x412   : > { %v7556_v51 = vpop.permute.xlu0 %4497  ;;  %10314 = vst [vmem:[#allocation184_spill] sm:$0xff] %v7561_v50  ;;  %v3256_v28 = vadd.f32 %v3255_v12, %v10315_v18  ;;  %v10321_v50 = vld [vmem:[#allocation31_spill] sm:$0xff]  ;;  %v10323_v12 = vld [vmem:[#allocation33_spill] sm:$0xff] }
 0x413   : > { %10311 = vst [vmem:[#allocation183_spill] sm:$0xff] %v7556_v51 }
 0x415   : > { %v7567_v11 = vpop.permute.xlu1 %4502 }
 0x416   : > { %v7564_v19 = vpop.permute.xlu0 %4507  ;;  %10318 = vst [vmem:[#allocation186_spill] sm:$0xff] %v7567_v11 }
 0x417   : > { %4522 = vperm.xlu1 %5457, %v4428_v23   ;;  %10316 = vst [vmem:[#allocation185_spill] sm:$0xff] %v7564_v19  ;;  %v3257_v23 = vadd.f32 %v3256_v28, %v10317_v7 }
 0x419   : > { %v3258_v51 = vadd.f32 %v3257_v23, %v10320_v59  ;;  %v7581_v28 = vpop.permute.xlu1 %4512  ;;  %v10329_v23 = vld [vmem:[#allocation95_spill] sm:$0xff]  ;;  %v10331_v59 = vld [vmem:[#allocation132_spill] sm:$0xff] }
 0x41a   : > { %10326 = vst [vmem:[#allocation188_spill] sm:$0xff] %v7581_v28  ;;  %v10334_v28 = vld [vmem:[#allocation32_spill] sm:$0xff] }
 0x41b   : > { %v3259_v29 = vadd.f32 %v3258_v51, %v10325_v25  ;;  %v10336_v25 = vld [vmem:[#allocation35_spill] sm:$0xff] }
 0x424   : > { %4517 = vperm.xlu0 %5458, %v4427_v61  }
 0x42b   : > { %v3020_v40 = vpop.xlane.xlu0 %3019 }
 0x42c   : > { %v3264_v57 = vmul.f32 0.0012755102, %v3020_v40 }
 0x42e   : > { %v7575_v61 = vsub.f32 %v10321_v50, %v3264_v57  ;;  %v7578_v18 = vsub.f32 %v10323_v12, %v3264_v57  ;;  %v7584_v62 = vsub.f32 %v10327_v8, %v3264_v57  ;;  %v7587_v19 = vsub.f32 %v10329_v23, %v3264_v57 }
 0x42f   : > { %v3029_v11 = vpop.xlane.xlu0 %3028  ;;  %v3261_v12 = vadd.f32 %v3260_v43, %v3259_v29  ;;  %v7594_v7 = vsub.f32 %v10331_v59, %v3264_v57  ;;  %v7597_v51 = vsub.f32 %v7143_v34, %v3264_v57  ;;  %v10342_v43 = vld [vmem:[#allocation97_spill] sm:$0xff] }
 0x430   : > { %10322 = vst [vmem:[#allocation31_spill] sm:$0xff] %v7575_v61  ;;  %10324 = vst [vmem:[#allocation33_spill] sm:$0xff] %v7578_v18  ;;  %v3265_v40 = vmul.f32 0.0012755102, %v3029_v11  ;;  %v3488_v14 = vmul.f32 %v7575_v61, %v7575_v61  ;;  %v3489_v50 = vmul.f32 %v7578_v18, %v7578_v18  ;;  %v10338_v11 = vld [vmem:[#allocation96_spill] sm:$0xff]  ;;  %v3490_v34 = vmul.f32 %v7584_v62, %v7584_v62 }
 0x431   : > { %10328 = vst [vmem:[#allocation94_spill] sm:$0xff] %v7584_v62  ;;  %10330 = vst [vmem:[#allocation95_spill] sm:$0xff] %v7587_v19  ;;  %v10340_v61 = vld [vmem:[#allocation160_spill] sm:$0xff]  ;;  %v3491_v59 = vmul.f32 %v7587_v19, %v7587_v19  ;;  %v3492_v19 = vmul.f32 %v7594_v7, %v7594_v7 }
 0x432   : > { %10332 = vst [vmem:[#allocation132_spill] sm:$0xff] %v7594_v7  ;;  %10333 = vst [vmem:[#allocation189_spill] sm:$0xff] %v7597_v51  ;;  %v7600_v8 = vsub.f32 %v10334_v28, %v3265_v40  ;;  %v7603_v23 = vsub.f32 %v10336_v25, %v3265_v40  ;;  %v7606_v0 = vsub.f32 %v10338_v11, %v3265_v40 }
 0x433   : > { %v7609_v41 = vsub.f32 %v10340_v61, %v3264_v57  ;;  %v3038_v18 = vpop.xlane.xlu1 %3037  ;;  %v7612_v29 = vsub.f32 %v10342_v43, %v3265_v40  ;;  %v3684_v28 = vadd.f32 %v3489_v50, %v3488_v14  ;;  %v7619_v25 = vsub.f32 %v7287_v44, %v3265_v40  ;;  %v10345_v61 = vld [vmem:[#allocation133_spill] sm:$0xff] }
 0x434   : > { %10335 = vst [vmem:[#allocation32_spill] sm:$0xff] %v7600_v8  ;;  %10337 = vst [vmem:[#allocation35_spill] sm:$0xff] %v7603_v23  ;;  %v3266_v58 = vmul.f32 0.0012755102, %v3038_v18  ;;  %v3495_v11 = vmul.f32 %v7600_v8, %v7600_v8  ;;  %v3496_v57 = vmul.f32 %v7603_v23, %v7603_v23  ;;  %v7626_v43 = vsub.f32 %v10345_v61, %v3265_v40  ;;  %v10348_v8 = vld [vmem:[#allocation34_spill] sm:$0xff] }
 0x435   : > { %10339 = vst [vmem:[#allocation96_spill] sm:$0xff] %v7606_v0  ;;  %10341 = vst [vmem:[#allocation160_spill] sm:$0xff] %v7609_v41  ;;  %v7629_v22 = vsub.f32 %v7147_v37, %v3265_v40  ;;  %v3493_v18 = vmul.f32 %v7597_v51, %v7597_v51  ;;  %v3497_v44 = vmul.f32 %v7606_v0, %v7606_v0  ;;  %v10350_v40 = vld [vmem:[#allocation37_spill] sm:$0xff] }
 0x436   : > { %10343 = vst [vmem:[#allocation97_spill] sm:$0xff] %v7612_v29  ;;  %10344 = vst [vmem:[#allocation190_spill] sm:$0xff] %v7619_v25  ;;  %v3693_v14 = vadd.f32 %v3496_v57, %v3495_v11  ;;  %v3685_v50 = vadd.f32 %v3684_v28, %v3490_v34  ;;  %v7638_v62 = vsub.f32 %v10348_v8, %v3266_v58  ;;  %v10353_v57 = vld [vmem:[#allocation99_spill] sm:$0xff] }
 0x437   : > { %10346 = vst [vmem:[#allocation133_spill] sm:$0xff] %v7626_v43  ;;  %10347 = vst [vmem:[#allocation191_spill] sm:$0xff] %v7629_v22  ;;  %v3047_v23 = vpop.xlane.xlu1 %3046  ;;  %v3498_v61 = vmul.f32 %v7612_v29, %v7612_v29  ;;  %v3494_v37 = vmul.f32 %v7609_v41, %v7609_v41  ;;  %v7645_v7 = vsub.f32 %v10350_v40, %v3266_v58 }
 0x438   : > { %10349 = vst [vmem:[#allocation34_spill] sm:$0xff] %v7638_v62  ;;  %v7648_v51 = vsub.f32 %v10352_v15, %v3266_v58  ;;  %v3267_v31 = vmul.f32 0.0012755102, %v3047_v23  ;;  %v3501_v34 = vmul.f32 %v7619_v25, %v7619_v25  ;;  %v3694_v28 = vadd.f32 %v3693_v14, %v3497_v44  ;;  %v10354_v25 = vld [vmem:[#allocation43_spill] sm:$0xff] }
 0x439   : > { %10351 = vst [vmem:[#allocation37_spill] sm:$0xff] %v7645_v7  ;;  %v3686_v8 = vadd.f32 %v3685_v50, %v3491_v59  ;;  %v3499_v11 = vmul.f32 %v7626_v43, %v7626_v43  ;;  %v7655_v29 = vsub.f32 %v10353_v57, %v3266_v58  ;;  %v3502_v0 = vmul.f32 %v7638_v62, %v7638_v62 }
 0x43a   : > { %v3503_v40 = vmul.f32 %v7645_v7, %v7645_v7  ;;  %v3500_v15 = vmul.f32 %v7629_v22, %v7629_v22  ;;  %v3695_v23 = vadd.f32 %v3694_v28, %v3498_v61  ;;  %v7664_v44 = vsub.f32 %v10354_v25, %v3266_v58  ;;  %v10356_v61 = vld [vmem:[#allocation36_spill] sm:$0xff] }
 0x43b   : > { %v3687_v41 = vadd.f32 %v3686_v8, %v3492_v19  ;;  %v3056_v59 = vpop.xlane.xlu0 %3055  ;;  %3262 = vadd.xlane.f32.xlu1 %v3261_v12  ;;  %v7667_v14 = vsub.f32 %v7156_v3, %v3266_v58  ;;  %v7670_v50 = vsub.f32 %v7297_v63, %v3266_v58  ;;  %v3504_v57 = vmul.f32 %v7648_v51, %v7648_v51  ;;  %v10358_v8 = vld [vmem:[#allocation39_spill] sm:$0xff] }
 0x43c   : > { %v3702_v7 = vadd.f32 %v3503_v40, %v3502_v0  ;;  %v3696_v62 = vadd.f32 %v3695_v23, %v3499_v11  ;;  %v3698_v22 = vsel %vm3016_vm2, %v3501_v34, 0.0  ;;  %v3689_v19 = vsel %vm3016_vm2, %v3494_v37, 0.0  ;;  %v10360_v11 = vld [vmem:[#allocation100_spill] sm:$0xff] }
 0x43d   : > { %10355 = vst [vmem:[#allocation98_spill] sm:$0xff] %v7667_v14  ;;  %v7677_v25 = vsub.f32 %v10356_v61, %v3267_v31  ;;  %v3688_v28 = vadd.f32 %v3687_v41, %v3493_v18  ;;  %v3505_v3 = vmul.f32 %v7655_v29, %v7655_v29  ;;  %v7682_v63 = vsub.f32 %v10358_v8, %v3267_v31 }
 0x43e   : > { %v3703_v12 = vadd.f32 %v3702_v7, %v3504_v57  ;;  %v3268_v58 = vmul.f32 0.0012755102, %v3056_v59  ;;  %v3697_v43 = vadd.f32 %v3696_v62, %v3500_v15  ;;  %v3506_v0 = vmul.f32 %v7664_v44, %v7664_v44  ;;  %v10361_v59 = vld [vmem:[#allocation101_spill] sm:$0xff] }
 0x43f   : > { %10357 = vst [vmem:[#allocation99_spill] sm:$0xff] %v7677_v25  ;;  %10359 = vst [vmem:[#allocation43_spill] sm:$0xff] %v7682_v63  ;;  %v7687_v34 = vsub.f32 %v10360_v11, %v3267_v31  ;;  %v3507_v37 = vmul.f32 %v7667_v14, %v7667_v14  ;;  %v3508_v41 = vmul.f32 %v7670_v50, %v7670_v50  ;;  %v3065_v40 = vpop.xlane.xlu1 %3064  ;;  %v10362_v11 = vld [vmem:[#allocation42_spill] sm:$0xff] }
 0x440   : > { %v3704_v18 = vadd.f32 %v3703_v12, %v3505_v3  ;;  %v3509_v7 = vmul.f32 %v7677_v25, %v7677_v25  ;;  %v3699_v23 = vadd.f32 %v3698_v22, %v3697_v43  ;;  %v7696_v62 = vsub.f32 %v10361_v59, %v3267_v31  ;;  %v10363_v12 = vld [vmem:[#allocation38_spill] sm:$0xff] }
 0x441   : > { %v7699_v15 = vsub.f32 %v7307_v20, %v3267_v31  ;;  %v3510_v57 = vmul.f32 %v7682_v63, %v7682_v63  ;;  %v3690_v61 = vadd.f32 %v3689_v19, %v3688_v28  ;;  %v7704_v14 = vsub.f32 %v10362_v11, %v3267_v31  ;;  %v10365_v20 = vld [vmem:[#allocation41_spill] sm:$0xff] }
 0x442   : > { %v3705_v8 = vadd.f32 %v3704_v18, %v3506_v0  ;;  %v7707_v3 = vsub.f32 %v7160_v27, %v3267_v31  ;;  %3700 = vadd.xlane.f32.xlu1 %v3699_v23  ;;  %v3511_v22 = vmul.f32 %v7687_v34, %v7687_v34  ;;  %v7712_v59 = vsub.f32 %v10363_v12, %v3268_v58  ;;  %v10367_v0 = vld [vmem:[#allocation102_spill] sm:$0xff] }
 0x443   : > { %v3711_v43 = vadd.f32 %v3510_v57, %v3509_v7  ;;  %v7715_v25 = vsub.f32 %v10365_v20, %v3268_v58  ;;  %v3269_v63 = vmul.f32 0.0012755102, %v3065_v40  ;;  %3691 = vadd.xlane.f32.xlu0 %v3690_v61  ;;  %v3707_v28 = vsel %vm3016_vm2, %v3508_v41, 0.0  ;;  %v3074_v57 = vpop.xlane.xlu0 %3073 }
 0x444   : > { %10364 = vst [vmem:[#allocation36_spill] sm:$0xff] %v7712_v59  ;;  %v3706_v19 = vadd.f32 %v3705_v8, %v3507_v37  ;;  %v7719_v18 = vsub.f32 %v10367_v0, %v3268_v58  ;;  %v3512_v27 = vmul.f32 %v7696_v62, %v7696_v62  ;;  %v3515_v31 = vmul.f32 %v7699_v15, %v7699_v15 }
 0x445   : > { %10366 = vst [vmem:[#allocation39_spill] sm:$0xff] %v7715_v25  ;;  %v3712_v7 = vadd.f32 %v3711_v43, %v3511_v22  ;;  %v7726_v23 = vsub.f32 %v10188_v53, %v3268_v58  ;;  %v7729_v40 = vsub.f32 %v7317_v39, %v3268_v58  ;;  %v3516_v37 = vmul.f32 %v7712_v59, %v7712_v59  ;;  %v10370_v53 = vld [vmem:[#allocation45_spill] sm:$0xff] }
 0x446   : > { %10368 = vst [vmem:[#allocation100_spill] sm:$0xff] %v7719_v18  ;;  %v3708_v11 = vadd.f32 %v3707_v28, %v3706_v19  ;;  %v3517_v41 = vmul.f32 %v7715_v25, %v7715_v25  ;;  %v3513_v61 = vmul.f32 %v7704_v14, %v7704_v14  ;;  %v3514_v8 = vmul.f32 %v7707_v3, %v7707_v3  ;;  %v10372_v19 = vld [vmem:[#allocation40_spill] sm:$0xff] }
 0x447   : > { %10369 = vst [vmem:[#allocation101_spill] sm:$0xff] %v7729_v40  ;;  %v3713_v22 = vadd.f32 %v3712_v7, %v3512_v27  ;;  %v7740_v43 = vsub.f32 %v10370_v53, %v3268_v58  ;;  %v7743_v39 = vsub.f32 %v7167_v1, %v3268_v58  ;;  %v3518_v12 = vmul.f32 %v7719_v18, %v7719_v18  ;;  %v10374_v27 = vld [vmem:[#allocation52_spill] sm:$0xff]  ;;  %v3083_v53 = vpop.xlane.xlu1 %3082  ;;  %v10375_v18 = vld [vmem:[#allocation103_spill] sm:$0xff] }
 0x448   : > { %3709 = vadd.xlane.f32.xlu0 %v3708_v11  ;;  %v3720_v20 = vadd.f32 %v3517_v41, %v3516_v37  ;;  %v7748_v28 = vsub.f32 %v10372_v19, %v3269_v63  ;;  %v3270_v0 = vmul.f32 0.0012755102, %v3074_v57  ;;  %v3522_v59 = vmul.f32 %v7729_v40, %v7729_v40 }
 0x449   : > { %10371 = vst [vmem:[#allocation42_spill] sm:$0xff] %v7743_v39  ;;  %v3714_v25 = vadd.f32 %v3713_v22, %v3513_v61  ;;  %v7753_v7 = vsub.f32 %v10374_v27, %v3269_v63  ;;  %v3716_v11 = vsel %vm3016_vm2, %v3515_v31, 0.0  ;;  %v3519_v1 = vmul.f32 %v7726_v23, %v7726_v23 }
 0x44a   : > { %10373 = vst [vmem:[#allocation38_spill] sm:$0xff] %v7748_v28  ;;  %v3721_v58 = vadd.f32 %v3720_v20, %v3518_v12  ;;  %v7759_v37 = vsub.f32 %v10375_v18, %v3269_v63  ;;  %v3520_v57 = vmul.f32 %v7740_v43, %v7740_v43  ;;  %v7764_v61 = vsub.f32 %v7327_v24, %v3269_v63 }
 0x44b   : > { %v3715_v41 = vadd.f32 %v3714_v25, %v3514_v8  ;;  %v3523_v22 = vmul.f32 %v7748_v28, %v7748_v28  ;;  %v3521_v31 = vmul.f32 %v7743_v39, %v7743_v39  ;;  %v7771_v27 = vsub.f32 %v10192_v55, %v3269_v63  ;;  %v3092_v12 = vpop.xlane.xlu0 %3091 }
 0x44c   : > { %10376 = vst [vmem:[#allocation41_spill] sm:$0xff] %v7764_v61  ;;  %v3722_v19 = vadd.f32 %v3721_v58, %v3519_v1  ;;  %v3524_v18 = vmul.f32 %v7753_v7, %v7753_v7  ;;  %v3271_v25 = vmul.f32 0.0012755102, %v3083_v53  ;;  %v3725_v20 = vsel %vm3016_vm2, %v3522_v59, 0.0  ;;  %v10377_v1 = vld [vmem:[#allocation53_spill] sm:$0xff] }
 0x44d   : > { %v3717_v8 = vadd.f32 %v3716_v11, %v3715_v41  ;;  %v7777_v24 = vsub.f32 %v7169_v49, %v3269_v63  ;;  %v3525_v28 = vmul.f32 %v7759_v37, %v7759_v37  ;;  %v7782_v58 = vsub.f32 %v10377_v1, %v3270_v0  ;;  %v10379_v11 = vld [vmem:[#allocation54_spill] sm:$0xff]  ;;  %v10381_v49 = vld [vmem:[#allocation19_spill] sm:$0xff] }
 0x44e   : > { %v3723_v40 = vadd.f32 %v3722_v19, %v3520_v57  ;;  %v3729_v39 = vadd.f32 %v3524_v18, %v3523_v22  ;;  %v7785_v55 = vsub.f32 %v7171_v26, %v3269_v63  ;;  %v3529_v53 = vmul.f32 %v7764_v61, %v7764_v61 }
 0x44f   : > { %10378 = vst [vmem:[#allocation102_spill] sm:$0xff] %v7782_v58  ;;  %3718 = vadd.xlane.f32.xlu1 %v3717_v8  ;;  %v7790_v59 = vsub.f32 %v10379_v11, %v3270_v0  ;;  %v7793_v41 = vsub.f32 %v10381_v49, %v3270_v0  ;;  %v7795_v57 = vmul.f32 0.0012755102, %v3092_v12  ;;  %v3526_v22 = vmul.f32 %v7771_v27, %v7771_v27 }
 0x450   : > { %v3724_v19 = vadd.f32 %v3723_v40, %v3521_v31  ;;  %v3730_v18 = vadd.f32 %v3729_v39, %v3525_v28  ;;  %v7800_v8 = vsub.f32 %v6951_v42, %v3270_v0  ;;  %v7803_v26 = vsub.f32 %v7337_v10, %v3270_v0  ;;  %v3101_v39 = vpop.xlane.xlu1 %3100 }
 0x451   : > { %10380 = vst [vmem:[#allocation45_spill] sm:$0xff] %v7790_v59  ;;  %10382 = vst [vmem:[#allocation40_spill] sm:$0xff] %v7793_v41  ;;  %v3530_v63 = vmul.f32 %v7782_v58, %v7782_v58  ;;  %v3531_v1 = vmul.f32 %v7790_v59, %v7790_v59  ;;  %v3527_v40 = vmul.f32 %v7777_v24, %v7777_v24  ;;  %v3734_v10 = vsel %vm3016_vm2, %v3529_v53, 0.0 }
 0x452   : > { %v3726_v11 = vadd.f32 %v3725_v20, %v3724_v19  ;;  %v3731_v31 = vadd.f32 %v3730_v18, %v3526_v22  ;;  %v7812_v12 = vsub.f32 %v7174_v9, %v3270_v0  ;;  %v3528_v42 = vmul.f32 %v7785_v55, %v7785_v55  ;;  %v10383_v19 = vld [vmem:[#allocation55_spill] sm:$0xff]  ;;  %v10385_v9 = vld [vmem:[#allocation57_spill] sm:$0xff] }
 0x453   : > { %v3532_v28 = vmul.f32 %v7793_v41, %v7793_v41  ;;  %v3738_v49 = vadd.f32 %v3531_v1, %v3530_v63  ;;  %v7820_v20 = vsub.f32 %v7178_v16, %v3270_v0  ;;  %v7823_v22 = vsub.f32 %v10383_v19, %v3271_v25  ;;  %v3110_v58 = vpop.xlane.xlu0 %3109  ;;  %v10387_v63 = vld [vmem:[#allocation18_spill] sm:$0xff] }
 0x454   : > { %3727 = vadd.xlane.f32.xlu0 %v3726_v11  ;;  %v3732_v59 = vadd.f32 %v3731_v31, %v3527_v40  ;;  %v7826_v18 = vsub.f32 %v10385_v9, %v3271_v25  ;;  %v3533_v61 = vmul.f32 %v7800_v8, %v7800_v8  ;;  %v3536_v53 = vmul.f32 %v7803_v26, %v7803_v26 }
 0x455   : > { %10384 = vst [vmem:[#allocation52_spill] sm:$0xff] %v7823_v22  ;;  %v3739_v41 = vadd.f32 %v3738_v49, %v3532_v28  ;;  %v7833_v1 = vsub.f32 %v10387_v63, %v3271_v25  ;;  %v7835_v11 = vmul.f32 0.0012755102, %v3101_v39  ;;  %v3534_v0 = vmul.f32 %v7812_v12, %v7812_v12 }
 0x456   : > { %10386 = vst [vmem:[#allocation103_spill] sm:$0xff] %v7826_v18  ;;  %v3733_v16 = vadd.f32 %v3732_v59, %v3528_v42  ;;  %v7840_v40 = vsub.f32 %v6955_v54, %v3271_v25  ;;  %v7843_v19 = vsub.f32 %v7180_v5, %v3271_v25  ;;  %v3537_v9 = vmul.f32 %v7823_v22, %v7823_v22 }
 0x457   : > { %10388 = vst [vmem:[#allocation53_spill] sm:$0xff] %v7833_v1  ;;  %v3740_v31 = vadd.f32 %v3739_v41, %v3533_v61  ;;  %v3538_v28 = vmul.f32 %v7826_v18, %v7826_v18  ;;  %v7849_v39 = vmul.f32 0.0012755102, %v3110_v58  ;;  %v3535_v59 = vmul.f32 %v7820_v20, %v7820_v20  ;;  %v10393_v58 = vld [vmem:[#allocation20_spill] sm:$0xff] }
 0x458   : > { %10389 = vst [vmem:[#allocation54_spill] sm:$0xff] %v7840_v40  ;;  %10390 = vst [vmem:[#allocation19_spill] sm:$0xff] %v7843_v19  ;;  %v3735_v49 = vadd.f32 %v3734_v10, %v3733_v16  ;;  %v7854_v42 = vsub.f32 %v7347_v60, %v3271_v25  ;;  %v3743_v61 = vsel %vm3016_vm2, %v3536_v53, 0.0  ;;  %v3539_v5 = vmul.f32 %v7833_v1, %v7833_v1  ;;  %v10395_v16 = vld [vmem:[#allocation17_spill] sm:$0xff] }
 0x459   : > { %v3741_v54 = vadd.f32 %v3740_v31, %v3534_v0  ;;  %v3747_v41 = vadd.f32 %v3538_v28, %v3537_v9  ;;  %v7860_v63 = vsub.f32 %v7182_v35, %v3271_v25  ;;  %v7864_v10 = vsub.f32 %v10393_v58, %v7795_v57  ;;  %v10397_v60 = vld [vmem:[#allocation21_spill] sm:$0xff]  ;;  %v3119_v31 = vpop.xlane.xlu1 %3118 }
 0x45a   : > { %10391 = vst [vmem:[#allocation55_spill] sm:$0xff] %v7854_v42  ;;  %3736 = vadd.xlane.f32.xlu1 %v3735_v49  ;;  %v7868_v18 = vsub.f32 %v10395_v16, %v7795_v57  ;;  %v7872_v0 = vsub.f32 %v10397_v60, %v7795_v57  ;;  %v3540_v9 = vmul.f32 %v7840_v40, %v7840_v40 }
 0x45b   : > { %10392 = vst [vmem:[#allocation57_spill] sm:$0xff] %v7860_v63  ;;  %10394 = vst [vmem:[#allocation18_spill] sm:$0xff] %v7864_v10  ;;  %v3742_v53 = vadd.f32 %v3741_v54, %v3535_v59  ;;  %v3541_v35 = vmul.f32 %v7843_v19, %v7843_v19  ;;  %v3748_v25 = vadd.f32 %v3747_v41, %v3539_v5  ;;  %v3128_v60 = vpop.xlane.xlu0 %3127  ;;  %v7896_v41 = vmul.f32 0.0012755102, %v3119_v31 }
 0x45c   : > { %10396 = vst [vmem:[#allocation20_spill] sm:$0xff] %v7868_v18  ;;  %10398 = vst [vmem:[#allocation17_spill] sm:$0xff] %v7872_v0  ;;  %v3543_v28 = vmul.f32 %v7854_v42, %v7854_v42  ;;  %v7882_v49 = vsub.f32 %v7357_v4, %v7795_v57  ;;  %v3544_v58 = vmul.f32 %v7864_v10, %v7864_v10  ;;  %v7915_v42 = vmul.f32 0.0012755102, %v3128_v60 }
 0x45d   : > { %v3545_v59 = vmul.f32 %v7868_v18, %v7868_v18  ;;  %v3744_v54 = vadd.f32 %v3743_v61, %v3742_v53  ;;  %v3749_v16 = vadd.f32 %v3748_v25, %v3540_v9  ;;  %v7890_v19 = vsub.f32 %v6966_v33, %v7795_v57  ;;  %v10403_v9 = vld [vmem:[#allocation58_spill] sm:$0xff] }
 0x45e   : > { %10399 = vst [vmem:[#allocation21_spill] sm:$0xff] %v7882_v49  ;;  %v7894_v5 = vsub.f32 %v7185_v17, %v7795_v57  ;;  %v3542_v4 = vmul.f32 %v7860_v63, %v7860_v63  ;;  %v7902_v10 = vsub.f32 %v7187_v45, %v7795_v57  ;;  %v3546_v61 = vmul.f32 %v7872_v0, %v7872_v0  ;;  %v10404_v17 = vld [vmem:[#allocation60_spill] sm:$0xff] }
 0x45f   : > { %10400 = vst [vmem:[#allocation192_spill] sm:$0xff] %v7890_v19  ;;  %3745 = vadd.xlane.f32.xlu0 %v3744_v54  ;;  %v3750_v53 = vadd.f32 %v3749_v16, %v3541_v35  ;;  %v3756_v33 = vadd.f32 %v3545_v59, %v3544_v58  ;;  %v7908_v25 = vsub.f32 %v10403_v9, %v7835_v11  ;;  %v3752_v18 = vsel %vm3016_vm2, %v3543_v28, 0.0  ;;  %v10405_v57 = vld [vmem:[#allocation56_spill] sm:$0xff]  ;;  %v3137_v9 = vpop.xlane.xlu1 %3136 }
 0x460   : > { %10401 = vst [vmem:[#allocation193_spill] sm:$0xff] %v7894_v5  ;;  %10402 = vst [vmem:[#allocation194_spill] sm:$0xff] %v7902_v10  ;;  %v7912_v31 = vsub.f32 %v10404_v17, %v7835_v11  ;;  %v3550_v45 = vmul.f32 %v7882_v49, %v7882_v49  ;;  %v7921_v54 = vsub.f32 %v10405_v57, %v7835_v11 }
 0x461   : > { %v3751_v35 = vadd.f32 %v3750_v53, %v3542_v4  ;;  %v3547_v58 = vmul.f32 %v7890_v19, %v7890_v19  ;;  %v3548_v59 = vmul.f32 %v7894_v5, %v7894_v5  ;;  %v3757_v16 = vadd.f32 %v3756_v33, %v3546_v61  ;;  %v10406_v5 = vld [vmem:[#allocation61_spill] sm:$0xff] }
 0x462   : > { %v7929_v28 = vsub.f32 %v6972_v13, %v7835_v11  ;;  %v7933_v60 = vsub.f32 %v7189_v30, %v7835_v11  ;;  %v3551_v17 = vmul.f32 %v7908_v25, %v7908_v25  ;;  %v3552_v4 = vmul.f32 %v7912_v31, %v7912_v31 }
 0x463   : > { %v3753_v53 = vadd.f32 %v3752_v18, %v3751_v35  ;;  %v3549_v57 = vmul.f32 %v7902_v10, %v7902_v10  ;;  %v3758_v61 = vadd.f32 %v3757_v16, %v3547_v58  ;;  %v7943_v33 = vsub.f32 %v7367_v56, %v7835_v11  ;;  %v10408_v56 = vld [vmem:[#allocation62_spill] sm:$0xff] }
 0x464   : > { %v3761_v13 = vsel %vm3016_vm2, %v3550_v45, 0.0  ;;  %v3553_v30 = vmul.f32 %v7921_v54, %v7921_v54  ;;  %v3765_v49 = vadd.f32 %v3552_v4, %v3551_v17  ;;  %v7950_v19 = vsub.f32 %v10406_v5, %v7849_v39  ;;  %v3146_v4 = vpop.xlane.xlu0 %3145 }
 0x465   : > { %3754 = vadd.xlane.f32.xlu1 %v3753_v53  ;;  %v3759_v18 = vadd.f32 %v3758_v61, %v3548_v59  ;;  %v7952_v35 = vmul.f32 0.0012755102, %v3137_v9  ;;  %v7956_v58 = vsub.f32 %v7191_v21, %v7835_v11  ;;  %v7960_v16 = vsub.f32 %v10408_v56, %v7849_v39  ;;  %v10410_v59 = vld [vmem:[#allocation22_spill] sm:$0xff] }
 0x466   : > { %10407 = vst [vmem:[#allocation58_spill] sm:$0xff] %v7950_v19  ;;  %v3554_v45 = vmul.f32 %v7929_v28, %v7929_v28  ;;  %v3555_v17 = vmul.f32 %v7933_v60, %v7933_v60  ;;  %v3766_v5 = vadd.f32 %v3765_v49, %v3553_v30  ;;  %v7968_v9 = vsub.f32 %v10410_v59, %v7849_v39 }
 0x467   : > { %10409 = vst [vmem:[#allocation60_spill] sm:$0xff] %v7960_v16  ;;  %v3760_v53 = vadd.f32 %v3759_v18, %v3549_v57  ;;  %v3557_v21 = vmul.f32 %v7943_v33, %v7943_v33  ;;  %v7974_v11 = vsub.f32 %v7377_v36, %v7849_v39  ;;  %v3558_v61 = vmul.f32 %v7950_v19, %v7950_v19 }
 0x468   : > { %10411 = vst [vmem:[#allocation56_spill] sm:$0xff] %v7968_v9  ;;  %v3767_v56 = vadd.f32 %v3766_v5, %v3554_v45  ;;  %v7980_v49 = vsub.f32 %v6983_v52, %v7849_v39  ;;  %v7984_v30 = vsub.f32 %v7193_v46, %v7849_v39  ;;  %v3559_v57 = vmul.f32 %v7960_v16, %v7960_v16  ;;  %v10416_v46 = vld [vmem:[#allocation63_spill] sm:$0xff] }
 0x469   : > { %10412 = vst [vmem:[#allocation61_spill] sm:$0xff] %v7974_v11  ;;  %v3762_v18 = vadd.f32 %v3761_v13, %v3760_v53  ;;  %v3556_v36 = vmul.f32 %v7956_v58, %v7956_v58  ;;  %v7990_v59 = vmul.f32 0.0012755102, %v3146_v4  ;;  %v7994_v45 = vsub.f32 %v7195_v2, %v7849_v39  ;;  %v10417_v53 = vld [vmem:[#allocation64_spill] sm:$0xff]  ;;  %v10418_v2 = vld [vmem:[#allocation59_spill] sm:$0xff] }
 0x46a   : > { %10413 = vst [vmem:[#allocation62_spill] sm:$0xff] %v7980_v49  ;;  %10414 = vst [vmem:[#allocation22_spill] sm:$0xff] %v7984_v30  ;;  %v3768_v5 = vadd.f32 %v3767_v56, %v3555_v17  ;;  %v3560_v52 = vmul.f32 %v7968_v9, %v7968_v9  ;;  %v3774_v19 = vadd.f32 %v3559_v57, %v3558_v61  ;;  %v3770_v13 = vsel %vm3016_vm2, %v3557_v21, 0.0  ;;  %v3155_v21 = vpop.xlane.xlu1 %3154  ;;  %v10427_v9 = vld [vmem:[#allocation25_spill] sm:$0xff] }
 0x46b   : > { %10415 = vst [vmem:[#allocation195_spill] sm:$0xff] %v7994_v45  ;;  %v8000_v10 = vsub.f32 %v10416_v46, %v7896_v41  ;;  %3763 = vadd.xlane.f32.xlu0 %v3762_v18  ;;  %v3564_v4 = vmul.f32 %v7974_v11, %v7974_v11  ;;  %v8007_v16 = vsub.f32 %v10417_v53, %v7896_v41  ;;  %v8036_v11 = vmul.f32 0.0012755102, %v3155_v21 }
 0x46c   : > { %v8011_v39 = vsub.f32 %v10418_v2, %v7896_v41  ;;  %v3769_v17 = vadd.f32 %v3768_v5, %v3556_v36  ;;  %v3561_v61 = vmul.f32 %v7980_v49, %v7980_v49  ;;  %v3562_v56 = vmul.f32 %v7984_v30, %v7984_v30 }
 0x46d   : > { %v3775_v57 = vadd.f32 %v3774_v19, %v3560_v52  ;;  %v8019_v18 = vsub.f32 %v6989_v47, %v7896_v41  ;;  %v8023_v46 = vsub.f32 %v7197_v38, %v7896_v41  ;;  %v3565_v53 = vmul.f32 %v8000_v10, %v8000_v10 }
 0x46e   : > { %v3566_v36 = vmul.f32 %v8007_v16, %v8007_v16  ;;  %v3771_v5 = vadd.f32 %v3770_v13, %v3769_v17  ;;  %v3563_v2 = vmul.f32 %v7994_v45, %v7994_v45  ;;  %v8033_v52 = vsub.f32 %v7387_v48, %v7896_v41  ;;  %v10419_v17 = vld [vmem:[#allocation65_spill] sm:$0xff]  ;;  %v10421_v48 = vld [vmem:[#allocation24_spill] sm:$0xff] }
 0x46f   : > { %v3776_v19 = vadd.f32 %v3775_v57, %v3561_v61  ;;  %v3779_v47 = vsel %vm3016_vm2, %v3564_v4, 0.0  ;;  %v3567_v38 = vmul.f32 %v8011_v39, %v8011_v39  ;;  %v8042_v13 = vsub.f32 %v7199_v6, %v7896_v41 }
 0x470   : > { %v3783_v30 = vadd.f32 %v3566_v36, %v3565_v53  ;;  %3772 = vadd.xlane.f32.xlu1 %v3771_v5  ;;  %v8046_v61 = vsub.f32 %v10419_v17, %v7915_v42  ;;  %v8050_v57 = vsub.f32 %v10421_v48, %v7915_v42  ;;  %v3568_v4 = vmul.f32 %v8019_v18, %v8019_v18  ;;  %v10423_v36 = vld [vmem:[#allocation23_spill] sm:$0xff] }
 0x471   : > { %v3777_v49 = vadd.f32 %v3776_v19, %v3562_v56  ;;  %v3569_v21 = vmul.f32 %v8023_v46, %v8023_v46  ;;  %v3164_v56 = vpop.xlane.xlu0 %3163  ;;  %v8058_v6 = vsub.f32 %v10423_v36, %v7915_v42  ;;  %v3571_v5 = vmul.f32 %v8033_v52, %v8033_v52  ;;  %v10425_v19 = vld [vmem:[#allocation48_spill] sm:$0xff] }
 0x472   : > { %10420 = vst [vmem:[#allocation63_spill] sm:$0xff] %v8046_v61  ;;  %10422 = vst [vmem:[#allocation64_spill] sm:$0xff] %v8050_v57  ;;  %v3784_v53 = vadd.f32 %v3783_v30, %v3567_v38  ;;  %v8064_v17 = vsub.f32 %v10425_v19, %v7915_v42  ;;  %v3572_v48 = vmul.f32 %v8046_v61, %v8046_v61  ;;  %v10429_v38 = vld [vmem:[#allocation44_spill] sm:$0xff]  ;;  %v8080_v0 = vmul.f32 0.0012755102, %v3164_v56  ;;  %v10431_v61 = vld [vmem:[#allocation47_spill] sm:$0xff] }
 0x473   : > { %10424 = vst [vmem:[#allocation59_spill] sm:$0xff] %v8058_v6  ;;  %v3778_v41 = vadd.f32 %v3777_v49, %v3563_v2  ;;  %v8070_v30 = vsub.f32 %v10427_v9, %v7915_v42  ;;  %v8074_v36 = vsub.f32 %v10429_v38, %v7915_v42  ;;  %v3573_v49 = vmul.f32 %v8050_v57, %v8050_v57  ;;  %v10433_v38 = vld [vmem:[#allocation66_spill] sm:$0xff] }
 0x474   : > { %10426 = vst [vmem:[#allocation65_spill] sm:$0xff] %v8064_v17  ;;  %v3785_v45 = vadd.f32 %v3784_v53, %v3568_v4  ;;  %v3570_v19 = vmul.f32 %v8042_v13, %v8042_v13  ;;  %v8084_v4 = vsub.f32 %v10431_v61, %v7915_v42  ;;  %v3574_v9 = vmul.f32 %v8058_v6, %v8058_v6  ;;  %v10436_v42 = vld [vmem:[#allocation105_spill] sm:$0xff] }
 0x475   : > { %10428 = vst [vmem:[#allocation24_spill] sm:$0xff] %v8070_v30  ;;  %10430 = vst [vmem:[#allocation23_spill] sm:$0xff] %v8074_v36  ;;  %v3780_v2 = vadd.f32 %v3779_v47, %v3778_v41  ;;  %v3792_v63 = vadd.f32 %v3573_v49, %v3572_v48  ;;  %v8090_v40 = vsub.f32 %v10433_v38, %v7952_v35  ;;  %v3788_v47 = vsel %vm3016_vm2, %v3571_v5, 0.0  ;;  %v10434_v41 = vld [vmem:[#allocation67_spill] sm:$0xff]  ;;  %v3173_v5 = vpop.xlane.xlu1 %3172 }
 0x476   : > { %10432 = vst [vmem:[#allocation48_spill] sm:$0xff] %v8084_v4  ;;  %v3786_v53 = vadd.f32 %v3785_v45, %v3569_v21  ;;  %v3578_v56 = vmul.f32 %v8064_v17, %v8064_v17  ;;  %v8097_v57 = vsub.f32 %v10434_v41, %v7952_v35  ;;  %v8101_v45 = vsub.f32 %v10436_v42, %v7952_v35  ;;  %v10440_v41 = vld [vmem:[#allocation46_spill] sm:$0xff] }
 0x477   : > { %3781 = vadd.xlane.f32.xlu0 %v3780_v2  ;;  %v3575_v21 = vmul.f32 %v8070_v30, %v8070_v30  ;;  %v3576_v48 = vmul.f32 %v8074_v36, %v8074_v36  ;;  %v3793_v49 = vadd.f32 %v3792_v63, %v3574_v9  ;;  %v10438_v2 = vld [vmem:[#allocation106_spill] sm:$0xff]  ;;  %v8113_v17 = vsub.f32 %v10440_v41, %v7952_v35  ;;  %v10442_v9 = vld [vmem:[#allocation104_spill] sm:$0xff] }
 0x478   : > { %10435 = vst [vmem:[#allocation25_spill] sm:$0xff] %v8097_v57  ;;  %10437 = vst [vmem:[#allocation44_spill] sm:$0xff] %v8101_v45  ;;  %v3787_v61 = vadd.f32 %v3786_v53, %v3570_v19  ;;  %v8109_v38 = vsub.f32 %v10438_v2, %v7952_v35  ;;  %v3579_v42 = vmul.f32 %v8090_v40, %v8090_v40  ;;  %v3797_v2 = vsel %vm3016_vm2, %v3578_v56, 0.0 }
 0x479   : > { %10441 = vst [vmem:[#allocation66_spill] sm:$0xff] %v8113_v17  ;;  %v3580_v19 = vmul.f32 %v8097_v57, %v8097_v57  ;;  %v3577_v36 = vmul.f32 %v8084_v4, %v8084_v4  ;;  %v3794_v63 = vadd.f32 %v3793_v49, %v3575_v21  ;;  %v8123_v30 = vsub.f32 %v10442_v9, %v7952_v35  ;;  %v10446_v21 = vld [vmem:[#allocation68_spill] sm:$0xff]  ;;  %v10448_v9 = vld [vmem:[#allocation69_spill] sm:$0xff] }
 0x47a   : > { %10439 = vst [vmem:[#allocation47_spill] sm:$0xff] %v8109_v38  ;;  %v3789_v53 = vadd.f32 %v3788_v47, %v3787_v61  ;;  %v8126_v6 = vmul.f32 0.0012755102, %v3173_v5  ;;  %v3581_v41 = vmul.f32 %v8101_v45, %v8101_v45  ;;  %v10444_v47 = vld [vmem:[#allocation50_spill] sm:$0xff]  ;;  %v8136_v49 = vsub.f32 %v10446_v21, %v7990_v59 }
 0x47b   : > { %10443 = vst [vmem:[#allocation67_spill] sm:$0xff] %v8123_v30  ;;  %v3801_v1 = vadd.f32 %v3580_v19, %v3579_v42  ;;  %v3795_v22 = vadd.f32 %v3794_v63, %v3576_v48  ;;  %v8132_v61 = vsub.f32 %v10444_v47, %v7952_v35  ;;  %v8140_v4 = vsub.f32 %v10448_v9, %v7990_v59  ;;  %v3182_v48 = vpop.xlane.xlu0 %3181  ;;  %v10450_v19 = vld [vmem:[#allocation107_spill] sm:$0xff]  ;;  %v10452_v47 = vld [vmem:[#allocation161_spill] sm:$0xff] }
 0x47c   : > { %3790 = vadd.xlane.f32.xlu1 %v3789_v53  ;;  %10447 = vst [vmem:[#allocation106_spill] sm:$0xff] %v8136_v49  ;;  %v3582_v56 = vmul.f32 %v8109_v38, %v8109_v38  ;;  %v3583_v5 = vmul.f32 %v8113_v17, %v8113_v17  ;;  %v8148_v35 = vsub.f32 %v10450_v19, %v7990_v59  ;;  %v10454_v17 = vld [vmem:[#allocation108_spill] sm:$0xff] }
 0x47d   : > { %10445 = vst [vmem:[#allocation105_spill] sm:$0xff] %v8132_v61  ;;  %10449 = vst [vmem:[#allocation46_spill] sm:$0xff] %v8140_v4  ;;  %v3802_v42 = vadd.f32 %v3801_v1, %v3581_v41  ;;  %v3796_v53 = vadd.f32 %v3795_v22, %v3577_v36  ;;  %v3585_v63 = vmul.f32 %v8123_v30, %v8123_v30  ;;  %v10456_v41 = vld [vmem:[#allocation49_spill] sm:$0xff]  ;;  %v8170_v30 = vmul.f32 0.0012755102, %v3182_v48 }
 0x47e   : > { %10451 = vst [vmem:[#allocation104_spill] sm:$0xff] %v8148_v35  ;;  %v8154_v21 = vsub.f32 %v10452_v47, %v7990_v59  ;;  %v3586_v9 = vmul.f32 %v8136_v49, %v8136_v49  ;;  %v8160_v1 = vsub.f32 %v10454_v17, %v7990_v59  ;;  %v8164_v19 = vsub.f32 %v10456_v41, %v7990_v59  ;;  %v10458_v49 = vld [vmem:[#allocation51_spill] sm:$0xff]  ;;  %v10460_v41 = vld [vmem:[#allocation70_spill] sm:$0xff] }
 0x47f   : > { %v3803_v38 = vadd.f32 %v3802_v42, %v3582_v56  ;;  %v3587_v22 = vmul.f32 %v8140_v4, %v8140_v4  ;;  %v3798_v36 = vadd.f32 %v3797_v2, %v3796_v53  ;;  %v3584_v47 = vmul.f32 %v8132_v61, %v8132_v61  ;;  %v10462_v53 = vld [vmem:[#allocation71_spill] sm:$0xff] }
 0x480   : > { %10453 = vst [vmem:[#allocation50_spill] sm:$0xff] %v8154_v21  ;;  %10455 = vst [vmem:[#allocation68_spill] sm:$0xff] %v8160_v1  ;;  %v8174_v56 = vsub.f32 %v10458_v49, %v7990_v59  ;;  %v3588_v17 = vmul.f32 %v8148_v35, %v8148_v35  ;;  %v8180_v57 = vsub.f32 %v10460_v41, %v8036_v11  ;;  %v3806_v2 = vsel %vm3016_vm2, %v3585_v63, 0.0  ;;  %v10464_v59 = vld [vmem:[#allocation109_spill] sm:$0xff]  ;;  %v3191_v63 = vpop.xlane.xlu1 %3190 }
 0x481   : > { %10457 = vst [vmem:[#allocation69_spill] sm:$0xff] %v8164_v19  ;;  %v3804_v42 = vadd.f32 %v3803_v38, %v3583_v5  ;;  %v3810_v45 = vadd.f32 %v3587_v22, %v3586_v9  ;;  %3799 = vadd.xlane.f32.xlu0 %v3798_v36  ;;  %v3592_v48 = vmul.f32 %v8154_v21, %v8154_v21  ;;  %v10466_v36 = vld [vmem:[#allocation110_spill] sm:$0xff]  ;;  %v8216_v35 = vmul.f32 0.0012755102, %v3191_v63 }
 0x482   : > { %10459 = vst [vmem:[#allocation107_spill] sm:$0xff] %v8174_v56  ;;  %10461 = vst [vmem:[#allocation161_spill] sm:$0xff] %v8180_v57  ;;  %v8187_v4 = vsub.f32 %v10462_v53, %v8036_v11  ;;  %v8191_v38 = vsub.f32 %v10464_v59, %v8036_v11  ;;  %v3589_v5 = vmul.f32 %v8160_v1, %v8160_v1  ;;  %v10468_v53 = vld [vmem:[#allocation134_spill] sm:$0xff] }
 0x483   : > { %v3805_v49 = vadd.f32 %v3804_v42, %v3584_v47  ;;  %v3590_v9 = vmul.f32 %v8164_v19, %v8164_v19  ;;  %v3811_v22 = vadd.f32 %v3810_v45, %v3588_v17  ;;  %v8199_v41 = vsub.f32 %v10466_v36, %v8036_v11  ;;  %v10470_v17 = vld [vmem:[#allocation162_spill] sm:$0xff] }
 0x484   : > { %10463 = vst [vmem:[#allocation108_spill] sm:$0xff] %v8187_v4  ;;  %10465 = vst [vmem:[#allocation49_spill] sm:$0xff] %v8191_v38  ;;  %v8203_v21 = vsub.f32 %v10468_v53, %v8036_v11  ;;  %v3593_v59 = vmul.f32 %v8180_v57, %v8180_v57  ;;  %v3594_v47 = vmul.f32 %v8187_v4, %v8187_v4  ;;  %v3815_v36 = vsel %vm3016_vm2, %v3592_v48, 0.0 }
 0x485   : > { %10467 = vst [vmem:[#allocation51_spill] sm:$0xff] %v8199_v41  ;;  %v3807_v42 = vadd.f32 %v3806_v2, %v3805_v49  ;;  %v3591_v19 = vmul.f32 %v8174_v56, %v8174_v56  ;;  %v3812_v45 = vadd.f32 %v3811_v22, %v3589_v5  ;;  %v8213_v1 = vsub.f32 %v10470_v17, %v8036_v11  ;;  %v10472_v2 = vld [vmem:[#allocation135_spill] sm:$0xff]  ;;  %v10474_v5 = vld [vmem:[#allocation26_spill] sm:$0xff]  ;;  %v10476_v17 = vld [vmem:[#allocation28_spill] sm:$0xff] }
 0x486   : > { %10469 = vst [vmem:[#allocation70_spill] sm:$0xff] %v8203_v21  ;;  %v3595_v53 = vmul.f32 %v8191_v38, %v8191_v38  ;;  %v3819_v57 = vadd.f32 %v3594_v47, %v3593_v59  ;;  %v8222_v49 = vsub.f32 %v10472_v2, %v8036_v11  ;;  %v8226_v22 = vsub.f32 %v10474_v5, %v8080_v0  ;;  %v10478_v47 = vld [vmem:[#allocation111_spill] sm:$0xff] }
 0x487   : > { %10471 = vst [vmem:[#allocation71_spill] sm:$0xff] %v8213_v1  ;;  %3808 = vadd.xlane.f32.xlu1 %v3807_v42  ;;  %v3813_v61 = vadd.f32 %v3812_v45, %v3590_v9  ;;  %v8230_v56 = vsub.f32 %v10476_v17, %v8080_v0  ;;  %v3596_v48 = vmul.f32 %v8199_v41, %v8199_v41  ;;  %v3200_v9 = vpop.xlane.xlu0 %3199  ;;  %v10480_v2 = vld [vmem:[#allocation163_spill] sm:$0xff] }
 0x488   : > { %10473 = vst [vmem:[#allocation109_spill] sm:$0xff] %v8222_v49  ;;  %10475 = vst [vmem:[#allocation110_spill] sm:$0xff] %v8226_v22  ;;  %v3597_v63 = vmul.f32 %v8203_v21, %v8203_v21  ;;  %v3820_v59 = vadd.f32 %v3819_v57, %v3595_v53  ;;  %v8238_v11 = vsub.f32 %v10478_v47, %v8080_v0  ;;  %v10482_v21 = vld [vmem:[#allocation27_spill] sm:$0xff]  ;;  %v10484_v53 = vld [vmem:[#allocation136_spill] sm:$0xff] }
 0x489   : > { %10477 = vst [vmem:[#allocation134_spill] sm:$0xff] %v8230_v56  ;;  %v3814_v42 = vadd.f32 %v3813_v61, %v3591_v19  ;;  %v3599_v45 = vmul.f32 %v8213_v1, %v8213_v1  ;;  %v8244_v5 = vsub.f32 %v10480_v2, %v8080_v0  ;;  %v3600_v17 = vmul.f32 %v8226_v22, %v8226_v22  ;;  %v10486_v22 = vld [vmem:[#allocation137_spill] sm:$0xff] }
 0x48a   : > { %10479 = vst [vmem:[#allocation162_spill] sm:$0xff] %v8238_v11  ;;  %v3821_v41 = vadd.f32 %v3820_v59, %v3596_v48  ;;  %v8250_v57 = vsub.f32 %v10482_v21, %v8080_v0  ;;  %v8254_v47 = vsub.f32 %v10484_v53, %v8080_v0  ;;  %v3601_v61 = vmul.f32 %v8230_v56, %v8230_v56  ;;  %v10488_v53 = vld [vmem:[#allocation72_spill] sm:$0xff] }
 0x48b   : > { %10481 = vst [vmem:[#allocation135_spill] sm:$0xff] %v8244_v5  ;;  %v3816_v19 = vadd.f32 %v3815_v36, %v3814_v42  ;;  %v3598_v2 = vmul.f32 %v8222_v49, %v8222_v49  ;;  %v8260_v1 = vmul.f32 0.0012755102, %v3200_v9  ;;  %v8264_v48 = vsub.f32 %v10486_v22, %v8080_v0  ;;  %v10490_v42 = vld [vmem:[#allocation73_spill] sm:$0xff]  ;;  %v10492_v0 = vld [vmem:[#allocation112_spill] sm:$0xff] }
 0x48c   : > { %10483 = vst [vmem:[#allocation26_spill] sm:$0xff] %v8250_v57  ;;  %10485 = vst [vmem:[#allocation28_spill] sm:$0xff] %v8254_v47  ;;  %v3822_v59 = vadd.f32 %v3821_v41, %v3597_v63  ;;  %v3602_v21 = vmul.f32 %v8238_v11, %v8238_v11  ;;  %v3828_v38 = vadd.f32 %v3601_v61, %v3600_v17  ;;  %v3824_v36 = vsel %vm3016_vm2, %v3599_v45, 0.0  ;;  %v3209_v45 = vpop.xlane.xlu1 %3208 }
 0x48d   : > { %10487 = vst [vmem:[#allocation111_spill] sm:$0xff] %v8264_v48  ;;  %v8270_v4 = vsub.f32 %v10488_v53, %v8126_v6  ;;  %3817 = vadd.xlane.f32.xlu0 %v3816_v19  ;;  %v3606_v9 = vmul.f32 %v8244_v5, %v8244_v5  ;;  %v8277_v56 = vsub.f32 %v10490_v42, %v8126_v6  ;;  %v10494_v19 = vld [vmem:[#allocation113_spill] sm:$0xff]  ;;  %v10496_v42 = vld [vmem:[#allocation138_spill] sm:$0xff]  ;;  %v8306_v11 = vmul.f32 0.0012755102, %v3209_v45 }
 0x48e   : > { %v8281_v41 = vsub.f32 %v10492_v0, %v8126_v6  ;;  %v3823_v22 = vadd.f32 %v3822_v59, %v3598_v2  ;;  %v3603_v63 = vmul.f32 %v8250_v57, %v8250_v57  ;;  %v3604_v17 = vmul.f32 %v8254_v47, %v8254_v47 }
 0x48f   : > { %10489 = vst [vmem:[#allocation163_spill] sm:$0xff] %v8270_v4  ;;  %10491 = vst [vmem:[#allocation27_spill] sm:$0xff] %v8277_v56  ;;  %v3829_v61 = vadd.f32 %v3828_v38, %v3602_v21  ;;  %v8289_v53 = vsub.f32 %v10494_v19, %v8126_v6  ;;  %v8293_v5 = vsub.f32 %v10496_v42, %v8126_v6  ;;  %v10498_v21 = vld [vmem:[#allocation164_spill] sm:$0xff]  ;;  %v3833_v19 = vsel %vm3016_vm2, %v3606_v9, 0.0 }
 0x490   : > { %10493 = vst [vmem:[#allocation136_spill] sm:$0xff] %v8281_v41  ;;  %v3607_v0 = vmul.f32 %v8270_v4, %v8270_v4  ;;  %v3608_v2 = vmul.f32 %v8277_v56, %v8277_v56  ;;  %v3825_v59 = vadd.f32 %v3824_v36, %v3823_v22  ;;  %v3605_v47 = vmul.f32 %v8264_v48, %v8264_v48  ;;  %v10500_v36 = vld [vmem:[#allocation139_spill] sm:$0xff] }
 0x491   : > { %10495 = vst [vmem:[#allocation137_spill] sm:$0xff] %v8289_v53  ;;  %10497 = vst [vmem:[#allocation72_spill] sm:$0xff] %v8293_v5  ;;  %v3830_v38 = vadd.f32 %v3829_v61, %v3603_v63  ;;  %v8303_v57 = vsub.f32 %v10498_v21, %v8126_v6  ;;  %v3609_v42 = vmul.f32 %v8281_v41, %v8281_v41  ;;  %v10502_v63 = vld [vmem:[#allocation74_spill] sm:$0xff]  ;;  %v10504_v21 = vld [vmem:[#allocation75_spill] sm:$0xff] }
 0x492   : > { %v3837_v4 = vadd.f32 %v3608_v2, %v3607_v0  ;;  %3826 = vadd.xlane.f32.xlu1 %v3825_v59  ;;  %v8312_v22 = vsub.f32 %v10500_v36, %v8126_v6  ;;  %v8316_v61 = vsub.f32 %v10502_v63, %v8170_v30  ;;  %v8320_v48 = vsub.f32 %v10504_v21, %v8170_v30  ;;  %v10506_v2 = vld [vmem:[#allocation29_spill] sm:$0xff] }
 0x493   : > { %10499 = vst [vmem:[#allocation73_spill] sm:$0xff] %v8303_v57  ;;  %v3831_v49 = vadd.f32 %v3830_v38, %v3604_v17  ;;  %v3610_v9 = vmul.f32 %v8289_v53, %v8289_v53  ;;  %v3611_v45 = vmul.f32 %v8293_v5, %v8293_v5  ;;  %v3218_v17 = vpop.xlane.xlu0 %3217  ;;  %v8328_v6 = vsub.f32 %v10506_v2, %v8170_v30  ;;  %v10508_v36 = vld [vmem:[#allocation165_spill] sm:$0xff]  ;;  %v10510_v5 = vld [vmem:[#allocation114_spill] sm:$0xff] }
 0x494   : > { %10501 = vst [vmem:[#allocation112_spill] sm:$0xff] %v8312_v22  ;;  %10503 = vst [vmem:[#allocation113_spill] sm:$0xff] %v8316_v61  ;;  %v3838_v0 = vadd.f32 %v3837_v4, %v3609_v42  ;;  %v3613_v38 = vmul.f32 %v8303_v57, %v8303_v57  ;;  %v8334_v63 = vsub.f32 %v10508_v36, %v8170_v30  ;;  %v10512_v42 = vld [vmem:[#allocation140_spill] sm:$0xff]  ;;  %v8350_v57 = vmul.f32 0.0012755102, %v3218_v17 }
 0x495   : > { %10505 = vst [vmem:[#allocation138_spill] sm:$0xff] %v8320_v48  ;;  %10507 = vst [vmem:[#allocation164_spill] sm:$0xff] %v8328_v6  ;;  %v3832_v59 = vadd.f32 %v3831_v49, %v3605_v47  ;;  %v3614_v21 = vmul.f32 %v8316_v61, %v8316_v61  ;;  %v8340_v4 = vsub.f32 %v10510_v5, %v8170_v30  ;;  %v10514_v61 = vld [vmem:[#allocation141_spill] sm:$0xff] }
 0x496   : > { %10509 = vst [vmem:[#allocation139_spill] sm:$0xff] %v8334_v63  ;;  %v3839_v53 = vadd.f32 %v3838_v0, %v3610_v9  ;;  %v8344_v2 = vsub.f32 %v10512_v42, %v8170_v30  ;;  %v3615_v49 = vmul.f32 %v8320_v48, %v8320_v48  ;;  %v3612_v36 = vmul.f32 %v8312_v22, %v8312_v22  ;;  %v10516_v42 = vld [vmem:[#allocation76_spill] sm:$0xff] }
 0x497   : > { %10511 = vst [vmem:[#allocation74_spill] sm:$0xff] %v8340_v4  ;;  %v3834_v47 = vadd.f32 %v3833_v19, %v3832_v59  ;;  %v8354_v9 = vsub.f32 %v10514_v61, %v8170_v30  ;;  %v3616_v5 = vmul.f32 %v8328_v6, %v8328_v6  ;;  %v8360_v56 = vsub.f32 %v10516_v42, %v8216_v35  ;;  %v10518_v59 = vld [vmem:[#allocation77_spill] sm:$0xff]  ;;  %v10520_v30 = vld [vmem:[#allocation115_spill] sm:$0xff] }
 0x498   : > { %10513 = vst [vmem:[#allocation75_spill] sm:$0xff] %v8344_v2  ;;  %v3840_v0 = vadd.f32 %v3839_v53, %v3611_v45  ;;  %v3846_v41 = vadd.f32 %v3615_v49, %v3614_v21  ;;  %v3842_v19 = vsel %vm3016_vm2, %v3613_v38, 0.0  ;;  %v3620_v17 = vmul.f32 %v8334_v63, %v8334_v63  ;;  %v3227_v38 = vpop.xlane.xlu1 %3226 }
 0x499   : > { %10515 = vst [vmem:[#allocation29_spill] sm:$0xff] %v8354_v9  ;;  %10517 = vst [vmem:[#allocation165_spill] sm:$0xff] %v8360_v56  ;;  %3835 = vadd.xlane.f32.xlu0 %v3834_v47  ;;  %v8367_v48 = vsub.f32 %v10518_v59, %v8216_v35  ;;  %v8371_v53 = vsub.f32 %v10520_v30, %v8216_v35  ;;  %v3617_v45 = vmul.f32 %v8340_v4, %v8340_v4  ;;  %v10522_v47 = vld [vmem:[#allocation116_spill] sm:$0xff]  ;;  %v10524_v59 = vld [vmem:[#allocation142_spill] sm:$0xff] }
 0x49a   : > { %v3841_v61 = vadd.f32 %v3840_v0, %v3612_v36  ;;  %v3618_v21 = vmul.f32 %v8344_v2, %v8344_v2  ;;  %v3847_v49 = vadd.f32 %v3846_v41, %v3616_v5  ;;  %v8379_v42 = vsub.f32 %v10522_v47, %v8216_v35  ;;  %v10526_v5 = vld [vmem:[#allocation166_spill] sm:$0xff] }
 0x49b   : > { %10519 = vst [vmem:[#allocation114_spill] sm:$0xff] %v8367_v48  ;;  %10521 = vst [vmem:[#allocation140_spill] sm:$0xff] %v8371_v53  ;;  %v8383_v63 = vsub.f32 %v10524_v59, %v8216_v35  ;;  %v3621_v30 = vmul.f32 %v8360_v56, %v8360_v56  ;;  %v3622_v36 = vmul.f32 %v8367_v48, %v8367_v48  ;;  %v3851_v47 = vsel %vm3016_vm2, %v3620_v17, 0.0 }
 0x49c   : > { %10523 = vst [vmem:[#allocation141_spill] sm:$0xff] %v8379_v42  ;;  %v3843_v0 = vadd.f32 %v3842_v19, %v3841_v61  ;;  %v3619_v2 = vmul.f32 %v8354_v9, %v8354_v9  ;;  %v3848_v41 = vadd.f32 %v3847_v49, %v3617_v45  ;;  %v8393_v4 = vsub.f32 %v10526_v5, %v8216_v35  ;;  %v10528_v19 = vld [vmem:[#allocation143_spill] sm:$0xff]  ;;  %v10530_v45 = vld [vmem:[#allocation78_spill] sm:$0xff] }
 0x49d   : > { %10525 = vst [vmem:[#allocation76_spill] sm:$0xff] %v8383_v63  ;;  %v8396_v6 = vmul.f32 0.0012755102, %v3227_v38  ;;  %v3623_v59 = vmul.f32 %v8371_v53, %v8371_v53  ;;  %v3855_v56 = vadd.f32 %v3622_v36, %v3621_v30  ;;  %v8402_v61 = vsub.f32 %v10528_v19, %v8216_v35  ;;  %v10532_v5 = vld [vmem:[#allocation79_spill] sm:$0xff]  ;;  %v10534_v36 = vld [vmem:[#allocation30_spill] sm:$0xff]  ;;  %v10536_v19 = vld [vmem:[#allocation117_spill] sm:$0xff] }
 0x49e   : > { %10527 = vst [vmem:[#allocation77_spill] sm:$0xff] %v8393_v4  ;;  %3844 = vadd.xlane.f32.xlu1 %v3843_v0  ;;  %v3849_v22 = vadd.f32 %v3848_v41, %v3618_v21  ;;  %v8406_v49 = vsub.f32 %v10530_v45, %v8260_v1  ;;  %v8410_v48 = vsub.f32 %v10532_v5, %v8260_v1  ;;  %v3236_v21 = vpop.xlane.xlu0 %3235 }
 0x49f   : > { %10529 = vst [vmem:[#allocation115_spill] sm:$0xff] %v8402_v61  ;;  %v3624_v17 = vmul.f32 %v8379_v42, %v8379_v42  ;;  %v3625_v38 = vmul.f32 %v8383_v63, %v8383_v63  ;;  %v3856_v30 = vadd.f32 %v3855_v56, %v3623_v59  ;;  %v8418_v35 = vsub.f32 %v10534_v36, %v8260_v1  ;;  %v10538_v63 = vld [vmem:[#allocation144_spill] sm:$0xff]  ;;  %v10540_v59 = vld [vmem:[#allocation167_spill] sm:$0xff] }
 0x4a0   : > { %10531 = vst [vmem:[#allocation116_spill] sm:$0xff] %v8406_v49  ;;  %10533 = vst [vmem:[#allocation142_spill] sm:$0xff] %v8410_v48  ;;  %v3850_v0 = vadd.f32 %v3849_v22, %v3619_v2  ;;  %v3627_v41 = vmul.f32 %v8393_v4, %v8393_v4  ;;  %v8424_v45 = vsub.f32 %v10536_v19, %v8260_v1  ;;  %v8440_v4 = vmul.f32 0.0012755102, %v3236_v21 }
 0x4a1   : > { %10535 = vst [vmem:[#allocation166_spill] sm:$0xff] %v8418_v35  ;;  %v3628_v5 = vmul.f32 %v8406_v49, %v8406_v49  ;;  %v3857_v42 = vadd.f32 %v3856_v30, %v3624_v17  ;;  %v8430_v56 = vsub.f32 %v10538_v63, %v8260_v1  ;;  %v8434_v36 = vsub.f32 %v10540_v59, %v8260_v1  ;;  %v10542_v49 = vld [vmem:[#allocation145_spill] sm:$0xff]  ;;  %v10543_v59 = vld [vmem:[#allocation80_spill] sm:$0xff] }
 0x4a2   : > { %10537 = vst [vmem:[#allocation143_spill] sm:$0xff] %v8424_v45  ;;  %v3629_v22 = vmul.f32 %v8410_v48, %v8410_v48  ;;  %v3852_v2 = vadd.f32 %v3851_v47, %v3850_v0  ;;  %v3626_v19 = vmul.f32 %v8402_v61, %v8402_v61  ;;  %v8444_v17 = vsub.f32 %v10542_v49, %v8260_v1  ;;  %v3245_v0 = vpop.xlane.xlu1 %3244  ;;  %v10545_v48 = vld [vmem:[#allocation81_spill] sm:$0xff] }
 0x4a3   : > { %10539 = vst [vmem:[#allocation78_spill] sm:$0xff] %v8430_v56  ;;  %10541 = vst [vmem:[#allocation79_spill] sm:$0xff] %v8434_v36  ;;  %v3858_v30 = vadd.f32 %v3857_v42, %v3625_v38  ;;  %v3630_v63 = vmul.f32 %v8418_v35, %v8418_v35  ;;  %v8450_v9 = vsub.f32 %v10543_v59, %v8306_v11  ;;  %v3860_v47 = vsel %vm3016_vm2, %v3627_v41, 0.0  ;;  %v10547_v42 = vld [vmem:[#allocation118_spill] sm:$0xff] }
 0x4a4   : > { %v3864_v53 = vadd.f32 %v3629_v22, %v3628_v5  ;;  %3853 = vadd.xlane.f32.xlu0 %v3852_v2  ;;  %v3631_v21 = vmul.f32 %v8424_v45, %v8424_v45  ;;  %v8457_v1 = vsub.f32 %v10545_v48, %v8306_v11  ;;  %v8461_v49 = vsub.f32 %v10547_v42, %v8306_v11  ;;  %v10549_v2 = vld [vmem:[#allocation119_spill] sm:$0xff]  ;;  %v10551_v45 = vld [vmem:[#allocation168_spill] sm:$0xff] }
 0x4a5   : > { %10544 = vst [vmem:[#allocation30_spill] sm:$0xff] %v8450_v9  ;;  %v3859_v38 = vadd.f32 %v3858_v30, %v3626_v19  ;;  %v3632_v5 = vmul.f32 %v8430_v56, %v8430_v56  ;;  %v3634_v22 = vmul.f32 %v8434_v36, %v8434_v36  ;;  %v8469_v59 = vsub.f32 %v10549_v2, %v8306_v11 }
 0x4a6   : > { %10546 = vst [vmem:[#allocation117_spill] sm:$0xff] %v8457_v1  ;;  %10548 = vst [vmem:[#allocation144_spill] sm:$0xff] %v8461_v49  ;;  %v3865_v41 = vadd.f32 %v3864_v53, %v3630_v63  ;;  %v8473_v48 = vsub.f32 %v10551_v45, %v8306_v11  ;;  %v3635_v42 = vmul.f32 %v8450_v9, %v8450_v9  ;;  %v8481_v53 = vmul.f32 0.0012755102, %v3245_v0  ;;  %v10553_v63 = vld [vmem:[#allocation146_spill] sm:$0xff] }
 0x4a7   : > { %10550 = vst [vmem:[#allocation167_spill] sm:$0xff] %v8469_v59  ;;  %v3636_v19 = vmul.f32 %v8457_v1, %v8457_v1  ;;  %v3861_v30 = vadd.f32 %v3860_v47, %v3859_v38  ;;  %v3633_v56 = vmul.f32 %v8444_v17, %v8444_v17  ;;  %v8485_v2 = vsub.f32 %v10553_v63, %v8306_v11  ;;  %v10554_v9 = vld [vmem:[#allocation82_spill] sm:$0xff]  ;;  %v10556_v38 = vld [vmem:[#allocation147_spill] sm:$0xff] }
 0x4a8   : > { %10552 = vst [vmem:[#allocation145_spill] sm:$0xff] %v8473_v48  ;;  %v3866_v36 = vadd.f32 %v3865_v41, %v3631_v21  ;;  %v3637_v45 = vmul.f32 %v8461_v49, %v8461_v49  ;;  %v8491_v61 = vsub.f32 %v10554_v9, %v8350_v57  ;;  %v8495_v1 = vsub.f32 %v10556_v38, %v8306_v11  ;;  %v10557_v21 = vld [vmem:[#allocation83_spill] sm:$0xff]  ;;  %v10559_v41 = vld [vmem:[#allocation120_spill] sm:$0xff]  ;;  %v10561_v11 = vld [vmem:[#allocation121_spill] sm:$0xff] }
 0x4a9   : > { %v3873_v35 = vadd.f32 %v3636_v19, %v3635_v42  ;;  %3862 = vadd.xlane.f32.xlu1 %v3861_v30  ;;  %v8499_v0 = vsub.f32 %v10557_v21, %v8350_v57  ;;  %v8503_v63 = vsub.f32 %v10559_v41, %v8350_v57  ;;  %v3869_v42 = vsel %vm3016_vm2, %v3634_v22, 0.0 }
 0x4aa   : > { %10555 = vst [vmem:[#allocation80_spill] sm:$0xff] %v8491_v61  ;;  %v3867_v47 = vadd.f32 %v3866_v36, %v3632_v5  ;;  %v3638_v9 = vmul.f32 %v8469_v59, %v8469_v59  ;;  %v3641_v36 = vmul.f32 %v8473_v48, %v8473_v48  ;;  %v8512_v30 = vsub.f32 %v10561_v11, %v8350_v57  ;;  %v10563_v59 = vld [vmem:[#allocation148_spill] sm:$0xff] }
 0x4ab   : > { %10558 = vst [vmem:[#allocation81_spill] sm:$0xff] %v8499_v0  ;;  %10560 = vst [vmem:[#allocation118_spill] sm:$0xff] %v8503_v63  ;;  %v3874_v5 = vadd.f32 %v3873_v35, %v3637_v45  ;;  %v3642_v38 = vmul.f32 %v8491_v61, %v8491_v61  ;;  %v3643_v21 = vmul.f32 %v8499_v0, %v8499_v0  ;;  %v10566_v61 = vld [vmem:[#allocation149_spill] sm:$0xff] }
 0x4ac   : > { %v3868_v19 = vadd.f32 %v3867_v47, %v3633_v56  ;;  %10562 = vst [vmem:[#allocation119_spill] sm:$0xff] %v8512_v30  ;;  %v3639_v22 = vmul.f32 %v8485_v2, %v8485_v2  ;;  %v8522_v49 = vsub.f32 %v10563_v59, %v8350_v57  ;;  %v8526_v35 = vsub.f32 %v7497_v32, %v8350_v57  ;;  %v10568_v59 = vld [vmem:[#allocation84_spill] sm:$0xff]  ;;  %v10570_v32 = vld [vmem:[#allocation85_spill] sm:$0xff] }
 0x4ad   : > { %v3875_v41 = vadd.f32 %v3874_v5, %v3638_v9  ;;  %v3640_v45 = vmul.f32 %v8495_v1, %v8495_v1  ;;  %v3644_v47 = vmul.f32 %v8503_v63, %v8503_v63  ;;  %v3882_v11 = vadd.f32 %v3643_v21, %v3642_v38  ;;  %v3254_v21 = vpop.xlane.xlu0 %3253 }
 0x4ae   : > { %10564 = vst [vmem:[#allocation168_spill] sm:$0xff] %v8522_v49  ;;  %10565 = vst [vmem:[#allocation146_spill] sm:$0xff] %v8526_v35  ;;  %v3870_v56 = vadd.f32 %v3869_v42, %v3868_v19  ;;  %v8534_v9 = vsub.f32 %v10566_v61, %v8350_v57  ;;  %v8538_v5 = vsub.f32 %v10568_v59, %v8396_v6  ;;  %v3878_v42 = vsel %vm3016_vm2, %v3641_v36, 0.0 }
 0x4af   : > { %v3876_v0 = vadd.f32 %v3875_v41, %v3639_v22  ;;  %v8542_v48 = vsub.f32 %v10570_v32, %v8396_v6  ;;  %v3645_v19 = vmul.f32 %v8512_v30, %v8512_v30  ;;  %v3883_v38 = vadd.f32 %v3882_v11, %v3644_v47  ;;  %v10572_v22 = vld [vmem:[#allocation122_spill] sm:$0xff]  ;;  %v10576_v30 = vld [vmem:[#allocation169_spill] sm:$0xff] }
 0x4b0   : > { %10567 = vst [vmem:[#allocation82_spill] sm:$0xff] %v8534_v9  ;;  %10569 = vst [vmem:[#allocation147_spill] sm:$0xff] %v8538_v5  ;;  %3871 = vadd.xlane.f32.xlu0 %v3870_v56  ;;  %v8549_v57 = vsub.f32 %v10572_v22, %v8396_v6  ;;  %v3646_v41 = vmul.f32 %v8522_v49, %v8522_v49  ;;  %v3648_v59 = vmul.f32 %v8526_v35, %v8526_v35  ;;  %v10574_v56 = vld [vmem:[#allocation123_spill] sm:$0xff] }
 0x4b1   : > { %10571 = vst [vmem:[#allocation83_spill] sm:$0xff] %v8542_v48  ;;  %v3877_v61 = vadd.f32 %v3876_v0, %v3640_v45  ;;  %v8557_v32 = vsub.f32 %v10574_v56, %v8396_v6  ;;  %v3884_v36 = vadd.f32 %v3883_v38, %v3645_v19  ;;  %v8561_v47 = vsub.f32 %v10576_v30, %v8396_v6  ;;  %v10578_v56 = vld [vmem:[#allocation150_spill] sm:$0xff] }
 0x4b2   : > { %10573 = vst [vmem:[#allocation120_spill] sm:$0xff] %v8549_v57  ;;  %v3649_v11 = vmul.f32 %v8538_v5, %v8538_v5  ;;  %v3650_v0 = vmul.f32 %v8542_v48, %v8542_v48  ;;  %v3647_v22 = vmul.f32 %v8534_v9, %v8534_v9  ;;  %v8569_v35 = vmul.f32 0.0012755102, %v3254_v21  ;;  %v10579_v5 = vld [vmem:[#allocation86_spill] sm:$0xff]  ;;  %v10583_v48 = vld [vmem:[#allocation87_spill] sm:$0xff]  ;;  %v10595_v9 = vld [vmem:[#allocation88_spill] sm:$0xff] }
 0x4b3   : > { %10575 = vst [vmem:[#allocation121_spill] sm:$0xff] %v8557_v32  ;;  %10577 = vst [vmem:[#allocation148_spill] sm:$0xff] %v8561_v47  ;;  %v3879_v45 = vadd.f32 %v3878_v42, %v3877_v61  ;;  %v8573_v49 = vsub.f32 %v10578_v56, %v8396_v6  ;;  %v3885_v19 = vadd.f32 %v3884_v36, %v3646_v41  ;;  %v3887_v42 = vsel %vm3016_vm2, %v3648_v59, 0.0  ;;  %v10581_v61 = vld [vmem:[#allocation151_spill] sm:$0xff]  ;;  %v10585_v41 = vld [vmem:[#allocation124_spill] sm:$0xff] }
 0x4b4   : > { %v3651_v30 = vmul.f32 %v8549_v57, %v8549_v57  ;;  %v3891_v38 = vadd.f32 %v3650_v0, %v3649_v11  ;;  %v8579_v63 = vsub.f32 %v10579_v5, %v8440_v4  ;;  %v8584_v21 = vsub.f32 %v10581_v61, %v8396_v6  ;;  %v10589_v61 = vld [vmem:[#allocation152_spill] sm:$0xff] }
 0x4b5   : > { %3880 = vadd.xlane.f32.xlu1 %v3879_v45  ;;  %v8588_v56 = vsub.f32 %v10583_v48, %v8440_v4  ;;  %v8592_v36 = vsub.f32 %v10585_v41, %v8440_v4  ;;  %v3886_v11 = vadd.f32 %v3885_v19, %v3647_v22  ;;  %v3652_v5 = vmul.f32 %v8557_v32, %v8557_v32  ;;  %v10587_v45 = vld [vmem:[#allocation125_spill] sm:$0xff] }
 0x4b6   : > { %10580 = vst [vmem:[#allocation149_spill] sm:$0xff] %v8579_v63  ;;  %10582 = vst [vmem:[#allocation84_spill] sm:$0xff] %v8584_v21  ;;  %v3655_v0 = vmul.f32 %v8561_v47, %v8561_v47  ;;  %v3892_v59 = vadd.f32 %v3891_v38, %v3651_v30  ;;  %v8600_v6 = vsub.f32 %v10587_v45, %v8440_v4  ;;  %v10591_v30 = vld [vmem:[#allocation153_spill] sm:$0xff]  ;;  %v10593_v45 = vld [vmem:[#allocation170_spill] sm:$0xff] }
 0x4b7   : > { %10584 = vst [vmem:[#allocation85_spill] sm:$0xff] %v8588_v56  ;;  %10586 = vst [vmem:[#allocation122_spill] sm:$0xff] %v8592_v36  ;;  %v8604_v48 = vsub.f32 %v10589_v61, %v8440_v4  ;;  %v3656_v41 = vmul.f32 %v8579_v63, %v8579_v63  ;;  %v3657_v22 = vmul.f32 %v8588_v56, %v8588_v56 }
 0x4b8   : > { %10588 = vst [vmem:[#allocation123_spill] sm:$0xff] %v8600_v6  ;;  %v3888_v19 = vadd.f32 %v3887_v42, %v3886_v11  ;;  %v3653_v32 = vmul.f32 %v8573_v49, %v8573_v49  ;;  %v3893_v47 = vadd.f32 %v3892_v59, %v3652_v5  ;;  %v8614_v38 = vsub.f32 %v10591_v30, %v8440_v4  ;;  %v10597_v5 = vld [vmem:[#allocation89_spill] sm:$0xff] }
 0x4b9   : > { %10590 = vst [vmem:[#allocation169_spill] sm:$0xff] %v8604_v48  ;;  %v8618_v57 = vsub.f32 %v10593_v45, %v8440_v4  ;;  %v3658_v61 = vmul.f32 %v8592_v36, %v8592_v36  ;;  %v3900_v63 = vadd.f32 %v3657_v22, %v3656_v41  ;;  %v8624_v56 = vsub.f32 %v10595_v9, %v8481_v53  ;;  %v10599_v4 = vld [vmem:[#allocation126_spill] sm:$0xff] }
 0x4ba   : > { %10592 = vst [vmem:[#allocation150_spill] sm:$0xff] %v8614_v38  ;;  %3889 = vadd.xlane.f32.xlu0 %v3888_v19  ;;  %v3654_v42 = vmul.f32 %v8584_v21, %v8584_v21  ;;  %v3894_v11 = vadd.f32 %v3893_v47, %v3653_v32  ;;  %v8630_v59 = vsub.f32 %v10597_v5, %v8481_v53  ;;  %v3896_v45 = vsel %vm3016_vm2, %v3655_v0, 0.0  ;;  %v10601_v32 = vld [vmem:[#allocation127_spill] sm:$0xff] }
 0x4bb   : > { %10594 = vst [vmem:[#allocation86_spill] sm:$0xff] %v8618_v57  ;;  %10596 = vst [vmem:[#allocation151_spill] sm:$0xff] %v8624_v56  ;;  %v8634_v30 = vsub.f32 %v10599_v4, %v8481_v53  ;;  %v3659_v41 = vmul.f32 %v8600_v6, %v8600_v6  ;;  %v3660_v9 = vmul.f32 %v8604_v48, %v8604_v48 }
 0x4bc   : > { %10598 = vst [vmem:[#allocation87_spill] sm:$0xff] %v8630_v59  ;;  %v3901_v22 = vadd.f32 %v3900_v63, %v3658_v61  ;;  %v3895_v19 = vadd.f32 %v3894_v11, %v3654_v42  ;;  %v8643_v47 = vsub.f32 %v10601_v32, %v8481_v53  ;;  %v3663_v5 = vmul.f32 %v8624_v56, %v8624_v56  ;;  %v10603_v63 = vld [vmem:[#allocation154_spill] sm:$0xff]  ;;  %v10605_v11 = vld [vmem:[#allocation155_spill] sm:$0xff] }
 0x4bd   : > { %10600 = vst [vmem:[#allocation124_spill] sm:$0xff] %v8634_v30  ;;  %v3664_v4 = vmul.f32 %v8630_v59, %v8630_v59  ;;  %v3661_v0 = vmul.f32 %v8614_v38, %v8614_v38  ;;  %v3662_v6 = vmul.f32 %v8618_v57, %v8618_v57  ;;  %v8655_v61 = vsub.f32 %v10603_v63, %v8481_v53  ;;  %v10607_v38 = vld [vmem:[#allocation171_spill] sm:$0xff] }
 0x4be   : > { %10602 = vst [vmem:[#allocation125_spill] sm:$0xff] %v8643_v47  ;;  %v3902_v36 = vadd.f32 %v3901_v22, %v3659_v41  ;;  %v3897_v42 = vadd.f32 %v3896_v45, %v3895_v19  ;;  %v8659_v32 = vsub.f32 %v10605_v11, %v8481_v53  ;;  %v3665_v56 = vmul.f32 %v8634_v30, %v8634_v30  ;;  %v10609_v41 = vld [vmem:[#allocation90_spill] sm:$0xff]  ;;  %v10611_v63 = vld [vmem:[#allocation91_spill] sm:$0xff] }
 0x4bf   : > { %10604 = vst [vmem:[#allocation152_spill] sm:$0xff] %v8655_v61  ;;  %v3909_v59 = vadd.f32 %v3664_v4, %v3663_v5  ;;  %v8665_v21 = vsub.f32 %v10607_v38, %v8481_v53  ;;  %v8669_v22 = vsub.f32 %v10609_v41, %v8569_v35  ;;  %v8673_v45 = vsub.f32 %v10611_v63, %v8569_v35  ;;  %v10613_v5 = vld [vmem:[#allocation128_spill] sm:$0xff] }
 0x4c0   : > { %10606 = vst [vmem:[#allocation153_spill] sm:$0xff] %v8659_v32  ;;  %v3903_v48 = vadd.f32 %v3902_v36, %v3660_v9  ;;  %3898 = vadd.xlane.f32.xlu1 %v3897_v42  ;;  %v3666_v19 = vmul.f32 %v8643_v47, %v8643_v47  ;;  %v8679_v36 = vsub.f32 %v10613_v5, %v8569_v35  ;;  %v3905_v53 = vsel %vm3016_vm2, %v3662_v6, 0.0  ;;  %v10615_v42 = vld [vmem:[#allocation129_spill] sm:$0xff]  ;;  %v10617_v5 = vld [vmem:[#allocation156_spill] sm:$0xff] }
 0x4c1   : > { %10608 = vst [vmem:[#allocation170_spill] sm:$0xff] %v8665_v21  ;;  %10610 = vst [vmem:[#allocation88_spill] sm:$0xff] %v8669_v22  ;;  %v3910_v11 = vadd.f32 %v3909_v59, %v3665_v56  ;;  %v3670_v38 = vmul.f32 %v8669_v22, %v8669_v22  ;;  %v3667_v4 = vmul.f32 %v8655_v61, %v8655_v61 }
 0x4c2   : > { %10612 = vst [vmem:[#allocation89_spill] sm:$0xff] %v8673_v45  ;;  %10614 = vst [vmem:[#allocation126_spill] sm:$0xff] %v8679_v36  ;;  %v3904_v9 = vadd.f32 %v3903_v48, %v3661_v0  ;;  %v8688_v63 = vsub.f32 %v10615_v42, %v8569_v35  ;;  %v3671_v56 = vmul.f32 %v8673_v45, %v8673_v45  ;;  %v10619_v42 = vld [vmem:[#allocation175_spill] sm:$0xff] }
 0x4c3   : > { %v3911_v41 = vadd.f32 %v3910_v11, %v3666_v19  ;;  %v3668_v48 = vmul.f32 %v8659_v32, %v8659_v32  ;;  %v3669_v6 = vmul.f32 %v8665_v21, %v8665_v21  ;;  %v8698_v22 = vsub.f32 %v10617_v5, %v8569_v35 }
 0x4c4   : > { %10616 = vst [vmem:[#allocation127_spill] sm:$0xff] %v8688_v63  ;;  %v3906_v59 = vadd.f32 %v3905_v53, %v3904_v9  ;;  %v3672_v19 = vmul.f32 %v8679_v36, %v8679_v36  ;;  %v3918_v11 = vadd.f32 %v3671_v56, %v3670_v38  ;;  %v8704_v45 = vsub.f32 %v10619_v42, %v8569_v35  ;;  %v10621_v53 = vld [vmem:[#allocation157_spill] sm:$0xff]  ;;  %v4430_v42 = vld [vmem:[%s7026_s14 + $0x90] sm:$0xff] }
 0x4c5   : > { %v3912_v0 = vadd.f32 %v3911_v41, %v3667_v4  ;;  %10618 = vst [vmem:[#allocation154_spill] sm:$0xff] %v8698_v22  ;;  %v8708_v32 = vsub.f32 %v10621_v53, %v8569_v35  ;;  %v3673_v4 = vmul.f32 %v8688_v63, %v8688_v63  ;;  %v3914_v5 = vsel %vm3016_vm2, %v3669_v6, 0.0  ;;  %v4432_v53 = vld [vmem:[%s7026_s14 + $0xa0] sm:$0xff] }
 0x4c6   : > { %3907 = vadd.xlane.f32.xlu0 %v3906_v59  ;;  %10620 = vst [vmem:[#allocation155_spill] sm:$0xff] %v8704_v45  ;;  %v3919_v41 = vadd.f32 %v3918_v11, %v3672_v19  ;;  %v3674_v38 = vmul.f32 %v8698_v22, %v8698_v22  ;;  %v3676_v59 = vmul.f32 %v8704_v45, %v8704_v45  ;;  %v8720_v11 = vpop.permute.xlu0 %4517  ;;  %v10629_v22 = vld [vmem:[#allocation131_spill] sm:$0xff] }
 0x4c7   : > { %v3913_v9 = vadd.f32 %v3912_v0, %v3668_v48  ;;  %10622 = vst [vmem:[#allocation171_spill] sm:$0xff] %v8708_v32  ;;  %v3675_v35 = vmul.f32 %v8708_v32, %v8708_v32 }
 0x4c8   : > { %v3920_v56 = vadd.f32 %v3919_v41, %v3673_v4  ;;  %v3923_v6 = vsel %vm3016_vm2, %v3676_v59, 0.0  ;;  %v4434_v4 = vld [vmem:[%s7026_s14 + $0xb0] sm:$0xff]  ;;  %v8725_v41 = vpop.permute.xlu1 %4522 }
 0x4c9   : > { %v3915_v36 = vadd.f32 %v3914_v5, %v3913_v9 }
 0x4ca   : > { %v3921_v48 = vadd.f32 %v3920_v56, %v3674_v38  ;;  %v4429_v38 = vld [vmem:[%s7026_s14 + $0x88] sm:$0xff]  ;;  %v4436_v56 = vld [vmem:[%s7026_s14 + $0xc0] sm:$0xff] }
 0x4cb   : > { %3916 = vadd.xlane.f32.xlu1 %v3915_v36 }
 0x4cc   : > { %v3922_v0 = vadd.f32 %v3921_v48, %v3675_v35  ;;  %v3692_v9 = vpop.xlane.xlu0 %3691  ;;  %v3263_v59 = vpop.xlane.xlu1 %3262  ;;  %v4431_v35 = vld [vmem:[%s7026_s14 + $0x98] sm:$0xff] }
 0x4cd   : > { %v3936_v36 = vmul.f32 0.0012755102, %v3692_v9  ;;  %v3291_v48 = vmul.f32 0.0012755102, %v3263_v59  ;;  %v10625_v9 = vld [vmem:[#allocation93_spill] sm:$0xff] }
 0x4ce   : > { %v3924_v19 = vadd.f32 %v3923_v6, %v3922_v0  ;;  %v4433_v0 = vld [vmem:[%s7026_s14 + $0xa8] sm:$0xff] }
 0x4cf   : > { %v3964_v5 = vadd.f32 1e-05, %v3936_v36  ;;  %v4435_v36 = vld [vmem:[%s7026_s14 + $0xb8] sm:$0xff]  ;;  %v4437_v59 = vld [vmem:[%s7026_s14 + $0xc8] sm:$0xff]  ;;  %v8755_v63 = vsub.f32 %v10629_v22, %v3291_v48 }
 0x4d0   : > { %3925 = vadd.xlane.f32.xlu0 %v3924_v19  ;;  %v3701_v6 = vpop.xlane.xlu1 %3700  ;;  %v10623_v19 = vld [vmem:[#allocation92_spill] sm:$0xff] }
 0x4d1   : > { %5517 = vrsqrt.f32 %v3964_v5  ;;  %10630 = vst [vmem:[#allocation129_spill] sm:$0xff] %v8755_v63 }
 0x4dc   : > { %4532 = vperm.xlu1 %5457, %v4430_v42   ;;  %v8732_v42 = vsub.f32 %v10623_v19, %v3291_v48 }
 0x4de   : > { %10624 = vst [vmem:[#allocation90_spill] sm:$0xff] %v8732_v42  ;;  %v3677_v5 = vmul.f32 %v8732_v42, %v8732_v42 }
 0x4e0   : > { %4542 = vperm.xlu1 %5457, %v4432_v53   ;;  %v8735_v53 = vsub.f32 %v10625_v9, %v3291_v48 }
 0x4e2   : > { %10626 = vst [vmem:[#allocation91_spill] sm:$0xff] %v8735_v53 }
 0x4e4   : > { %4552 = vperm.xlu1 %5457, %v4434_v4   ;;  %v3719_v4 = vpop.xlane.xlu1 %3718 }
 0x4e6   : > { %4527 = vperm.xlu0 %5458, %v4429_v38   ;;  %v3678_v38 = vmul.f32 %v8735_v53, %v8735_v53 }
 0x4e8   : > { %4562 = vperm.xlu1 %5457, %v4436_v56   ;;  %v5518_v56 = vpop.eup %5517  ;;  %v3737_v9 = vpop.xlane.xlu1 %3736  ;;  %v3927_v45 = vadd.f32 %v3678_v38, %v3677_v5  ;;  %v10633_v38 = vld [vmem:[#allocation159_spill] sm:$0xff] }
 0x4ea   : > { %4537 = vperm.xlu0 %5458, %v4431_v35   ;;  %v4020_v35 = vld [vmem:[%s8743_s0] sm:$0xff] }
 0x4eb   : > { %v4048_v32 = vmul.f32 %v5518_v56, %v4020_v35  ;;  %v8765_v56 = vsub.f32 %v10633_v38, %v3291_v48  ;;  %v10635_v35 = vld [vmem:[#allocation187_spill] sm:$0xff] }
 0x4ed   : > { %10634 = vst [vmem:[#allocation175_spill] sm:$0xff] %v8765_v56 }
 0x4ee   : > { %4547 = vperm.xlu0 %5458, %v4433_v0   ;;  %v10627_v0 = vld [vmem:[#allocation130_spill] sm:$0xff]  ;;  %v3755_v21 = vpop.xlane.xlu1 %3754 }
 0x4ef   : > { %v8752_v19 = vsub.f32 %v10627_v0, %v3291_v48  ;;  %v3680_v0 = vmul.f32 %v8755_v63, %v8755_v63 }
 0x4f1   : > { %10628 = vst [vmem:[#allocation128_spill] sm:$0xff] %v8752_v19  ;;  %v3679_v42 = vmul.f32 %v8752_v19, %v8752_v19  ;;  %v8770_v19 = vsub.f32 %v10635_v35, %v3291_v48  ;;  %v4029_v35 = vld [vmem:[%s8743_s0 + $0x48] sm:$0xff] }
 0x4f2   : > { %4557 = vperm.xlu0 %5458, %v4435_v36   ;;  %v10631_v36 = vld [vmem:[#allocation158_spill] sm:$0xff] }
 0x4f3   : > { %v3928_v61 = vadd.f32 %v3927_v45, %v3679_v42  ;;  %v8760_v53 = vsub.f32 %v10631_v36, %v3291_v48  ;;  %10636 = vst [vmem:[#allocation157_spill] sm:$0xff] %v8770_v19  ;;  %v3937_v45 = vmul.f32 0.0012755102, %v3701_v6  ;;  %v3710_v42 = vpop.xlane.xlu0 %3709  ;;  %v3682_v36 = vmul.f32 %v8765_v56, %v8765_v56 }
 0x4f4   : > { %v3938_v38 = vmul.f32 0.0012755102, %v3710_v42 }
 0x4f5   : > { %10632 = vst [vmem:[#allocation156_spill] sm:$0xff] %v8760_v53  ;;  %v3929_v30 = vadd.f32 %v3928_v61, %v3680_v0  ;;  %v3681_v22 = vmul.f32 %v8760_v53, %v8760_v53  ;;  %v3965_v0 = vadd.f32 1e-05, %v3937_v45 }
 0x4f6   : > { %4567 = vperm.xlu0 %5458, %v4437_v59  }
 0x4f9   : > { %v3773_v47 = vpop.xlane.xlu1 %3772 }
 0x4fa   : > { %4078 = vperm.xlu0 %5458, %v4048_v32   ;;  %v3945_v5 = vmul.f32 0.0012755102, %v3773_v47  ;;  %v3930_v32 = vadd.f32 %v3929_v30, %v3681_v22  ;;  %v3683_v47 = vmul.f32 %v8770_v19, %v8770_v19  ;;  %v3966_v30 = vadd.f32 1e-05, %v3938_v38 }
 0x4fb   : > { %v3939_v22 = vmul.f32 0.0012755102, %v3719_v4 }
 0x4fc   : > { %v3973_v59 = vadd.f32 1e-05, %v3945_v5  ;;  %v3931_v61 = vadd.f32 %v3930_v32, %v3682_v36  ;;  %v3932_v5 = vsel %vm3016_vm2, %v3683_v47, 0.0 }
 0x4fd   : > { %v3967_v19 = vadd.f32 1e-05, %v3939_v22  ;;  %v3943_v22 = vmul.f32 0.0012755102, %v3755_v21 }
 0x4fe   : > { %5519 = vrsqrt.f32 %v3973_v59  ;;  %v3933_v48 = vadd.f32 %v3932_v5, %v3931_v61  ;;  %v3728_v59 = vpop.xlane.xlu0 %3727  ;;  %v4021_v5 = vld [vmem:[%s8743_s0 + $0x8] sm:$0xff] }
 0x4ff   : > { %5521 = vrsqrt.f32 %v3965_v0  ;;  %v3940_v32 = vmul.f32 0.0012755102, %v3728_v59 }
 0x501   : > { %v3968_v42 = vadd.f32 1e-05, %v3940_v32  ;;  %v3971_v32 = vadd.f32 1e-05, %v3943_v22  ;;  %v4024_v22 = vld [vmem:[%s8743_s0 + $0x20] sm:$0xff] }
 0x502   : > { %v3746_v47 = vpop.xlane.xlu0 %3745 }
 0x503   : > { %v3942_v0 = vmul.f32 0.0012755102, %v3746_v47 }
 0x505   : > { %v3791_v63 = vpop.xlane.xlu1 %3790 }
 0x506   : > { %v3947_v53 = vmul.f32 0.0012755102, %v3791_v63  ;;  %v3941_v63 = vmul.f32 0.0012755102, %v3737_v9 }
 0x508   : > { %v3975_v6 = vadd.f32 1e-05, %v3947_v53  ;;  %v3969_v53 = vadd.f32 1e-05, %v3941_v63 }
 0x50a   : > { %5523 = vrsqrt.f32 %v3975_v6 }
 0x50b   : > { %v5520_v56 = vpop.eup %5519  ;;  %5525 = vrsqrt.f32 %v3966_v30 }
 0x50c   : > { %3934 = vadd.xlane.f32.xlu1 %v3933_v48  ;;  %v4057_v45 = vmul.f32 %v5520_v56, %v4029_v35  ;;  %5527 = vrsqrt.f32 %v3967_v19  ;;  %v5522_v38 = vpop.eup %5521  ;;  %v4031_v48 = vld [vmem:[%s8743_s0 + $0x58] sm:$0xff]  ;;  %v3970_v56 = vadd.f32 1e-05, %v3942_v0  ;;  %v3764_v19 = vpop.xlane.xlu0 %3763  ;;  %v4022_v35 = vld [vmem:[%s8743_s0 + $0x10] sm:$0xff] }
 0x50d   : > { %5529 = vrsqrt.f32 %v3968_v42  ;;  %v4049_v6 = vmul.f32 %v5522_v38, %v4021_v5  ;;  %v3944_v42 = vmul.f32 0.0012755102, %v3764_v19 }
 0x50e   : > { %4123 = vperm.xlu0 %5458, %v4057_v45  }
 0x510   : > { %v3809_v36 = vpop.xlane.xlu1 %3808  ;;  %v3782_v63 = vpop.xlane.xlu0 %3781 }
 0x511   : > { %v3949_v61 = vmul.f32 0.0012755102, %v3809_v36  ;;  %v3946_v0 = vmul.f32 0.0012755102, %v3782_v63 }
 0x513   : > { %v3977_v4 = vadd.f32 1e-05, %v3949_v61  ;;  %v4023_v61 = vld [vmem:[%s8743_s0 + $0x18] sm:$0xff] }
 0x514   : > { %v3800_v38 = vpop.xlane.xlu0 %3799 }
 0x515   : > { %5531 = vrsqrt.f32 %v3977_v4 }
 0x516   : > { %5533 = vrsqrt.f32 %v3969_v53  ;;  %v3972_v53 = vadd.f32 1e-05, %v3944_v42 }
 0x517   : > { %v5524_v30 = vpop.eup %5523  ;;  %5535 = vrsqrt.f32 %v3970_v56 }
 0x518   : > { %v4059_v9 = vmul.f32 %v5524_v30, %v4031_v48  ;;  %v5526_v59 = vpop.eup %5525  ;;  %5537 = vrsqrt.f32 %v3971_v32  ;;  %v4033_v48 = vld [vmem:[%s8743_s0 + $0x68] sm:$0xff] }
 0x519   : > { %v4050_v36 = vmul.f32 %v5526_v59, %v4022_v35  ;;  %v5528_v21 = vpop.eup %5527  ;;  %v3818_v59 = vpop.xlane.xlu0 %3817  ;;  %v4025_v32 = vld [vmem:[%s8743_s0 + $0x28] sm:$0xff] }
 0x51a   : > { %4133 = vperm.xlu0 %5458, %v4059_v9   ;;  %v4051_v5 = vmul.f32 %v5528_v21, %v4023_v61  ;;  %v5530_v30 = vpop.eup %5529  ;;  %v3948_v9 = vmul.f32 0.0012755102, %v3800_v38  ;;  %v4035_v38 = vld [vmem:[%s8743_s0 + $0x78] sm:$0xff] }
 0x51b   : > { %v3827_v45 = vpop.xlane.xlu1 %3826  ;;  %v4052_v35 = vmul.f32 %v5530_v30, %v4024_v22 }
 0x51c   : > { %v3951_v47 = vmul.f32 0.0012755102, %v3827_v45 }
 0x51d   : > { %4083 = vperm.xlu1 %5457, %v4049_v6   ;;  %v3974_v6 = vadd.f32 1e-05, %v3946_v0 }
 0x51e   : > { %v3979_v4 = vadd.f32 1e-05, %v3951_v47  ;;  %v3950_v47 = vmul.f32 0.0012755102, %v3818_v59 }
 0x520   : > { %5539 = vrsqrt.f32 %v3979_v4 }
 0x521   : > { %4088 = vperm.xlu1 %5457, %v4050_v36   ;;  %5541 = vrsqrt.f32 %v3972_v53  ;;  %v3976_v36 = vadd.f32 1e-05, %v3948_v9  ;;  %v4026_v53 = vld [vmem:[%s8743_s0 + $0x30] sm:$0xff] }
 0x522   : > { %v5532_v56 = vpop.eup %5531  ;;  %5543 = vrsqrt.f32 %v3974_v6  ;;  %v3836_v61 = vpop.xlane.xlu0 %3835  ;;  %v4027_v6 = vld [vmem:[%s8743_s0 + $0x38] sm:$0xff] }
 0x523   : > { %v4061_v19 = vmul.f32 %v5532_v56, %v4033_v48  ;;  %v5534_v45 = vpop.eup %5533  ;;  %v3978_v48 = vadd.f32 1e-05, %v3950_v47  ;;  %v3952_v30 = vmul.f32 0.0012755102, %v3836_v61 }
 0x524   : > { %v4053_v21 = vmul.f32 %v5534_v45, %v4025_v32  ;;  %v5536_v4 = vpop.eup %5535 }
 0x525   : > { %4093 = vperm.xlu1 %5457, %v4051_v5   ;;  %4143 = vperm.xlu0 %5458, %v4061_v19   ;;  %v5538_v5 = vpop.eup %5537  ;;  %v4054_v22 = vmul.f32 %v5536_v4, %v4026_v53  ;;  %v4030_v53 = vld [vmem:[%s8743_s0 + $0x50] sm:$0xff] }
 0x526   : > { %v4055_v45 = vmul.f32 %v5538_v5, %v4027_v6 }
 0x527   : > { %v3845_v42 = vpop.xlane.xlu1 %3844 }
 0x528   : > { %v3953_v63 = vmul.f32 0.0012755102, %v3845_v42 }
 0x529   : > { %4098 = vperm.xlu1 %5457, %v4052_v35   ;;  %v3980_v35 = vadd.f32 1e-05, %v3952_v30 }
 0x52a   : > { %v3981_v0 = vadd.f32 1e-05, %v3953_v63  ;;  %v4028_v63 = vld [vmem:[%s8743_s0 + $0x40] sm:$0xff] }
 0x52c   : > { %5545 = vrsqrt.f32 %v3981_v0  ;;  %v4037_v0 = vld [vmem:[%s8743_s0 + $0x88] sm:$0xff] }
 0x52d   : > { %4103 = vperm.xlu1 %5457, %v4053_v21   ;;  %5547 = vrsqrt.f32 %v3976_v36  ;;  %v3854_v56 = vpop.xlane.xlu0 %3853  ;;  %v5540_v19 = vpop.eup %5539 }
 0x52e   : > { %v3954_v9 = vmul.f32 0.0012755102, %v3854_v56  ;;  %v4063_v59 = vmul.f32 %v5540_v19, %v4035_v38  ;;  %5549 = vrsqrt.f32 %v3978_v48  ;;  %v5542_v32 = vpop.eup %5541  ;;  %v4032_v56 = vld [vmem:[%s8743_s0 + $0x60] sm:$0xff] }
 0x52f   : > { %5551 = vrsqrt.f32 %v3980_v35  ;;  %v4056_v21 = vmul.f32 %v5542_v32, %v4028_v63  ;;  %v5544_v4 = vpop.eup %5543  ;;  %v4034_v32 = vld [vmem:[%s8743_s0 + $0x70] sm:$0xff] }
 0x530   : > { %4153 = vperm.xlu0 %5458, %v4063_v59   ;;  %v3982_v42 = vadd.f32 1e-05, %v3954_v9  ;;  %v4058_v48 = vmul.f32 %v5544_v4, %v4030_v53 }
 0x531   : > { %4108 = vperm.xlu1 %5457, %v4054_v22  }
 0x532   : > { %v3863_v36 = vpop.xlane.xlu1 %3862  ;;  %5553 = vrsqrt.f32 %v3982_v42 }
 0x533   : > { %v3955_v47 = vmul.f32 0.0012755102, %v3863_v36 }
 0x535   : > { %4113 = vperm.xlu1 %5457, %v4055_v45   ;;  %v3983_v61 = vadd.f32 1e-05, %v3955_v47 }
 0x537   : > { %5555 = vrsqrt.f32 %v3983_v61  ;;  %v4039_v61 = vld [vmem:[%s8743_s0 + $0x98] sm:$0xff] }
 0x539   : > { %4118 = vperm.xlu1 %5457, %v4056_v21   ;;  %v3872_v38 = vpop.xlane.xlu0 %3871  ;;  %v5546_v5 = vpop.eup %5545  ;;  %v4036_v21 = vld [vmem:[%s8743_s0 + $0x80] sm:$0xff] }
 0x53a   : > { %v3956_v30 = vmul.f32 0.0012755102, %v3872_v38  ;;  %v5548_v22 = vpop.eup %5547  ;;  %v4065_v19 = vmul.f32 %v5546_v5, %v4037_v0  ;;  %v4038_v38 = vld [vmem:[%s8743_s0 + $0x90] sm:$0xff] }
 0x53b   : > { %v4060_v9 = vmul.f32 %v5548_v22, %v4032_v56  ;;  %v5550_v35 = vpop.eup %5549 }
 0x53c   : > { %v3984_v6 = vadd.f32 1e-05, %v3956_v30  ;;  %4163 = vperm.xlu0 %5458, %v4065_v19   ;;  %v4062_v63 = vmul.f32 %v5550_v35, %v4034_v32  ;;  %v5552_v36 = vpop.eup %5551  ;;  %v4040_v19 = vld [vmem:[%s8743_s0 + $0xa0] sm:$0xff]  ;;  %v4041_v32 = vld [vmem:[%s8743_s0 + $0xa8] sm:$0xff] }
 0x53d   : > { %4128 = vperm.xlu1 %5457, %v4058_v48   ;;  %v4064_v48 = vmul.f32 %v5552_v36, %v4036_v21 }
 0x53e   : > { %5557 = vrsqrt.f32 %v3984_v6  ;;  %v3881_v59 = vpop.xlane.xlu1 %3880 }
 0x53f   : > { %v3957_v45 = vmul.f32 0.0012755102, %v3881_v59  ;;  %v5554_v4 = vpop.eup %5553 }
 0x540   : > { %v4066_v22 = vmul.f32 %v5554_v4, %v4038_v38 }
 0x541   : > { %4138 = vperm.xlu1 %5457, %v4060_v9   ;;  %v3985_v42 = vadd.f32 1e-05, %v3957_v45 }
 0x543   : > { %5559 = vrsqrt.f32 %v3985_v42  ;;  %v3890_v47 = vpop.xlane.xlu0 %3889 }
 0x544   : > { %v3958_v53 = vmul.f32 0.0012755102, %v3890_v47  ;;  %v5556_v0 = vpop.eup %5555 }
 0x545   : > { %4148 = vperm.xlu1 %5457, %v4062_v63   ;;  %v4067_v30 = vmul.f32 %v5556_v0, %v4039_v61  ;;  %v4042_v61 = vld [vmem:[%s8743_s0 + $0xb0] sm:$0xff] }
 0x546   : > { %v3986_v5 = vadd.f32 1e-05, %v3958_v53 }
 0x547   : > { %4173 = vperm.xlu0 %5458, %v4067_v30  }
 0x548   : > { %5561 = vrsqrt.f32 %v3986_v5 }
 0x549   : > { %4158 = vperm.xlu1 %5457, %v4064_v48   ;;  %v3899_v56 = vpop.xlane.xlu1 %3898  ;;  %v4043_v48 = vld [vmem:[%s8743_s0 + $0xb8] sm:$0xff] }
 0x54a   : > { %v3959_v6 = vmul.f32 0.0012755102, %v3899_v56 }
 0x54b   : > { %v5558_v9 = vpop.eup %5557 }
 0x54c   : > { %v3987_v59 = vadd.f32 1e-05, %v3959_v6  ;;  %v4068_v35 = vmul.f32 %v5558_v9, %v4040_v19  ;;  %v4044_v6 = vld [vmem:[%s8743_s0 + $0xc0] sm:$0xff] }
 0x54d   : > { %4168 = vperm.xlu1 %5457, %v4066_v22  }
 0x54e   : > { %5563 = vrsqrt.f32 %v3987_v59 }
 0x54f   : > { %v3908_v45 = vpop.xlane.xlu0 %3907 }
 0x550   : > { %v3960_v42 = vmul.f32 0.0012755102, %v3908_v45  ;;  %v5560_v63 = vpop.eup %5559  ;;  %v4045_v45 = vld [vmem:[%s8743_s0 + $0xc8] sm:$0xff] }
 0x551   : > { %4178 = vperm.xlu1 %5457, %v4068_v35   ;;  %v4069_v47 = vmul.f32 %v5560_v63, %v4041_v32 }
 0x552   : > { %v3988_v36 = vadd.f32 1e-05, %v3960_v42 }
 0x553   : > { %4183 = vperm.xlu0 %5458, %v4069_v47   ;;  %v4046_v47 = vld [vmem:[%s8743_s0 + $0xd0] sm:$0xff] }
 0x554   : > { %5565 = vrsqrt.f32 %v3988_v36  ;;  %v3917_v21 = vpop.xlane.xlu1 %3916 }
 0x555   : > { %v3961_v4 = vmul.f32 0.0012755102, %v3917_v21  ;;  %v5562_v53 = vpop.eup %5561 }
 0x556   : > { %v4070_v38 = vmul.f32 %v5562_v53, %v4042_v61  ;;  %v4438_v53 = vld [vmem:[%s7026_s14 + $0xd0] sm:$0xff] }
 0x557   : > { %v3989_v0 = vadd.f32 1e-05, %v3961_v4 }
 0x558   : > { %4188 = vperm.xlu1 %5457, %v4070_v38  }
 0x559   : > { %5567 = vrsqrt.f32 %v3989_v0  ;;  %v3926_v5 = vpop.xlane.xlu0 %3925 }
 0x55a   : > { %v3962_v30 = vmul.f32 0.0012755102, %v3926_v5  ;;  %v10638_v5 = vld [vmem:[#allocation31_spill] sm:$0xff] }
 0x55b   : > { %v5564_v22 = vpop.eup %5563 }
 0x55c   : > { %v3990_v56 = vadd.f32 1e-05, %v3962_v30  ;;  %v4071_v19 = vmul.f32 %v5564_v22, %v4043_v48  ;;  %v10639_v30 = vld [vmem:[#allocation33_spill] sm:$0xff] }
 0x55e   : > { %5569 = vrsqrt.f32 %v3990_v56  ;;  %4193 = vperm.xlu0 %5458, %v4071_v19   ;;  %v10640_v56 = vld [vmem:[#allocation94_spill] sm:$0xff] }
 0x561   : > { %v5566_v9 = vpop.eup %5565  ;;  %v8801_v59 = vpop.permute.xlu0 %4527 }
 0x562   : > { %v4072_v35 = vmul.f32 %v5566_v9, %v4044_v6  ;;  %v10641_v6 = vld [vmem:[#allocation95_spill] sm:$0xff] }
 0x564   : > { %4198 = vperm.xlu1 %5457, %v4072_v35   ;;  %v10642_v35 = vld [vmem:[#allocation132_spill] sm:$0xff] }
 0x565   : > { %v8804_v42 = vpop.permute.xlu0 %4537 }
 0x566   : > { %v5568_v32 = vpop.eup %5567 }
 0x567   : > { %v4073_v63 = vmul.f32 %v5568_v32, %v4045_v45  ;;  %v10643_v32 = vld [vmem:[#allocation189_spill] sm:$0xff] }
 0x569   : > { %4203 = vperm.xlu0 %5458, %v4073_v63   ;;  %v8806_v36 = vpop.permute.xlu0 %4547 }
 0x56b   : > { %v5570_v21 = vpop.eup %5569 }
 0x56c   : > { %v4074_v61 = vmul.f32 %v5570_v21, %v4046_v47  ;;  %v10644_v47 = vld [vmem:[#allocation160_spill] sm:$0xff] }
 0x56d   : > { %v8809_v4 = vpop.permute.xlu0 %4557 }
 0x56e   : > { %4208 = vperm.xlu1 %5457, %v4074_v61   ;;  %v10645_v61 = vld [vmem:[#allocation173_spill] sm:$0xff] }
 0x571   : > { %v8812_v0 = vpop.permute.xlu0 %4567 }
 0x572   : > { %10637 = vst [vmem:[#allocation92_spill] sm:$0xff] %v8812_v0  ;;  %4572 = vperm.xlu1 %5457, %v4438_v53  }
 0x575   : > { %v4079_v38 = vpop.permute.xlu0 %4078 }
 0x576   : > { %v4216_v48 = vmul.f32 %v4079_v38, %v10638_v5  ;;  %v4217_v22 = vmul.f32 %v4079_v38, %v10639_v30  ;;  %v4218_v19 = vmul.f32 %v4079_v38, %v10640_v56  ;;  %v4219_v9 = vmul.f32 %v4079_v38, %v10641_v6 }
 0x577   : > { %v4220_v45 = vmul.f32 %v4079_v38, %v10642_v35  ;;  %v4221_v63 = vmul.f32 %v4079_v38, %v10643_v32  ;;  %v4222_v21 = vmul.f32 %v4079_v38, %v10644_v47  ;;  %v8839_v38 = vpop.permute.xlu1 %4532  ;;  %v10646_v47 = vld [vmem:[#allocation181_spill] sm:$0xff] }
 0x578   : > { %v4580_v57 = vadd.f32 %v10645_v61, %v4216_v48  ;;  %v4581_v53 = vadd.f32 %v10645_v61, %v4217_v22  ;;  %v4582_v0 = vadd.f32 %v10645_v61, %v4218_v19  ;;  %v4583_v5 = vadd.f32 %v10645_v61, %v4219_v9 }
 0x579   : > { %v4584_v30 = vadd.f32 %v10645_v61, %v4220_v45  ;;  %v4585_v56 = vadd.f32 %v10645_v61, %v4221_v63  ;;  %v4586_v6 = vadd.f32 %v10645_v61, %v4222_v21 }
 0x57a   : > { %4776 = vst [vmem:[%s8829_s13] sm:$0xff] %v4580_v57  ;;  %4777 = vst [vmem:[%s8829_s13 + $0x8] sm:$0xff] %v4581_v53 }
 0x57b   : > { %4778 = vst [vmem:[%s8829_s13 + $0x10] sm:$0xff] %v4582_v0  ;;  %4779 = vst [vmem:[%s8829_s13 + $0x18] sm:$0xff] %v4583_v5  ;;  %v8841_v48 = vpop.permute.xlu1 %4542 }
 0x57c   : > { %4780 = vst [vmem:[%s8829_s13 + $0x20] sm:$0xff] %v4584_v30  ;;  %4781 = vst [vmem:[%s8829_s13 + $0x28] sm:$0xff] %v4585_v56 }
 0x57d   : > { %4782 = vst.msk [vmem:[%s8829_s13 + $0x30] sm:$0xff] %vm3016_vm2, %v4586_v6 }
 0x57f   : > { %v8843_v22 = vpop.permute.xlu1 %4552 }
 0x583   : > { %v8856_v61 = vpop.permute.xlu1 %4562 }
 0x589   : > { %v4124_v19 = vpop.permute.xlu0 %4123 }
 0x58a   : > { %v4279_v9 = vmul.f32 %v4124_v19, %v7908_v25  ;;  %v4280_v57 = vmul.f32 %v4124_v19, %v7912_v31  ;;  %v4281_v0 = vmul.f32 %v4124_v19, %v7921_v54  ;;  %v4282_v35 = vmul.f32 %v4124_v19, %v7929_v28 }
 0x58b   : > { %v4283_v45 = vmul.f32 %v4124_v19, %v7933_v60  ;;  %v4284_v32 = vmul.f32 %v4124_v19, %v7956_v58  ;;  %v4285_v63 = vmul.f32 %v4124_v19, %v7943_v33 }
 0x58c   : > { %v4643_v25 = vadd.f32 %v10646_v47, %v4279_v9  ;;  %v4644_v21 = vadd.f32 %v10646_v47, %v4280_v57  ;;  %v4645_v31 = vadd.f32 %v10646_v47, %v4281_v0  ;;  %v4646_v54 = vadd.f32 %v10646_v47, %v4282_v35  ;;  %v10647_v0 = vld [vmem:[#allocation32_spill] sm:$0xff] }
 0x58d   : > { %v4647_v28 = vadd.f32 %v10646_v47, %v4283_v45  ;;  %v4648_v60 = vadd.f32 %v10646_v47, %v4284_v32  ;;  %v4649_v53 = vadd.f32 %v10646_v47, %v4285_v63  ;;  %v10648_v45 = vld [vmem:[#allocation35_spill] sm:$0xff]  ;;  %v10649_v63 = vld [vmem:[#allocation96_spill] sm:$0xff] }
 0x58e   : > { %4839 = vst [vmem:[%s8829_s13 + $0x1f8] sm:$0xff] %v4643_v25  ;;  %4840 = vst [vmem:[%s8829_s13 + $0x200] sm:$0xff] %v4644_v21  ;;  %v10650_v25 = vld [vmem:[#allocation97_spill] sm:$0xff] }
 0x58f   : > { %4841 = vst [vmem:[%s8829_s13 + $0x208] sm:$0xff] %v4645_v31  ;;  %4842 = vst [vmem:[%s8829_s13 + $0x210] sm:$0xff] %v4646_v54  ;;  %v10652_v31 = vld [vmem:[#allocation191_spill] sm:$0xff]  ;;  %v10653_v54 = vld [vmem:[#allocation190_spill] sm:$0xff] }
 0x590   : > { %4843 = vst [vmem:[%s8829_s13 + $0x218] sm:$0xff] %v4647_v28  ;;  %4844 = vst [vmem:[%s8829_s13 + $0x220] sm:$0xff] %v4648_v60 }
 0x591   : > { %4845 = vst.msk [vmem:[%s8829_s13 + $0x228] sm:$0xff] %vm3016_vm2, %v4649_v53 }
 0x595   : > { %v3935_v33 = vpop.xlane.xlu1 %3934  ;;  %v4134_v30 = vpop.permute.xlu0 %4133 }
 0x596   : > { %v3963_v58 = vmul.f32 0.0012755102, %v3935_v33  ;;  %v4293_v6 = vmul.f32 %v4134_v30, %v8000_v10  ;;  %v8871_v19 = vmul.f32 %v4134_v30, %v8007_v16  ;;  %v8874_v9 = vmul.f32 %v4134_v30, %v8011_v39  ;;  %v10651_v16 = vld [vmem:[#allocation133_spill] sm:$0xff] }
 0x597   : > { %v8877_v57 = vmul.f32 %v4134_v30, %v8019_v18  ;;  %v10654_v18 = vld [vmem:[#allocation172_spill] sm:$0xff] }
 0x598   : > { %v3991_v5 = vadd.f32 1e-05, %v3963_v58  ;;  %v8890_v58 = vmul.f32 %v4134_v30, %v8023_v46 }
 0x599   : > { %v4084_v56 = vpop.permute.xlu1 %4083 }
 0x59a   : > { %5571 = vrsqrt.f32 %v3991_v5  ;;  %v4223_v35 = vmul.f32 %v4084_v56, %v10647_v0  ;;  %v4224_v32 = vmul.f32 %v4084_v56, %v10648_v45  ;;  %v4225_v47 = vmul.f32 %v4084_v56, %v10649_v63 }
 0x59b   : > { %v4226_v10 = vmul.f32 %v4084_v56, %v10650_v25  ;;  %v4227_v21 = vmul.f32 %v4084_v56, %v10651_v16  ;;  %v4228_v39 = vmul.f32 %v4084_v56, %v10652_v31  ;;  %v4229_v28 = vmul.f32 %v4084_v56, %v10653_v54 }
 0x59c   : > { %v4587_v60 = vadd.f32 %v10654_v18, %v4223_v35  ;;  %v4588_v53 = vadd.f32 %v10654_v18, %v4224_v32  ;;  %v4589_v33 = vadd.f32 %v10654_v18, %v4225_v47  ;;  %v10655_v32 = vld [vmem:[#allocation34_spill] sm:$0xff]  ;;  %v10656_v47 = vld [vmem:[#allocation37_spill] sm:$0xff]  ;;  %v8912_v54 = vmul.f32 %v4134_v30, %v8042_v13 }
 0x59d   : > { %v4590_v5 = vadd.f32 %v10654_v18, %v4226_v10  ;;  %v4591_v0 = vadd.f32 %v10654_v18, %v4227_v21  ;;  %v4592_v45 = vadd.f32 %v10654_v18, %v4228_v39  ;;  %v4593_v56 = vadd.f32 %v10654_v18, %v4229_v28  ;;  %v4089_v35 = vpop.permute.xlu1 %4088  ;;  %v10657_v21 = vld [vmem:[#allocation98_spill] sm:$0xff] }
 0x59e   : > { %4783 = vst [vmem:[%s8829_s13 + $0x38] sm:$0xff] %v4587_v60  ;;  %4784 = vst [vmem:[%s8829_s13 + $0x40] sm:$0xff] %v4588_v53  ;;  %v4230_v63 = vmul.f32 %v4089_v35, %v10655_v32  ;;  %v4231_v25 = vmul.f32 %v4089_v35, %v10656_v47  ;;  %v4232_v46 = vmul.f32 %v4089_v35, %v7648_v51  ;;  %v10658_v51 = vld [vmem:[#allocation176_spill] sm:$0xff]  ;;  %v10661_v47 = vld [vmem:[#allocation183_spill] sm:$0xff] }
 0x59f   : > { %4785 = vst [vmem:[%s8829_s13 + $0x48] sm:$0xff] %v4589_v33  ;;  %v4233_v16 = vmul.f32 %v4089_v35, %v7655_v29  ;;  %4786 = vst [vmem:[%s8829_s13 + $0x50] sm:$0xff] %v4590_v5  ;;  %v4234_v10 = vmul.f32 %v4089_v35, %v7664_v44  ;;  %v4235_v31 = vmul.f32 %v4089_v35, %v10657_v21  ;;  %v10659_v5 = vld [vmem:[#allocation99_spill] sm:$0xff] }
 0x5a0   : > { %4787 = vst [vmem:[%s8829_s13 + $0x58] sm:$0xff] %v4591_v0  ;;  %4788 = vst [vmem:[%s8829_s13 + $0x60] sm:$0xff] %v4592_v45  ;;  %v4236_v39 = vmul.f32 %v4089_v35, %v7670_v50  ;;  %v4594_v29 = vadd.f32 %v10658_v51, %v4230_v63  ;;  %v4595_v28 = vadd.f32 %v10658_v51, %v4231_v25  ;;  %v10660_v45 = vld [vmem:[#allocation43_spill] sm:$0xff] }
 0x5a1   : > { %4789 = vst.msk [vmem:[%s8829_s13 + $0x68] sm:$0xff] %vm3016_vm2, %v4593_v56  ;;  %v4596_v18 = vadd.f32 %v10658_v51, %v4232_v46  ;;  %v4597_v60 = vadd.f32 %v10658_v51, %v4233_v16  ;;  %v4598_v44 = vadd.f32 %v10658_v51, %v4234_v10  ;;  %v4599_v53 = vadd.f32 %v10658_v51, %v4235_v31  ;;  %v4094_v33 = vpop.permute.xlu1 %4093  ;;  %v10663_v31 = vld [vmem:[#allocation36_spill] sm:$0xff] }
 0x5a2   : > { %v4600_v50 = vadd.f32 %v10658_v51, %v4236_v39  ;;  %v8922_v13 = vmul.f32 %v4134_v30, %v8033_v52  ;;  %4790 = vst [vmem:[%s8829_s13 + $0x70] sm:$0xff] %v4594_v29  ;;  %4791 = vst [vmem:[%s8829_s13 + $0x78] sm:$0xff] %v4595_v28  ;;  %v4237_v0 = vmul.f32 %v4094_v33, %v10659_v5  ;;  %v10664_v51 = vld [vmem:[#allocation39_spill] sm:$0xff]  ;;  %v10665_v28 = vld [vmem:[#allocation100_spill] sm:$0xff] }
 0x5a3   : > { %4792 = vst [vmem:[%s8829_s13 + $0x80] sm:$0xff] %v4596_v18  ;;  %4793 = vst [vmem:[%s8829_s13 + $0x88] sm:$0xff] %v4597_v60  ;;  %v4238_v56 = vmul.f32 %v4094_v33, %v10660_v45  ;;  %v4239_v35 = vmul.f32 %v4094_v33, %v7687_v34  ;;  %v4240_v32 = vmul.f32 %v4094_v33, %v7696_v62  ;;  %v10662_v34 = vld [vmem:[#allocation174_spill] sm:$0xff]  ;;  %v10667_v5 = vld [vmem:[#allocation101_spill] sm:$0xff] }
 0x5a4   : > { %4794 = vst [vmem:[%s8829_s13 + $0x90] sm:$0xff] %v4598_v44  ;;  %4795 = vst [vmem:[%s8829_s13 + $0x98] sm:$0xff] %v4599_v53  ;;  %v4241_v52 = vmul.f32 %v4094_v33, %v7704_v14  ;;  %v4242_v30 = vmul.f32 %v4094_v33, %v7707_v3  ;;  %v4243_v63 = vmul.f32 %v4094_v33, %v7699_v15  ;;  %v4047_v44 = vld [vmem:[%s8743_s0 + $0xd8] sm:$0xff]  ;;  %v10668_v45 = vld [vmem:[#allocation178_spill] sm:$0xff] }
 0x5a5   : > { %4796 = vst.msk [vmem:[%s8829_s13 + $0xa0] sm:$0xff] %vm3016_vm2, %v4600_v50  ;;  %v4657_v25 = vadd.f32 %v10661_v47, %v4293_v6  ;;  %v4601_v46 = vadd.f32 %v10662_v34, %v4237_v0  ;;  %v4602_v62 = vadd.f32 %v10662_v34, %v4238_v56  ;;  %v4603_v16 = vadd.f32 %v10662_v34, %v4239_v35  ;;  %v4099_v15 = vpop.permute.xlu1 %4098  ;;  %v10666_v50 = vld [vmem:[#allocation42_spill] sm:$0xff] }
 0x5a6   : > { %v4604_v10 = vadd.f32 %v10662_v34, %v4240_v32  ;;  %v4605_v21 = vadd.f32 %v10662_v34, %v4241_v52  ;;  %v4606_v14 = vadd.f32 %v10662_v34, %v4242_v30  ;;  %v4607_v3 = vadd.f32 %v10662_v34, %v4243_v63  ;;  %v10669_v34 = vld [vmem:[#allocation38_spill] sm:$0xff] }
 0x5a7   : > { %v4658_v6 = vadd.f32 %v10661_v47, %v8871_v19  ;;  %4853 = vst [vmem:[%s8829_s13 + $0x268] sm:$0xff] %v4657_v25  ;;  %4797 = vst [vmem:[%s8829_s13 + $0xa8] sm:$0xff] %v4601_v46  ;;  %v4244_v39 = vmul.f32 %v4099_v15, %v10663_v31  ;;  %v4245_v29 = vmul.f32 %v4099_v15, %v10664_v51  ;;  %v5572_v53 = vpop.eup %5571 }
 0x5a8   : > { %4798 = vst [vmem:[%s8829_s13 + $0xb0] sm:$0xff] %v4602_v62  ;;  %4799 = vst [vmem:[%s8829_s13 + $0xb8] sm:$0xff] %v4603_v16  ;;  %v4246_v18 = vmul.f32 %v4099_v15, %v10665_v28  ;;  %v4247_v60 = vmul.f32 %v4099_v15, %v7726_v23  ;;  %v4248_v19 = vmul.f32 %v4099_v15, %v7740_v43 }
 0x5a9   : > { %4800 = vst [vmem:[%s8829_s13 + $0xc0] sm:$0xff] %v4604_v10  ;;  %4801 = vst [vmem:[%s8829_s13 + $0xc8] sm:$0xff] %v4605_v21  ;;  %v4249_v33 = vmul.f32 %v4099_v15, %v10666_v50  ;;  %v4250_v0 = vmul.f32 %v4099_v15, %v10667_v5  ;;  %v4659_v23 = vadd.f32 %v10661_v47, %v8874_v9  ;;  %v4104_v25 = vpop.permute.xlu1 %4103  ;;  %v10673_v50 = vld [vmem:[#allocation45_spill] sm:$0xff] }
 0x5aa   : > { %4802 = vst [vmem:[%s8829_s13 + $0xd0] sm:$0xff] %v4606_v14  ;;  %4803 = vst.msk [vmem:[%s8829_s13 + $0xd8] sm:$0xff] %vm3016_vm2, %v4607_v3  ;;  %v4608_v56 = vadd.f32 %v10668_v45, %v4244_v39  ;;  %v4609_v35 = vadd.f32 %v10668_v45, %v4245_v29  ;;  %v4610_v32 = vadd.f32 %v10668_v45, %v4246_v18  ;;  %v10670_v3 = vld [vmem:[#allocation41_spill] sm:$0xff]  ;;  %v4439_v39 = vld [vmem:[%s7026_s14 + $0xd8] sm:$0xff]  ;;  %v9005_v18 = vpop.permute.xlu0 %4143  ;;  %s5711_s14 = scalar_lea.vmem %s5710_s20, 50176 }
 0x5ab   : > { %4854 = vst [vmem:[%s8829_s13 + $0x270] sm:$0xff] %v4658_v6  ;;  %v4611_v43 = vadd.f32 %v10668_v45, %v4247_v60  ;;  %v4612_v52 = vadd.f32 %v10668_v45, %v4248_v19  ;;  %v4613_v30 = vadd.f32 %v10668_v45, %v4249_v33  ;;  %v4614_v63 = vadd.f32 %v10668_v45, %v4250_v0  ;;  %v10674_v33 = vld [vmem:[#allocation40_spill] sm:$0xff]  ;;  %p5713_p6 = scmp.lt.s32.totalorder %s5711_s14, %s5705_s19 }
 0x5ac   : > { %v4075_v9 = vmul.f32 %v5572_v53, %v4047_v44  ;;  %4855 = vst [vmem:[%s8829_s13 + $0x278] sm:$0xff] %v4659_v23  ;;  %4804 = vst [vmem:[%s8829_s13 + $0xe0] sm:$0xff] %v4608_v56  ;;  %v4251_v46 = vmul.f32 %v4104_v25, %v10669_v34  ;;  %v4252_v62 = vmul.f32 %v4104_v25, %v7753_v7  ;;  %v10672_v53 = vld [vmem:[#allocation102_spill] sm:$0xff] }
 0x5ad   : > { %4805 = vst [vmem:[%s8829_s13 + $0xe8] sm:$0xff] %v4609_v35  ;;  %4806 = vst [vmem:[%s8829_s13 + $0xf0] sm:$0xff] %v4610_v32  ;;  %v4253_v16 = vmul.f32 %v4104_v25, %v7759_v37  ;;  %v4254_v10 = vmul.f32 %v4104_v25, %v7771_v27  ;;  %v4255_v21 = vmul.f32 %v4104_v25, %v7777_v24  ;;  %v10671_v37 = vld [vmem:[#allocation177_spill] sm:$0xff]  ;;  %v4109_v28 = vpop.permute.xlu1 %4108  ;;  %v10679_v34 = vld [vmem:[#allocation54_spill] sm:$0xff]  ;;  %p5714_p13 = por %p5713_p6, %p5712_p5 }
 0x5ae   : > { %4807 = vst [vmem:[%s8829_s13 + $0xf8] sm:$0xff] %v4611_v43  ;;  %4808 = vst [vmem:[%s8829_s13 + $0x100] sm:$0xff] %v4612_v52  ;;  %v4256_v14 = vmul.f32 %v4104_v25, %v7785_v55  ;;  %v4257_v15 = vmul.f32 %v4104_v25, %v10670_v3  ;;  %4213 = vperm.xlu0 %5458, %v4075_v9   ;;  %v4660_v7 = vadd.f32 %v10661_v47, %v8877_v57  ;;  %v10676_v52 = vld [vmem:[#allocation52_spill] sm:$0xff]  ;;  %v10678_v9 = vld [vmem:[#allocation53_spill] sm:$0xff] }
 0x5af   : > { %4809 = vst [vmem:[%s8829_s13 + $0x108] sm:$0xff] %v4613_v30  ;;  %4810 = vst.msk [vmem:[%s8829_s13 + $0x110] sm:$0xff] %vm3016_vm2, %v4614_v63  ;;  %v4615_v27 = vadd.f32 %v10671_v37, %v4251_v46  ;;  %v4616_v6 = vadd.f32 %v10671_v37, %v4252_v62  ;;  %v4617_v31 = vadd.f32 %v10671_v37, %v4253_v16  ;;  %v10677_v63 = vld [vmem:[#allocation103_spill] sm:$0xff]  ;;  %p5715_p2 = pnand %p5714_p13, %p5708_p0 }
 0x5b0   : > { %v4618_v24 = vadd.f32 %v10671_v37, %v4254_v10  ;;  %v4619_v55 = vadd.f32 %v10671_v37, %v4255_v21  ;;  %v4620_v51 = vadd.f32 %v10671_v37, %v4256_v14  ;;  %v4621_v29 = vadd.f32 %v10671_v37, %v4257_v15  ;;  %4856 = vst [vmem:[%s8829_s13 + $0x280] sm:$0xff] %v4660_v7  ;;  %v10680_v62 = vld [vmem:[#allocation19_spill] sm:$0xff]  ;;  %v10681_v10 = vld [vmem:[#allocation57_spill] sm:$0xff] }
 0x5b1   : > { %v4661_v57 = vadd.f32 %v10661_v47, %v8890_v58  ;;  %4811 = vst [vmem:[%s8829_s13 + $0x118] sm:$0xff] %v4615_v27  ;;  %4812 = vst [vmem:[%s8829_s13 + $0x120] sm:$0xff] %v4616_v6  ;;  %v4662_v60 = vadd.f32 %v10661_v47, %v8912_v54  ;;  %v4663_v44 = vadd.f32 %v10661_v47, %v8922_v13  ;;  %v10675_v47 = vld [vmem:[#allocation180_spill] sm:$0xff]  ;;  %v10682_v14 = vld [vmem:[#allocation55_spill] sm:$0xff] }
 0x5b2   : > { %4813 = vst [vmem:[%s8829_s13 + $0x128] sm:$0xff] %v4617_v31  ;;  %4814 = vst [vmem:[%s8829_s13 + $0x130] sm:$0xff] %v4618_v24  ;;  %v4258_v19 = vmul.f32 %v4109_v28, %v10672_v53  ;;  %v4259_v58 = vmul.f32 %v4109_v28, %v10673_v50  ;;  %v4260_v5 = vmul.f32 %v4109_v28, %v10674_v33  ;;  %4577 = vperm.xlu0 %5458, %v4439_v39   ;;  %v10683_v15 = vld [vmem:[#allocation179_spill] sm:$0xff]  ;;  %v10684_v6 = vld [vmem:[#allocation25_spill] sm:$0xff] }
 0x5b3   : > { %4815 = vst [vmem:[%s8829_s13 + $0x138] sm:$0xff] %v4619_v55  ;;  %4816 = vst [vmem:[%s8829_s13 + $0x140] sm:$0xff] %v4620_v51  ;;  %v4261_v0 = vmul.f32 %v4109_v28, %v7800_v8  ;;  %v4262_v23 = vmul.f32 %v4109_v28, %v7812_v12  ;;  %v4263_v54 = vmul.f32 %v4109_v28, %v7820_v20  ;;  %v10687_v53 = vld [vmem:[#allocation66_spill] sm:$0xff]  ;;  %v10688_v50 = vld [vmem:[#allocation105_spill] sm:$0xff] }
 0x5b4   : > { %4817 = vst.msk [vmem:[%s8829_s13 + $0x148] sm:$0xff] %vm3016_vm2, %v4621_v29  ;;  %4857 = vst [vmem:[%s8829_s13 + $0x288] sm:$0xff] %v4661_v57  ;;  %v4264_v13 = vmul.f32 %v4109_v28, %v7803_v26  ;;  %v4622_v45 = vadd.f32 %v10675_v47, %v4258_v19  ;;  %v4623_v56 = vadd.f32 %v10675_v47, %v4259_v58  ;;  %v4114_v26 = vpop.permute.xlu1 %4113  ;;  %v10685_v57 = vld [vmem:[#allocation44_spill] sm:$0xff]  ;;  %v10689_v33 = vld [vmem:[#allocation67_spill] sm:$0xff] }
 0x5b5   : > { %4858 = vst [vmem:[%s8829_s13 + $0x290] sm:$0xff] %v4662_v60  ;;  %4859 = vst.msk [vmem:[%s8829_s13 + $0x298] sm:$0xff] %vm3016_vm2, %v4663_v44  ;;  %v4307_v8 = vmul.f32 %v9005_v18, %v8090_v40  ;;  %v4624_v12 = vadd.f32 %v10675_v47, %v4260_v5  ;;  %v4625_v20 = vadd.f32 %v10675_v47, %v4261_v0  ;;  %v10686_v60 = vld [vmem:[#allocation47_spill] sm:$0xff]  ;;  %v10690_v0 = vld [vmem:[#allocation185_spill] sm:$0xff] }
 0x5b6   : > { %v4626_v35 = vadd.f32 %v10675_v47, %v4262_v23  ;;  %v4627_v32 = vadd.f32 %v10675_v47, %v4263_v54  ;;  %v4628_v43 = vadd.f32 %v10675_v47, %v4264_v13  ;;  %4818 = vst [vmem:[%s8829_s13 + $0x150] sm:$0xff] %v4622_v45  ;;  %4819 = vst [vmem:[%s8829_s13 + $0x158] sm:$0xff] %v4623_v56  ;;  %v10691_v13 = vld [vmem:[#allocation18_spill] sm:$0xff] }
 0x5b7   : > { %v4265_v30 = vmul.f32 %v4114_v26, %v10676_v52  ;;  %v4266_v25 = vmul.f32 %v4114_v26, %v10677_v63  ;;  %v4267_v40 = vmul.f32 %v4114_v26, %v10678_v9  ;;  %4820 = vst [vmem:[%s8829_s13 + $0x160] sm:$0xff] %v4624_v12  ;;  %4821 = vst [vmem:[%s8829_s13 + $0x168] sm:$0xff] %v4625_v20  ;;  %v10695_v63 = vld [vmem:[#allocation193_spill] sm:$0xff]  ;;  %v10696_v9 = vld [vmem:[#allocation194_spill] sm:$0xff] }
 0x5b8   : > { %4822 = vst [vmem:[%s8829_s13 + $0x170] sm:$0xff] %v4626_v35  ;;  %4823 = vst [vmem:[%s8829_s13 + $0x178] sm:$0xff] %v4627_v32  ;;  %v4268_v46 = vmul.f32 %v4114_v26, %v10679_v34  ;;  %v4269_v16 = vmul.f32 %v4114_v26, %v10680_v62  ;;  %v4270_v21 = vmul.f32 %v4114_v26, %v10681_v10  ;;  %v4119_v29 = vpop.permute.xlu1 %4118  ;;  %v10693_v32 = vld [vmem:[#allocation17_spill] sm:$0xff]  ;;  %v10698_v62 = vld [vmem:[#allocation182_spill] sm:$0xff] }
 0x5b9   : > { %v4271_v3 = vmul.f32 %v4114_v26, %v10682_v14  ;;  %4824 = vst.msk [vmem:[%s8829_s13 + $0x180] sm:$0xff] %vm3016_vm2, %v4628_v43  ;;  %v4629_v7 = vadd.f32 %v10683_v15, %v4265_v30  ;;  %v4630_v37 = vadd.f32 %v10683_v15, %v4266_v25  ;;  %v4631_v27 = vadd.f32 %v10683_v15, %v4267_v40  ;;  %v10694_v43 = vld [vmem:[#allocation192_spill] sm:$0xff]  ;;  %v10697_v34 = vld [vmem:[#allocation21_spill] sm:$0xff] }
 0x5ba   : > { %v4308_v31 = vmul.f32 %v9005_v18, %v10684_v6  ;;  %v4632_v24 = vadd.f32 %v10683_v15, %v4268_v46  ;;  %v4633_v39 = vadd.f32 %v10683_v15, %v4269_v16  ;;  %v4634_v55 = vadd.f32 %v10683_v15, %v4270_v21 }
 0x5bb   : > { %v4635_v51 = vadd.f32 %v10683_v15, %v4271_v3  ;;  %4825 = vst [vmem:[%s8829_s13 + $0x188] sm:$0xff] %v4629_v7  ;;  %4826 = vst [vmem:[%s8829_s13 + $0x190] sm:$0xff] %v4630_v37  ;;  %v4309_v28 = vmul.f32 %v9005_v18, %v10685_v57  ;;  %v4310_v44 = vmul.f32 %v9005_v18, %v10686_v60  ;;  %v10699_v3 = vld [vmem:[#allocation58_spill] sm:$0xff]  ;;  %v4154_v7 = vpop.permute.xlu0 %4153  ;;  %v10704_v60 = vld [vmem:[#allocation195_spill] sm:$0xff] }
 0x5bc   : > { %4827 = vst [vmem:[%s8829_s13 + $0x198] sm:$0xff] %v4631_v27  ;;  %v4311_v19 = vmul.f32 %v9005_v18, %v10687_v53  ;;  %v4312_v58 = vmul.f32 %v9005_v18, %v10688_v50  ;;  %4828 = vst [vmem:[%s8829_s13 + $0x1a0] sm:$0xff] %v4632_v24  ;;  %v4313_v5 = vmul.f32 %v9005_v18, %v10689_v33  ;;  %v4129_v30 = vpop.permute.xlu1 %4128  ;;  %v10703_v57 = vld [vmem:[#allocation22_spill] sm:$0xff] }
 0x5bd   : > { %4829 = vst [vmem:[%s8829_s13 + $0x1a8] sm:$0xff] %v4633_v39  ;;  %4830 = vst [vmem:[%s8829_s13 + $0x1b0] sm:$0xff] %v4634_v55  ;;  %v4671_v23 = vadd.f32 %v10690_v0, %v4307_v8  ;;  %v4672_v54 = vadd.f32 %v10690_v0, %v4308_v31  ;;  %v4272_v47 = vmul.f32 %v4119_v29, %v10691_v13  ;;  %v10692_v8 = vld [vmem:[#allocation20_spill] sm:$0xff] }
 0x5be   : > { %4831 = vst.msk [vmem:[%s8829_s13 + $0x1b8] sm:$0xff] %vm3016_vm2, %v4635_v51  ;;  %v4673_v45 = vadd.f32 %v10690_v0, %v4309_v28  ;;  %v4674_v56 = vadd.f32 %v10690_v0, %v4310_v44  ;;  %v4675_v12 = vadd.f32 %v10690_v0, %v4311_v19  ;;  %v4676_v20 = vadd.f32 %v10690_v0, %v4312_v58  ;;  %v10700_v31 = vld [vmem:[#allocation60_spill] sm:$0xff]  ;;  %v10702_v51 = vld [vmem:[#allocation62_spill] sm:$0xff]  ;;  %v10705_v19 = vld [vmem:[#allocation61_spill] sm:$0xff] }
 0x5bf   : > { %v4677_v18 = vadd.f32 %v10690_v0, %v4313_v5  ;;  %4867 = vst [vmem:[%s8829_s13 + $0x2d8] sm:$0xff] %v4671_v23  ;;  %4868 = vst [vmem:[%s8829_s13 + $0x2e0] sm:$0xff] %v4672_v54  ;;  %v4273_v35 = vmul.f32 %v4119_v29, %v10692_v8  ;;  %v4274_v26 = vmul.f32 %v4119_v29, %v10693_v32  ;;  %v10701_v39 = vld [vmem:[#allocation56_spill] sm:$0xff]  ;;  %v10707_v0 = vld [vmem:[#allocation161_spill] sm:$0xff] }
 0x5c0   : > { %v4275_v52 = vmul.f32 %v4119_v29, %v10694_v43  ;;  %4869 = vst [vmem:[%s8829_s13 + $0x2e8] sm:$0xff] %v4673_v45  ;;  %4870 = vst [vmem:[%s8829_s13 + $0x2f0] sm:$0xff] %v4674_v56  ;;  %v4276_v25 = vmul.f32 %v4119_v29, %v10695_v63  ;;  %v4277_v40 = vmul.f32 %v4119_v29, %v10696_v9  ;;  %v4139_v53 = vpop.permute.xlu1 %4138  ;;  %v10706_v58 = vld [vmem:[#allocation184_spill] sm:$0xff]  ;;  %v10713_v63 = vld [vmem:[#allocation71_spill] sm:$0xff] }
 0x5c1   : > { %4871 = vst [vmem:[%s8829_s13 + $0x2f8] sm:$0xff] %v4675_v12  ;;  %4872 = vst [vmem:[%s8829_s13 + $0x300] sm:$0xff] %v4676_v20  ;;  %v4278_v46 = vmul.f32 %v4119_v29, %v10697_v34  ;;  %v4636_v16 = vadd.f32 %v10698_v62, %v4272_v47  ;;  %v4637_v10 = vadd.f32 %v10698_v62, %v4273_v35  ;;  %v10708_v12 = vld [vmem:[#allocation108_spill] sm:$0xff]  ;;  %v10710_v35 = vld [vmem:[#allocation51_spill] sm:$0xff] }
 0x5c2   : > { %4873 = vst.msk [vmem:[%s8829_s13 + $0x308] sm:$0xff] %vm3016_vm2, %v4677_v18  ;;  %v4638_v21 = vadd.f32 %v10698_v62, %v4274_v26  ;;  %v4639_v14 = vadd.f32 %v10698_v62, %v4275_v52  ;;  %v4286_v15 = vmul.f32 %v4129_v30, %v10699_v3  ;;  %v4640_v37 = vadd.f32 %v10698_v62, %v4276_v25  ;;  %v10709_v18 = vld [vmem:[#allocation49_spill] sm:$0xff]  ;;  %v10711_v26 = vld [vmem:[#allocation70_spill] sm:$0xff] }
 0x5c3   : > { %v4641_v27 = vadd.f32 %v10698_v62, %v4277_v40  ;;  %v4642_v6 = vadd.f32 %v10698_v62, %v4278_v46  ;;  %4832 = vst [vmem:[%s8829_s13 + $0x1c0] sm:$0xff] %v4636_v16  ;;  %v4287_v24 = vmul.f32 %v4129_v30, %v10700_v31  ;;  %4833 = vst [vmem:[%s8829_s13 + $0x1c8] sm:$0xff] %v4637_v10  ;;  %v10712_v52 = vld [vmem:[#allocation109_spill] sm:$0xff]  ;;  %v10714_v16 = vld [vmem:[#allocation63_spill] sm:$0xff] }
 0x5c4   : > { %4834 = vst [vmem:[%s8829_s13 + $0x1d0] sm:$0xff] %v4638_v21  ;;  %4835 = vst [vmem:[%s8829_s13 + $0x1d8] sm:$0xff] %v4639_v14  ;;  %v4288_v55 = vmul.f32 %v4129_v30, %v10701_v39  ;;  %v4289_v29 = vmul.f32 %v4129_v30, %v10702_v51  ;;  %v4290_v28 = vmul.f32 %v4129_v30, %v10703_v57  ;;  %v4149_v40 = vpop.permute.xlu1 %4148  ;;  %v10721_v57 = vld [vmem:[#allocation186_spill] sm:$0xff] }
 0x5c5   : > { %v4291_v44 = vmul.f32 %v4129_v30, %v10704_v60  ;;  %4836 = vst [vmem:[%s8829_s13 + $0x1e0] sm:$0xff] %v4640_v37  ;;  %4837 = vst [vmem:[%s8829_s13 + $0x1e8] sm:$0xff] %v4641_v27  ;;  %v4292_v50 = vmul.f32 %v4129_v30, %v10705_v19  ;;  %v4650_v33 = vadd.f32 %v10706_v58, %v4286_v15  ;;  %v10715_v15 = vld [vmem:[#allocation64_spill] sm:$0xff]  ;;  %v10716_v37 = vld [vmem:[#allocation59_spill] sm:$0xff] }
 0x5c6   : > { %4838 = vst.msk [vmem:[%s8829_s13 + $0x1f0] sm:$0xff] %vm3016_vm2, %v4642_v6  ;;  %v4651_v5 = vadd.f32 %v10706_v58, %v4287_v24  ;;  %v4321_v23 = vmul.f32 %v4154_v7, %v10707_v0  ;;  %v4652_v54 = vadd.f32 %v10706_v58, %v4288_v55  ;;  %v4653_v13 = vadd.f32 %v10706_v58, %v4289_v29  ;;  %v10717_v6 = vld [vmem:[#allocation24_spill] sm:$0xff]  ;;  %v10718_v24 = vld [vmem:[#allocation23_spill] sm:$0xff]  ;;  %v4164_v0 = vpop.permute.xlu0 %4163 }
 0x5c7   : > { %v4654_v47 = vadd.f32 %v10706_v58, %v4290_v28  ;;  %v4655_v45 = vadd.f32 %v10706_v58, %v4291_v44  ;;  %v4656_v56 = vadd.f32 %v10706_v58, %v4292_v50  ;;  %4846 = vst [vmem:[%s8829_s13 + $0x230] sm:$0xff] %v4650_v33  ;;  %v4322_v20 = vmul.f32 %v4154_v7, %v10708_v12  ;;  %v10719_v55 = vld [vmem:[#allocation48_spill] sm:$0xff]  ;;  %v10722_v44 = vld [vmem:[#allocation106_spill] sm:$0xff] }
 0x5c8   : > { %4847 = vst [vmem:[%s8829_s13 + $0x238] sm:$0xff] %v4651_v5  ;;  %v4323_v8 = vmul.f32 %v4154_v7, %v10709_v18  ;;  %v4324_v32 = vmul.f32 %v4154_v7, %v10710_v35  ;;  %4848 = vst [vmem:[%s8829_s13 + $0x240] sm:$0xff] %v4652_v54  ;;  %v4325_v43 = vmul.f32 %v4154_v7, %v10711_v26  ;;  %v4159_v12 = vpop.permute.xlu1 %4158 }
 0x5c9   : > { %4849 = vst [vmem:[%s8829_s13 + $0x248] sm:$0xff] %v4653_v13  ;;  %4850 = vst [vmem:[%s8829_s13 + $0x250] sm:$0xff] %v4654_v47  ;;  %v4326_v30 = vmul.f32 %v4154_v7, %v10712_v52  ;;  %v4327_v25 = vmul.f32 %v4154_v7, %v10713_v63  ;;  %v4685_v9 = vadd.f32 %v8720_v11, %v4321_v23  ;;  %v10723_v23 = vld [vmem:[#allocation46_spill] sm:$0xff]  ;;  %v10724_v13 = vld [vmem:[#allocation104_spill] sm:$0xff] }
 0x5ca   : > { %4851 = vst [vmem:[%s8829_s13 + $0x258] sm:$0xff] %v4655_v45  ;;  %4852 = vst.msk [vmem:[%s8829_s13 + $0x260] sm:$0xff] %vm3016_vm2, %v4656_v56  ;;  %v4686_v34 = vadd.f32 %v8720_v11, %v4322_v20  ;;  %v4687_v46 = vadd.f32 %v8720_v11, %v4323_v8  ;;  %v4688_v62 = vadd.f32 %v8720_v11, %v4324_v32  ;;  %v10725_v45 = vld [vmem:[#allocation68_spill] sm:$0xff]  ;;  %v10726_v20 = vld [vmem:[#allocation69_spill] sm:$0xff] }
 0x5cb   : > { %v4300_v10 = vmul.f32 %v4139_v53, %v10714_v16  ;;  %v4689_v21 = vadd.f32 %v8720_v11, %v4325_v43  ;;  %v4690_v14 = vadd.f32 %v8720_v11, %v4326_v30  ;;  %v4691_v3 = vadd.f32 %v8720_v11, %v4327_v25  ;;  %4881 = vst [vmem:[%s8829_s13 + $0x348] sm:$0xff] %v4685_v9  ;;  %v10720_v11 = vld [vmem:[#allocation65_spill] sm:$0xff]  ;;  %v10727_v8 = vld [vmem:[#allocation107_spill] sm:$0xff]  ;;  %v10728_v32 = vld [vmem:[#allocation50_spill] sm:$0xff] }
 0x5cc   : > { %v4301_v7 = vmul.f32 %v4139_v53, %v10715_v15  ;;  %4882 = vst [vmem:[%s8829_s13 + $0x350] sm:$0xff] %v4686_v34  ;;  %4883 = vst [vmem:[%s8829_s13 + $0x358] sm:$0xff] %v4687_v46  ;;  %v4302_v27 = vmul.f32 %v4139_v53, %v10716_v37  ;;  %v4303_v31 = vmul.f32 %v4139_v53, %v10717_v6  ;;  %v10729_v43 = vld [vmem:[#allocation188_spill] sm:$0xff]  ;;  %v10730_v9 = vld [vmem:[#allocation163_spill] sm:$0xff] }
 0x5cd   : > { %4884 = vst [vmem:[%s8829_s13 + $0x360] sm:$0xff] %v4688_v62  ;;  %v4304_v39 = vmul.f32 %v4139_v53, %v10718_v24  ;;  %v4305_v51 = vmul.f32 %v4139_v53, %v10719_v55  ;;  %4885 = vst [vmem:[%s8829_s13 + $0x368] sm:$0xff] %v4689_v21  ;;  %v4306_v29 = vmul.f32 %v4139_v53, %v10720_v11  ;;  %v10731_v16 = vld [vmem:[#allocation27_spill] sm:$0xff]  ;;  %v10732_v21 = vld [vmem:[#allocation136_spill] sm:$0xff] }
 0x5ce   : > { %4886 = vst [vmem:[%s8829_s13 + $0x370] sm:$0xff] %v4690_v14  ;;  %4887 = vst.msk [vmem:[%s8829_s13 + $0x378] sm:$0xff] %vm3016_vm2, %v4691_v3  ;;  %v4664_v28 = vadd.f32 %v10721_v57, %v4300_v10  ;;  %v4665_v60 = vadd.f32 %v10721_v57, %v4301_v7  ;;  %v4314_v19 = vmul.f32 %v4149_v40, %v10722_v44  ;;  %v10733_v3 = vld [vmem:[#allocation137_spill] sm:$0xff]  ;;  %v10734_v7 = vld [vmem:[#allocation72_spill] sm:$0xff]  ;;  %v4169_v44 = vpop.permute.xlu1 %4168 }
 0x5cf   : > { %v4666_v50 = vadd.f32 %v10721_v57, %v4302_v27  ;;  %v4667_v58 = vadd.f32 %v10721_v57, %v4303_v31  ;;  %v4668_v33 = vadd.f32 %v10721_v57, %v4304_v39  ;;  %v4669_v5 = vadd.f32 %v10721_v57, %v4305_v51  ;;  %v10735_v27 = vld [vmem:[#allocation112_spill] sm:$0xff]  ;;  %v10736_v31 = vld [vmem:[#allocation73_spill] sm:$0xff]  ;;  %v10737_v51 = vld [vmem:[#allocation110_spill] sm:$0xff] }
 0x5d0   : > { %v4670_v53 = vadd.f32 %v10721_v57, %v4306_v29  ;;  %4860 = vst [vmem:[%s8829_s13 + $0x2a0] sm:$0xff] %v4664_v28  ;;  %4861 = vst [vmem:[%s8829_s13 + $0x2a8] sm:$0xff] %v4665_v60  ;;  %v4315_v54 = vmul.f32 %v4149_v40, %v10723_v23  ;;  %v4316_v47 = vmul.f32 %v4149_v40, %v10724_v13  ;;  %v10741_v23 = vld [vmem:[#allocation28_spill] sm:$0xff]  ;;  %v10742_v13 = vld [vmem:[#allocation111_spill] sm:$0xff] }
 0x5d1   : > { %v4317_v56 = vmul.f32 %v4149_v40, %v10725_v45  ;;  %4862 = vst [vmem:[%s8829_s13 + $0x2b0] sm:$0xff] %v4666_v50  ;;  %4863 = vst [vmem:[%s8829_s13 + $0x2b8] sm:$0xff] %v4667_v58  ;;  %v4318_v18 = vmul.f32 %v4149_v40, %v10726_v20  ;;  %v4319_v35 = vmul.f32 %v4149_v40, %v10727_v8  ;;  %v10738_v50 = vld [vmem:[#allocation134_spill] sm:$0xff] }
 0x5d2   : > { %4864 = vst [vmem:[%s8829_s13 + $0x2c0] sm:$0xff] %v4668_v33  ;;  %4865 = vst [vmem:[%s8829_s13 + $0x2c8] sm:$0xff] %v4669_v5  ;;  %v4320_v26 = vmul.f32 %v4149_v40, %v10728_v32  ;;  %v4678_v52 = vadd.f32 %v10729_v43, %v4314_v19  ;;  %v4679_v30 = vadd.f32 %v10729_v43, %v4315_v54  ;;  %v10739_v33 = vld [vmem:[#allocation162_spill] sm:$0xff] }
 0x5d3   : > { %4866 = vst.msk [vmem:[%s8829_s13 + $0x2d0] sm:$0xff] %vm3016_vm2, %v4670_v53  ;;  %v4680_v63 = vadd.f32 %v10729_v43, %v4316_v47  ;;  %v4681_v25 = vadd.f32 %v10729_v43, %v4317_v56  ;;  %v4335_v34 = vmul.f32 %v4164_v0, %v10730_v9  ;;  %v4682_v46 = vadd.f32 %v10729_v43, %v4318_v18 }
 0x5d4   : > { %v4683_v62 = vadd.f32 %v10729_v43, %v4319_v35  ;;  %v4684_v40 = vadd.f32 %v10729_v43, %v4320_v26  ;;  %4874 = vst [vmem:[%s8829_s13 + $0x310] sm:$0xff] %v4678_v52  ;;  %v4336_v10 = vmul.f32 %v4164_v0, %v10731_v16  ;;  %4875 = vst [vmem:[%s8829_s13 + $0x318] sm:$0xff] %v4679_v30  ;;  %v10744_v35 = vld [vmem:[#allocation113_spill] sm:$0xff]  ;;  %v4174_v26 = vpop.permute.xlu0 %4173  ;;  %v10745_v30 = vld [vmem:[#allocation138_spill] sm:$0xff] }
 0x5d5   : > { %4876 = vst [vmem:[%s8829_s13 + $0x320] sm:$0xff] %v4680_v63  ;;  %4877 = vst [vmem:[%s8829_s13 + $0x328] sm:$0xff] %v4681_v25  ;;  %v4337_v14 = vmul.f32 %v4164_v0, %v10732_v21  ;;  %v4338_v15 = vmul.f32 %v4164_v0, %v10733_v3  ;;  %v4339_v37 = vmul.f32 %v4164_v0, %v10734_v7  ;;  %v10746_v25 = vld [vmem:[#allocation164_spill] sm:$0xff]  ;;  %v10749_v16 = vld [vmem:[#allocation29_spill] sm:$0xff] }
 0x5d6   : > { %v4340_v6 = vmul.f32 %v4164_v0, %v10735_v27  ;;  %4878 = vst [vmem:[%s8829_s13 + $0x330] sm:$0xff] %v4682_v46  ;;  %4879 = vst [vmem:[%s8829_s13 + $0x338] sm:$0xff] %v4683_v62  ;;  %v4341_v24 = vmul.f32 %v4164_v0, %v10736_v31  ;;  %v4699_v39 = vadd.f32 %v8801_v59, %v4335_v34  ;;  %v10740_v0 = vld [vmem:[#allocation26_spill] sm:$0xff]  ;;  %v10748_v62 = vld [vmem:[#allocation75_spill] sm:$0xff] }
 0x5d7   : > { %4880 = vst.msk [vmem:[%s8829_s13 + $0x340] sm:$0xff] %vm3016_vm2, %v4684_v40  ;;  %v4700_v55 = vadd.f32 %v8801_v59, %v4336_v10  ;;  %v4328_v11 = vmul.f32 %v4159_v12, %v10737_v51  ;;  %v4701_v29 = vadd.f32 %v8801_v59, %v4337_v14  ;;  %v4702_v57 = vadd.f32 %v8801_v59, %v4338_v15  ;;  %v10747_v34 = vld [vmem:[#allocation74_spill] sm:$0xff]  ;;  %v10751_v15 = vld [vmem:[#allocation165_spill] sm:$0xff] }
 0x5d8   : > { %v4703_v28 = vadd.f32 %v8801_v59, %v4339_v37  ;;  %v4704_v60 = vadd.f32 %v8801_v59, %v4340_v6  ;;  %v4705_v19 = vadd.f32 %v8801_v59, %v4341_v24  ;;  %4895 = vst [vmem:[%s8829_s13 + $0x3b8] sm:$0xff] %v4699_v39  ;;  %v4329_v58 = vmul.f32 %v4159_v12, %v10738_v50  ;;  %v10743_v59 = vld [vmem:[#allocation135_spill] sm:$0xff]  ;;  %v4179_v24 = vpop.permute.xlu1 %4178 }
 0x5d9   : > { %4896 = vst [vmem:[%s8829_s13 + $0x3c0] sm:$0xff] %v4700_v55  ;;  %v4330_v5 = vmul.f32 %v4159_v12, %v10739_v33  ;;  %v4331_v53 = vmul.f32 %v4159_v12, %v10740_v0  ;;  %4897 = vst [vmem:[%s8829_s13 + $0x3c8] sm:$0xff] %v4701_v29  ;;  %v4332_v54 = vmul.f32 %v4159_v12, %v10741_v23  ;;  %v10752_v55 = vld [vmem:[#allocation114_spill] sm:$0xff]  ;;  %v10758_v23 = vld [vmem:[#allocation116_spill] sm:$0xff] }
 0x5da   : > { %4898 = vst [vmem:[%s8829_s13 + $0x3d0] sm:$0xff] %v4702_v57  ;;  %4899 = vst [vmem:[%s8829_s13 + $0x3d8] sm:$0xff] %v4703_v28  ;;  %v4333_v47 = vmul.f32 %v4159_v12, %v10742_v13  ;;  %v4334_v45 = vmul.f32 %v4159_v12, %v10743_v59  ;;  %v4692_v56 = vadd.f32 %v8725_v41, %v4328_v11  ;;  %v10753_v11 = vld [vmem:[#allocation140_spill] sm:$0xff]  ;;  %v10754_v57 = vld [vmem:[#allocation141_spill] sm:$0xff]  ;;  %v4184_v13 = vpop.permute.xlu0 %4183 }
 0x5db   : > { %4900 = vst [vmem:[%s8829_s13 + $0x3e0] sm:$0xff] %v4704_v60  ;;  %4901 = vst.msk [vmem:[%s8829_s13 + $0x3e8] sm:$0xff] %vm3016_vm2, %v4705_v19  ;;  %v4693_v20 = vadd.f32 %v8725_v41, %v4329_v58  ;;  %v4694_v18 = vadd.f32 %v8725_v41, %v4330_v5  ;;  %v4695_v8 = vadd.f32 %v8725_v41, %v4331_v53  ;;  %v10755_v60 = vld [vmem:[#allocation76_spill] sm:$0xff]  ;;  %v10756_v19 = vld [vmem:[#allocation115_spill] sm:$0xff] }
 0x5dc   : > { %v4342_v32 = vmul.f32 %v4169_v44, %v10744_v35  ;;  %v4696_v43 = vadd.f32 %v8725_v41, %v4332_v54  ;;  %v4697_v12 = vadd.f32 %v8725_v41, %v4333_v47  ;;  %v4698_v52 = vadd.f32 %v8725_v41, %v4334_v45  ;;  %4888 = vst [vmem:[%s8829_s13 + $0x380] sm:$0xff] %v4692_v56  ;;  %v10750_v41 = vld [vmem:[#allocation139_spill] sm:$0xff]  ;;  %v10759_v56 = vld [vmem:[#allocation142_spill] sm:$0xff] }
 0x5dd   : > { %v4343_v63 = vmul.f32 %v4169_v44, %v10745_v30  ;;  %4889 = vst [vmem:[%s8829_s13 + $0x388] sm:$0xff] %v4693_v20  ;;  %4890 = vst [vmem:[%s8829_s13 + $0x390] sm:$0xff] %v4694_v18  ;;  %v4344_v9 = vmul.f32 %v4169_v44, %v10746_v25  ;;  %v4345_v46 = vmul.f32 %v4169_v44, %v10747_v34  ;;  %v10760_v18 = vld [vmem:[#allocation166_spill] sm:$0xff]  ;;  %v10761_v35 = vld [vmem:[#allocation143_spill] sm:$0xff] }
 0x5de   : > { %4891 = vst [vmem:[%s8829_s13 + $0x398] sm:$0xff] %v4695_v8  ;;  %v4346_v40 = vmul.f32 %v4169_v44, %v10748_v62  ;;  %v4347_v10 = vmul.f32 %v4169_v44, %v10749_v16  ;;  %4892 = vst [vmem:[%s8829_s13 + $0x3a0] sm:$0xff] %v4696_v43  ;;  %v4348_v21 = vmul.f32 %v4169_v44, %v10750_v41  ;;  %v10764_v25 = vld [vmem:[#allocation30_spill] sm:$0xff] }
 0x5df   : > { %4893 = vst [vmem:[%s8829_s13 + $0x3a8] sm:$0xff] %v4697_v12  ;;  %4894 = vst.msk [vmem:[%s8829_s13 + $0x3b0] sm:$0xff] %vm3016_vm2, %v4698_v52  ;;  %v4706_v14 = vadd.f32 %v8839_v38, %v4342_v32  ;;  %v4707_v3 = vadd.f32 %v8839_v38, %v4343_v63  ;;  %v4349_v7 = vmul.f32 %v4174_v26, %v10751_v15 }
 0x5e0   : > { %v4708_v37 = vadd.f32 %v8839_v38, %v4344_v9  ;;  %v4709_v27 = vadd.f32 %v8839_v38, %v4345_v46  ;;  %v4710_v6 = vadd.f32 %v8839_v38, %v4346_v40  ;;  %v4711_v31 = vadd.f32 %v8839_v38, %v4347_v10  ;;  %v4189_v40 = vpop.permute.xlu1 %4188  ;;  %v10765_v10 = vld [vmem:[#allocation117_spill] sm:$0xff] }
 0x5e1   : > { %v4712_v39 = vadd.f32 %v8839_v38, %v4348_v21  ;;  %4902 = vst [vmem:[%s8829_s13 + $0x3f0] sm:$0xff] %v4706_v14  ;;  %4903 = vst [vmem:[%s8829_s13 + $0x3f8] sm:$0xff] %v4707_v3  ;;  %v4350_v51 = vmul.f32 %v4174_v26, %v10752_v55  ;;  %v4351_v29 = vmul.f32 %v4174_v26, %v10753_v11  ;;  %v10757_v38 = vld [vmem:[#allocation77_spill] sm:$0xff]  ;;  %v10766_v21 = vld [vmem:[#allocation144_spill] sm:$0xff] }
 0x5e2   : > { %v4352_v28 = vmul.f32 %v4174_v26, %v10754_v57  ;;  %4904 = vst [vmem:[%s8829_s13 + $0x400] sm:$0xff] %v4708_v37  ;;  %4905 = vst [vmem:[%s8829_s13 + $0x408] sm:$0xff] %v4709_v27  ;;  %v4353_v44 = vmul.f32 %v4174_v26, %v10755_v60  ;;  %v4354_v50 = vmul.f32 %v4174_v26, %v10756_v19  ;;  %v10767_v3 = vld [vmem:[#allocation167_spill] sm:$0xff]  ;;  %v10769_v55 = vld [vmem:[#allocation80_spill] sm:$0xff] }
 0x5e3   : > { %4906 = vst [vmem:[%s8829_s13 + $0x410] sm:$0xff] %v4710_v6  ;;  %4907 = vst [vmem:[%s8829_s13 + $0x418] sm:$0xff] %v4711_v31  ;;  %v4355_v58 = vmul.f32 %v4174_v26, %v10757_v38  ;;  %v4713_v33 = vadd.f32 %v8804_v42, %v4349_v7  ;;  %v4714_v5 = vadd.f32 %v8804_v42, %v4350_v51  ;;  %v10762_v26 = vld [vmem:[#allocation78_spill] sm:$0xff]  ;;  %v4194_v51 = vpop.permute.xlu0 %4193  ;;  %v10770_v57 = vld [vmem:[#allocation81_spill] sm:$0xff] }
 0x5e4   : > { %4908 = vst.msk [vmem:[%s8829_s13 + $0x420] sm:$0xff] %vm3016_vm2, %v4712_v39  ;;  %v4715_v0 = vadd.f32 %v8804_v42, %v4351_v29  ;;  %v4716_v53 = vadd.f32 %v8804_v42, %v4352_v28  ;;  %v4356_v54 = vmul.f32 %v4179_v24, %v10758_v23  ;;  %v4717_v47 = vadd.f32 %v8804_v42, %v4353_v44  ;;  %v10771_v60 = vld [vmem:[#allocation118_spill] sm:$0xff]  ;;  %v10772_v19 = vld [vmem:[#allocation119_spill] sm:$0xff]  ;;  %v10773_v38 = vld [vmem:[#allocation168_spill] sm:$0xff] }
 0x5e5   : > { %v4718_v59 = vadd.f32 %v8804_v42, %v4354_v50  ;;  %v4719_v45 = vadd.f32 %v8804_v42, %v4355_v58  ;;  %4909 = vst [vmem:[%s8829_s13 + $0x428] sm:$0xff] %v4713_v33  ;;  %v4357_v20 = vmul.f32 %v4179_v24, %v10759_v56  ;;  %4910 = vst [vmem:[%s8829_s13 + $0x430] sm:$0xff] %v4714_v5  ;;  %v10763_v42 = vld [vmem:[#allocation79_spill] sm:$0xff]  ;;  %v10774_v33 = vld [vmem:[#allocation82_spill] sm:$0xff] }
 0x5e6   : > { %4911 = vst [vmem:[%s8829_s13 + $0x438] sm:$0xff] %v4715_v0  ;;  %4912 = vst [vmem:[%s8829_s13 + $0x440] sm:$0xff] %v4716_v53  ;;  %v4358_v8 = vmul.f32 %v4179_v24, %v10760_v18  ;;  %v4359_v32 = vmul.f32 %v4179_v24, %v10761_v35  ;;  %v4360_v43 = vmul.f32 %v4179_v24, %v10762_v26 }
 0x5e7   : > { %v4361_v12 = vmul.f32 %v4179_v24, %v8444_v17  ;;  %4913 = vst [vmem:[%s8829_s13 + $0x448] sm:$0xff] %v4717_v47  ;;  %4914 = vst [vmem:[%s8829_s13 + $0x450] sm:$0xff] %v4718_v59  ;;  %v4362_v52 = vmul.f32 %v4179_v24, %v10763_v42  ;;  %v4720_v30 = vadd.f32 %v8841_v48, %v4356_v54  ;;  %v10776_v54 = vld [vmem:[#allocation147_spill] sm:$0xff] }
 0x5e8   : > { %4915 = vst.msk [vmem:[%s8829_s13 + $0x458] sm:$0xff] %vm3016_vm2, %v4719_v45  ;;  %v4721_v63 = vadd.f32 %v8841_v48, %v4357_v20  ;;  %v4363_v9 = vmul.f32 %v4184_v13, %v10764_v25  ;;  %v4722_v34 = vadd.f32 %v8841_v48, %v4358_v8  ;;  %v4723_v17 = vadd.f32 %v8841_v48, %v4359_v32  ;;  %v4199_v20 = vpop.permute.xlu1 %4198  ;;  %v10777_v8 = vld [vmem:[#allocation83_spill] sm:$0xff]  ;;  %v10778_v32 = vld [vmem:[#allocation120_spill] sm:$0xff] }
 0x5e9   : > { %v4724_v46 = vadd.f32 %v8841_v48, %v4360_v43  ;;  %v4725_v62 = vadd.f32 %v8841_v48, %v4361_v12  ;;  %v4726_v16 = vadd.f32 %v8841_v48, %v4362_v52  ;;  %4916 = vst [vmem:[%s8829_s13 + $0x460] sm:$0xff] %v4720_v30  ;;  %v4364_v41 = vmul.f32 %v4184_v13, %v10765_v10  ;;  %v10768_v48 = vld [vmem:[#allocation145_spill] sm:$0xff]  ;;  %v10780_v52 = vld [vmem:[#allocation84_spill] sm:$0xff] }
 0x5ea   : > { %4917 = vst [vmem:[%s8829_s13 + $0x468] sm:$0xff] %v4721_v63  ;;  %v4365_v14 = vmul.f32 %v4184_v13, %v10766_v21  ;;  %v4366_v15 = vmul.f32 %v4184_v13, %v10767_v3  ;;  %4918 = vst [vmem:[%s8829_s13 + $0x470] sm:$0xff] %v4722_v34  ;;  %v4367_v7 = vmul.f32 %v4184_v13, %v8485_v2  ;;  %v10779_v43 = vld [vmem:[#allocation121_spill] sm:$0xff] }
 0x5eb   : > { %4919 = vst [vmem:[%s8829_s13 + $0x478] sm:$0xff] %v4723_v17  ;;  %4920 = vst [vmem:[%s8829_s13 + $0x480] sm:$0xff] %v4724_v46  ;;  %v4368_v37 = vmul.f32 %v4184_v13, %v8495_v1  ;;  %v4369_v27 = vmul.f32 %v4184_v13, %v10768_v48  ;;  %v4727_v6 = vadd.f32 %v8806_v36, %v4363_v9  ;;  %v10782_v46 = vld [vmem:[#allocation149_spill] sm:$0xff] }
 0x5ec   : > { %4921 = vst [vmem:[%s8829_s13 + $0x488] sm:$0xff] %v4725_v62  ;;  %4922 = vst.msk [vmem:[%s8829_s13 + $0x490] sm:$0xff] %vm3016_vm2, %v4726_v16  ;;  %v4728_v31 = vadd.f32 %v8806_v36, %v4364_v41  ;;  %v4729_v24 = vadd.f32 %v8806_v36, %v4365_v14  ;;  %v4730_v39 = vadd.f32 %v8806_v36, %v4366_v15  ;;  %v4204_v62 = vpop.permute.xlu0 %4203  ;;  %v10783_v41 = vld [vmem:[#allocation85_spill] sm:$0xff]  ;;  %v10784_v14 = vld [vmem:[#allocation122_spill] sm:$0xff] }
 0x5ed   : > { %v4370_v2 = vmul.f32 %v4189_v40, %v10769_v55  ;;  %v4731_v1 = vadd.f32 %v8806_v36, %v4367_v7  ;;  %v4732_v11 = vadd.f32 %v8806_v36, %v4368_v37  ;;  %v4733_v29 = vadd.f32 %v8806_v36, %v4369_v27  ;;  %4923 = vst [vmem:[%s8829_s13 + $0x498] sm:$0xff] %v4727_v6  ;;  %v10775_v36 = vld [vmem:[#allocation146_spill] sm:$0xff]  ;;  %v10785_v15 = vld [vmem:[#allocation123_spill] sm:$0xff]  ;;  %v10786_v37 = vld [vmem:[#allocation169_spill] sm:$0xff] }
 0x5ee   : > { %v4371_v28 = vmul.f32 %v4189_v40, %v10770_v57  ;;  %4924 = vst [vmem:[%s8829_s13 + $0x4a0] sm:$0xff] %v4728_v31  ;;  %4925 = vst [vmem:[%s8829_s13 + $0x4a8] sm:$0xff] %v4729_v24  ;;  %v4372_v44 = vmul.f32 %v4189_v40, %v10771_v60  ;;  %v4373_v50 = vmul.f32 %v4189_v40, %v10772_v19  ;;  %v10787_v27 = vld [vmem:[#allocation150_spill] sm:$0xff]  ;;  %v10789_v55 = vld [vmem:[#allocation151_spill] sm:$0xff] }
 0x5ef   : > { %4926 = vst [vmem:[%s8829_s13 + $0x4b0] sm:$0xff] %v4730_v39  ;;  %v4374_v58 = vmul.f32 %v4189_v40, %v10773_v38  ;;  %v4375_v5 = vmul.f32 %v4189_v40, %v10774_v33  ;;  %4927 = vst [vmem:[%s8829_s13 + $0x4b8] sm:$0xff] %v4731_v1  ;;  %v4376_v0 = vmul.f32 %v4189_v40, %v10775_v36  ;;  %v10793_v33 = vld [vmem:[#allocation152_spill] sm:$0xff]  ;;  %v10794_v36 = vld [vmem:[#allocation153_spill] sm:$0xff] }
 0x5f0   : > { %4928 = vst [vmem:[%s8829_s13 + $0x4c0] sm:$0xff] %v4732_v11  ;;  %4929 = vst.msk [vmem:[%s8829_s13 + $0x4c8] sm:$0xff] %vm3016_vm2, %v4733_v29  ;;  %v4734_v53 = vadd.f32 %v8843_v22, %v4370_v2  ;;  %v4735_v23 = vadd.f32 %v8843_v22, %v4371_v28  ;;  %v4377_v13 = vmul.f32 %v4194_v51, %v10776_v54  ;;  %v10790_v28 = vld [vmem:[#allocation87_spill] sm:$0xff] }
 0x5f1   : > { %v4736_v47 = vadd.f32 %v8843_v22, %v4372_v44  ;;  %v4737_v59 = vadd.f32 %v8843_v22, %v4373_v50  ;;  %v4738_v45 = vadd.f32 %v8843_v22, %v4374_v58  ;;  %v4739_v56 = vadd.f32 %v8843_v22, %v4375_v5  ;;  %v10791_v44 = vld [vmem:[#allocation124_spill] sm:$0xff]  ;;  %v10792_v50 = vld [vmem:[#allocation125_spill] sm:$0xff]  ;;  %v4209_v58 = vpop.permute.xlu1 %4208 }
 0x5f2   : > { %v4740_v18 = vadd.f32 %v8843_v22, %v4376_v0  ;;  %4930 = vst [vmem:[%s8829_s13 + $0x4d0] sm:$0xff] %v4734_v53  ;;  %4931 = vst [vmem:[%s8829_s13 + $0x4d8] sm:$0xff] %v4735_v23  ;;  %v4378_v35 = vmul.f32 %v4194_v51, %v10777_v8  ;;  %v4379_v26 = vmul.f32 %v4194_v51, %v10778_v32  ;;  %v10781_v22 = vld [vmem:[#allocation148_spill] sm:$0xff]  ;;  %v10795_v0 = vld [vmem:[#allocation170_spill] sm:$0xff] }
 0x5f3   : > { %v4380_v12 = vmul.f32 %v4194_v51, %v10779_v43  ;;  %4932 = vst [vmem:[%s8829_s13 + $0x4e0] sm:$0xff] %v4736_v47  ;;  %4933 = vst [vmem:[%s8829_s13 + $0x4e8] sm:$0xff] %v4737_v59  ;;  %v4381_v42 = vmul.f32 %v4194_v51, %v8573_v49  ;;  %v4382_v30 = vmul.f32 %v4194_v51, %v10780_v52  ;;  %v10796_v23 = vld [vmem:[#allocation92_spill] sm:$0xff]  ;;  %v10801_v52 = vld [vmem:[#allocation154_spill] sm:$0xff] }
 0x5f4   : > { %4934 = vst [vmem:[%s8829_s13 + $0x4f0] sm:$0xff] %v4738_v45  ;;  %4935 = vst [vmem:[%s8829_s13 + $0x4f8] sm:$0xff] %v4739_v56  ;;  %v4383_v63 = vmul.f32 %v4194_v51, %v10781_v22  ;;  %v4741_v25 = vadd.f32 %v8809_v4, %v4377_v13  ;;  %v4742_v9 = vadd.f32 %v8809_v4, %v4378_v35  ;;  %v10797_v45 = vld [vmem:[#allocation88_spill] sm:$0xff]  ;;  %v10798_v35 = vld [vmem:[#allocation89_spill] sm:$0xff] }
 0x5f5   : > { %4936 = vst.msk [vmem:[%s8829_s13 + $0x500] sm:$0xff] %vm3016_vm2, %v4740_v18  ;;  %v4743_v34 = vadd.f32 %v8809_v4, %v4379_v26  ;;  %v4744_v17 = vadd.f32 %v8809_v4, %v4380_v12  ;;  %v4384_v49 = vmul.f32 %v4199_v20, %v10782_v46  ;;  %v4745_v40 = vadd.f32 %v8809_v4, %v4381_v42  ;;  %v10799_v26 = vld [vmem:[#allocation126_spill] sm:$0xff]  ;;  %v10800_v12 = vld [vmem:[#allocation127_spill] sm:$0xff] }
 0x5f6   : > { %v4746_v16 = vadd.f32 %v8809_v4, %v4382_v30  ;;  %v4747_v10 = vadd.f32 %v8809_v4, %v4383_v63  ;;  %4937 = vst [vmem:[%s8829_s13 + $0x508] sm:$0xff] %v4741_v25  ;;  %v4385_v21 = vmul.f32 %v4199_v20, %v10783_v41  ;;  %4938 = vst [vmem:[%s8829_s13 + $0x510] sm:$0xff] %v4742_v9  ;;  %v10788_v4 = vld [vmem:[#allocation86_spill] sm:$0xff]  ;;  %v10802_v22 = vld [vmem:[#allocation171_spill] sm:$0xff]  ;;  %v4573_v25 = vpop.permute.xlu1 %4572 }
 0x5f7   : > { %4939 = vst [vmem:[%s8829_s13 + $0x518] sm:$0xff] %v4743_v34  ;;  %4940 = vst [vmem:[%s8829_s13 + $0x520] sm:$0xff] %v4744_v17  ;;  %v4386_v3 = vmul.f32 %v4199_v20, %v10784_v14  ;;  %v4387_v7 = vmul.f32 %v4199_v20, %v10785_v15  ;;  %v4388_v48 = vmul.f32 %v4199_v20, %v10786_v37  ;;  %v10803_v9 = vld [vmem:[#allocation155_spill] sm:$0xff] }
 0x5f8   : > { %v4389_v6 = vmul.f32 %v4199_v20, %v10787_v27  ;;  %4941 = vst [vmem:[%s8829_s13 + $0x528] sm:$0xff] %v4745_v40  ;;  %4942 = vst [vmem:[%s8829_s13 + $0x530] sm:$0xff] %v4746_v16  ;;  %v4390_v31 = vmul.f32 %v4199_v20, %v10788_v4  ;;  %v4748_v24 = vadd.f32 %v8856_v61, %v4384_v49 }
 0x5f9   : > { %4943 = vst.msk [vmem:[%s8829_s13 + $0x538] sm:$0xff] %vm3016_vm2, %v4747_v10  ;;  %v4749_v39 = vadd.f32 %v8856_v61, %v4385_v21  ;;  %v4391_v2 = vmul.f32 %v4204_v62, %v10789_v55  ;;  %v4750_v51 = vadd.f32 %v8856_v61, %v4386_v3  ;;  %v4751_v1 = vadd.f32 %v8856_v61, %v4387_v7  ;;  %v10804_v21 = vld [vmem:[#allocation90_spill] sm:$0xff]  ;;  %v10805_v3 = vld [vmem:[#allocation91_spill] sm:$0xff]  ;;  %v10806_v7 = vld [vmem:[#allocation128_spill] sm:$0xff] }
 0x5fa   : > { %v4752_v11 = vadd.f32 %v8856_v61, %v4388_v48  ;;  %v4753_v29 = vadd.f32 %v8856_v61, %v4389_v6  ;;  %v4754_v57 = vadd.f32 %v8856_v61, %v4390_v31  ;;  %4944 = vst [vmem:[%s8829_s13 + $0x540] sm:$0xff] %v4748_v24  ;;  %v4392_v60 = vmul.f32 %v4204_v62, %v10790_v28  ;;  %v10807_v48 = vld [vmem:[#allocation129_spill] sm:$0xff]  ;;  %v10808_v6 = vld [vmem:[#allocation156_spill] sm:$0xff]  ;;  %v10809_v31 = vld [vmem:[#allocation175_spill] sm:$0xff] }
 0x5fb   : > { %4945 = vst [vmem:[%s8829_s13 + $0x548] sm:$0xff] %v4749_v39  ;;  %v4393_v19 = vmul.f32 %v4204_v62, %v10791_v44  ;;  %v4394_v38 = vmul.f32 %v4204_v62, %v10792_v50  ;;  %4946 = vst [vmem:[%s8829_s13 + $0x550] sm:$0xff] %v4750_v51  ;;  %v4395_v5 = vmul.f32 %v4204_v62, %v10793_v33  ;;  %v10810_v39 = vld [vmem:[#allocation157_spill] sm:$0xff] }
 0x5fc   : > { %4947 = vst [vmem:[%s8829_s13 + $0x558] sm:$0xff] %v4751_v1  ;;  %4948 = vst [vmem:[%s8829_s13 + $0x560] sm:$0xff] %v4752_v11  ;;  %v4396_v61 = vmul.f32 %v4204_v62, %v10794_v36  ;;  %v4397_v53 = vmul.f32 %v4204_v62, %v10795_v0  ;;  %v4755_v54 = vadd.f32 %v10796_v23, %v4391_v2 }
 0x5fd   : > { %4949 = vst [vmem:[%s8829_s13 + $0x568] sm:$0xff] %v4753_v29  ;;  %4950 = vst.msk [vmem:[%s8829_s13 + $0x570] sm:$0xff] %vm3016_vm2, %v4754_v57  ;;  %v4756_v13 = vadd.f32 %v10796_v23, %v4392_v60  ;;  %v4757_v47 = vadd.f32 %v10796_v23, %v4393_v19  ;;  %v4758_v59 = vadd.f32 %v10796_v23, %v4394_v38 }
 0x5fe   : > { %v4398_v56 = vmul.f32 %v4209_v58, %v10797_v45  ;;  %v4759_v20 = vadd.f32 %v10796_v23, %v4395_v5  ;;  %v4760_v18 = vadd.f32 %v10796_v23, %v4396_v61  ;;  %v4761_v8 = vadd.f32 %v10796_v23, %v4397_v53  ;;  %4951 = vst [vmem:[%s8829_s13 + $0x578] sm:$0xff] %v4755_v54 }
 0x5ff   : > { %v4399_v32 = vmul.f32 %v4209_v58, %v10798_v35  ;;  %4952 = vst [vmem:[%s8829_s13 + $0x580] sm:$0xff] %v4756_v13  ;;  %4953 = vst [vmem:[%s8829_s13 + $0x588] sm:$0xff] %v4757_v47  ;;  %v4400_v43 = vmul.f32 %v4209_v58, %v10799_v26  ;;  %v4401_v42 = vmul.f32 %v4209_v58, %v10800_v12 }
 0x600   : > { %4954 = vst [vmem:[%s8829_s13 + $0x590] sm:$0xff] %v4758_v59  ;;  %v4402_v30 = vmul.f32 %v4209_v58, %v10801_v52  ;;  %v4403_v63 = vmul.f32 %v4209_v58, %v10802_v22  ;;  %4955 = vst [vmem:[%s8829_s13 + $0x598] sm:$0xff] %v4759_v20  ;;  %v4404_v34 = vmul.f32 %v4209_v58, %v10803_v9 }
 0x601   : > { %4956 = vst [vmem:[%s8829_s13 + $0x5a0] sm:$0xff] %v4760_v18  ;;  %4957 = vst.msk [vmem:[%s8829_s13 + $0x5a8] sm:$0xff] %vm3016_vm2, %v4761_v8  ;;  %v4762_v17 = vadd.f32 %v4573_v25, %v4398_v56  ;;  %v4763_v46 = vadd.f32 %v4573_v25, %v4399_v32  ;;  %v4764_v49 = vadd.f32 %v4573_v25, %v4400_v43 }
 0x602   : > { %v4765_v62 = vadd.f32 %v4573_v25, %v4401_v42  ;;  %v4766_v40 = vadd.f32 %v4573_v25, %v4402_v30  ;;  %v4767_v16 = vadd.f32 %v4573_v25, %v4403_v63  ;;  %v4768_v10 = vadd.f32 %v4573_v25, %v4404_v34 }
 0x603   : > { %4958 = vst [vmem:[%s8829_s13 + $0x5b0] sm:$0xff] %v4762_v17  ;;  %4959 = vst [vmem:[%s8829_s13 + $0x5b8] sm:$0xff] %v4763_v46 }
 0x604   : > { %4960 = vst [vmem:[%s8829_s13 + $0x5c0] sm:$0xff] %v4764_v49  ;;  %4961 = vst [vmem:[%s8829_s13 + $0x5c8] sm:$0xff] %v4765_v62 }
 0x605   : > { %4962 = vst [vmem:[%s8829_s13 + $0x5d0] sm:$0xff] %v4766_v40  ;;  %4963 = vst [vmem:[%s8829_s13 + $0x5d8] sm:$0xff] %v4767_v16 }
 0x606   : > { %4964 = vst.msk [vmem:[%s8829_s13 + $0x5e0] sm:$0xff] %vm3016_vm2, %v4768_v10 }
 0x629   : > { %v4214_v41 = vpop.permute.xlu0 %4213 }
 0x62a   : > { %v4405_v14 = vmul.f32 %v4214_v41, %v10804_v21  ;;  %v4406_v15 = vmul.f32 %v4214_v41, %v10805_v3  ;;  %v4407_v37 = vmul.f32 %v4214_v41, %v10806_v7  ;;  %v4408_v27 = vmul.f32 %v4214_v41, %v10807_v48 }
 0x62b   : > { %v4409_v4 = vmul.f32 %v4214_v41, %v10808_v6  ;;  %v4410_v24 = vmul.f32 %v4214_v41, %v10809_v31  ;;  %v4411_v55 = vmul.f32 %v4214_v41, %v10810_v39 }
 0x62d   : > { %v4578_v2 = vpop.permute.xlu0 %4577 }
 0x62e   : > { %v4769_v51 = vadd.f32 %v4578_v2, %v4405_v14  ;;  %v4770_v1 = vadd.f32 %v4578_v2, %v4406_v15  ;;  %v4771_v11 = vadd.f32 %v4578_v2, %v4407_v37  ;;  %v4772_v29 = vadd.f32 %v4578_v2, %v4408_v27 }
 0x62f   : > { %v4773_v57 = vadd.f32 %v4578_v2, %v4409_v4  ;;  %v4774_v28 = vadd.f32 %v4578_v2, %v4410_v24  ;;  %v4775_v60 = vadd.f32 %v4578_v2, %v4411_v55 }
 0x630   : > { %4965 = vst [vmem:[%s8829_s13 + $0x5e8] sm:$0xff] %v4769_v51  ;;  %4966 = vst [vmem:[%s8829_s13 + $0x5f0] sm:$0xff] %v4770_v1 }
 0x631   : > { %4967 = vst [vmem:[%s8829_s13 + $0x5f8] sm:$0xff] %v4771_v11  ;;  %4968 = vst [vmem:[%s8829_s13 + $0x600] sm:$0xff] %v4772_v29 }
 0x632   : > { %4969 = vst [vmem:[%s8829_s13 + $0x608] sm:$0xff] %v4773_v57  ;;  %4970 = vst [vmem:[%s8829_s13 + $0x610] sm:$0xff] %v4774_v28 }
 0x633   : > { %4971 = vst.msk [vmem:[%s8829_s13 + $0x618] sm:$0xff] %vm3016_vm2, %v4775_v60 }
 0x634   : > { %5718 = shalt.err (!%p5715_p2)
}
 0x635   : > { %s5719_s17 = scalar_lea.hbm %s9453_s11, 25088  ;;  %s5723_s23 = scalar_lea.hbm %s9513_s7, 50176 }
 0x636   : > { %p5720_p4 = scmp.ne.s32.totalorder %s9453_s11, %s5719_s17  ;;  %p5724_p11 = scmp.lt.s32.totalorder %s9453_s11, %s9513_s7 }
 0x637   : > { %p5725_p12 = scmp.lt.s32.totalorder %s5723_s23, %s5719_s17 }
 0x638   : > { %p5721_p8 = pnand %p5720_p4, %p10811_p7 }
 0x639   : > { %p5726_p3 = por %p5725_p12, %p5724_p11 }
 0x63a   : > { %p5722_p1 = pneg %p5721_p8 }
 0x63c   : > { %p5727_p9 = pnand %p5726_p3, %p5722_p1 }
 0x63e   : > { %5730 = shalt.err (!%p5727_p9)
}
 0x63f   : > { %s5794_s28 = smov 896   ;;  %s5795_s21 = smov 56  }
 0x640   : > { %5380 = dma.vmem_to_hbm [thread:$0]  (%p10811_p7), %s9455_s18, 25088, %s9453_s11, %s4973_s30, %s5794_s28, %s5794_s28, %s5795_s21  }
 0x641 PF: > { %s5002_s19 = sand.u32 1, %s5769_s24   ;;  %p10812_p10 = scmp.ne.s32.totalorder %s9919_s8, 0 }
 0x642   : > { %p10813_p0 = scmp.ge.s32.totalorder %s5781_s27, 2  ;;  %s5003_s16 = scalar_lea.sflag [#allocation4], %s5002_s19 }
 0x644   : > { %p5400_p5 = pnand %p10813_p0, %p10812_p10 }
 0x646   : > { %p5401_p6 = pneg %p5400_p5 }
 0x648   : > { %5764 = dma.done.wait (%p5401_p6), %s5003_s16, 25088  }
 0x649   : > { %5766 = vsyncadd (%p5401_p6), %s5003_s16, 4294942208  ;;  %p20_p13 = scmp.ge.s32.totalorder %s5934_s29, 4   ;;  %s10814_s24 = smov %s5773_s25 }
 0x64a   : > { %s10815_s25 = smov %s5777_s26  ;;  %s10816_s26 = smov %s5943_s12 }
 0x64b   : > { %s10817_s27 = smov %s5934_s29  ;;  %22 = sbr.rel (!%p20_p13) target bundleno = 8 (0x8), region = 114 }
 0x650   :  { %5008 = vsyncpa [#allocation3], 1 }
 0x651   :  { %5010 = vsyncpa [#allocation3 + $0x1], 1 }
 0x652   :  { %5011 = vsyncpa [#allocation6], 1 }
 0x653   :  { %5012 = vsyncpa [#allocation9], 1 }
 0x654   :  { %5013 = vsyncpa [#allocation4], 1 }
 0x655   :  { %5015 = vsyncpa [#allocation4 + $0x1], 1 }

</bundles_post_ra>
